<compile_context>
chip_gen: v6e
topology: v6e:2x2x1
jax: 0.10.0
libtpu: 0.0.40
codegen_flags: <defaults>
</compile_context>

<pallas_src>
import numpy as np

import jax
import jax.numpy as jnp
from jax import lax
from jax.experimental import pallas as pl
from jax.experimental.pallas import tpu as pltpu

# ---- static shape constants implied by the module --------------------------
KERNEL1 = 5                       # first conv kernel size
KERNEL2 = 3                       # second conv kernel size
PAD = (KERNEL1 - 1) // 2 + 1      # ReplicationPad1d((3, 3)) for kernel=5
L = 8                             # joints per body group (len of index lists)
L_PAD = L + 2 * PAD               # 14
L_MID = L_PAD - KERNEL1 + 1       # 10 (after conv k=5); conv k=3 -> back to 8
N_JOINT = 22
JCP = 128                         # lane-padded joint*coord width (66 -> 128)
N_MAT = 7                         # folded matrices per stage
N_VEC = 6                         # bias/keep rows per stage

LIST_LEFT = [2, 5, 8, 11, 14, 17, 19, 21]
LIST_RIGHT = [3, 4, 7, 10, 13, 16, 18, 20]
LIST_UP = [13, 14, 16, 17, 18, 19, 20, 21]
LIST_DOWN = [1, 2, 4, 5, 7, 8, 10, 11]

_HI = lax.Precision.HIGHEST


# ============================================================================
# Pallas kernel: entire SCINet_human_structure forward on one (Bt, 128) tile
# ============================================================================
def _scinet_fused_kernel(aj_ref, w_ref, b_ref, out_ref):
    f32 = jnp.float32

    def dot(a, b):
        return jnp.dot(a, b, preferred_element_type=f32, precision=_HI)

    def leaky(v):                      # LeakyReLU(0.01); Dropout = identity (eval)
        return jnp.maximum(v, 0.01 * v)

    aj = aj_ref[...]                   # [Bt, 128]  lane-padded all_joint tile
    for st in range(2):                # statically unrolled: interact_1, interact_2
        mo = st * N_MAT
        bo = st * N_VEC
        # gather [x1 | x2]  (parallel to the folded first conv below)
        xc = dot(aj, w_ref[mo + 0])                               # [Bt, 128]
        # folded gather + RepPad + Conv1d(k=5) + bias   (psi on x2 | phi on x1)
        h = leaky(dot(aj, w_ref[mo + 1]) + b_ref[bo + 0])         # [Bt, 128]
        pp = jnp.tanh(dot(h, w_ref[mo + 2]) + b_ref[bo + 1])      # [psi(x2)|phi(x1)]
        # c = x1*exp(psi(x2)), d = x2*exp(phi(x1))  ->  cd = [c | d]
        cd = xc * jnp.exp(pp)
        # second conv pair (U on d | P on c)
        h2 = leaky(dot(cd, w_ref[mo + 3]) + b_ref[bo + 2])
        up = jnp.tanh(dot(h2, w_ref[mo + 4]) + b_ref[bo + 3])     # [U(d)|P(c)]
        # choose_1/choose_2 with the scatter folded in (accumulate, MRB-friendly)
        acc = dot(cd, w_ref[mo + 5])
        acc = acc + dot(up, w_ref[mo + 6])
        # keep mask zeroes the overwritten joint slots; bias is already scattered
        aj = aj * b_ref[bo + 5] + acc + b_ref[bo + 4]
    out_ref[...] = aj


def scinet_forward(prep, all_joint, block_b=256):
    """all_joint: [B, 22, C] -> updated all_joint (same semantics as torch forward)."""
    B, J, C = all_joint.shape
    JC = J * C
    aj = all_joint.astype(jnp.float32).reshape(B, JC)

    # batch tiling: sublane-align, then chunk into Bt-row tiles for the grid
    b8 = -(-B // 8) * 8
    bt = max(8, (min(b8, int(block_b)) // 8) * 8)
    b_pad = -(-b8 // bt) * bt
    grid = (b_pad // bt,)

    # lane-pad 66 -> 128 (padding is baked into G / scatter / keep on the host)
    aj_p = jnp.zeros((b_pad, JCP), jnp.float32).at[:B, :JC].set(aj)

    n_weight = int(prep['W'].size) + int(prep['Bv'].size)
    cost = pl.CostEstimate(
        flops=int(b_pad) * (2 * N_MAT) * 2 * JCP * JCP,
        transcendentals=int(b_pad) * 2 * 3 * JCP,
        bytes_accessed=4 * (2 * int(b_pad) * JCP + n_weight),
    )

    out = pl.pallas_call(
        _scinet_fused_kernel,
        out_shape=jax.ShapeDtypeStruct((b_pad, JCP), jnp.float32),
        grid_spec=pltpu.PrefetchScalarGridSpec(
            num_scalar_prefetch=0,
            grid=grid,
            in_specs=[
                pl.BlockSpec((bt, JCP), lambda i: (i, 0)),               # aj tiles
                pl.BlockSpec((2 * N_MAT, JCP, JCP), lambda i: (0, 0, 0)),  # weights: resident
                pl.BlockSpec((2 * N_VEC, 1, JCP), lambda i: (0, 0, 0)),    # biases/keep: resident
            ],
            out_specs=pl.BlockSpec((bt, JCP), lambda i: (i, 0)),
        ),
        compiler_params=pltpu.CompilerParams(dimension_semantics=("parallel",)),
        input_output_aliases={0: 0},     # update padded aj slab in place
        cost_estimate=cost,
    )(aj_p, prep['W'], prep['Bv'])
    return out[:B, :JC].reshape(B, J, C)


# ============================================================================
# One-time host-side weight folding (numpy) — hoisted out of the hot path
# ============================================================================
def _pad_mat(m, rows=JCP, cols=JCP):
    out = np.zeros((rows, cols), np.float32)
    out[:m.shape[0], :m.shape[1]] = m
    return out


def _pad_vec(v, n=JCP, fill=0.0):
    out = np.full((n,), fill, np.float32)
    out[:v.shape[0]] = v
    return out


def _fold_branch(w1, b1, w2, b2):
    """Fold RepPad(3,3)+Conv1d(k=5)+bias and Conv1d(k=3)+bias into dense maps
    acting on vec(channel, position):  h_vec = x_vec @ M1 + b1v ;
    y_vec = h_vec @ M2 + b2v."""
    H, C, K1 = w1.shape
    _, _, K2 = w2.shape
    idx = np.clip(np.arange(L_PAD) - PAD, 0, L - 1)                   # replication pad source
    src = idx[np.arange(L_MID)[:, None] + np.arange(K1)[None, :]]     # [L_MID, K1]
    E1 = (src[None, :, :] == np.arange(L)[:, None, None]).astype(np.float32)   # [L, L_MID, K1]
    M1 = np.einsum('ltk,ock->clot', E1, w1).reshape(C * L, H * L_MID)
    b1v = np.repeat(b1, L_MID)                                        # index o*L_MID + t
    E2 = (np.arange(L_MID)[:, None, None] ==
          (np.arange(L)[None, :, None] + np.arange(K2)[None, None, :])).astype(np.float32)
    M2 = np.einsum('tsk,mok->otms', E2, w2).reshape(H * L_MID, C * L)
    b2v = np.repeat(b2, L)                                            # index m*L + s
    return (M1.astype(np.float32), b1v.astype(np.float32),
            M2.astype(np.float32), b2v.astype(np.float32))


def _fold_stage(raw, list1, list2):
    """Fold one Interactor_interactive into 7 lane-padded [128,128] matrices and
    6 [128] bias/keep rows (branch order in raw: 0=phi, 1=psi, 2=U, 3=P)."""
    w1 = np.asarray(raw['w1']); b1 = np.asarray(raw['b1'])
    w2 = np.asarray(raw['w2']); b2 = np.asarray(raw['b2'])
    cw = np.asarray(raw['cw']); cb = np.asarray(raw['cb'])
    H, C = w1.shape[1], w1.shape[2]
    CL, HM = C * L, H * L_MID
    JC = N_JOINT * C
    assert 2 * CL <= JCP and 2 * HM <= JCP and JC <= JCP, "folded dims exceed 128-lane pad"

    names = ('phi', 'psi', 'U', 'P')
    M1, B1, M2, B2 = {}, {}, {}, {}
    for i, n in enumerate(names):
        M1[n], B1[n], M2[n], B2[n] = _fold_branch(w1[i], b1[i], w2[i], b2[i])

    # pair 1: input [x1 | x2] -> hidden [psi_h | phi_h] -> [psi(x2) | phi(x1)]
    Wa = np.zeros((2 * CL, 2 * HM), np.float32)
    Wa[CL:, :HM] = M1['psi']; Wa[:CL, HM:] = M1['phi']
    ba = np.concatenate([B1['psi'], B1['phi']])
    Wb = np.zeros((2 * HM, 2 * CL), np.float32)
    Wb[:HM, :CL] = M2['psi']; Wb[HM:, CL:] = M2['phi']
    bb = np.concatenate([B2['psi'], B2['phi']])
    # pair 2: input [c | d] -> hidden [U_h | P_h] -> [U(d) | P(c)]
    Wc = np.zeros((2 * CL, 2 * HM), np.float32)
    Wc[CL:, :HM] = M1['U']; Wc[:CL, HM:] = M1['P']
    bc = np.concatenate([B1['U'], B1['P']])
    Wd = np.zeros((2 * HM, 2 * CL), np.float32)
    Wd[:HM, :CL] = M2['U']; Wd[HM:, CL:] = M2['P']
    bd = np.concatenate([B2['U'], B2['P']])
    # choose_1/choose_2:  y = [c|d] @ Wcd + [Ud|Pc] @ Wup + be  ->  [y1 | y2]
    I_C = np.eye(C, dtype=np.float32)
    Wcd = np.zeros((2 * CL, 2 * CL), np.float32)
    Wcd[:CL, :CL] = np.kron(I_C, cw[0][:, :L].T)        # c  -> y1
    Wcd[CL:, CL:] = np.kron(I_C, cw[1][:, :L].T)        # d  -> y2
    Wup = np.zeros((2 * CL, 2 * CL), np.float32)
    Wup[:CL, :CL] = np.kron(I_C, cw[0][:, L:].T)        # Ud -> y1
    Wup[CL:, CL:] = np.kron(I_C, cw[1][:, L:].T)        # Pc -> y2
    be = np.concatenate([np.tile(cb[0], C), np.tile(cb[1], C)]).astype(np.float32)

    # static gather / scatter selection matrices and keep mask
    G = np.zeros((JC, 2 * CL), np.float32)
    keep = np.ones((JC,), np.float32)
    for side, lst in enumerate((list1, list2)):
        for l, j in enumerate(lst):
            for cc in range(C):
                G[j * C + cc, side * CL + cc * L + l] = 1.0
                keep[j * C + cc] = 0.0
    S = G.T                                             # [2CL, JC]

    # --- host-side folds that shorten the in-kernel dependent-dot chain -----
    GW = G @ Wa                                         # gather folded into conv-1
    WcdS = Wcd @ S                                      # scatter folded into choose
    WupS = Wup @ S
    beS = be @ S

    W_stage = np.stack([_pad_mat(G), _pad_mat(GW), _pad_mat(Wb), _pad_mat(Wc),
                        _pad_mat(Wd), _pad_mat(WcdS), _pad_mat(WupS)])      # [7,128,128]
    B_stage = np.stack([_pad_vec(ba), _pad_vec(bb), _pad_vec(bc), _pad_vec(bd),
                        _pad_vec(beS), _pad_vec(keep, fill=1.0)])           # [6,128]
    return W_stage, B_stage


def prepare_scinet_params(raw1, raw2):
    """One-time prepare: fold & pack both stages into exactly two constant slabs."""
    W1, B1 = _fold_stage(raw1, LIST_LEFT, LIST_RIGHT)
    W2, B2 = _fold_stage(raw2, LIST_UP, LIST_DOWN)
    W = np.concatenate([W1, W2], axis=0)                          # [14, 128, 128]
    Bv = np.concatenate([B1, B2], axis=0).reshape(2 * N_VEC, 1, JCP)   # [12, 1, 128]
    return dict(W=jnp.asarray(W, jnp.float32), Bv=jnp.asarray(Bv, jnp.float32))


# ============================================================================
# Pure-JAX reference (original pad/conv formulation) for a correctness check
# ============================================================================
def _branch_ref(x, w1, b1, w2, b2):
    B, C, _ = x.shape
    H = w1.shape[0]
    left = x[:, :, 0:1]
    right = x[:, :, L - 1:L]
    xp = jnp.concatenate([left, left, left, x, right, right, right], axis=-1)
    h = jnp.zeros((B, H, L_MID), jnp.float32)
    for k in range(KERNEL1):
        h = h + jnp.einsum('oi,bil->bol', w1[:, :, k], xp[:, :, k:k + L_MID], precision=_HI)
    h = h + b1[None, :, None]
    h = jnp.where(h > 0, h, 0.01 * h)
    o = jnp.zeros((B, C, L), jnp.float32)
    for k in range(KERNEL2):
        o = o + jnp.einsum('oi,bil->bol', w2[:, :, k], h[:, :, k:k + L], precision=_HI)
    o = o + b2[None, :, None]
    return jnp.tanh(o)


def _interactor_ref(raw, x1_bjc, x2_bjc):
    x1 = jnp.transpose(x1_bjc, (0, 2, 1)).astype(jnp.float32)
    x2 = jnp.transpose(x2_bjc, (0, 2, 1)).astype(jnp.float32)
    w1, b1, w2, b2, cw, cb = (raw[k] for k in ('w1', 'b1', 'w2', 'b2', 'cw', 'cb'))
    d = x2 * jnp.exp(_branch_ref(x1, w1[0], b1[0], w2[0], b2[0]))
    c = x1 * jnp.exp(_branch_ref(x2, w1[1], b1[1], w2[1], b2[1]))
    Ud = _branch_ref(d, w1[2], b1[2], w2[2], b2[2])
    Pc = _branch_ref(c, w1[3], b1[3], w2[3], b2[3])
    y1 = jnp.einsum('bcl,ol->bco', jnp.concatenate([c, Ud], -1), cw[0],
                    precision=_HI) + cb[0][None, None, :]
    y2 = jnp.einsum('bcl,ol->bco', jnp.concatenate([d, Pc], -1), cw[1],
                    precision=_HI) + cb[1][None, None, :]
    return jnp.transpose(y1, (0, 2, 1)), jnp.transpose(y2, (0, 2, 1))


def scinet_ref(raw1, raw2, all_joint):
    y1, y2 = _interactor_ref(raw1, all_joint[:, LIST_LEFT, :], all_joint[:, LIST_RIGHT, :])
    all_joint = all_joint.at[:, jnp.array(LIST_LEFT), :].set(y1)
    all_joint = all_joint.at[:, jnp.array(LIST_RIGHT), :].set(y2)
    y1, y2 = _interactor_ref(raw2, all_joint[:, LIST_UP, :], all_joint[:, LIST_DOWN, :])
    all_joint = all_joint.at[:, jnp.array(LIST_UP), :].set(y1)
    all_joint = all_joint.at[:, jnp.array(LIST_DOWN), :].set(y2)
    return all_joint


# ---- deterministic parameter init (shapes from the module __init__) --------
def init_interactor_params(key, in_planes, hidden_size):
    H = in_planes * hidden_size
    ks = jax.random.split(key, 6)
    return dict(
        w1=0.1 * jax.random.normal(ks[0], (4, H, in_planes, KERNEL1), jnp.float32),
        b1=0.1 * jax.random.normal(ks[1], (4, H), jnp.float32),
        w2=0.1 * jax.random.normal(ks[2], (4, in_planes, H, KERNEL2), jnp.float32),
        b2=0.1 * jax.random.normal(ks[3], (4, in_planes), jnp.float32),
        cw=0.1 * jax.random.normal(ks[4], (2, L, 2 * L), jnp.float32),   # choose_1/2: [8, 16]
        cb=0.1 * jax.random.normal(ks[5], (2, L), jnp.float32),
    )


if __name__ == "__main__":
    B, J, C = 2, 22, 3          # joint indices go up to 21, 3 coords per joint
    hidden_size = 2

    key = jax.random.PRNGKey(0)
    k_in, k_p1, k_p2 = jax.random.split(key, 3)
    all_joint = jax.random.normal(k_in, (B, J, C), jnp.float32)
    raw1 = init_interactor_params(k_p1, C, hidden_size)
    raw2 = init_interactor_params(k_p2, C, hidden_size)

    prep = prepare_scinet_params(raw1, raw2)       # one-time host-side fold/pack

    fwd = jax.jit(scinet_forward, static_argnames=("block_b",))
    ref_fn = jax.jit(scinet_ref)

    # check 1: tiny batch, single grid step
    out = jax.block_until_ready(fwd(prep, all_joint))
    ref = jax.block_until_ready(ref_fn(raw1, raw2, all_joint))
    assert out.shape == (B, J, C)
    assert jnp.allclose(out, ref, rtol=1e-3, atol=1e-3), \
        float(jnp.max(jnp.abs(out - ref)))

    # check 2: larger batch with small block -> multi-step parallel grid,
    # weights stay VMEM-resident across grid steps
    B2 = 20
    all_joint2 = jax.random.normal(jax.random.PRNGKey(1), (B2, J, C), jnp.float32)
    out2 = jax.block_until_ready(fwd(prep, all_joint2, block_b=8))
    ref2 = jax.block_until_ready(ref_fn(raw1, raw2, all_joint2))
    assert out2.shape == (B2, J, C)
    assert jnp.allclose(out2, ref2, rtol=1e-3, atol=1e-3), \
        float(jnp.max(jnp.abs(out2 - ref2)))

    print("KERNEL_OK")
</pallas_src>

<mosaic_0001>
module attributes {stable_mosaic.version = 11 : i64} {
  func.func @_scinet_fused_kernel(%arg0: i32, %arg1: memref<8x128xf32, #tpu.memory_space<vmem>>, %arg2: memref<14x128x128xf32, #tpu.memory_space<vmem>>, %arg3: memref<12x1x128xf32, #tpu.memory_space<vmem>>, %arg4: memref<8x128xf32, #tpu.memory_space<vmem>>) attributes {dimension_semantics = [#tpu.dimension_semantics<parallel>], iteration_bounds = array<i64: 1>, scalar_prefetch = 0 : i64, scratch_operands = 0 : i64, tpu.core_type = #tpu.core_type<tc>, window_params = [{transform_indices = @transform_0, window_bounds = array<i64: 8, 128>}, {pipeline_mode = #tpu.pipeline_mode<synchronous>, transform_indices = @transform_1, window_bounds = array<i64: 14, 128, 128>}, {pipeline_mode = #tpu.pipeline_mode<synchronous>, transform_indices = @transform_2, window_bounds = array<i64: 12, 1, 128>}, {transform_indices = @transform_3, window_bounds = array<i64: 8, 128>}]} {
    %c0 = arith.constant 0 : index
    %c0_0 = arith.constant 0 : index
    %0 = vector.load %arg1[%c0, %c0_0] : memref<8x128xf32, #tpu.memory_space<vmem>>, vector<8x128xf32>
    %c0_1 = arith.constant 0 : index
    %c0_2 = arith.constant 0 : index
    %c0_3 = arith.constant 0 : index
    %1 = vector.load %arg2[%c0_1, %c0_2, %c0_3] : memref<14x128x128xf32, #tpu.memory_space<vmem>>, vector<1x128x128xf32>
    %2 = vector.shape_cast %1 : vector<1x128x128xf32> to vector<128x128xf32>
    %cst = arith.constant dense<0.000000e+00> : vector<8x128xf32>
    %3 = tpu.matmul %0, %2, %cst {dimension_numbers = #tpu.dot_dimension_numbers<[1], [0], [0], [1], [0, 0, 1, 1], [], []>, precision = #tpu.contract_precision<fp32>} : vector<8x128xf32>, vector<128x128xf32>, vector<8x128xf32> -> vector<8x128xf32>
    %c1 = arith.constant 1 : index
    %c0_4 = arith.constant 0 : index
    %c0_5 = arith.constant 0 : index
    %4 = vector.load %arg2[%c1, %c0_4, %c0_5] : memref<14x128x128xf32, #tpu.memory_space<vmem>>, vector<1x128x128xf32>
    %5 = vector.shape_cast %4 : vector<1x128x128xf32> to vector<128x128xf32>
    %cst_6 = arith.constant dense<0.000000e+00> : vector<8x128xf32>
    %6 = tpu.matmul %0, %5, %cst_6 {dimension_numbers = #tpu.dot_dimension_numbers<[1], [0], [0], [1], [0, 0, 1, 1], [], []>, precision = #tpu.contract_precision<fp32>} : vector<8x128xf32>, vector<128x128xf32>, vector<8x128xf32> -> vector<8x128xf32>
    %c0_7 = arith.constant 0 : index
    %c0_8 = arith.constant 0 : index
    %c0_9 = arith.constant 0 : index
    %7 = vector.load %arg3[%c0_7, %c0_8, %c0_9] : memref<12x1x128xf32, #tpu.memory_space<vmem>>, vector<1x1x128xf32>
    %8 = vector.shape_cast %7 : vector<1x1x128xf32> to vector<1x128xf32>
    %9 = vector.broadcast %8 : vector<1x128xf32> to vector<8x128xf32>
    %10 = arith.addf %6, %9 : vector<8x128xf32>
    %cst_10 = arith.constant 0.00999999977 : f32
    %11 = vector.broadcast %cst_10 : f32 to vector<8x128xf32>
    %12 = arith.mulf %11, %10 : vector<8x128xf32>
    %13 = arith.maximumf %10, %12 : vector<8x128xf32>
    %c2 = arith.constant 2 : index
    %c0_11 = arith.constant 0 : index
    %c0_12 = arith.constant 0 : index
    %14 = vector.load %arg2[%c2, %c0_11, %c0_12] : memref<14x128x128xf32, #tpu.memory_space<vmem>>, vector<1x128x128xf32>
    %15 = vector.shape_cast %14 : vector<1x128x128xf32> to vector<128x128xf32>
    %cst_13 = arith.constant dense<0.000000e+00> : vector<8x128xf32>
    %16 = tpu.matmul %13, %15, %cst_13 {dimension_numbers = #tpu.dot_dimension_numbers<[1], [0], [0], [1], [0, 0, 1, 1], [], []>, precision = #tpu.contract_precision<fp32>} : vector<8x128xf32>, vector<128x128xf32>, vector<8x128xf32> -> vector<8x128xf32>
    %c1_14 = arith.constant 1 : index
    %c0_15 = arith.constant 0 : index
    %c0_16 = arith.constant 0 : index
    %17 = vector.load %arg3[%c1_14, %c0_15, %c0_16] : memref<12x1x128xf32, #tpu.memory_space<vmem>>, vector<1x1x128xf32>
    %18 = vector.shape_cast %17 : vector<1x1x128xf32> to vector<1x128xf32>
    %19 = vector.broadcast %18 : vector<1x128xf32> to vector<8x128xf32>
    %20 = arith.addf %16, %19 : vector<8x128xf32>
    %21 = math.tanh %20 : vector<8x128xf32>
    %22 = math.exp %21 : vector<8x128xf32>
    %23 = arith.mulf %3, %22 : vector<8x128xf32>
    %c3 = arith.constant 3 : index
    %c0_17 = arith.constant 0 : index
    %c0_18 = arith.constant 0 : index
    %24 = vector.load %arg2[%c3, %c0_17, %c0_18] : memref<14x128x128xf32, #tpu.memory_space<vmem>>, vector<1x128x128xf32>
    %25 = vector.shape_cast %24 : vector<1x128x128xf32> to vector<128x128xf32>
    %cst_19 = arith.constant dense<0.000000e+00> : vector<8x128xf32>
    %26 = tpu.matmul %23, %25, %cst_19 {dimension_numbers = #tpu.dot_dimension_numbers<[1], [0], [0], [1], [0, 0, 1, 1], [], []>, precision = #tpu.contract_precision<fp32>} : vector<8x128xf32>, vector<128x128xf32>, vector<8x128xf32> -> vector<8x128xf32>
    %c2_20 = arith.constant 2 : index
    %c0_21 = arith.constant 0 : index
    %c0_22 = arith.constant 0 : index
    %27 = vector.load %arg3[%c2_20, %c0_21, %c0_22] : memref<12x1x128xf32, #tpu.memory_space<vmem>>, vector<1x1x128xf32>
    %28 = vector.shape_cast %27 : vector<1x1x128xf32> to vector<1x128xf32>
    %29 = vector.broadcast %28 : vector<1x128xf32> to vector<8x128xf32>
    %30 = arith.addf %26, %29 : vector<8x128xf32>
    %cst_23 = arith.constant 0.00999999977 : f32
    %31 = vector.broadcast %cst_23 : f32 to vector<8x128xf32>
    %32 = arith.mulf %31, %30 : vector<8x128xf32>
    %33 = arith.maximumf %30, %32 : vector<8x128xf32>
    %c4 = arith.constant 4 : index
    %c0_24 = arith.constant 0 : index
    %c0_25 = arith.constant 0 : index
    %34 = vector.load %arg2[%c4, %c0_24, %c0_25] : memref<14x128x128xf32, #tpu.memory_space<vmem>>, vector<1x128x128xf32>
    %35 = vector.shape_cast %34 : vector<1x128x128xf32> to vector<128x128xf32>
    %cst_26 = arith.constant dense<0.000000e+00> : vector<8x128xf32>
    %36 = tpu.matmul %33, %35, %cst_26 {dimension_numbers = #tpu.dot_dimension_numbers<[1], [0], [0], [1], [0, 0, 1, 1], [], []>, precision = #tpu.contract_precision<fp32>} : vector<8x128xf32>, vector<128x128xf32>, vector<8x128xf32> -> vector<8x128xf32>
    %c3_27 = arith.constant 3 : index
    %c0_28 = arith.constant 0 : index
    %c0_29 = arith.constant 0 : index
    %37 = vector.load %arg3[%c3_27, %c0_28, %c0_29] : memref<12x1x128xf32, #tpu.memory_space<vmem>>, vector<1x1x128xf32>
    %38 = vector.shape_cast %37 : vector<1x1x128xf32> to vector<1x128xf32>
    %39 = vector.broadcast %38 : vector<1x128xf32> to vector<8x128xf32>
    %40 = arith.addf %36, %39 : vector<8x128xf32>
    %41 = math.tanh %40 : vector<8x128xf32>
    %c5 = arith.constant 5 : index
    %c0_30 = arith.constant 0 : index
    %c0_31 = arith.constant 0 : index
    %42 = vector.load %arg2[%c5, %c0_30, %c0_31] : memref<14x128x128xf32, #tpu.memory_space<vmem>>, vector<1x128x128xf32>
    %43 = vector.shape_cast %42 : vector<1x128x128xf32> to vector<128x128xf32>
    %cst_32 = arith.constant dense<0.000000e+00> : vector<8x128xf32>
    %44 = tpu.matmul %23, %43, %cst_32 {dimension_numbers = #tpu.dot_dimension_numbers<[1], [0], [0], [1], [0, 0, 1, 1], [], []>, precision = #tpu.contract_precision<fp32>} : vector<8x128xf32>, vector<128x128xf32>, vector<8x128xf32> -> vector<8x128xf32>
    %c6 = arith.constant 6 : index
    %c0_33 = arith.constant 0 : index
    %c0_34 = arith.constant 0 : index
    %45 = vector.load %arg2[%c6, %c0_33, %c0_34] : memref<14x128x128xf32, #tpu.memory_space<vmem>>, vector<1x128x128xf32>
    %46 = vector.shape_cast %45 : vector<1x128x128xf32> to vector<128x128xf32>
    %cst_35 = arith.constant dense<0.000000e+00> : vector<8x128xf32>
    %47 = tpu.matmul %41, %46, %cst_35 {dimension_numbers = #tpu.dot_dimension_numbers<[1], [0], [0], [1], [0, 0, 1, 1], [], []>, precision = #tpu.contract_precision<fp32>} : vector<8x128xf32>, vector<128x128xf32>, vector<8x128xf32> -> vector<8x128xf32>
    %48 = arith.addf %44, %47 : vector<8x128xf32>
    %c5_36 = arith.constant 5 : index
    %c0_37 = arith.constant 0 : index
    %c0_38 = arith.constant 0 : index
    %49 = vector.load %arg3[%c5_36, %c0_37, %c0_38] : memref<12x1x128xf32, #tpu.memory_space<vmem>>, vector<1x1x128xf32>
    %50 = vector.shape_cast %49 : vector<1x1x128xf32> to vector<1x128xf32>
    %51 = vector.broadcast %50 : vector<1x128xf32> to vector<8x128xf32>
    %52 = arith.mulf %0, %51 : vector<8x128xf32>
    %53 = arith.addf %52, %48 : vector<8x128xf32>
    %c4_39 = arith.constant 4 : index
    %c0_40 = arith.constant 0 : index
    %c0_41 = arith.constant 0 : index
    %54 = vector.load %arg3[%c4_39, %c0_40, %c0_41] : memref<12x1x128xf32, #tpu.memory_space<vmem>>, vector<1x1x128xf32>
    %55 = vector.shape_cast %54 : vector<1x1x128xf32> to vector<1x128xf32>
    %56 = vector.broadcast %55 : vector<1x128xf32> to vector<8x128xf32>
    %57 = arith.addf %53, %56 : vector<8x128xf32>
    %c7 = arith.constant 7 : index
    %c0_42 = arith.constant 0 : index
    %c0_43 = arith.constant 0 : index
    %58 = vector.load %arg2[%c7, %c0_42, %c0_43] : memref<14x128x128xf32, #tpu.memory_space<vmem>>, vector<1x128x128xf32>
    %59 = vector.shape_cast %58 : vector<1x128x128xf32> to vector<128x128xf32>
    %cst_44 = arith.constant dense<0.000000e+00> : vector<8x128xf32>
    %60 = tpu.matmul %57, %59, %cst_44 {dimension_numbers = #tpu.dot_dimension_numbers<[1], [0], [0], [1], [0, 0, 1, 1], [], []>, precision = #tpu.contract_precision<fp32>} : vector<8x128xf32>, vector<128x128xf32>, vector<8x128xf32> -> vector<8x128xf32>
    %c8 = arith.constant 8 : index
    %c0_45 = arith.constant 0 : index
    %c0_46 = arith.constant 0 : index
    %61 = vector.load %arg2[%c8, %c0_45, %c0_46] : memref<14x128x128xf32, #tpu.memory_space<vmem>>, vector<1x128x128xf32>
    %62 = vector.shape_cast %61 : vector<1x128x128xf32> to vector<128x128xf32>
    %cst_47 = arith.constant dense<0.000000e+00> : vector<8x128xf32>
    %63 = tpu.matmul %57, %62, %cst_47 {dimension_numbers = #tpu.dot_dimension_numbers<[1], [0], [0], [1], [0, 0, 1, 1], [], []>, precision = #tpu.contract_precision<fp32>} : vector<8x128xf32>, vector<128x128xf32>, vector<8x128xf32> -> vector<8x128xf32>
    %c6_48 = arith.constant 6 : index
    %c0_49 = arith.constant 0 : index
    %c0_50 = arith.constant 0 : index
    %64 = vector.load %arg3[%c6_48, %c0_49, %c0_50] : memref<12x1x128xf32, #tpu.memory_space<vmem>>, vector<1x1x128xf32>
    %65 = vector.shape_cast %64 : vector<1x1x128xf32> to vector<1x128xf32>
    %66 = vector.broadcast %65 : vector<1x128xf32> to vector<8x128xf32>
    %67 = arith.addf %63, %66 : vector<8x128xf32>
    %cst_51 = arith.constant 0.00999999977 : f32
    %68 = vector.broadcast %cst_51 : f32 to vector<8x128xf32>
    %69 = arith.mulf %68, %67 : vector<8x128xf32>
    %70 = arith.maximumf %67, %69 : vector<8x128xf32>
    %c9 = arith.constant 9 : index
    %c0_52 = arith.constant 0 : index
    %c0_53 = arith.constant 0 : index
    %71 = vector.load %arg2[%c9, %c0_52, %c0_53] : memref<14x128x128xf32, #tpu.memory_space<vmem>>, vector<1x128x128xf32>
    %72 = vector.shape_cast %71 : vector<1x128x128xf32> to vector<128x128xf32>
    %cst_54 = arith.constant dense<0.000000e+00> : vector<8x128xf32>
    %73 = tpu.matmul %70, %72, %cst_54 {dimension_numbers = #tpu.dot_dimension_numbers<[1], [0], [0], [1], [0, 0, 1, 1], [], []>, precision = #tpu.contract_precision<fp32>} : vector<8x128xf32>, vector<128x128xf32>, vector<8x128xf32> -> vector<8x128xf32>
    %c7_55 = arith.constant 7 : index
    %c0_56 = arith.constant 0 : index
    %c0_57 = arith.constant 0 : index
    %74 = vector.load %arg3[%c7_55, %c0_56, %c0_57] : memref<12x1x128xf32, #tpu.memory_space<vmem>>, vector<1x1x128xf32>
    %75 = vector.shape_cast %74 : vector<1x1x128xf32> to vector<1x128xf32>
    %76 = vector.broadcast %75 : vector<1x128xf32> to vector<8x128xf32>
    %77 = arith.addf %73, %76 : vector<8x128xf32>
    %78 = math.tanh %77 : vector<8x128xf32>
    %79 = math.exp %78 : vector<8x128xf32>
    %80 = arith.mulf %60, %79 : vector<8x128xf32>
    %c10 = arith.constant 10 : index
    %c0_58 = arith.constant 0 : index
    %c0_59 = arith.constant 0 : index
    %81 = vector.load %arg2[%c10, %c0_58, %c0_59] : memref<14x128x128xf32, #tpu.memory_space<vmem>>, vector<1x128x128xf32>
    %82 = vector.shape_cast %81 : vector<1x128x128xf32> to vector<128x128xf32>
    %cst_60 = arith.constant dense<0.000000e+00> : vector<8x128xf32>
    %83 = tpu.matmul %80, %82, %cst_60 {dimension_numbers = #tpu.dot_dimension_numbers<[1], [0], [0], [1], [0, 0, 1, 1], [], []>, precision = #tpu.contract_precision<fp32>} : vector<8x128xf32>, vector<128x128xf32>, vector<8x128xf32> -> vector<8x128xf32>
    %c8_61 = arith.constant 8 : index
    %c0_62 = arith.constant 0 : index
    %c0_63 = arith.constant 0 : index
    %84 = vector.load %arg3[%c8_61, %c0_62, %c0_63] : memref<12x1x128xf32, #tpu.memory_space<vmem>>, vector<1x1x128xf32>
    %85 = vector.shape_cast %84 : vector<1x1x128xf32> to vector<1x128xf32>
    %86 = vector.broadcast %85 : vector<1x128xf32> to vector<8x128xf32>
    %87 = arith.addf %83, %86 : vector<8x128xf32>
    %cst_64 = arith.constant 0.00999999977 : f32
    %88 = vector.broadcast %cst_64 : f32 to vector<8x128xf32>
    %89 = arith.mulf %88, %87 : vector<8x128xf32>
    %90 = arith.maximumf %87, %89 : vector<8x128xf32>
    %c11 = arith.constant 11 : index
    %c0_65 = arith.constant 0 : index
    %c0_66 = arith.constant 0 : index
    %91 = vector.load %arg2[%c11, %c0_65, %c0_66] : memref<14x128x128xf32, #tpu.memory_space<vmem>>, vector<1x128x128xf32>
    %92 = vector.shape_cast %91 : vector<1x128x128xf32> to vector<128x128xf32>
    %cst_67 = arith.constant dense<0.000000e+00> : vector<8x128xf32>
    %93 = tpu.matmul %90, %92, %cst_67 {dimension_numbers = #tpu.dot_dimension_numbers<[1], [0], [0], [1], [0, 0, 1, 1], [], []>, precision = #tpu.contract_precision<fp32>} : vector<8x128xf32>, vector<128x128xf32>, vector<8x128xf32> -> vector<8x128xf32>
    %c9_68 = arith.constant 9 : index
    %c0_69 = arith.constant 0 : index
    %c0_70 = arith.constant 0 : index
    %94 = vector.load %arg3[%c9_68, %c0_69, %c0_70] : memref<12x1x128xf32, #tpu.memory_space<vmem>>, vector<1x1x128xf32>
    %95 = vector.shape_cast %94 : vector<1x1x128xf32> to vector<1x128xf32>
    %96 = vector.broadcast %95 : vector<1x128xf32> to vector<8x128xf32>
    %97 = arith.addf %93, %96 : vector<8x128xf32>
    %98 = math.tanh %97 : vector<8x128xf32>
    %c12 = arith.constant 12 : index
    %c0_71 = arith.constant 0 : index
    %c0_72 = arith.constant 0 : index
    %99 = vector.load %arg2[%c12, %c0_71, %c0_72] : memref<14x128x128xf32, #tpu.memory_space<vmem>>, vector<1x128x128xf32>
    %100 = vector.shape_cast %99 : vector<1x128x128xf32> to vector<128x128xf32>
    %cst_73 = arith.constant dense<0.000000e+00> : vector<8x128xf32>
    %101 = tpu.matmul %80, %100, %cst_73 {dimension_numbers = #tpu.dot_dimension_numbers<[1], [0], [0], [1], [0, 0, 1, 1], [], []>, precision = #tpu.contract_precision<fp32>} : vector<8x128xf32>, vector<128x128xf32>, vector<8x128xf32> -> vector<8x128xf32>
    %c13 = arith.constant 13 : index
    %c0_74 = arith.constant 0 : index
    %c0_75 = arith.constant 0 : index
    %102 = vector.load %arg2[%c13, %c0_74, %c0_75] : memref<14x128x128xf32, #tpu.memory_space<vmem>>, vector<1x128x128xf32>
    %103 = vector.shape_cast %102 : vector<1x128x128xf32> to vector<128x128xf32>
    %cst_76 = arith.constant dense<0.000000e+00> : vector<8x128xf32>
    %104 = tpu.matmul %98, %103, %cst_76 {dimension_numbers = #tpu.dot_dimension_numbers<[1], [0], [0], [1], [0, 0, 1, 1], [], []>, precision = #tpu.contract_precision<fp32>} : vector<8x128xf32>, vector<128x128xf32>, vector<8x128xf32> -> vector<8x128xf32>
    %105 = arith.addf %101, %104 : vector<8x128xf32>
    %c11_77 = arith.constant 11 : index
    %c0_78 = arith.constant 0 : index
    %c0_79 = arith.constant 0 : index
    %106 = vector.load %arg3[%c11_77, %c0_78, %c0_79] : memref<12x1x128xf32, #tpu.memory_space<vmem>>, vector<1x1x128xf32>
    %107 = vector.shape_cast %106 : vector<1x1x128xf32> to vector<1x128xf32>
    %108 = vector.broadcast %107 : vector<1x128xf32> to vector<8x128xf32>
    %109 = arith.mulf %57, %108 : vector<8x128xf32>
    %110 = arith.addf %109, %105 : vector<8x128xf32>
    %c10_80 = arith.constant 10 : index
    %c0_81 = arith.constant 0 : index
    %c0_82 = arith.constant 0 : index
    %111 = vector.load %arg3[%c10_80, %c0_81, %c0_82] : memref<12x1x128xf32, #tpu.memory_space<vmem>>, vector<1x1x128xf32>
    %112 = vector.shape_cast %111 : vector<1x1x128xf32> to vector<1x128xf32>
    %113 = vector.broadcast %112 : vector<1x128xf32> to vector<8x128xf32>
    %114 = arith.addf %110, %113 : vector<8x128xf32>
    %c0_83 = arith.constant 0 : index
    %c0_84 = arith.constant 0 : index
    %115 = vector.load %arg4[%c0_83, %c0_84] : memref<8x128xf32, #tpu.memory_space<vmem>>, vector<8x128xf32>
    tpu.vector_store %arg4[%c0_83, %c0_84], %114 {strides = array<i32>} : memref<8x128xf32, #tpu.memory_space<vmem>>, vector<8x128xf32>,
    return
  }
  func.func @transform_0(%arg0: i32) -> (i32, i32) {
    %c0_i32 = arith.constant 0 : i32
    %c0_i32_0 = arith.constant 0 : i32
    return %arg0, %c0_i32 : i32, i32
  }
  func.func @transform_1(%arg0: i32) -> (i32, i32, i32) {
    %c0_i32 = arith.constant 0 : i32
    %c0_i32_0 = arith.constant 0 : i32
    %c0_i32_1 = arith.constant 0 : i32
    %c0_i32_2 = arith.constant 0 : i32
    return %c0_i32, %c0_i32_0, %c0_i32_1 : i32, i32, i32
  }
  func.func @transform_2(%arg0: i32) -> (i32, i32, i32) {
    %c0_i32 = arith.constant 0 : i32
    %c0_i32_0 = arith.constant 0 : i32
    %c0_i32_1 = arith.constant 0 : i32
    %c0_i32_2 = arith.constant 0 : i32
    return %c0_i32, %c0_i32_0, %c0_i32_1 : i32, i32, i32
  }
  func.func @transform_3(%arg0: i32) -> (i32, i32) {
    %c0_i32 = arith.constant 0 : i32
    %c0_i32_0 = arith.constant 0 : i32
    return %arg0, %c0_i32 : i32, i32
  }
}

</mosaic_0001>

<bundles_post_ra>
// kernel: scinet_forward.1
= control target key start
LH: loop header
LB: loop body
LE: loop exit
PB: predicated region body
PF: predicated region fallthrough
CT: control target
= control target key end

     0   :  { %8 = vsyncpa [#allocation3], 0  ;;  %s13796_s12 = smov [#allocation2]   ;;  %s18923_s0 = inlined_call_operand.vmem [shape: f32[8,128], index: 0, kind: input, shape index: {}, may-alias: {0,3}]   ;;  %s18924_s1 = inlined_call_operand.hbm [shape: f32[14,128,128], index: 1, kind: input, shape index: {}]   ;;  %s18925_s2 = inlined_call_operand.vmem [shape: f32[12,1,128], index: 2, kind: input, shape index: {}]   ;;  %s18926_s3 = inlined_call_operand.vmem [shape: f32[8,128], index: 3, kind: output, shape index: {}, may-alias: {0,3}]  }
   0x1   :  { %s16_s13 = sshll.u32 %s13796_s12, 4  ;;  %s17_s13 = int_to_ptr.vmem [resolvable:$true] %s16_s13 }
   0x2   :  { %s13782_s14 = scalar_lea.vmem %s17_s13, 28672  ;;  %p13787_p1 = scmp.lt.s32.totalorder %s17_s13, %s17_s13 }
   0x3   :  { %p13783_p0 = scmp.ne.s32.totalorder %s17_s13, %s13782_s14  ;;  %p13788_p2 = scmp.lt.s32.totalorder %s13782_s14, %s13782_s14 }
   0x5   :  { %p13789_p3 = por %p13788_p2, %p13787_p1 }
   0x7   :  { %p13790_p4 = pnand %p13789_p3, %p13783_p0 }
   0x9   :  { %13793 = shalt.err (!%p13790_p4)
}
   0xa   :  { %s13797_s15 = smov 128   ;;  %s13798_s16 = smov 8  }
   0xb   :  { %22 = dma.hbm_to_vmem [thread:$0]  %s18924_s1, 28672, %s17_s13, [#allocation3], %s13797_s15, %s13797_s15, %s13798_s16  }
   0xc   :  { %13794 = dma.done.wait [#allocation3], 28672  }
   0xd   :  { %13795 = vsyncadd [#allocation3], 4294938624  ;;  %v13799_v0 = vmov 0.0   ;;  %vm13800_vm0 = vmmov 0   ;;  %v44_v1 = vld [vmem:[#allocation2 + $0x78] sm:$0xff]  ;;  %v43_v2 = vld [vmem:[#allocation2 + $0x70] sm:$0xff] }
   0xe   :  { %10816 = vmatprep.subr.mxu0 %v13799_v0  ;;  %10851 = vmatprep.subr.mxu1 %v13799_v0  ;;  %v42_v3 = vld [vmem:[#allocation2 + $0x68] sm:$0xff]  ;;  %v13830_v4 = vand.u32 4294901760, %v44_v1  ;;  %v13832_v5 = vand.u32 4294901760, %v43_v2  ;;  %v41_v7 = vld [vmem:[#allocation2 + $0x60] sm:$0xff]  ;;  %v40_v8 = vld [vmem:[#allocation2 + $0x58] sm:$0xff] }
   0xf   :  { %10848 = vmatprep.mubr.msk.f32.mxu0 %vm13800_vm0, %v13799_v0  ;;  %10883 = vmatprep.mubr.msk.f32.mxu1 %vm13800_vm0, %v13799_v0  ;;  %v13834_v6 = vand.u32 4294901760, %v42_v3  ;;  %v39_v9 = vld [vmem:[#allocation2 + $0x50] sm:$0xff]  ;;  %v13836_v10 = vand.u32 4294901760, %v41_v7  ;;  %v13838_v11 = vand.u32 4294901760, %v40_v8  ;;  %v38_v13 = vld [vmem:[#allocation2 + $0x48] sm:$0xff]  ;;  %v37_v14 = vld [vmem:[#allocation2 + $0x40] sm:$0xff] }
  0x10   :  { %v13840_v12 = vand.u32 4294901760, %v39_v9  ;;  %10817 = vmatpush3.msra.mxu0 %v13830_v4  ;;  %v13844_v15 = vsub.f32 %v44_v1, %v13830_v4  ;;  %v13847_v16 = vsub.f32 %v43_v2, %v13832_v5  ;;  %v13849_v17 = vand.u32 4294901760, %v38_v13  ;;  %v36_v19 = vld [vmem:[#allocation2 + $0x38] sm:$0xff]  ;;  %v35_v26 = vld [vmem:[#allocation2 + $0x30] sm:$0xff]  ;;  %v34_v36 = vld [vmem:[#allocation2 + $0x28] sm:$0xff] }
  0x11   :  { %v13852_v18 = vsub.f32 %v42_v3, %v13834_v6  ;;  %10818 = vmatprep.subr.mxu0 %v13799_v0  ;;  %v13856_v20 = vsub.f32 %v41_v7, %v13836_v10  ;;  %v13859_v21 = vsub.f32 %v40_v8, %v13838_v11  ;;  %v13865_v25 = vand.u32 4294901760, %v37_v14  ;;  %v33_v41 = vld [vmem:[#allocation2 + $0x20] sm:$0xff]  ;;  %v32_v49 = vld [vmem:[#allocation2 + $0x18] sm:$0xff]  ;;  %v31_v54 = vld [vmem:[#allocation2 + $0x10] sm:$0xff] }
  0x12   :  { %10819 = vmatpush3.msra.mxu0 %v13832_v5  ;;  %v139_v22 = vand.u32 4294901760, %v13844_v15  ;;  %v146_v23 = vand.u32 4294901760, %v13847_v16  ;;  %v13869_v28 = vand.u32 4294901760, %v36_v19  ;;  %v13873_v30 = vsub.f32 %v39_v9, %v13840_v12  ;;  %v28_v50 = vld [vmem:[%s18923_s0] sm:$0xff]  ;;  %v30_v60 = vld [vmem:[#allocation2 + $0x8] sm:$0xff] }
  0x13   :  { %v153_v24 = vand.u32 4294901760, %v13852_v18  ;;  %10820 = vmatprep.subr.mxu0 %v13799_v0  ;;  %v160_v27 = vand.u32 4294901760, %v13856_v20  ;;  %v167_v29 = vand.u32 4294901760, %v13859_v21  ;;  %v13886_v34 = vsub.f32 %v38_v13, %v13849_v17  ;;  %v29_v7 = vld [vmem:[#allocation2] sm:$0xff] }
  0x14   :  { %10821 = vmatpush3.msra.mxu0 %v13834_v6  ;;  %v140_v31 = vsub.f32 %v13844_v15, %v139_v22  ;;  %v147_v32 = vsub.f32 %v13847_v16, %v146_v23  ;;  %v13889_v35 = vand.u32 4294901760, %v35_v26  ;;  %v174_v40 = vand.u32 4294901760, %v13873_v30 }
  0x15   :  { %v154_v33 = vsub.f32 %v13852_v18, %v153_v24  ;;  %10822 = vmatprep.subr.mxu0 %v13799_v0  ;;  %v161_v39 = vsub.f32 %v13856_v20, %v160_v27  ;;  %v168_v42 = vsub.f32 %v13859_v21, %v167_v29  ;;  %v13901_v43 = vsub.f32 %v37_v14, %v13865_v25 }
  0x16   :  { %10823 = vmatpush3.msra.mxu0 %v13836_v10  ;;  %v141_v37 = vand.u32 4294901760, %v140_v31  ;;  %v148_v38 = vand.u32 4294901760, %v147_v32  ;;  %v13904_v45 = vand.u32 4294901760, %v34_v36  ;;  %v181_v46 = vand.u32 4294901760, %v13886_v34 }
  0x17   :  { %10824 = vmatprep.subr.mxu0 %v13799_v0  ;;  %v155_v44 = vand.u32 4294901760, %v154_v33  ;;  %v13908_v47 = vsub.f32 %v36_v19, %v13869_v28  ;;  %v13912_v48 = vand.u32 4294901760, %v33_v41  ;;  %v162_v51 = vand.u32 4294901760, %v161_v39 }
  0x18   :  { %10825 = vmatpush3.msra.mxu0 %v13838_v11  ;;  %10852 = vmatpush3.msra.mxu1 %v141_v37  ;;  %v175_v52 = vsub.f32 %v13873_v30, %v174_v40  ;;  %v188_v53 = vand.u32 4294901760, %v13901_v43  ;;  %v13923_v55 = vsub.f32 %v35_v26, %v13889_v35  ;;  %v169_v56 = vand.u32 4294901760, %v168_v42 }
  0x19   :  { %10826 = vmatprep.subr.mxu0 %v13799_v0  ;;  %10853 = vmatprep.subr.mxu1 %v13799_v0  ;;  %v195_v57 = vand.u32 4294901760, %v13908_v47  ;;  %v182_v58 = vsub.f32 %v13886_v34, %v181_v46  ;;  %v13932_v59 = vand.u32 4294901760, %v32_v49  ;;  %v13935_v61 = vsub.f32 %v34_v36, %v13904_v45 }
  0x1a   :  { %10827 = vmatpush3.msra.mxu0 %v13840_v12  ;;  %10854 = vmatpush3.msra.mxu1 %v148_v38  ;;  %v13937_v62 = vand.u32 4294901760, %v28_v50  ;;  %v13941_v63 = vand.u32 4294901760, %v31_v54  ;;  %v176_v1 = vand.u32 4294901760, %v175_v52  ;;  %v189_v2 = vsub.f32 %v13901_v43, %v188_v53 }
  0x1b   :  { %10828 = vmatprep.subr.mxu0 %v13799_v0  ;;  %10855 = vmatprep.subr.mxu1 %v13799_v0  ;;  %v202_v3 = vand.u32 4294901760, %v13923_v55  ;;  %v13949_v8 = vsub.f32 %v33_v41, %v13912_v48  ;;  %v196_v9 = vsub.f32 %v13908_v47, %v195_v57  ;;  %v13956_v13 = vand.u32 4294901760, %v30_v60 }
  0x1c   :  { %10829 = vmatpush3.msra.mxu0 %v13849_v17  ;;  %10856 = vmatpush3.msra.mxu1 %v155_v44  ;;  %v183_v14 = vand.u32 4294901760, %v182_v58  ;;  %v209_v19 = vand.u32 4294901760, %v13935_v61  ;;  %v13961_v26 = vsub.f32 %v28_v50, %v13937_v62  ;;  %v13964_v31 = vsub.f32 %v32_v49, %v13932_v59 }
  0x1d   :  { %10830 = vmatprep.subr.mxu0 %v13799_v0  ;;  %10857 = vmatprep.subr.mxu1 %v13799_v0  ;;  %v13968_v32 = vand.u32 4294901760, %v29_v7  ;;  %v190_v33 = vand.u32 4294901760, %v189_v2  ;;  %v203_v36 = vsub.f32 %v13923_v55, %v202_v3  ;;  %v216_v37 = vand.u32 4294901760, %v13949_v8 }
  0x1e   :  { %10831 = vmatpush3.msra.mxu0 %v13865_v25  ;;  %10858 = vmatpush3.msra.mxu1 %v162_v51  ;;  %v13976_v38 = vsub.f32 %v31_v54, %v13941_v63  ;;  %v197_v39 = vand.u32 4294901760, %v196_v9  ;;  %v210_v41 = vsub.f32 %v13935_v61, %v209_v19  ;;  %v13985_v42 = vand.u32 4294901760, %v13961_v26 }
  0x1f   :  { %10832 = vmatprep.subr.mxu0 %v13799_v0  ;;  %10859 = vmatprep.subr.mxu1 %v13799_v0  ;;  %v223_v44 = vand.u32 4294901760, %v13964_v31  ;;  %v13989_v49 = vsub.f32 %v30_v60, %v13956_v13  ;;  %v204_v50 = vand.u32 4294901760, %v203_v36  ;;  %v217_v51 = vsub.f32 %v13949_v8, %v216_v37 }
  0x20   :  { %10833 = vmatpush3.msra.mxu0 %v13869_v28  ;;  %10860 = vmatpush3.msra.mxu1 %v169_v56  ;;  %v230_v52 = vand.u32 4294901760, %v13976_v38  ;;  %v13999_v54 = vsub.f32 %v29_v7, %v13968_v32  ;;  %v211_v56 = vand.u32 4294901760, %v210_v41  ;;  %v129_v58 = vsub.f32 %v13961_v26, %v13985_v42 }
  0x21   :  { %10834 = vmatprep.subr.mxu0 %v13799_v0  ;;  %10861 = vmatprep.subr.mxu1 %v13799_v0  ;;  %v224_v60 = vsub.f32 %v13964_v31, %v223_v44  ;;  %v218_v2 = vand.u32 4294901760, %v217_v51 }
  0x22   :  { %10835 = vmatpush3.msra.mxu0 %v13889_v35  ;;  %10862 = vmatpush3.msra.mxu1 %v176_v1  ;;  %v237_v1 = vand.u32 4294901760, %v13989_v49  ;;  %v231_v7 = vsub.f32 %v13976_v38, %v230_v52  ;;  %v244_v9 = vand.u32 4294901760, %v13999_v54 }
  0x23   :  { %10836 = vmatprep.subr.mxu0 %v13799_v0  ;;  %10863 = vmatprep.subr.mxu1 %v13799_v0 }
  0x24   :  { %10837 = vmatpush3.msra.mxu0 %v13904_v45  ;;  %10864 = vmatpush3.msra.mxu1 %v183_v14  ;;  %v14020_v14 = vand.u32 4294901760, %v129_v58  ;;  %v238_v36 = vsub.f32 %v13989_v49, %v237_v1  ;;  %v245_v41 = vsub.f32 %v13999_v54, %v244_v9 }
  0x25   :  { %10838 = vmatprep.subr.mxu0 %v13799_v0  ;;  %10865 = vmatprep.subr.mxu1 %v13799_v0 }
  0x26   :  { %10839 = vmatpush3.msra.mxu0 %v13912_v48  ;;  %10866 = vmatpush3.msra.mxu1 %v190_v33  ;;  %v225_v33 = vand.u32 4294901760, %v224_v60  ;;  %v246_v51 = vand.u32 4294901760, %v245_v41 }
  0x27   :  { %10840 = vmatprep.subr.mxu0 %v13799_v0  ;;  %10867 = vmatprep.subr.mxu1 %v13799_v0 }
  0x28   :  { %10841 = vmatpush3.msra.mxu0 %v13932_v59  ;;  %10868 = vmatpush3.msra.mxu1 %v197_v39  ;;  %v232_v39 = vand.u32 4294901760, %v231_v7 }
  0x29   :  { %10842 = vmatprep.subr.mxu0 %v13799_v0  ;;  %10869 = vmatprep.subr.mxu1 %v13799_v0 }
  0x2a   :  { %10843 = vmatpush3.msra.mxu0 %v13941_v63  ;;  %10870 = vmatpush3.msra.mxu1 %v204_v50  ;;  %v239_v50 = vand.u32 4294901760, %v238_v36 }
  0x2b   :  { %10844 = vmatprep.subr.mxu0 %v13799_v0  ;;  %10871 = vmatprep.subr.mxu1 %v13799_v0 }
  0x2c   :  { %10845 = vmatpush3.msra.mxu0 %v13956_v13  ;;  %10872 = vmatpush3.msra.mxu1 %v211_v56 }
  0x2d   :  { %10846 = vmatprep.subr.mxu0 %v13799_v0  ;;  %10873 = vmatprep.subr.mxu1 %v13799_v0 }
  0x2e   :  { %10847 = vmatpush3.msra.mxu0 %v13968_v32  ;;  %10874 = vmatpush3.msra.mxu1 %v218_v2 }
  0x2f   :  { %10875 = vmatprep.subr.mxu1 %v13799_v0  ;;  %10886 = vmatprep.subr.mxu0 %v13799_v0 }
  0x30   :  { %10849 = vmatmul.mubr.f32.vlgmr.msra.gmra.mxu0 %v14020_v14  ;;  %10876 = vmatpush3.msra.mxu1 %v225_v33 }
  0x31   :  { %10887 = vmatpush3.msra.mxu0 %v13844_v15  ;;  %10877 = vmatprep.subr.mxu1 %v13799_v0 }
  0x32   :  { %10888 = vmatprep.subr.mxu0 %v13799_v0  ;;  %10878 = vmatpush3.msra.mxu1 %v232_v39 }
  0x33   :  { %10889 = vmatpush3.msra.mxu0 %v13847_v16  ;;  %10879 = vmatprep.subr.mxu1 %v13799_v0 }
  0x34   :  { %10890 = vmatprep.subr.mxu0 %v13799_v0  ;;  %10880 = vmatpush3.msra.mxu1 %v239_v50  ;;  %v689_v50 = vld [vmem:[#allocation2 + $0x90] sm:$0xff] }
  0x35   :  { %10891 = vmatpush3.msra.mxu0 %v13852_v18  ;;  %10881 = vmatprep.subr.mxu1 %v13799_v0  ;;  %v698_v18 = vld [vmem:[#allocation2 + $0xd8] sm:$0xff] }
  0x36   :  { %10892 = vmatprep.subr.mxu0 %v13799_v0  ;;  %10882 = vmatpush3.msra.mxu1 %v246_v51 }
  0x37   :  { %10893 = vmatpush3.msra.mxu0 %v13856_v20  ;;  %10884 = vmatmul.mubr.f32.vlgmr.msra.gmra.mxu1 %v13937_v62 }
  0x38   :  { %10894 = vmatprep.subr.mxu0 %v13799_v0  ;;  %10921 = vmatprep.subr.mxu1 %v13799_v0 }
  0x39   :  { %10895 = vmatpush3.msra.mxu0 %v13859_v21  ;;  %10922 = vmatpush3.msra.mxu1 %v13830_v4  ;;  %v697_v21 = vld [vmem:[#allocation2 + $0xd0] sm:$0xff] }
  0x3a   :  { %10896 = vmatprep.subr.mxu0 %v13799_v0  ;;  %10923 = vmatprep.subr.mxu1 %v13799_v0 }
  0x3b   :  { %10897 = vmatpush3.msra.mxu0 %v13873_v30  ;;  %10924 = vmatpush3.msra.mxu1 %v13832_v5  ;;  %v695_v30 = vld [vmem:[#allocation2 + $0xc0] sm:$0xff] }
  0x3c   :  { %10898 = vmatprep.subr.mxu0 %v13799_v0  ;;  %10925 = vmatprep.subr.mxu1 %v13799_v0 }
  0x3d   :  { %10899 = vmatpush3.msra.mxu0 %v13886_v34  ;;  %10926 = vmatpush3.msra.mxu1 %v13834_v6 }
  0x3e   :  { %10900 = vmatprep.subr.mxu0 %v13799_v0  ;;  %10927 = vmatprep.subr.mxu1 %v13799_v0 }
  0x3f   :  { %10901 = vmatpush3.msra.mxu0 %v13901_v43  ;;  %10928 = vmatpush3.msra.mxu1 %v13836_v10 }
  0x40   :  { %10902 = vmatprep.subr.mxu0 %v13799_v0  ;;  %10929 = vmatprep.subr.mxu1 %v13799_v0 }
  0x41   :  { %10903 = vmatpush3.msra.mxu0 %v13908_v47  ;;  %10930 = vmatpush3.msra.mxu1 %v13838_v11 }
  0x42   :  { %10904 = vmatprep.subr.mxu0 %v13799_v0  ;;  %10931 = vmatprep.subr.mxu1 %v13799_v0 }
  0x43   :  { %10905 = vmatpush3.msra.mxu0 %v13923_v55  ;;  %10932 = vmatpush3.msra.mxu1 %v13840_v12 }
  0x44   :  { %10906 = vmatprep.subr.mxu0 %v13799_v0  ;;  %10933 = vmatprep.subr.mxu1 %v13799_v0 }
  0x45   :  { %10907 = vmatpush3.msra.mxu0 %v13935_v61  ;;  %10934 = vmatpush3.msra.mxu1 %v13849_v17 }
  0x46   :  { %10908 = vmatprep.subr.mxu0 %v13799_v0  ;;  %10935 = vmatprep.subr.mxu1 %v13799_v0 }
  0x47   :  { %10909 = vmatpush3.msra.mxu0 %v13949_v8  ;;  %10936 = vmatpush3.msra.mxu1 %v13865_v25 }
  0x48   :  { %10910 = vmatprep.subr.mxu0 %v13799_v0  ;;  %10937 = vmatprep.subr.mxu1 %v13799_v0 }
  0x49   :  { %10911 = vmatpush3.msra.mxu0 %v13964_v31  ;;  %10938 = vmatpush3.msra.mxu1 %v13869_v28 }
  0x4a   :  { %10912 = vmatprep.subr.mxu0 %v13799_v0  ;;  %10939 = vmatprep.subr.mxu1 %v13799_v0 }
  0x4b   :  { %10913 = vmatpush3.msra.mxu0 %v13976_v38  ;;  %10940 = vmatpush3.msra.mxu1 %v13889_v35 }
  0x4c   :  { %10914 = vmatprep.subr.mxu0 %v13799_v0  ;;  %10941 = vmatprep.subr.mxu1 %v13799_v0 }
  0x4d   :  { %10915 = vmatpush3.msra.mxu0 %v13989_v49  ;;  %10942 = vmatpush3.msra.mxu1 %v13904_v45 }
  0x4e   :  { %10916 = vmatprep.subr.mxu0 %v13799_v0  ;;  %10943 = vmatprep.subr.mxu1 %v13799_v0 }
  0x4f   :  { %10917 = vmatpush3.msra.mxu0 %v13999_v54  ;;  %10918 = vmatprep.mubr.msk.f32.mxu0 %vm13800_vm0, %v13799_v0 }
  0x50   :  { %10944 = vmatpush3.msra.mxu1 %v13912_v48  ;;  %10919 = vmatmul.mubr.f32.vlgmr.msra.gmra.mxu0 %v13961_v26 }
  0x51   :  { %10945 = vmatprep.subr.mxu1 %v13799_v0  ;;  %10956 = vmatprep.subr.mxu0 %v13799_v0 }
  0x52   :  { %10946 = vmatpush3.msra.mxu1 %v13932_v59  ;;  %10957 = vmatpush3.msra.mxu0 %v139_v22 }
  0x53   :  { %10947 = vmatprep.subr.mxu1 %v13799_v0  ;;  %10958 = vmatprep.subr.mxu0 %v13799_v0 }
  0x54   :  { %10948 = vmatpush3.msra.mxu1 %v13941_v63  ;;  %10959 = vmatpush3.msra.mxu0 %v146_v23  ;;  %v14197_v23 = vand.u32 4294901760, %v698_v18 }
  0x55   :  { %10949 = vmatprep.subr.mxu1 %v13799_v0  ;;  %10960 = vmatprep.subr.mxu0 %v13799_v0 }
  0x56   :  { %10950 = vmatpush3.msra.mxu1 %v13956_v13  ;;  %10961 = vmatpush3.msra.mxu0 %v153_v24  ;;  %v14215_v34 = vsub.f32 %v698_v18, %v14197_v23  ;;  %v688_v18 = vld [vmem:[#allocation2 + $0x88] sm:$0xff] }
  0x57   :  { %10951 = vmatprep.subr.mxu1 %v13799_v0  ;;  %10962 = vmatprep.subr.mxu0 %v13799_v0 }
  0x58   :  { %10952 = vmatpush3.msra.mxu1 %v13968_v32  ;;  %10953 = vmatprep.mubr.msk.f32.mxu1 %vm13800_vm0, %v13799_v0 }
  0x59   :  { %10963 = vmatpush3.msra.mxu0 %v160_v27  ;;  %10954 = vmatmul.mubr.f32.vlgmr.msra.gmra.mxu1 %v13985_v42  ;;  %v696_v27 = vld [vmem:[#allocation2 + $0xc8] sm:$0xff] }
  0x5a   :  { %10964 = vmatprep.subr.mxu0 %v13799_v0  ;;  %10991 = vmatprep.subr.mxu1 %v13799_v0 }
  0x5b   :  { %10965 = vmatpush3.msra.mxu0 %v167_v29  ;;  %10992 = vmatpush3.msra.mxu1 %v13830_v4  ;;  %v702_v4 = vld [vmem:[#allocation2 + $0xf8] sm:$0xff] }
  0x5c   :  { %10966 = vmatprep.subr.mxu0 %v13799_v0  ;;  %10993 = vmatprep.subr.mxu1 %v13799_v0 }
  0x5d   :  { %10967 = vmatpush3.msra.mxu0 %v174_v40  ;;  %10994 = vmatpush3.msra.mxu1 %v13832_v5  ;;  %v701_v5 = vld [vmem:[#allocation2 + $0xf0] sm:$0xff]  ;;  %v14220_v40 = vand.u32 4294901760, %v696_v27 }
  0x5e   :  { %10968 = vmatprep.subr.mxu0 %v13799_v0  ;;  %10995 = vmatprep.subr.mxu1 %v13799_v0 }
  0x5f   :  { %10969 = vmatpush3.msra.mxu0 %v181_v46  ;;  %10996 = vmatpush3.msra.mxu1 %v13834_v6  ;;  %v14159_v6 = vand.u32 4294901760, %v702_v4  ;;  %v14243_v61 = vsub.f32 %v696_v27, %v14220_v40 }
  0x60   :  { %10970 = vmatprep.subr.mxu0 %v13799_v0  ;;  %10997 = vmatprep.subr.mxu1 %v13799_v0 }
  0x61   :  { %10971 = vmatpush3.msra.mxu0 %v188_v53  ;;  %10998 = vmatpush3.msra.mxu1 %v13836_v10  ;;  %v700_v10 = vld [vmem:[#allocation2 + $0xe8] sm:$0xff]  ;;  %v14174_v15 = vsub.f32 %v702_v4, %v14159_v6  ;;  %v14234_v53 = vand.u32 4294901760, %v695_v30  ;;  %v846_v56 = vand.u32 4294901760, %v14243_v61 }
  0x62   :  { %10972 = vmatprep.subr.mxu0 %v13799_v0  ;;  %10999 = vmatprep.subr.mxu1 %v13799_v0  ;;  %v14176_v16 = vand.u32 4294901760, %v700_v10 }
  0x63   :  { %10973 = vmatpush3.msra.mxu0 %v195_v57  ;;  %11000 = vmatpush3.msra.mxu1 %v13838_v11  ;;  %v14166_v11 = vand.u32 4294901760, %v701_v5  ;;  %v804_v24 = vand.u32 4294901760, %v14174_v15  ;;  %v693_v57 = vld [vmem:[#allocation2 + $0xb0] sm:$0xff]  ;;  %v14258_v31 = vsub.f32 %v695_v30, %v14234_v53  ;;  %v847_v39 = vsub.f32 %v14243_v61, %v846_v56 }
  0x64   :  { %10974 = vmatprep.subr.mxu0 %v13799_v0  ;;  %11001 = vmatprep.subr.mxu1 %v13799_v0  ;;  %v14195_v22 = vsub.f32 %v700_v10, %v14176_v16 }
  0x65   :  { %10975 = vmatpush3.msra.mxu0 %v202_v3  ;;  %11002 = vmatpush3.msra.mxu1 %v13840_v12  ;;  %v699_v12 = vld [vmem:[#allocation2 + $0xe0] sm:$0xff]  ;;  %v14186_v20 = vsub.f32 %v701_v5, %v14166_v11  ;;  %v832_v3 = vand.u32 4294901760, %v14215_v34  ;;  %v853_v7 = vand.u32 4294901760, %v14258_v31  ;;  %v848_v27 = vand.u32 4294901760, %v847_v39 }
  0x66   :  { %10976 = vmatprep.subr.mxu0 %v13799_v0  ;;  %11003 = vmatprep.subr.mxu1 %v13799_v0  ;;  %v818_v43 = vand.u32 4294901760, %v14195_v22 }
  0x67   :  { %10977 = vmatpush3.msra.mxu0 %v209_v19  ;;  %11004 = vmatpush3.msra.mxu1 %v13849_v17  ;;  %v14180_v17 = vand.u32 4294901760, %v699_v12  ;;  %v811_v29 = vand.u32 4294901760, %v14186_v20  ;;  %v854_v10 = vsub.f32 %v14258_v31, %v853_v7 }
  0x68   :  { %10978 = vmatprep.subr.mxu0 %v13799_v0  ;;  %11005 = vmatprep.subr.mxu1 %v13799_v0 }
  0x69   :  { %10979 = vmatpush3.msra.mxu0 %v216_v37  ;;  %11006 = vmatpush3.msra.mxu1 %v13865_v25  ;;  %v14203_v25 = vsub.f32 %v699_v12, %v14180_v17  ;;  %v14260_v37 = vand.u32 4294901760, %v693_v57 }
  0x6a   :  { %10980 = vmatprep.subr.mxu0 %v13799_v0  ;;  %11007 = vmatprep.subr.mxu1 %v13799_v0 }
  0x6b   :  { %10981 = vmatpush3.msra.mxu0 %v223_v44  ;;  %11008 = vmatpush3.msra.mxu1 %v13869_v28  ;;  %v14207_v28 = vand.u32 4294901760, %v697_v21  ;;  %v825_v46 = vand.u32 4294901760, %v14203_v25  ;;  %v691_v44 = vld [vmem:[#allocation2 + $0xa0] sm:$0xff]  ;;  %v14279_v60 = vsub.f32 %v693_v57, %v14260_v37  ;;  %v14323_v57 = vand.u32 4294901760, %v688_v18 }
  0x6c   :  { %10982 = vmatprep.subr.mxu0 %v13799_v0  ;;  %11009 = vmatprep.subr.mxu1 %v13799_v0  ;;  %v14284_v2 = vand.u32 4294901760, %v691_v44 }
  0x6d   :  { %10983 = vmatpush3.msra.mxu0 %v230_v52  ;;  %11010 = vmatpush3.msra.mxu1 %v13889_v35  ;;  %v805_v35 = vsub.f32 %v14174_v15, %v804_v24  ;;  %v14229_v47 = vsub.f32 %v697_v21, %v14207_v28  ;;  %v826_v8 = vsub.f32 %v14203_v25, %v825_v46  ;;  %v867_v12 = vand.u32 4294901760, %v14279_v60 }
  0x6e   :  { %10984 = vmatprep.subr.mxu0 %v13799_v0  ;;  %11011 = vmatprep.subr.mxu1 %v13799_v0  ;;  %v833_v52 = vsub.f32 %v14215_v34, %v832_v3  ;;  %v14303_v5 = vsub.f32 %v691_v44, %v14284_v2  ;;  %v14311_v21 = vand.u32 4294901760, %v689_v50 }
  0x6f   :  { %10985 = vmatpush3.msra.mxu0 %v237_v1  ;;  %11012 = vmatpush3.msra.mxu1 %v13904_v45  ;;  %v694_v45 = vld [vmem:[#allocation2 + $0xb8] sm:$0xff]  ;;  %v827_v58 = vand.u32 4294901760, %v826_v8 }
  0x70   :  { %10986 = vmatprep.subr.mxu0 %v13799_v0  ;;  %11013 = vmatprep.subr.mxu1 %v13799_v0  ;;  %v14238_v55 = vand.u32 4294901760, %v694_v45  ;;  %v834_v33 = vand.u32 4294901760, %v833_v52  ;;  %v881_v8 = vand.u32 4294901760, %v14303_v5  ;;  %v14344_v52 = vsub.f32 %v688_v18, %v14323_v57 }
  0x71   :  { %10987 = vmatpush3.msra.mxu0 %v244_v9  ;;  %10988 = vmatprep.mubr.msk.f32.mxu0 %vm13800_vm0, %v13799_v0  ;;  %v690_v9 = vld [vmem:[#allocation2 + $0x98] sm:$0xff] }
  0x72   :  { %11014 = vmatpush3.msra.mxu1 %v13912_v48  ;;  %10989 = vmatmul.mubr.f32.vlgmr.msra.gmra.mxu0 %v13937_v62  ;;  %v812_v48 = vsub.f32 %v14186_v20, %v811_v29  ;;  %v14266_v38 = vsub.f32 %v694_v45, %v14238_v55  ;;  %v14299_v51 = vand.u32 4294901760, %v690_v9  ;;  %v687_v45 = vld [vmem:[#allocation2 + $0x80] sm:$0xff] }
  0x73   :  { %11015 = vmatprep.subr.mxu1 %v13799_v0  ;;  %11026 = vmatprep.subr.mxu0 %v13799_v0 }
  0x74   :  { %11016 = vmatpush3.msra.mxu1 %v13932_v59  ;;  %11027 = vmatpush3.msra.mxu0 %v14159_v6  ;;  %v806_v59 = vand.u32 4294901760, %v805_v35  ;;  %v813_v19 = vand.u32 4294901760, %v812_v48  ;;  %v860_v41 = vand.u32 4294901760, %v14266_v38  ;;  %v14321_v48 = vsub.f32 %v690_v9, %v14299_v51 }
  0x75   :  { %11017 = vmatprep.subr.mxu1 %v13799_v0  ;;  %11028 = vmatprep.subr.mxu0 %v13799_v0  ;;  %v882_v9 = vsub.f32 %v14303_v5, %v881_v8 }
  0x76   :  { %11018 = vmatpush3.msra.mxu1 %v13941_v63  ;;  %11029 = vmatpush3.msra.mxu0 %v14166_v11  ;;  %v819_v63 = vsub.f32 %v14195_v22, %v818_v43  ;;  %v861_v30 = vsub.f32 %v14266_v38, %v860_v41 }
  0x77   :  { %11019 = vmatprep.subr.mxu1 %v13799_v0  ;;  %11030 = vmatprep.subr.mxu0 %v13799_v0  ;;  %v883_v18 = vand.u32 4294901760, %v882_v9 }
  0x78   :  { %11020 = vmatpush3.msra.mxu1 %v13956_v13  ;;  %11031 = vmatpush3.msra.mxu0 %v14176_v16  ;;  %v692_v13 = vld [vmem:[#allocation2 + $0xa8] sm:$0xff]  ;;  %v820_v49 = vand.u32 4294901760, %v819_v63  ;;  %v868_v63 = vsub.f32 %v14279_v60, %v867_v12  ;;  %v862_v44 = vand.u32 4294901760, %v861_v30 }
  0x79   :  { %11021 = vmatprep.subr.mxu1 %v13799_v0  ;;  %11032 = vmatprep.subr.mxu0 %v13799_v0  ;;  %v14272_v54 = vand.u32 4294901760, %v692_v13 }
  0x7a   :  { %11022 = vmatpush3.msra.mxu1 %v13968_v32  ;;  %11023 = vmatprep.mubr.msk.f32.mxu1 %vm13800_vm0, %v13799_v0  ;;  %v839_v32 = vand.u32 4294901760, %v14229_v47 }
  0x7b   :  { %11033 = vmatpush3.msra.mxu0 %v14180_v17  ;;  %11024 = vmatmul.mubr.f32.vlgmr.msra.gmra.mxu1 %v13937_v62  ;;  %v14291_v36 = vsub.f32 %v692_v13, %v14272_v54  ;;  %v14333_v13 = vsub.f32 %v689_v50, %v14311_v21 }
  0x7c   :  { %11034 = vmatprep.subr.mxu0 %v13799_v0  ;;  %11061 = vmatprep.subr.mxu1 %v13799_v0  ;;  %v840_v1 = vsub.f32 %v14229_v47, %v839_v32 }
  0x7d   :  { %11035 = vmatpush3.msra.mxu0 %v14197_v23  ;;  %11062 = vmatpush3.msra.mxu1 %v806_v59  ;;  %v874_v35 = vand.u32 4294901760, %v14291_v36  ;;  %v855_v59 = vand.u32 4294901760, %v854_v10  ;;  %v895_v39 = vand.u32 4294901760, %v14333_v13  ;;  %v902_v10 = vand.u32 4294901760, %v14344_v52 }
  0x7e   :  { %11036 = vmatprep.subr.mxu0 %v13799_v0  ;;  %11063 = vmatprep.subr.mxu1 %v13799_v0  ;;  %v841_v4 = vand.u32 4294901760, %v840_v1  ;;  %v869_v1 = vand.u32 4294901760, %v868_v63 }
  0x7f   :  { %11037 = vmatpush3.msra.mxu0 %v14207_v28  ;;  %11064 = vmatpush3.msra.mxu1 %v813_v19  ;;  %v14335_v19 = vand.u32 4294901760, %v687_v45 }
  0x80   :  { %11038 = vmatprep.subr.mxu0 %v13799_v0  ;;  %11065 = vmatprep.subr.mxu1 %v13799_v0 }
  0x81   :  { %11039 = vmatpush3.msra.mxu0 %v14220_v40  ;;  %11066 = vmatpush3.msra.mxu1 %v820_v49  ;;  %v875_v49 = vsub.f32 %v14291_v36, %v874_v35 }
  0x82   :  { %11040 = vmatprep.subr.mxu0 %v13799_v0  ;;  %11067 = vmatprep.subr.mxu1 %v13799_v0 }
  0x83   :  { %11041 = vmatpush3.msra.mxu0 %v14234_v53  ;;  %11068 = vmatpush3.msra.mxu1 %v827_v58  ;;  %v888_v58 = vand.u32 4294901760, %v14321_v48  ;;  %v876_v50 = vand.u32 4294901760, %v875_v49 }
  0x84   :  { %11042 = vmatprep.subr.mxu0 %v13799_v0  ;;  %11069 = vmatprep.subr.mxu1 %v13799_v0 }
  0x85   :  { %11043 = vmatpush3.msra.mxu0 %v14238_v55  ;;  %11070 = vmatpush3.msra.mxu1 %v834_v33  ;;  %v14354_v33 = vsub.f32 %v687_v45, %v14335_v19 }
  0x86   :  { %11044 = vmatprep.subr.mxu0 %v13799_v0  ;;  %11071 = vmatprep.subr.mxu1 %v13799_v0 }
  0x87   :  { %11045 = vmatpush3.msra.mxu0 %v14260_v37  ;;  %11072 = vmatpush3.msra.mxu1 %v841_v4  ;;  %v889_v4 = vsub.f32 %v14321_v48, %v888_v58  ;;  %v909_v30 = vand.u32 4294901760, %v14354_v33 }
  0x88   :  { %11046 = vmatprep.subr.mxu0 %v13799_v0  ;;  %11073 = vmatprep.subr.mxu1 %v13799_v0 }
  0x89   :  { %11047 = vmatpush3.msra.mxu0 %v14272_v54  ;;  %11074 = vmatpush3.msra.mxu1 %v848_v27  ;;  %v896_v27 = vsub.f32 %v14333_v13, %v895_v39  ;;  %v890_v45 = vand.u32 4294901760, %v889_v4 }
  0x8a   :  { %11048 = vmatprep.subr.mxu0 %v13799_v0  ;;  %11075 = vmatprep.subr.mxu1 %v13799_v0 }
  0x8b   :  { %11049 = vmatpush3.msra.mxu0 %v14284_v2  ;;  %11076 = vmatpush3.msra.mxu1 %v855_v59  ;;  %v903_v59 = vsub.f32 %v14344_v52, %v902_v10  ;;  %v897_v63 = vand.u32 4294901760, %v896_v27  ;;  %v1360_v27 = vld [vmem:[#allocation2 + $0x130] sm:$0xff] }
  0x8c   :  { %11050 = vmatprep.subr.mxu0 %v13799_v0  ;;  %11077 = vmatprep.subr.mxu1 %v13799_v0 }
  0x8d   :  { %11051 = vmatpush3.msra.mxu0 %v14299_v51  ;;  %11078 = vmatpush3.msra.mxu1 %v862_v44  ;;  %v910_v44 = vsub.f32 %v14354_v33, %v909_v30  ;;  %v904_v49 = vand.u32 4294901760, %v903_v59 }
  0x8e   :  { %11052 = vmatprep.subr.mxu0 %v13799_v0  ;;  %11079 = vmatprep.subr.mxu1 %v13799_v0 }
  0x8f   :  { %11053 = vmatpush3.msra.mxu0 %v14311_v21  ;;  %11080 = vmatpush3.msra.mxu1 %v869_v1  ;;  %v911_v1 = vand.u32 4294901760, %v910_v44  ;;  %v1359_v44 = vld [vmem:[#allocation2 + $0x128] sm:$0xff] }
  0x90   :  { %11054 = vmatprep.subr.mxu0 %v13799_v0  ;;  %11081 = vmatprep.subr.mxu1 %v13799_v0 }
  0x91   :  { %11055 = vmatpush3.msra.mxu0 %v14323_v57  ;;  %11082 = vmatpush3.msra.mxu1 %v876_v50 }
  0x92   :  { %11056 = vmatprep.subr.mxu0 %v13799_v0  ;;  %11083 = vmatprep.subr.mxu1 %v13799_v0 }
  0x93   :  { %11057 = vmatpush3.msra.mxu0 %v14335_v19  ;;  %11084 = vmatpush3.msra.mxu1 %v883_v18 }
  0x94   :  { %11058 = vmatprep.mubr.msk.f32.mxu0 %vm13800_vm0, %v13799_v0  ;;  %11085 = vmatprep.subr.mxu1 %v13799_v0 }
  0x95   :  { %11096 = vmatprep.subr.mxu0 %v13799_v0  ;;  %11059 = vmatmul.mubr.f32.vlgmr.msra.gmra.mxu0 %v14020_v14 }
  0x96   :  { %11086 = vmatpush3.msra.mxu1 %v890_v45  ;;  %11097 = vmatpush3.msra.mxu0 %v14174_v15  ;;  %v1369_v15 = vld [vmem:[#allocation2 + $0x178] sm:$0xff] }
  0x97   :  { %11087 = vmatprep.subr.mxu1 %v13799_v0  ;;  %11098 = vmatprep.subr.mxu0 %v13799_v0 }
  0x98   :  { %11088 = vmatpush3.msra.mxu1 %v897_v63  ;;  %11099 = vmatpush3.msra.mxu0 %v14186_v20  ;;  %v1367_v20 = vld [vmem:[#allocation2 + $0x168] sm:$0xff]  ;;  %v14653_v63 = vand.u32 4294901760, %v1360_v27 }
  0x99   :  { %11089 = vmatprep.subr.mxu1 %v13799_v0  ;;  %11100 = vmatprep.subr.mxu0 %v13799_v0 }
  0x9a   :  { %11090 = vmatpush3.msra.mxu1 %v904_v49  ;;  %11101 = vmatpush3.msra.mxu0 %v14195_v22  ;;  %v1366_v22 = vld [vmem:[#allocation2 + $0x160] sm:$0xff] }
  0x9b   :  { %11091 = vmatprep.subr.mxu1 %v13799_v0  ;;  %11102 = vmatprep.subr.mxu0 %v13799_v0 }
  0x9c   :  { %11092 = vmatpush3.msra.mxu1 %v911_v1  ;;  %11093 = vmatprep.mubr.msk.f32.mxu1 %vm13800_vm0, %v13799_v0 }
  0x9d   :  { %11103 = vmatpush3.msra.mxu0 %v14203_v25  ;;  %11094 = vmatmul.mubr.f32.vlgmr.msra.gmra.mxu1 %v13937_v62  ;;  %v14564_v25 = vand.u32 4294901760, %v1366_v22 }
  0x9e   :  { %11104 = vmatprep.subr.mxu0 %v13799_v0  ;;  %11131 = vmatprep.subr.mxu1 %v13799_v0 }
  0x9f   :  { %11105 = vmatpush3.msra.mxu0 %v14215_v34  ;;  %11132 = vmatpush3.msra.mxu1 %v14159_v6  ;;  %v1363_v34 = vld [vmem:[#allocation2 + $0x148] sm:$0xff] }
  0xa0   :  { %11106 = vmatprep.subr.mxu0 %v13799_v0  ;;  %11133 = vmatprep.subr.mxu1 %v13799_v0 }
  0xa1   :  { %11107 = vmatpush3.msra.mxu0 %v14229_v47  ;;  %11134 = vmatpush3.msra.mxu1 %v14166_v11  ;;  %v1362_v47 = vld [vmem:[#allocation2 + $0x140] sm:$0xff] }
  0xa2   :  { %11108 = vmatprep.subr.mxu0 %v13799_v0  ;;  %11135 = vmatprep.subr.mxu1 %v13799_v0 }
  0xa3   :  { %11109 = vmatpush3.msra.mxu0 %v14243_v61  ;;  %11136 = vmatpush3.msra.mxu1 %v14176_v16 }
  0xa4   :  { %11110 = vmatprep.subr.mxu0 %v13799_v0  ;;  %11137 = vmatprep.subr.mxu1 %v13799_v0 }
  0xa5   :  { %11111 = vmatpush3.msra.mxu0 %v14258_v31  ;;  %11138 = vmatpush3.msra.mxu1 %v14180_v17 }
  0xa6   :  { %11112 = vmatprep.subr.mxu0 %v13799_v0  ;;  %11139 = vmatprep.subr.mxu1 %v13799_v0 }
  0xa7   :  { %11113 = vmatpush3.msra.mxu0 %v14266_v38  ;;  %11140 = vmatpush3.msra.mxu1 %v14197_v23  ;;  %v14595_v38 = vand.u32 4294901760, %v1362_v47 }
  0xa8   :  { %11114 = vmatprep.subr.mxu0 %v13799_v0  ;;  %11141 = vmatprep.subr.mxu1 %v13799_v0 }
  0xa9   :  { %11115 = vmatpush3.msra.mxu0 %v14279_v60  ;;  %11142 = vmatpush3.msra.mxu1 %v14207_v28 }
  0xaa   :  { %11116 = vmatprep.subr.mxu0 %v13799_v0  ;;  %11143 = vmatprep.subr.mxu1 %v13799_v0 }
  0xab   :  { %11117 = vmatpush3.msra.mxu0 %v14291_v36  ;;  %11144 = vmatpush3.msra.mxu1 %v14220_v40 }
  0xac   :  { %11118 = vmatprep.subr.mxu0 %v13799_v0  ;;  %11145 = vmatprep.subr.mxu1 %v13799_v0 }
  0xad   :  { %11119 = vmatpush3.msra.mxu0 %v14303_v5  ;;  %11146 = vmatpush3.msra.mxu1 %v14234_v53 }
  0xae   :  { %11120 = vmatprep.subr.mxu0 %v13799_v0  ;;  %11147 = vmatprep.subr.mxu1 %v13799_v0 }
  0xaf   :  { %11121 = vmatpush3.msra.mxu0 %v14321_v48  ;;  %11148 = vmatpush3.msra.mxu1 %v14238_v55 }
  0xb0   :  { %11122 = vmatprep.subr.mxu0 %v13799_v0  ;;  %11149 = vmatprep.subr.mxu1 %v13799_v0 }
  0xb1   :  { %11123 = vmatpush3.msra.mxu0 %v14333_v13  ;;  %11150 = vmatpush3.msra.mxu1 %v14260_v37 }
  0xb2   :  { %11124 = vmatprep.subr.mxu0 %v13799_v0  ;;  %11151 = vmatprep.subr.mxu1 %v13799_v0 }
  0xb3   :  { %11125 = vmatpush3.msra.mxu0 %v14344_v52  ;;  %11152 = vmatpush3.msra.mxu1 %v14272_v54 }
  0xb4   :  { %11126 = vmatprep.subr.mxu0 %v13799_v0  ;;  %11153 = vmatprep.subr.mxu1 %v13799_v0 }
  0xb5   :  { %11127 = vmatpush3.msra.mxu0 %v14354_v33  ;;  %11128 = vmatprep.mubr.msk.f32.mxu0 %vm13800_vm0, %v13799_v0  ;;  %v1361_v33 = vld [vmem:[#allocation2 + $0x138] sm:$0xff] }
  0xb6   :  { %11154 = vmatpush3.msra.mxu1 %v14284_v2  ;;  %11129 = vmatmul.mubr.f32.vlgmr.msra.gmra.mxu0 %v13961_v26 }
  0xb7   :  { %11155 = vmatprep.subr.mxu1 %v13799_v0  ;;  %11166 = vmatprep.subr.mxu0 %v13799_v0 }
  0xb8   :  { %11156 = vmatpush3.msra.mxu1 %v14299_v51  ;;  %11167 = vmatpush3.msra.mxu0 %v804_v24  ;;  %v14562_v24 = vand.u32 4294901760, %v1367_v20 }
  0xb9   :  { %11157 = vmatprep.subr.mxu1 %v13799_v0  ;;  %11168 = vmatprep.subr.mxu0 %v13799_v0 }
  0xba   :  { %11158 = vmatpush3.msra.mxu1 %v14311_v21  ;;  %11169 = vmatpush3.msra.mxu0 %v811_v29  ;;  %v1364_v29 = vld [vmem:[#allocation2 + $0x150] sm:$0xff]  ;;  %v14579_v61 = vsub.f32 %v1367_v20, %v14562_v24  ;;  %v1357_v20 = vld [vmem:[#allocation2 + $0x118] sm:$0xff] }
  0xbb   :  { %11159 = vmatprep.subr.mxu1 %v13799_v0  ;;  %11170 = vmatprep.subr.mxu0 %v13799_v0 }
  0xbc   :  { %11160 = vmatpush3.msra.mxu1 %v14323_v57  ;;  %11171 = vmatpush3.msra.mxu0 %v818_v43  ;;  %v14570_v43 = vand.u32 4294901760, %v1364_v29  ;;  %v1486_v60 = vand.u32 4294901760, %v14579_v61 }
  0xbd   :  { %11161 = vmatprep.subr.mxu1 %v13799_v0  ;;  %11172 = vmatprep.subr.mxu0 %v13799_v0 }
  0xbe   :  { %11162 = vmatpush3.msra.mxu1 %v14335_v19  ;;  %11163 = vmatprep.mubr.msk.f32.mxu1 %vm13800_vm0, %v13799_v0 }
  0xbf   :  { %11173 = vmatpush3.msra.mxu0 %v825_v46  ;;  %11164 = vmatmul.mubr.f32.vlgmr.msra.gmra.mxu1 %v13985_v42  ;;  %v14572_v46 = vand.u32 4294901760, %v1363_v34 }
  0xc0   :  { %11174 = vmatprep.subr.mxu0 %v13799_v0  ;;  %11201 = vmatprep.subr.mxu1 %v13799_v0 }
  0xc1   :  { %11175 = vmatpush3.msra.mxu0 %v832_v3  ;;  %11202 = vmatpush3.msra.mxu1 %v14159_v6  ;;  %v14582_v3 = vsub.f32 %v1366_v22, %v14564_v25 }
  0xc2   :  { %11176 = vmatprep.subr.mxu0 %v13799_v0  ;;  %11203 = vmatprep.subr.mxu1 %v13799_v0 }
  0xc3   :  { %11177 = vmatpush3.msra.mxu0 %v839_v32  ;;  %11204 = vmatpush3.msra.mxu1 %v14166_v11  ;;  %v14593_v32 = vsub.f32 %v1363_v34, %v14572_v46 }
  0xc4   :  { %11178 = vmatprep.subr.mxu0 %v13799_v0  ;;  %11205 = vmatprep.subr.mxu1 %v13799_v0 }
  0xc5   :  { %11179 = vmatpush3.msra.mxu0 %v846_v56  ;;  %11206 = vmatpush3.msra.mxu1 %v14176_v16  ;;  %v14555_v16 = vand.u32 4294901760, %v1369_v15 }
  0xc6   :  { %11180 = vmatprep.subr.mxu0 %v13799_v0  ;;  %11207 = vmatprep.subr.mxu1 %v13799_v0 }
  0xc7   :  { %11181 = vmatpush3.msra.mxu0 %v853_v7  ;;  %11208 = vmatpush3.msra.mxu1 %v14180_v17  ;;  %v1368_v17 = vld [vmem:[#allocation2 + $0x170] sm:$0xff] }
  0xc8   :  { %11182 = vmatprep.subr.mxu0 %v13799_v0  ;;  %11209 = vmatprep.subr.mxu1 %v13799_v0 }
  0xc9   :  { %11183 = vmatpush3.msra.mxu0 %v860_v41  ;;  %11210 = vmatpush3.msra.mxu1 %v14197_v23  ;;  %v14558_v23 = vsub.f32 %v1369_v15, %v14555_v16  ;;  %v14608_v41 = vsub.f32 %v1362_v47, %v14595_v38 }
  0xca   :  { %11184 = vmatprep.subr.mxu0 %v13799_v0  ;;  %11211 = vmatprep.subr.mxu1 %v13799_v0 }
  0xcb   :  { %11185 = vmatpush3.msra.mxu0 %v867_v12  ;;  %11212 = vmatpush3.msra.mxu1 %v14207_v28  ;;  %v1365_v28 = vld [vmem:[#allocation2 + $0x158] sm:$0xff]  ;;  %v1487_v12 = vsub.f32 %v14579_v61, %v1486_v60  ;;  %v1521_v52 = vand.u32 4294901760, %v14608_v41 }
  0xcc   :  { %11186 = vmatprep.subr.mxu0 %v13799_v0  ;;  %11213 = vmatprep.subr.mxu1 %v13799_v0 }
  0xcd   :  { %11187 = vmatpush3.msra.mxu0 %v874_v35  ;;  %11214 = vmatpush3.msra.mxu1 %v14220_v40  ;;  %v14567_v40 = vand.u32 4294901760, %v1365_v28  ;;  %v1488_v48 = vand.u32 4294901760, %v1487_v12  ;;  %v1522_v4 = vsub.f32 %v14608_v41, %v1521_v52 }
  0xce   :  { %11188 = vmatprep.subr.mxu0 %v13799_v0  ;;  %11215 = vmatprep.subr.mxu1 %v13799_v0 }
  0xcf   :  { %11189 = vmatpush3.msra.mxu0 %v881_v8  ;;  %11216 = vmatpush3.msra.mxu1 %v14234_v53  ;;  %v1472_v53 = vand.u32 4294901760, %v14558_v23  ;;  %v14586_v31 = vsub.f32 %v1365_v28, %v14567_v40  ;;  %v1514_v8 = vand.u32 4294901760, %v14593_v32  ;;  %v1523_v49 = vand.u32 4294901760, %v1522_v4  ;;  %v1354_v4 = vld [vmem:[#allocation2 + $0x100] sm:$0xff] }
  0xd0   :  { %11190 = vmatprep.subr.mxu0 %v13799_v0  ;;  %11217 = vmatprep.subr.mxu1 %v13799_v0 }
  0xd1   :  { %11191 = vmatpush3.msra.mxu0 %v888_v58  ;;  %11218 = vmatpush3.msra.mxu1 %v14238_v55  ;;  %v1500_v7 = vand.u32 4294901760, %v14586_v31  ;;  %v1515_v9 = vsub.f32 %v14593_v32, %v1514_v8 }
  0xd2   :  { %11192 = vmatprep.subr.mxu0 %v13799_v0  ;;  %11219 = vmatprep.subr.mxu1 %v13799_v0 }
  0xd3   :  { %11193 = vmatpush3.msra.mxu0 %v895_v39  ;;  %11220 = vmatpush3.msra.mxu1 %v14260_v37  ;;  %v14589_v37 = vsub.f32 %v1364_v29, %v14570_v43  ;;  %v1516_v45 = vand.u32 4294901760, %v1515_v9 }
  0xd4   :  { %11194 = vmatprep.subr.mxu0 %v13799_v0  ;;  %11221 = vmatprep.subr.mxu1 %v13799_v0 }
  0xd5   :  { %11195 = vmatpush3.msra.mxu0 %v902_v10  ;;  %11222 = vmatpush3.msra.mxu1 %v14272_v54  ;;  %v1473_v54 = vsub.f32 %v14558_v23, %v1472_v53  ;;  %v1507_v36 = vand.u32 4294901760, %v14589_v37  ;;  %v14644_v10 = vand.u32 4294901760, %v1361_v33 }
  0xd6   :  { %11196 = vmatprep.subr.mxu0 %v13799_v0  ;;  %11223 = vmatprep.subr.mxu1 %v13799_v0 }
  0xd7   :  { %11197 = vmatpush3.msra.mxu0 %v909_v30  ;;  %11198 = vmatprep.mubr.msk.f32.mxu0 %vm13800_vm0, %v13799_v0  ;;  %v14651_v59 = vsub.f32 %v1361_v33, %v14644_v10 }
  0xd8   :  { %11224 = vmatpush3.msra.mxu1 %v14284_v2  ;;  %11199 = vmatmul.mubr.f32.vlgmr.msra.gmra.mxu0 %v13937_v62  ;;  %v1493_v2 = vand.u32 4294901760, %v14582_v3 }
  0xd9   :  { %11225 = vmatprep.subr.mxu1 %v13799_v0  ;;  %11233 = vmatprep.mubr.msk.f32.mxu1 %vm13800_vm0, %v13799_v0  ;;  %v1528_v1 = vand.u32 4294901760, %v14651_v59 }
  0xda   :  { %11226 = vmatpush3.msra.mxu1 %v14299_v51  ;;  %11236 = vmatprep.subr.mxu0 %v13799_v0  ;;  %v1474_v51 = vand.u32 4294901760, %v1473_v54  ;;  %v14688_v54 = vand.u32 4294901760, %v1357_v20 }
  0xdb   :  { %11227 = vmatprep.subr.mxu1 %v13799_v0  ;;  %11268 = vmatprep.mubr.msk.f32.mxu0 %vm13800_vm0, %v13799_v0 }
  0xdc   :  { %11228 = vmatpush3.msra.mxu1 %v14311_v21  ;;  %11237 = vmatpush3.msra.mxu0 %v14555_v16  ;;  %v1494_v21 = vsub.f32 %v14582_v3, %v1493_v2 }
  0xdd   :  { %11229 = vmatprep.subr.mxu1 %v13799_v0  ;;  %11238 = vmatprep.subr.mxu0 %v13799_v0 }
  0xde   :  { %11230 = vmatpush3.msra.mxu1 %v14323_v57  ;;  %v1501_v57 = vsub.f32 %v14586_v31, %v1500_v7  ;;  %v1495_v13 = vand.u32 4294901760, %v1494_v21 }
  0xdf   :  { %11231 = vmatprep.subr.mxu1 %v13799_v0 }
  0xe0   :  { %11232 = vmatpush3.msra.mxu1 %v14335_v19  ;;  %v1508_v19 = vsub.f32 %v14589_v37, %v1507_v36  ;;  %v1502_v58 = vand.u32 4294901760, %v1501_v57  ;;  %v14697_v57 = vsub.f32 %v1357_v20, %v14688_v54 }
  0xe1   :  { %11234 = vmatmul.mubr.f32.vlgmr.msra.gmra.mxu1 %v13937_v62  ;;  %11271 = vmatprep.subr.mxu1 %v13799_v0  ;;  %v14560_v62 = vand.u32 4294901760, %v1368_v17 }
  0xe2   :  { %11303 = vmatprep.mubr.msk.f32.mxu1 %vm13800_vm0, %v13799_v0  ;;  %11272 = vmatpush3.msra.mxu1 %v1474_v51  ;;  %v1509_v50 = vand.u32 4294901760, %v1508_v19  ;;  %v1356_v51 = vld [vmem:[#allocation2 + $0x110] sm:$0xff]  ;;  %v1355_v19 = vld [vmem:[#allocation2 + $0x108] sm:$0xff] }
  0xe3   :  { %v14576_v55 = vsub.f32 %v1368_v17, %v14560_v62  ;;  %11239 = vmatpush3.msra.mxu0 %v14560_v62  ;;  %11273 = vmatprep.subr.mxu1 %v13799_v0  ;;  %v14705_v33 = vand.u32 4294901760, %v1355_v19 }
  0xe4   :  { %11240 = vmatprep.subr.mxu0 %v13799_v0 }
  0xe5   :  { %v1479_v56 = vand.u32 4294901760, %v14576_v55  ;;  %11241 = vmatpush3.msra.mxu0 %v14562_v24 }
  0xe6   :  { %11242 = vmatprep.subr.mxu0 %v13799_v0 }
  0xe7   :  { %v1480_v5 = vsub.f32 %v14576_v55, %v1479_v56  ;;  %11243 = vmatpush3.msra.mxu0 %v14564_v25 }
  0xe8   :  { %11244 = vmatprep.subr.mxu0 %v13799_v0 }
  0xe9   :  { %v1481_v35 = vand.u32 4294901760, %v1480_v5  ;;  %11245 = vmatpush3.msra.mxu0 %v14567_v40 }
  0xea   :  { %11246 = vmatprep.subr.mxu0 %v13799_v0 }
  0xeb   :  { %11274 = vmatpush3.msra.mxu1 %v1481_v35  ;;  %11247 = vmatpush3.msra.mxu0 %v14570_v43 }
  0xec   :  { %11275 = vmatprep.subr.mxu1 %v13799_v0  ;;  %11248 = vmatprep.subr.mxu0 %v13799_v0 }
  0xed   :  { %11276 = vmatpush3.msra.mxu1 %v1488_v48  ;;  %11249 = vmatpush3.msra.mxu0 %v14572_v46 }
  0xee   :  { %11277 = vmatprep.subr.mxu1 %v13799_v0  ;;  %11250 = vmatprep.subr.mxu0 %v13799_v0 }
  0xef   :  { %11278 = vmatpush3.msra.mxu1 %v1495_v13  ;;  %11251 = vmatpush3.msra.mxu0 %v14595_v38  ;;  %v14699_v13 = vand.u32 4294901760, %v1356_v51 }
  0xf0   :  { %v132_v26 = vpop.f32.mrf.mxu0  ;;  %11279 = vmatprep.subr.mxu1 %v13799_v0  ;;  %11252 = vmatprep.subr.mxu0 %v13799_v0 }
  0xf1   :  { %11280 = vmatpush3.msra.mxu1 %v1502_v58  ;;  %11253 = vmatpush3.msra.mxu0 %v14644_v10 }
  0xf2   :  { %v10850_v42 = vpop.f32.mrf.mxu0  ;;  %11281 = vmatprep.subr.mxu1 %v13799_v0  ;;  %11254 = vmatprep.subr.mxu0 %v13799_v0 }
  0xf3   :  { %11282 = vmatpush3.msra.mxu1 %v1509_v50  ;;  %v14662_v42 = vand.u32 4294901760, %v1359_v44  ;;  %11255 = vmatpush3.msra.mxu0 %v14653_v63  ;;  %v14711_v50 = vsub.f32 %v1356_v51, %v14699_v13 }
  0xf4   :  { %11283 = vmatprep.subr.mxu1 %v13799_v0  ;;  %11256 = vmatprep.subr.mxu0 %v13799_v0 }
  0xf5   :  { %11284 = vmatpush3.msra.mxu1 %v1516_v45  ;;  %v14672_v15 = vsub.f32 %v1359_v44, %v14662_v42  ;;  %11257 = vmatpush3.msra.mxu0 %v14662_v42  ;;  %v18929_v44 = vand.u32 4294901760, %v14711_v50 }
  0xf6   :  { %11285 = vmatprep.subr.mxu1 %v13799_v0  ;;  %11258 = vmatprep.subr.mxu0 %v13799_v0 }
  0xf7   :  { %v283_v14 = vpop.f32.mrf.mxu1  ;;  %11286 = vmatpush3.msra.mxu1 %v1523_v49  ;;  %v18932_v29 = vand.u32 4294901760, %v14672_v15  ;;  %v1564_v20 = vsub.f32 %v14711_v50, %v18929_v44 }
  0xf8   :  { %v14553_v6 = vadd.f32 %v283_v14, %v132_v26  ;;  %v14660_v26 = vsub.f32 %v1360_v27, %v14653_v63  ;;  %v1358_v14 = vld [vmem:[#allocation2 + $0x120] sm:$0xff]  ;;  %11287 = vmatprep.subr.mxu1 %v13799_v0  ;;  %v14715_v27 = vsub.f32 %v1355_v19, %v14705_v33 }
  0xf9   :  { %v10885_v11 = vpop.f32.mrf.mxu1  ;;  %v14674_v17 = vand.u32 4294901760, %v1358_v14  ;;  %v1543_v21 = vsub.f32 %v14672_v15, %v18932_v29 }
  0xfa   :  { %v1535_v11 = vand.u32 4294901760, %v14660_v26  ;;  %v18928_v49 = vand.u32 4294901760, %v14715_v27 }
  0xfb   :  { %v14684_v34 = vsub.f32 %v1358_v14, %v14674_v17  ;;  %11259 = vmatpush3.msra.mxu0 %v14674_v17  ;;  %v1544_v58 = vand.u32 4294901760, %v1543_v21 }
  0xfc   :  { %v1536_v28 = vsub.f32 %v14660_v26, %v1535_v11  ;;  %11260 = vmatprep.subr.mxu0 %v13799_v0 }
  0xfd   :  { %v18931_v35 = vand.u32 4294901760, %v14684_v34  ;;  %11261 = vmatpush3.msra.mxu0 %v14688_v54 }
  0xfe   :  { %v1537_v12 = vand.u32 4294901760, %v1536_v28  ;;  %11262 = vmatprep.subr.mxu0 %v13799_v0 }
  0xff   :  { %v1550_v9 = vsub.f32 %v14684_v34, %v18931_v35  ;;  %11263 = vmatpush3.msra.mxu0 %v14699_v13 }
 0x100   :  { %11264 = vmatprep.subr.mxu0 %v13799_v0 }
 0x101   :  { %11265 = vmatpush3.msra.mxu0 %v14705_v33 }
 0x102   :  { %11266 = vmatprep.subr.mxu0 %v13799_v0 }
 0x110   :  { %v387_v39 = vpop.f32.mrf.mxu0 }
 0x111   :  { %v388_v18 = vadd.f32 %v387_v39, %v14553_v6  ;;  %v1529_v6 = vsub.f32 %v14651_v59, %v1528_v1  ;;  %v18930_v39 = vand.u32 4294901760, %v14697_v57 }
 0x112   :  { %v10920_v30 = vpop.f32.mrf.mxu0 }
 0x113   :  { %v1530_v22 = vand.u32 4294901760, %v1529_v6  ;;  %v14717_v30 = vand.u32 4294901760, %v1354_v4  ;;  %v1557_v45 = vsub.f32 %v14697_v57, %v18930_v39 }
 0x115   :  { %11288 = vmatpush3.msra.mxu1 %v1530_v22  ;;  %v14728_v14 = vsub.f32 %v1354_v4, %v14717_v30  ;;  %v1558_v6 = vand.u32 4294901760, %v1557_v45  ;;  %11267 = vmatpush3.msra.mxu0 %v14717_v30  ;;  %v1571_v22 = vsub.f32 %v14715_v27, %v18928_v49 }
 0x116   :  { %11289 = vmatprep.subr.mxu1 %v13799_v0  ;;  %11306 = vmatprep.subr.mxu0 %v13799_v0 }
 0x117   :  { %11290 = vmatpush3.msra.mxu1 %v1537_v12  ;;  %v18927_v28 = vand.u32 4294901760, %v14728_v14  ;;  %v1572_v51 = vand.u32 4294901760, %v1571_v22 }
 0x118   :  { %11291 = vmatprep.subr.mxu1 %v13799_v0 }
 0x119   :  { %v476_v47 = vpop.f32.mrf.mxu1  ;;  %11292 = vmatpush3.msra.mxu1 %v1544_v58  ;;  %v1578_v12 = vsub.f32 %v14728_v14, %v18927_v28 }
 0x11a   :  { %v477_v5 = vadd.f32 %v476_v47, %v388_v18  ;;  %v1551_v18 = vand.u32 4294901760, %v1550_v9  ;;  %11293 = vmatprep.subr.mxu1 %v13799_v0  ;;  %v1565_v47 = vand.u32 4294901760, %v1564_v20 }
 0x11b   :  { %v10955_v48 = vpop.f32.mrf.mxu1  ;;  %v1579_v21 = vand.u32 4294901760, %v1578_v12 }
 0x11c   :  { %11294 = vmatpush3.msra.mxu1 %v1551_v18 }
 0x11d   :  { %11295 = vmatprep.subr.mxu1 %v13799_v0 }
 0x11e   :  { %11296 = vmatpush3.msra.mxu1 %v1558_v6 }
 0x11f   :  { %11297 = vmatprep.subr.mxu1 %v13799_v0 }
 0x120   :  { %11298 = vmatpush3.msra.mxu1 %v1565_v47 }
 0x121   :  { %11299 = vmatprep.subr.mxu1 %v13799_v0 }
 0x122   :  { %11300 = vmatpush3.msra.mxu1 %v1572_v51 }
 0x123   :  { %11301 = vmatprep.subr.mxu1 %v13799_v0 }
 0x124   :  { %11302 = vmatpush3.msra.mxu1 %v1579_v21  ;;  %v9365_v21 = vld [vmem:[%s18925_s2] ss:$0 sm:$0xff] }
 0x125   :  { %11341 = vmatprep.subr.mxu1 %v13799_v0 }
 0x132   :  { %v595_v48 = vpop.f32.mrf.mxu0 }
 0x133   :  { %v596_v19 = vadd.f32 %v595_v48, %v477_v5 }
 0x134   :  { %v10990_v58 = vpop.f32.mrf.mxu0 }
 0x13b   :  { %v682_v9 = vpop.f32.mrf.mxu1 }
 0x13c   :  { %v14748_v4 = vadd.f32 %v682_v9, %v596_v19 }
 0x13d   :  { %v11025_v18 = vpop.f32.mrf.mxu1 }
 0x155   :  { %v797_v45 = vpop.f32.mrf.mxu0 }
 0x156   :  { %v798_v49 = vadd.f32 %v9365_v21, %v797_v45  ;;  %v2031_v45 = vld [vmem:[#allocation2 + $0x1b8] sm:$0xff] }
 0x157   :  { %v11060_v6 = vpop.f32.mrf.mxu0 }
 0x15d   :  { %v948_v20 = vpop.f32.mrf.mxu1 }
 0x15e   :  { %v949_v5 = vadd.f32 %v948_v20, %v798_v49 }
 0x15f   :  { %v11095_v22 = vpop.f32.mrf.mxu1 }
 0x176   :  { %v1052_v47 = vpop.f32.mrf.mxu0 }
 0x177   :  { %v1053_v58 = vadd.f32 %v1052_v47, %v949_v5  ;;  %v2030_v5 = vld [vmem:[#allocation2 + $0x1b0] sm:$0xff] }
 0x178   :  { %v11130_v28 = vpop.f32.mrf.mxu0 }
 0x17f   :  { %v1141_v12 = vpop.f32.mrf.mxu1 }
 0x180   :  { %v1142_v19 = vadd.f32 %v1141_v12, %v1053_v58 }
 0x181   :  { %v11165_v51 = vpop.f32.mrf.mxu1 }
 0x182   :  { %v15001_v51 = vand.u32 4294901760, %v2031_v45 }
 0x198   :  { %v1260_v44 = vpop.f32.mrf.mxu0 }
 0x199   :  { %v1261_v9 = vadd.f32 %v1260_v44, %v1142_v19 }
 0x19a   :  { %v11200_v48 = vpop.f32.mrf.mxu0 }
 0x1a1   :  { %v1347_v18 = vpop.f32.mrf.mxu1 }
 0x1a2   :  { %v1348_v39 = vadd.f32 %v1347_v18, %v1261_v9  ;;  %v15011_v9 = vsub.f32 %v2031_v45, %v15001_v51  ;;  %v15014_v18 = vand.u32 4294901760, %v2030_v5 }
 0x1a3   :  { %v11235_v6 = vpop.f32.mrf.mxu1 }
 0x1a4   :  { %v1351_v35 = vmul.f32 0.01, %v1348_v39  ;;  %v2029_v6 = vld [vmem:[#allocation2 + $0x1a8] sm:$0xff] }
 0x1a6   :  { %v1352_v22 = vmax.f32 %v1348_v39, %v1351_v35 }
 0x1a8   :  { %v14753_v29 = vand.u32 4294901760, %v1352_v22 }
 0x1aa   :  { %v14756_v28 = vsub.f32 %v1352_v22, %v14753_v29  ;;  %11304 = vmatmul.mubr.f32.vlgmr.msra.gmra.mxu1 %v14753_v29 }
 0x1ab   :  { %11342 = vmatpush3.msra.mxu1 %v14555_v16  ;;  %11373 = vmatprep.mubr.msk.f32.mxu1 %vm13800_vm0, %v13799_v0 }
 0x1ac   :  { %v1461_v49 = vand.u32 4294901760, %v14756_v28  ;;  %11343 = vmatprep.subr.mxu1 %v13799_v0 }
 0x1ad   :  { %11344 = vmatpush3.msra.mxu1 %v14560_v62 }
 0x1ae   :  { %11345 = vmatprep.subr.mxu1 %v13799_v0  ;;  %v1462_v35 = vsub.f32 %v14756_v28, %v1461_v49 }
 0x1af   :  { %11346 = vmatpush3.msra.mxu1 %v14562_v24 }
 0x1b0   :  { %11347 = vmatprep.subr.mxu1 %v13799_v0  ;;  %v1463_v39 = vand.u32 4294901760, %v1462_v35  ;;  %v15022_v35 = vand.u32 4294901760, %v2029_v6 }
 0x1b1   :  { %11348 = vmatpush3.msra.mxu1 %v14564_v25 }
 0x1b2   :  { %11349 = vmatprep.subr.mxu1 %v13799_v0  ;;  %11269 = vmatmul.mubr.f32.vlgmr.msra.gmra.mxu0 %v1463_v39  ;;  %v15026_v39 = vsub.f32 %v2030_v5, %v15014_v18 }
 0x1b3   :  { %11307 = vmatpush3.msra.mxu0 %v14558_v23  ;;  %11350 = vmatpush3.msra.mxu1 %v14567_v40  ;;  %v18995_v23 = vand.u32 4294901760, %v14684_v34 }
 0x1b4   :  { %11308 = vmatprep.subr.mxu0 %v13799_v0  ;;  %11351 = vmatprep.subr.mxu1 %v13799_v0 }
 0x1b5   :  { %11309 = vmatpush3.msra.mxu0 %v14576_v55  ;;  %11352 = vmatpush3.msra.mxu1 %v14570_v43 }
 0x1b6   :  { %11310 = vmatprep.subr.mxu0 %v13799_v0  ;;  %11353 = vmatprep.subr.mxu1 %v13799_v0 }
 0x1b7   :  { %11311 = vmatpush3.msra.mxu0 %v14579_v61  ;;  %11354 = vmatpush3.msra.mxu1 %v14572_v46 }
 0x1b8   :  { %11312 = vmatprep.subr.mxu0 %v13799_v0  ;;  %11355 = vmatprep.subr.mxu1 %v13799_v0 }
 0x1b9   :  { %11313 = vmatpush3.msra.mxu0 %v14582_v3  ;;  %11356 = vmatpush3.msra.mxu1 %v14595_v38  ;;  %v2037_v3 = vld [vmem:[#allocation2 + $0x1e8] sm:$0xff] }
 0x1ba   :  { %11314 = vmatprep.subr.mxu0 %v13799_v0  ;;  %11357 = vmatprep.subr.mxu1 %v13799_v0 }
 0x1bb   :  { %11315 = vmatpush3.msra.mxu0 %v14586_v31  ;;  %11358 = vmatpush3.msra.mxu1 %v14644_v10 }
 0x1bc   :  { %11316 = vmatprep.subr.mxu0 %v13799_v0  ;;  %11359 = vmatprep.subr.mxu1 %v13799_v0 }
 0x1bd   :  { %11317 = vmatpush3.msra.mxu0 %v14589_v37  ;;  %11360 = vmatpush3.msra.mxu1 %v14653_v63 }
 0x1be   :  { %11318 = vmatprep.subr.mxu0 %v13799_v0  ;;  %11361 = vmatprep.subr.mxu1 %v13799_v0 }
 0x1bf   :  { %11319 = vmatpush3.msra.mxu0 %v14593_v32  ;;  %11362 = vmatpush3.msra.mxu1 %v14662_v42  ;;  %v14933_v32 = vand.u32 4294901760, %v2037_v3 }
 0x1c0   :  { %11320 = vmatprep.subr.mxu0 %v13799_v0  ;;  %11363 = vmatprep.subr.mxu1 %v13799_v0 }
 0x1c1   :  { %11321 = vmatpush3.msra.mxu0 %v14608_v41  ;;  %11364 = vmatpush3.msra.mxu1 %v14674_v17 }
 0x1c2   :  { %11322 = vmatprep.subr.mxu0 %v13799_v0  ;;  %11365 = vmatprep.subr.mxu1 %v13799_v0 }
 0x1c3   :  { %11323 = vmatpush3.msra.mxu0 %v14651_v59  ;;  %11366 = vmatpush3.msra.mxu1 %v14688_v54 }
 0x1c4   :  { %11324 = vmatprep.subr.mxu0 %v13799_v0  ;;  %11367 = vmatprep.subr.mxu1 %v13799_v0 }
 0x1c5   :  { %11325 = vmatpush3.msra.mxu0 %v14660_v26  ;;  %11368 = vmatpush3.msra.mxu1 %v14699_v13 }
 0x1c6   :  { %11326 = vmatprep.subr.mxu0 %v13799_v0  ;;  %11369 = vmatprep.subr.mxu1 %v13799_v0 }
 0x1c7   :  { %11327 = vmatpush3.msra.mxu0 %v14672_v15  ;;  %11370 = vmatpush3.msra.mxu1 %v14705_v33 }
 0x1c8   :  { %11328 = vmatprep.subr.mxu0 %v13799_v0  ;;  %11371 = vmatprep.subr.mxu1 %v13799_v0 }
 0x1c9   :  { %11329 = vmatpush3.msra.mxu0 %v14684_v34  ;;  %11372 = vmatpush3.msra.mxu1 %v14717_v30 }
 0x1ca   :  { %11330 = vmatprep.subr.mxu0 %v13799_v0  ;;  %11374 = vmatmul.mubr.f32.vlgmr.msra.gmra.mxu1 %v1461_v49  ;;  %v2198_v49 = vand.u32 4294901760, %v15011_v9 }
 0x1cb   :  { %11411 = vmatprep.subr.mxu1 %v13799_v0  ;;  %11331 = vmatpush3.msra.mxu0 %v14697_v57 }
 0x1cc   :  { %11412 = vmatpush3.msra.mxu1 %v14555_v16  ;;  %11332 = vmatprep.subr.mxu0 %v13799_v0  ;;  %v18994_v16 = vand.u32 4294901760, %v14672_v15 }
 0x1cd   :  { %11413 = vmatprep.subr.mxu1 %v13799_v0  ;;  %11333 = vmatpush3.msra.mxu0 %v14711_v50 }
 0x1ce   :  { %11414 = vmatpush3.msra.mxu1 %v14560_v62  ;;  %11334 = vmatprep.subr.mxu0 %v13799_v0  ;;  %v18996_v62 = vand.u32 4294901760, %v14697_v57 }
 0x1cf   :  { %11415 = vmatprep.subr.mxu1 %v13799_v0  ;;  %11335 = vmatpush3.msra.mxu0 %v14715_v27 }
 0x1d0   :  { %11416 = vmatpush3.msra.mxu1 %v14562_v24  ;;  %11336 = vmatprep.subr.mxu0 %v13799_v0  ;;  %v18997_v24 = vand.u32 4294901760, %v14711_v50 }
 0x1d1   :  { %11417 = vmatprep.subr.mxu1 %v13799_v0  ;;  %11337 = vmatpush3.msra.mxu0 %v14728_v14 }
 0x1d2   :  { %11338 = vmatprep.mubr.msk.f32.mxu0 %vm13800_vm0, %v13799_v0  ;;  %11418 = vmatpush3.msra.mxu1 %v14564_v25  ;;  %v18998_v25 = vand.u32 4294901760, %v14715_v27 }
 0x1d3   :  { %11339 = vmatmul.mubr.f32.vlgmr.msra.gmra.mxu0 %v14756_v28  ;;  %11376 = vmatprep.subr.mxu0 %v13799_v0 }
 0x1d4   :  { %11419 = vmatprep.subr.mxu1 %v13799_v0  ;;  %11377 = vmatpush3.msra.mxu0 %v1472_v53  ;;  %v2038_v53 = vld [vmem:[#allocation2 + $0x1f0] sm:$0xff] }
 0x1d5   :  { %11420 = vmatpush3.msra.mxu1 %v14567_v40  ;;  %11378 = vmatprep.subr.mxu0 %v13799_v0  ;;  %v18999_v40 = vand.u32 4294901760, %v14728_v14  ;;  %v14925_v61 = vand.u32 4294901760, %v2038_v53 }
 0x1d6   :  { %11421 = vmatprep.subr.mxu1 %v13799_v0  ;;  %11379 = vmatpush3.msra.mxu0 %v1479_v56 }
 0x1d7   :  { %11422 = vmatpush3.msra.mxu1 %v14570_v43  ;;  %11380 = vmatprep.subr.mxu0 %v13799_v0  ;;  %v2039_v43 = vld [vmem:[#allocation2 + $0x1f8] sm:$0xff]  ;;  %v14931_v37 = vsub.f32 %v2038_v53, %v14925_v61 }
 0x1d8   :  { %11423 = vmatprep.subr.mxu1 %v13799_v0  ;;  %11381 = vmatpush3.msra.mxu0 %v1486_v60 }
 0x1d9   :  { %11424 = vmatpush3.msra.mxu1 %v14572_v46  ;;  %11382 = vmatprep.subr.mxu0 %v13799_v0  ;;  %v14920_v46 = vand.u32 4294901760, %v2039_v43  ;;  %v2149_v60 = vand.u32 4294901760, %v14931_v37 }
 0x1da   :  { %11425 = vmatprep.subr.mxu1 %v13799_v0  ;;  %11383 = vmatpush3.msra.mxu0 %v1493_v2  ;;  %v14942_v2 = vsub.f32 %v2037_v3, %v14933_v32 }
 0x1db   :  { %11426 = vmatpush3.msra.mxu1 %v14595_v38  ;;  %11384 = vmatprep.subr.mxu0 %v13799_v0  ;;  %v14923_v55 = vsub.f32 %v2039_v43, %v14920_v46  ;;  %v2036_v38 = vld [vmem:[#allocation2 + $0x1e0] sm:$0xff]  ;;  %v2027_v43 = vld [vmem:[#allocation2 + $0x198] sm:$0xff] }
 0x1dc   :  { %11427 = vmatprep.subr.mxu1 %v13799_v0  ;;  %11385 = vmatpush3.msra.mxu0 %v1500_v7  ;;  %v14944_v7 = vand.u32 4294901760, %v2036_v38 }
 0x1dd   :  { %11428 = vmatpush3.msra.mxu1 %v14644_v10  ;;  %11386 = vmatprep.subr.mxu0 %v13799_v0  ;;  %v2142_v31 = vand.u32 4294901760, %v14923_v55 }
 0x1de   :  { %11429 = vmatprep.subr.mxu1 %v13799_v0  ;;  %11387 = vmatpush3.msra.mxu0 %v1507_v36  ;;  %v2035_v36 = vld [vmem:[#allocation2 + $0x1d8] sm:$0xff]  ;;  %v14953_v10 = vsub.f32 %v2036_v38, %v14944_v7 }
 0x1df   :  { %11430 = vmatpush3.msra.mxu1 %v14653_v63  ;;  %11388 = vmatprep.subr.mxu0 %v13799_v0  ;;  %v2143_v56 = vsub.f32 %v14923_v55, %v2142_v31  ;;  %v14956_v59 = vand.u32 4294901760, %v2035_v36  ;;  %v2034_v63 = vld [vmem:[#allocation2 + $0x1d0] sm:$0xff] }
 0x1e0   :  { %11431 = vmatprep.subr.mxu1 %v13799_v0  ;;  %11389 = vmatpush3.msra.mxu0 %v1514_v8  ;;  %v2150_v8 = vsub.f32 %v14931_v37, %v2149_v60 }
 0x1e1   :  { %11432 = vmatpush3.msra.mxu1 %v14662_v42  ;;  %11390 = vmatprep.subr.mxu0 %v13799_v0  ;;  %v2144_v41 = vand.u32 4294901760, %v2143_v56  ;;  %v2163_v42 = vand.u32 4294901760, %v14953_v10  ;;  %v14967_v15 = vsub.f32 %v2035_v36, %v14956_v59  ;;  %v15046_v56 = vand.u32 4294901760, %v2027_v43 }
 0x1e2   :  { %11433 = vmatprep.subr.mxu1 %v13799_v0  ;;  %11391 = vmatpush3.msra.mxu0 %v1521_v52  ;;  %v2156_v52 = vand.u32 4294901760, %v14942_v2 }
 0x1e3   :  { %11434 = vmatpush3.msra.mxu1 %v14674_v17  ;;  %11392 = vmatprep.subr.mxu0 %v13799_v0  ;;  %v2033_v17 = vld [vmem:[#allocation2 + $0x1c8] sm:$0xff]  ;;  %v2164_v34 = vsub.f32 %v14953_v10, %v2163_v42 }
 0x1e4   :  { %11435 = vmatprep.subr.mxu1 %v13799_v0  ;;  %11393 = vmatpush3.msra.mxu0 %v1528_v1  ;;  %v2151_v1 = vand.u32 4294901760, %v2150_v8  ;;  %v2157_v26 = vsub.f32 %v14942_v2, %v2156_v52  ;;  %v14976_v57 = vand.u32 4294901760, %v2033_v17 }
 0x1e5   :  { %11436 = vmatpush3.msra.mxu1 %v14688_v54  ;;  %11394 = vmatprep.subr.mxu0 %v13799_v0  ;;  %v2165_v50 = vand.u32 4294901760, %v2164_v34 }
 0x1e6   :  { %11437 = vmatprep.subr.mxu1 %v13799_v0  ;;  %11395 = vmatpush3.msra.mxu0 %v1535_v11  ;;  %v14963_v11 = vand.u32 4294901760, %v2034_v63 }
 0x1e7   :  { %11438 = vmatpush3.msra.mxu1 %v14699_v13  ;;  %11396 = vmatprep.subr.mxu0 %v13799_v0  ;;  %v2170_v13 = vand.u32 4294901760, %v14967_v15 }
 0x1e8   :  { %11439 = vmatprep.subr.mxu1 %v13799_v0  ;;  %11397 = vmatpush3.msra.mxu0 %v18994_v16  ;;  %v14974_v54 = vsub.f32 %v2034_v63, %v14963_v11  ;;  %v2028_v16 = vld [vmem:[#allocation2 + $0x1a0] sm:$0xff] }
 0x1e9   :  { %11440 = vmatpush3.msra.mxu1 %v14705_v33  ;;  %11398 = vmatprep.subr.mxu0 %v13799_v0  ;;  %v2032_v33 = vld [vmem:[#allocation2 + $0x1c0] sm:$0xff]  ;;  %v2171_v14 = vsub.f32 %v14967_v15, %v2170_v13 }
 0x1ea   :  { %11441 = vmatprep.subr.mxu1 %v13799_v0  ;;  %11399 = vmatpush3.msra.mxu0 %v18995_v23  ;;  %v2177_v27 = vand.u32 4294901760, %v14974_v54  ;;  %v14986_v44 = vand.u32 4294901760, %v2032_v33 }
 0x1eb   :  { %11442 = vmatpush3.msra.mxu1 %v14717_v30  ;;  %11443 = vmatprep.mubr.msk.f32.mxu1 %vm13800_vm0, %v13799_v0  ;;  %v14984_v30 = vsub.f32 %v2033_v17, %v14976_v57  ;;  %v2172_v21 = vand.u32 4294901760, %v2171_v14 }
 0x1ec   :  { %11400 = vmatprep.subr.mxu0 %v13799_v0  ;;  %11444 = vmatmul.mubr.f32.vlgmr.msra.gmra.mxu1 %v14753_v29  ;;  %v2178_v20 = vsub.f32 %v14974_v54, %v2177_v27  ;;  %v14999_v12 = vsub.f32 %v2032_v33, %v14986_v44 }
 0x1ed   :  { %11401 = vmatpush3.msra.mxu0 %v18996_v62  ;;  %11408 = vmatprep.mubr.msk.f32.mxu0 %vm13800_vm0, %v13799_v0  ;;  %v2184_v47 = vand.u32 4294901760, %v14984_v30  ;;  %v2199_v62 = vsub.f32 %v15011_v9, %v2198_v49 }
 0x1ee   :  { %11402 = vmatprep.subr.mxu0 %v13799_v0  ;;  %11481 = vmatprep.subr.mxu1 %v13799_v0  ;;  %v2179_v48 = vand.u32 4294901760, %v2178_v20  ;;  %v2191_v19 = vand.u32 4294901760, %v14999_v12  ;;  %v2024_v20 = vld [vmem:[#allocation2 + $0x180] sm:$0xff] }
 0x1ef   :  { %11403 = vmatpush3.msra.mxu0 %v18997_v24  ;;  %11513 = vmatprep.mubr.msk.f32.mxu1 %vm13800_vm0, %v13799_v0  ;;  %v2185_v58 = vsub.f32 %v14984_v30, %v2184_v47  ;;  %v15034_v24 = vsub.f32 %v2029_v6, %v15022_v35  ;;  %v2200_v53 = vand.u32 4294901760, %v2199_v62 }
 0x1f0   :  { %11404 = vmatprep.subr.mxu0 %v13799_v0  ;;  %11482 = vmatpush3.msra.mxu1 %v2144_v41  ;;  %v2192_v28 = vsub.f32 %v14999_v12, %v2191_v19  ;;  %v2026_v41 = vld [vmem:[#allocation2 + $0x190] sm:$0xff] }
 0x1f1   :  { %11405 = vmatpush3.msra.mxu0 %v18998_v25  ;;  %11483 = vmatprep.subr.mxu1 %v13799_v0  ;;  %v2186_v22 = vand.u32 4294901760, %v2185_v58  ;;  %v15036_v25 = vand.u32 4294901760, %v2028_v16  ;;  %v18938_v3 = vand.u32 4294901760, %v15034_v24  ;;  %v15082_v58 = vand.u32 4294901760, %v2024_v20 }
 0x1f2   :  { %11406 = vmatprep.subr.mxu0 %v13799_v0  ;;  %11484 = vmatpush3.msra.mxu1 %v2151_v1  ;;  %v2193_v23 = vand.u32 4294901760, %v2192_v28  ;;  %v15059_v1 = vsub.f32 %v2027_v43, %v15046_v56 }
 0x1f3   :  { %11407 = vmatpush3.msra.mxu0 %v18999_v40  ;;  %11485 = vmatprep.subr.mxu1 %v13799_v0  ;;  %v2205_v40 = vand.u32 4294901760, %v15026_v39  ;;  %v15044_v38 = vsub.f32 %v2028_v16, %v15036_v25  ;;  %v2213_v8 = vsub.f32 %v15034_v24, %v18938_v3  ;;  %v15094_v16 = vsub.f32 %v2024_v20, %v15082_v58 }
 0x1f4   :  { %11409 = vmatmul.mubr.f32.vlgmr.msra.gmra.mxu0 %v14753_v29  ;;  %11446 = vmatprep.subr.mxu0 %v13799_v0  ;;  %v2158_v29 = vand.u32 4294901760, %v2157_v26  ;;  %v15061_v26 = vand.u32 4294901760, %v2026_v41 }
 0x1f5   :  { %11478 = vmatprep.mubr.msk.f32.mxu0 %vm13800_vm0, %v13799_v0  ;;  %11447 = vmatpush3.msra.mxu0 %v14920_v46  ;;  %v2206_v36 = vsub.f32 %v15026_v39, %v2205_v40  ;;  %v18937_v63 = vand.u32 4294901760, %v15044_v38  ;;  %v2214_v34 = vand.u32 4294901760, %v2213_v8  ;;  %v18933_v43 = vand.u32 4294901760, %v15094_v16 }
 0x1f6   :  { %11448 = vmatprep.subr.mxu0 %v13799_v0  ;;  %11486 = vmatpush3.msra.mxu1 %v2158_v29  ;;  %v2025_v29 = vld [vmem:[#allocation2 + $0x188] sm:$0xff]  ;;  %v15071_v14 = vsub.f32 %v2026_v41, %v15061_v26 }
 0x1f7   :  { %11449 = vmatpush3.msra.mxu0 %v14925_v61  ;;  %11487 = vmatprep.subr.mxu1 %v13799_v0  ;;  %v2207_v17 = vand.u32 4294901760, %v2206_v36  ;;  %v2220_v33 = vsub.f32 %v15044_v38, %v18937_v63  ;;  %v15074_v45 = vand.u32 4294901760, %v2025_v29  ;;  %v2248_v36 = vsub.f32 %v15094_v16, %v18933_v43 }
 0x1f8   :  { %11450 = vmatprep.subr.mxu0 %v13799_v0  ;;  %11488 = vmatpush3.msra.mxu1 %v2165_v50  ;;  %v18936_v50 = vand.u32 4294901760, %v15059_v1 }
 0x1f9   :  { %11451 = vmatpush3.msra.mxu0 %v14933_v32  ;;  %11489 = vmatprep.subr.mxu1 %v13799_v0  ;;  %v15086_v6 = vsub.f32 %v2025_v29, %v15074_v45  ;;  %v2249_v8 = vand.u32 4294901760, %v2248_v36 }
 0x1fa   :  { %11452 = vmatprep.subr.mxu0 %v13799_v0  ;;  %11490 = vmatpush3.msra.mxu1 %v2172_v21  ;;  %v2221_v21 = vand.u32 4294901760, %v2220_v33  ;;  %v2227_v5 = vsub.f32 %v15059_v1, %v18936_v50 }
 0x1fb   :  { %11453 = vmatpush3.msra.mxu0 %v14944_v7  ;;  %11491 = vmatprep.subr.mxu1 %v13799_v0 }
 0x1fc   :  { %11454 = vmatprep.subr.mxu0 %v13799_v0  ;;  %11492 = vmatpush3.msra.mxu1 %v2179_v48  ;;  %v18935_v48 = vand.u32 4294901760, %v15071_v14 }
 0x1fd   :  { %11455 = vmatpush3.msra.mxu0 %v14956_v59  ;;  %11493 = vmatprep.subr.mxu1 %v13799_v0 }
 0x1fe   :  { %11456 = vmatprep.subr.mxu0 %v13799_v0  ;;  %11494 = vmatpush3.msra.mxu1 %v2186_v22  ;;  %v2228_v22 = vand.u32 4294901760, %v2227_v5  ;;  %v2234_v28 = vsub.f32 %v15071_v14, %v18935_v48 }
 0x1ff   :  { %11457 = vmatpush3.msra.mxu0 %v14963_v11  ;;  %11495 = vmatprep.subr.mxu1 %v13799_v0 }
 0x200   :  { %11458 = vmatprep.subr.mxu0 %v13799_v0  ;;  %11496 = vmatpush3.msra.mxu1 %v2193_v23  ;;  %v18934_v23 = vand.u32 4294901760, %v15086_v6  ;;  %v2235_v62 = vand.u32 4294901760, %v2234_v28  ;;  %v9367_v28 = vld [vmem:[%s18925_s2 + $0x1] ss:$0 sm:$0xff] }
 0x201   :  { %11459 = vmatpush3.msra.mxu0 %v14976_v57  ;;  %11497 = vmatprep.subr.mxu1 %v13799_v0 }
 0x202   :  { %11460 = vmatprep.subr.mxu0 %v13799_v0  ;;  %11498 = vmatpush3.msra.mxu1 %v2200_v53  ;;  %v2241_v53 = vsub.f32 %v15086_v6, %v18934_v23 }
 0x203   :  { %11461 = vmatpush3.msra.mxu0 %v14986_v44  ;;  %11499 = vmatprep.subr.mxu1 %v13799_v0 }
 0x204   :  { %11462 = vmatprep.subr.mxu0 %v13799_v0  ;;  %11500 = vmatpush3.msra.mxu1 %v2207_v17  ;;  %v2242_v41 = vand.u32 4294901760, %v2241_v53 }
 0x205   :  { %11463 = vmatpush3.msra.mxu0 %v15001_v51  ;;  %11501 = vmatprep.subr.mxu1 %v13799_v0 }
 0x206   :  { %11464 = vmatprep.subr.mxu0 %v13799_v0  ;;  %11502 = vmatpush3.msra.mxu1 %v2214_v34 }
 0x207   :  { %11465 = vmatpush3.msra.mxu0 %v15014_v18  ;;  %11503 = vmatprep.subr.mxu1 %v13799_v0 }
 0x208   :  { %11466 = vmatprep.subr.mxu0 %v13799_v0  ;;  %11504 = vmatpush3.msra.mxu1 %v2221_v21 }
 0x209   :  { %11467 = vmatpush3.msra.mxu0 %v15022_v35  ;;  %11505 = vmatprep.subr.mxu1 %v13799_v0 }
 0x20a   :  { %11468 = vmatprep.subr.mxu0 %v13799_v0  ;;  %11506 = vmatpush3.msra.mxu1 %v2228_v22 }
 0x20b   :  { %11469 = vmatpush3.msra.mxu0 %v15036_v25  ;;  %11507 = vmatprep.subr.mxu1 %v13799_v0 }
 0x20c   :  { %11470 = vmatprep.subr.mxu0 %v13799_v0  ;;  %11508 = vmatpush3.msra.mxu1 %v2235_v62 }
 0x20d   :  { %11471 = vmatpush3.msra.mxu0 %v15046_v56  ;;  %11509 = vmatprep.subr.mxu1 %v13799_v0 }
 0x20e   :  { %11472 = vmatprep.subr.mxu0 %v13799_v0  ;;  %11510 = vmatpush3.msra.mxu1 %v2242_v41 }
 0x20f   :  { %11473 = vmatpush3.msra.mxu0 %v15061_v26  ;;  %11511 = vmatprep.subr.mxu1 %v13799_v0 }
 0x210   :  { %11474 = vmatprep.subr.mxu0 %v13799_v0  ;;  %11512 = vmatpush3.msra.mxu1 %v2249_v8 }
 0x211   :  { %11475 = vmatpush3.msra.mxu0 %v15074_v45  ;;  %11551 = vmatprep.subr.mxu1 %v13799_v0 }
 0x212   :  { %11476 = vmatprep.subr.mxu0 %v13799_v0 }
 0x213   :  { %11477 = vmatpush3.msra.mxu0 %v15082_v58 }
 0x214   :  { %11516 = vmatprep.subr.mxu0 %v13799_v0 }
 0x26a   :  { %v1616_v17 = vpop.f32.mrf.mxu1 }
 0x26c   :  { %v11305_v29 = vpop.f32.mrf.mxu1 }
 0x272   :  { %v1465_v34 = vpop.f32.mrf.mxu0 }
 0x273   :  { %v1466_v62 = vadd.f32 %v9367_v28, %v1465_v34  ;;  %v2699_v28 = vld [vmem:[#allocation2 + $0x238] sm:$0xff] }
 0x274   :  { %v11270_v33 = vpop.f32.mrf.mxu0 }
 0x275   :  { %v1617_v36 = vadd.f32 %v1616_v17, %v1466_v62 }
 0x28a   :  { %v1809_v20 = vpop.f32.mrf.mxu1 }
 0x28c   :  { %v11375_v21 = vpop.f32.mrf.mxu1 }
 0x293   :  { %v1720_v5 = vpop.f32.mrf.mxu0 }
 0x294   :  { %v1721_v43 = vadd.f32 %v1720_v5, %v1617_v36  ;;  %v15375_v36 = vand.u32 4294901760, %v2699_v28 }
 0x295   :  { %v11340_v22 = vpop.f32.mrf.mxu0 }
 0x296   :  { %v1810_v8 = vadd.f32 %v1809_v20, %v1721_v43  ;;  %v2700_v43 = vld [vmem:[#allocation2 + $0x240] sm:$0xff] }
 0x297   :  { %v15367_v5 = vand.u32 4294901760, %v2700_v43 }
 0x2ac   :  { %v2015_v53 = vpop.f32.mrf.mxu1 }
 0x2ae   :  { %v11445_v41 = vpop.f32.mrf.mxu1 }
 0x2af   :  { %v2698_v41 = vld [vmem:[#allocation2 + $0x230] sm:$0xff] }
 0x2b4   :  { %v1928_v23 = vpop.f32.mrf.mxu0 }
 0x2b5   :  { %v1929_v48 = vadd.f32 %v1928_v23, %v1810_v8 }
 0x2b6   :  { %v11410_v50 = vpop.f32.mrf.mxu0 }
 0x2b7   :  { %v2016_v29 = vadd.f32 %v2015_v53, %v1929_v48  ;;  %v15373_v53 = vsub.f32 %v2700_v43, %v15367_v5 }
 0x2b9   :  { %13761 = vtanh.f32 %v2016_v29  ;;  %v18947_v29 = vand.u32 4294901760, %v15373_v53 }
 0x2c6   :  { %v13762_v33 = vpop.eup %13761 }
 0x2c7   :  { %v2020_v63 = vmul.f32 1.442695, %v13762_v33  ;;  %v15382_v33 = vsub.f32 %v2699_v28, %v15375_v36 }
 0x2c9   :  { %13763 = vpow2.f32 %v2020_v63 }
 0x2d6   :  { %v13764_v21 = vpop.eup %13763 }
 0x2d7   :  { %v2022_v22 = vmul.f32 %v13764_v21, %v14748_v4  ;;  %v15384_v21 = vand.u32 4294901760, %v2698_v41 }
 0x2d9   :  { %v15116_v3 = vand.u32 4294901760, %v2022_v22 }
 0x2db   :  { %11514 = vmatmul.mubr.f32.vlgmr.msra.gmra.mxu1 %v15116_v3  ;;  %v15120_v17 = vsub.f32 %v2022_v22, %v15116_v3  ;;  %v2697_v22 = vld [vmem:[#allocation2 + $0x228] sm:$0xff] }
 0x2dc   :  { %11552 = vmatpush3.msra.mxu1 %v14920_v46  ;;  %11583 = vmatprep.mubr.msk.f32.mxu1 %vm13800_vm0, %v13799_v0 }
 0x2dd   :  { %11553 = vmatprep.subr.mxu1 %v13799_v0  ;;  %v15127_v50 = vand.u32 4294901760, %v15120_v17 }
 0x2de   :  { %11554 = vmatpush3.msra.mxu1 %v14925_v61 }
 0x2df   :  { %11555 = vmatprep.subr.mxu1 %v13799_v0  ;;  %v2132_v4 = vsub.f32 %v15120_v17, %v15127_v50 }
 0x2e0   :  { %11556 = vmatpush3.msra.mxu1 %v14933_v32 }
 0x2e1   :  { %11557 = vmatprep.subr.mxu1 %v13799_v0  ;;  %v15135_v63 = vand.u32 4294901760, %v2132_v4  ;;  %v2860_v4 = vsub.f32 %v15373_v53, %v18947_v29 }
 0x2e2   :  { %11558 = vmatpush3.msra.mxu1 %v14944_v7 }
 0x2e3   :  { %11559 = vmatprep.subr.mxu1 %v13799_v0  ;;  %11479 = vmatmul.mubr.f32.vlgmr.msra.gmra.mxu0 %v15135_v63 }
 0x2e4   :  { %11517 = vmatpush3.msra.mxu0 %v14923_v55  ;;  %11560 = vmatpush3.msra.mxu1 %v14956_v59  ;;  %v19001_v55 = vand.u32 4294901760, %v15044_v38 }
 0x2e5   :  { %11518 = vmatprep.subr.mxu0 %v13799_v0  ;;  %11561 = vmatprep.subr.mxu1 %v13799_v0 }
 0x2e6   :  { %11519 = vmatpush3.msra.mxu0 %v14931_v37  ;;  %11562 = vmatpush3.msra.mxu1 %v14963_v11  ;;  %v19004_v37 = vand.u32 4294901760, %v15086_v6 }
 0x2e7   :  { %11520 = vmatprep.subr.mxu0 %v13799_v0  ;;  %11563 = vmatprep.subr.mxu1 %v13799_v0 }
 0x2e8   :  { %11521 = vmatpush3.msra.mxu0 %v14942_v2  ;;  %11564 = vmatpush3.msra.mxu1 %v14976_v57 }
 0x2e9   :  { %11522 = vmatprep.subr.mxu0 %v13799_v0  ;;  %11565 = vmatprep.subr.mxu1 %v13799_v0 }
 0x2ea   :  { %11523 = vmatpush3.msra.mxu0 %v14953_v10  ;;  %11566 = vmatpush3.msra.mxu1 %v14986_v44  ;;  %v2704_v10 = vld [vmem:[#allocation2 + $0x260] sm:$0xff] }
 0x2eb   :  { %11524 = vmatprep.subr.mxu0 %v13799_v0  ;;  %11567 = vmatprep.subr.mxu1 %v13799_v0 }
 0x2ec   :  { %11525 = vmatpush3.msra.mxu0 %v14967_v15  ;;  %11568 = vmatpush3.msra.mxu1 %v15001_v51  ;;  %v2703_v15 = vld [vmem:[#allocation2 + $0x258] sm:$0xff] }
 0x2ed   :  { %11526 = vmatprep.subr.mxu0 %v13799_v0  ;;  %11569 = vmatprep.subr.mxu1 %v13799_v0 }
 0x2ee   :  { %11527 = vmatpush3.msra.mxu0 %v14974_v54  ;;  %11570 = vmatpush3.msra.mxu1 %v15014_v18  ;;  %v2702_v54 = vld [vmem:[#allocation2 + $0x250] sm:$0xff] }
 0x2ef   :  { %11528 = vmatprep.subr.mxu0 %v13799_v0  ;;  %11571 = vmatprep.subr.mxu1 %v13799_v0 }
 0x2f0   :  { %11529 = vmatpush3.msra.mxu0 %v14984_v30  ;;  %11572 = vmatpush3.msra.mxu1 %v15022_v35  ;;  %v15304_v30 = vand.u32 4294901760, %v2702_v54 }
 0x2f1   :  { %11530 = vmatprep.subr.mxu0 %v13799_v0  ;;  %11573 = vmatprep.subr.mxu1 %v13799_v0 }
 0x2f2   :  { %11531 = vmatpush3.msra.mxu0 %v14999_v12  ;;  %11574 = vmatpush3.msra.mxu1 %v15036_v25 }
 0x2f3   :  { %11532 = vmatprep.subr.mxu0 %v13799_v0  ;;  %11575 = vmatprep.subr.mxu1 %v13799_v0 }
 0x2f4   :  { %11533 = vmatpush3.msra.mxu0 %v15011_v9  ;;  %11576 = vmatpush3.msra.mxu1 %v15046_v56 }
 0x2f5   :  { %11534 = vmatprep.subr.mxu0 %v13799_v0  ;;  %11577 = vmatprep.subr.mxu1 %v13799_v0 }
 0x2f6   :  { %11535 = vmatpush3.msra.mxu0 %v15026_v39  ;;  %11578 = vmatpush3.msra.mxu1 %v15061_v26 }
 0x2f7   :  { %11536 = vmatprep.subr.mxu0 %v13799_v0  ;;  %11579 = vmatprep.subr.mxu1 %v13799_v0 }
 0x2f8   :  { %11537 = vmatpush3.msra.mxu0 %v15034_v24  ;;  %11580 = vmatpush3.msra.mxu1 %v15074_v45 }
 0x2f9   :  { %11538 = vmatprep.subr.mxu0 %v13799_v0  ;;  %11581 = vmatprep.subr.mxu1 %v13799_v0 }
 0x2fa   :  { %11539 = vmatpush3.msra.mxu0 %v15044_v38  ;;  %11582 = vmatpush3.msra.mxu1 %v15082_v58 }
 0x2fb   :  { %11540 = vmatprep.subr.mxu0 %v13799_v0  ;;  %11584 = vmatmul.mubr.f32.vlgmr.msra.gmra.mxu1 %v15127_v50 }
 0x2fc   :  { %11621 = vmatprep.subr.mxu1 %v13799_v0  ;;  %11541 = vmatpush3.msra.mxu0 %v15059_v1 }
 0x2fd   :  { %11622 = vmatpush3.msra.mxu1 %v14920_v46  ;;  %11542 = vmatprep.subr.mxu0 %v13799_v0  ;;  %v19000_v46 = vand.u32 4294901760, %v15034_v24 }
 0x2fe   :  { %11623 = vmatprep.subr.mxu1 %v13799_v0  ;;  %11543 = vmatpush3.msra.mxu0 %v15071_v14 }
 0x2ff   :  { %11624 = vmatpush3.msra.mxu1 %v14925_v61  ;;  %11544 = vmatprep.subr.mxu0 %v13799_v0  ;;  %v19002_v61 = vand.u32 4294901760, %v15059_v1 }
 0x300   :  { %11625 = vmatprep.subr.mxu1 %v13799_v0  ;;  %11545 = vmatpush3.msra.mxu0 %v15086_v6 }
 0x301   :  { %11626 = vmatpush3.msra.mxu1 %v14933_v32  ;;  %11546 = vmatprep.subr.mxu0 %v13799_v0  ;;  %v19005_v32 = vand.u32 4294901760, %v15094_v16 }
 0x302   :  { %11627 = vmatprep.subr.mxu1 %v13799_v0  ;;  %11547 = vmatpush3.msra.mxu0 %v15094_v16 }
 0x303   :  { %11548 = vmatprep.mubr.msk.f32.mxu0 %vm13800_vm0, %v13799_v0  ;;  %11628 = vmatpush3.msra.mxu1 %v14944_v7  ;;  %v2706_v7 = vld [vmem:[#allocation2 + $0x270] sm:$0xff] }
 0x304   :  { %11549 = vmatmul.mubr.f32.vlgmr.msra.gmra.mxu0 %v15120_v17  ;;  %11586 = vmatprep.subr.mxu0 %v13799_v0 }
 0x305   :  { %11629 = vmatprep.subr.mxu1 %v13799_v0  ;;  %11587 = vmatpush3.msra.mxu0 %v2142_v31  ;;  %v19003_v31 = vand.u32 4294901760, %v15071_v14 }
 0x306   :  { %11630 = vmatpush3.msra.mxu1 %v14956_v59  ;;  %11588 = vmatprep.subr.mxu0 %v13799_v0  ;;  %v15292_v59 = vand.u32 4294901760, %v2706_v7 }
 0x307   :  { %11631 = vmatprep.subr.mxu1 %v13799_v0  ;;  %11589 = vmatpush3.msra.mxu0 %v2149_v60  ;;  %v2707_v60 = vld [vmem:[#allocation2 + $0x278] sm:$0xff] }
 0x308   :  { %11632 = vmatpush3.msra.mxu1 %v14963_v11  ;;  %11590 = vmatprep.subr.mxu0 %v13799_v0  ;;  %v15290_v2 = vand.u32 4294901760, %v2707_v60  ;;  %v15296_v11 = vand.u32 4294901760, %v2704_v10 }
 0x309   :  { %11633 = vmatprep.subr.mxu1 %v13799_v0  ;;  %11591 = vmatpush3.msra.mxu0 %v2156_v52  ;;  %v2705_v52 = vld [vmem:[#allocation2 + $0x268] sm:$0xff] }
 0x30a   :  { %11634 = vmatpush3.msra.mxu1 %v14976_v57  ;;  %11592 = vmatprep.subr.mxu0 %v13799_v0  ;;  %v2701_v57 = vld [vmem:[#allocation2 + $0x248] sm:$0xff] }
 0x30b   :  { %11635 = vmatprep.subr.mxu1 %v13799_v0  ;;  %11593 = vmatpush3.msra.mxu0 %v2163_v42  ;;  %v15294_v42 = vand.u32 4294901760, %v2705_v52 }
 0x30c   :  { %11636 = vmatpush3.msra.mxu1 %v14986_v44  ;;  %11594 = vmatprep.subr.mxu0 %v13799_v0  ;;  %v15306_v44 = vand.u32 4294901760, %v2701_v57 }
 0x30d   :  { %11637 = vmatprep.subr.mxu1 %v13799_v0  ;;  %11595 = vmatpush3.msra.mxu0 %v2170_v13  ;;  %v15299_v13 = vsub.f32 %v2707_v60, %v15290_v2  ;;  %v15312_v12 = vsub.f32 %v2705_v52, %v15294_v42 }
 0x30e   :  { %11638 = vmatpush3.msra.mxu1 %v15001_v51  ;;  %11596 = vmatprep.subr.mxu0 %v13799_v0  ;;  %v15315_v51 = vsub.f32 %v2704_v10, %v15296_v11  ;;  %v2695_v10 = vld [vmem:[#allocation2 + $0x218] sm:$0xff] }
 0x30f   :  { %11639 = vmatprep.subr.mxu1 %v13799_v0  ;;  %11597 = vmatpush3.msra.mxu0 %v2177_v27  ;;  %v15302_v27 = vand.u32 4294901760, %v2703_v15 }
 0x310   :  { %11640 = vmatpush3.msra.mxu1 %v15014_v18  ;;  %11598 = vmatprep.subr.mxu0 %v13799_v0  ;;  %v15324_v18 = vsub.f32 %v2702_v54, %v15304_v30  ;;  %v2831_v39 = vand.u32 4294901760, %v15315_v51 }
 0x311   :  { %11641 = vmatprep.subr.mxu1 %v13799_v0  ;;  %11599 = vmatpush3.msra.mxu0 %v2184_v47  ;;  %v15309_v47 = vsub.f32 %v2706_v7, %v15292_v59  ;;  %v15320_v9 = vsub.f32 %v2703_v15, %v15302_v27 }
 0x312   :  { %11642 = vmatpush3.msra.mxu1 %v15022_v35  ;;  %11600 = vmatprep.subr.mxu0 %v13799_v0  ;;  %v2824_v35 = vand.u32 4294901760, %v15312_v12  ;;  %v2845_v14 = vand.u32 4294901760, %v15324_v18 }
 0x313   :  { %11643 = vmatprep.subr.mxu1 %v13799_v0  ;;  %11601 = vmatpush3.msra.mxu0 %v2191_v19  ;;  %v2810_v19 = vand.u32 4294901760, %v15299_v13 }
 0x314   :  { %11644 = vmatpush3.msra.mxu1 %v15036_v25  ;;  %11602 = vmatprep.subr.mxu0 %v13799_v0  ;;  %v2838_v25 = vand.u32 4294901760, %v15320_v9  ;;  %v2846_v23 = vsub.f32 %v15324_v18, %v2845_v14 }
 0x315   :  { %11645 = vmatprep.subr.mxu1 %v13799_v0  ;;  %11603 = vmatpush3.msra.mxu0 %v2198_v49  ;;  %v2817_v49 = vand.u32 4294901760, %v15309_v47  ;;  %v2811_v24 = vsub.f32 %v15299_v13, %v2810_v19 }
 0x316   :  { %11646 = vmatpush3.msra.mxu1 %v15046_v56  ;;  %11604 = vmatprep.subr.mxu0 %v13799_v0  ;;  %v2825_v56 = vsub.f32 %v15312_v12, %v2824_v35  ;;  %v2847_v62 = vand.u32 4294901760, %v2846_v23 }
 0x317   :  { %11647 = vmatprep.subr.mxu1 %v13799_v0  ;;  %11605 = vmatpush3.msra.mxu0 %v2205_v40  ;;  %v15336_v40 = vsub.f32 %v2701_v57, %v15306_v44  ;;  %v2818_v38 = vsub.f32 %v15309_v47, %v2817_v49  ;;  %v2812_v1 = vand.u32 4294901760, %v2811_v24  ;;  %v15417_v24 = vand.u32 4294901760, %v2695_v10 }
 0x318   :  { %11648 = vmatpush3.msra.mxu1 %v15061_v26  ;;  %11606 = vmatprep.subr.mxu0 %v13799_v0  ;;  %v2832_v26 = vsub.f32 %v15315_v51, %v2831_v39  ;;  %v2826_v48 = vand.u32 4294901760, %v2825_v56  ;;  %v2694_v56 = vld [vmem:[#allocation2 + $0x210] sm:$0xff] }
 0x319   :  { %11649 = vmatprep.subr.mxu1 %v13799_v0  ;;  %11607 = vmatpush3.msra.mxu0 %v19000_v46  ;;  %v2852_v6 = vand.u32 4294901760, %v15336_v40  ;;  %v18946_v46 = vand.u32 4294901760, %v15382_v33 }
 0x31a   :  { %11650 = vmatpush3.msra.mxu1 %v15074_v45  ;;  %11608 = vmatprep.subr.mxu0 %v13799_v0  ;;  %v2819_v45 = vand.u32 4294901760, %v2818_v38  ;;  %v2833_v16 = vand.u32 4294901760, %v2832_v26 }
 0x31b   :  { %11651 = vmatprep.subr.mxu1 %v13799_v0  ;;  %11609 = vmatpush3.msra.mxu0 %v19001_v55  ;;  %v2853_v20 = vsub.f32 %v15336_v40, %v2852_v6  ;;  %v15394_v55 = vsub.f32 %v2698_v41, %v15384_v21 }
 0x31c   :  { %11652 = vmatpush3.msra.mxu1 %v15082_v58  ;;  %11653 = vmatprep.mubr.msk.f32.mxu1 %vm13800_vm0, %v13799_v0  ;;  %v2839_v58 = vsub.f32 %v15320_v9, %v2838_v25 }
 0x31d   :  { %11610 = vmatprep.subr.mxu0 %v13799_v0  ;;  %11654 = vmatmul.mubr.f32.vlgmr.msra.gmra.mxu1 %v15116_v3  ;;  %v2854_v8 = vand.u32 4294901760, %v2853_v20  ;;  %v18945_v60 = vand.u32 4294901760, %v15394_v55 }
 0x31e   :  { %11611 = vmatpush3.msra.mxu0 %v19002_v61  ;;  %11618 = vmatprep.mubr.msk.f32.mxu0 %vm13800_vm0, %v13799_v0  ;;  %v2840_v34 = vand.u32 4294901760, %v2839_v58  ;;  %v15396_v61 = vand.u32 4294901760, %v2697_v22 }
 0x31f   :  { %11612 = vmatprep.subr.mxu0 %v13799_v0  ;;  %11691 = vmatprep.subr.mxu1 %v13799_v0  ;;  %v2874_v54 = vsub.f32 %v15394_v55, %v18945_v60 }
 0x320   :  { %11613 = vmatpush3.msra.mxu0 %v19003_v31  ;;  %11723 = vmatprep.mubr.msk.f32.mxu1 %vm13800_vm0, %v13799_v0  ;;  %v2696_v31 = vld [vmem:[#allocation2 + $0x220] sm:$0xff]  ;;  %v15406_v7 = vsub.f32 %v2697_v22, %v15396_v61 }
 0x321   :  { %11614 = vmatprep.subr.mxu0 %v13799_v0  ;;  %11692 = vmatpush3.msra.mxu1 %v2812_v1  ;;  %v15410_v52 = vand.u32 4294901760, %v2696_v31  ;;  %v2875_v1 = vand.u32 4294901760, %v2874_v54 }
 0x322   :  { %11615 = vmatpush3.msra.mxu0 %v19004_v37  ;;  %11693 = vmatprep.subr.mxu1 %v13799_v0  ;;  %v2861_v37 = vand.u32 4294901760, %v2860_v4  ;;  %v18944_v57 = vand.u32 4294901760, %v15406_v7 }
 0x323   :  { %11616 = vmatprep.subr.mxu0 %v13799_v0  ;;  %11694 = vmatpush3.msra.mxu1 %v2819_v45  ;;  %v15421_v38 = vsub.f32 %v2696_v31, %v15410_v52  ;;  %v15428_v45 = vsub.f32 %v2695_v10, %v15417_v24 }
 0x324   :  { %11617 = vmatpush3.msra.mxu0 %v19005_v32  ;;  %11695 = vmatprep.subr.mxu1 %v13799_v0  ;;  %v2867_v32 = vsub.f32 %v15382_v33, %v18946_v46  ;;  %v2881_v26 = vsub.f32 %v15406_v7, %v18944_v57 }
 0x325   :  { %11619 = vmatmul.mubr.f32.vlgmr.msra.gmra.mxu0 %v15116_v3  ;;  %11656 = vmatprep.subr.mxu0 %v13799_v0  ;;  %v18943_v58 = vand.u32 4294901760, %v15421_v38  ;;  %v18942_v43 = vand.u32 4294901760, %v15428_v45 }
 0x326   :  { %11688 = vmatprep.mubr.msk.f32.mxu0 %vm13800_vm0, %v13799_v0  ;;  %11657 = vmatpush3.msra.mxu0 %v15290_v2  ;;  %v2868_v15 = vand.u32 4294901760, %v2867_v32  ;;  %v2882_v23 = vand.u32 4294901760, %v2881_v26 }
 0x327   :  { %11658 = vmatprep.subr.mxu0 %v13799_v0  ;;  %11696 = vmatpush3.msra.mxu1 %v2826_v48  ;;  %v15430_v48 = vand.u32 4294901760, %v2694_v56  ;;  %v2888_v28 = vsub.f32 %v15421_v38, %v18943_v58  ;;  %v2895_v41 = vsub.f32 %v15428_v45, %v18942_v43 }
 0x328   :  { %11659 = vmatpush3.msra.mxu0 %v15292_v59  ;;  %11697 = vmatprep.subr.mxu1 %v13799_v0 }
 0x329   :  { %11660 = vmatprep.subr.mxu0 %v13799_v0  ;;  %11698 = vmatpush3.msra.mxu1 %v2833_v16  ;;  %v2693_v16 = vld [vmem:[#allocation2 + $0x208] sm:$0xff]  ;;  %v2889_v31 = vand.u32 4294901760, %v2888_v28 }
 0x32a   :  { %11661 = vmatpush3.msra.mxu0 %v15294_v42  ;;  %11699 = vmatprep.subr.mxu1 %v13799_v0  ;;  %v15440_v20 = vand.u32 4294901760, %v2693_v16 }
 0x32b   :  { %11662 = vmatprep.subr.mxu0 %v13799_v0  ;;  %11700 = vmatpush3.msra.mxu1 %v2840_v34  ;;  %v15438_v34 = vsub.f32 %v2694_v56, %v15430_v48 }
 0x32c   :  { %11663 = vmatpush3.msra.mxu0 %v15296_v11  ;;  %11701 = vmatprep.subr.mxu1 %v13799_v0  ;;  %v15453_v22 = vsub.f32 %v2693_v16, %v15440_v20 }
 0x32d   :  { %11664 = vmatprep.subr.mxu0 %v13799_v0  ;;  %11702 = vmatpush3.msra.mxu1 %v2847_v62  ;;  %v2692_v62 = vld [vmem:[#allocation2 + $0x200] sm:$0xff] }
 0x32e   :  { %11665 = vmatpush3.msra.mxu0 %v15302_v27  ;;  %11703 = vmatprep.subr.mxu1 %v13799_v0  ;;  %v15455_v4 = vand.u32 4294901760, %v2692_v62  ;;  %v18939_v10 = vand.u32 4294901760, %v15453_v22 }
 0x32f   :  { %11666 = vmatprep.subr.mxu0 %v13799_v0  ;;  %11704 = vmatpush3.msra.mxu1 %v2854_v8  ;;  %v18941_v8 = vand.u32 4294901760, %v15438_v34 }
 0x330   :  { %11667 = vmatpush3.msra.mxu0 %v15304_v30  ;;  %11705 = vmatprep.subr.mxu1 %v13799_v0  ;;  %v2909_v56 = vsub.f32 %v15453_v22, %v18939_v10 }
 0x331   :  { %11668 = vmatprep.subr.mxu0 %v13799_v0  ;;  %11706 = vmatpush3.msra.mxu1 %v2861_v37  ;;  %v2896_v37 = vand.u32 4294901760, %v2895_v41  ;;  %v2902_v32 = vsub.f32 %v15438_v34, %v18941_v8 }
 0x332   :  { %11669 = vmatpush3.msra.mxu0 %v15306_v44  ;;  %11707 = vmatprep.subr.mxu1 %v13799_v0  ;;  %v2910_v26 = vand.u32 4294901760, %v2909_v56 }
 0x333   :  { %11670 = vmatprep.subr.mxu0 %v13799_v0  ;;  %11708 = vmatpush3.msra.mxu1 %v2868_v15  ;;  %v15465_v15 = vsub.f32 %v2692_v62, %v15455_v4  ;;  %v2903_v54 = vand.u32 4294901760, %v2902_v32 }
 0x334   :  { %11671 = vmatpush3.msra.mxu0 %v15367_v5  ;;  %11709 = vmatprep.subr.mxu1 %v13799_v0 }
 0x335   :  { %11672 = vmatprep.subr.mxu0 %v13799_v0  ;;  %11710 = vmatpush3.msra.mxu1 %v2875_v1  ;;  %v18940_v1 = vand.u32 4294901760, %v15465_v15 }
 0x336   :  { %11673 = vmatpush3.msra.mxu0 %v15375_v36  ;;  %11711 = vmatprep.subr.mxu1 %v13799_v0 }
 0x337   :  { %11674 = vmatprep.subr.mxu0 %v13799_v0  ;;  %11712 = vmatpush3.msra.mxu1 %v2882_v23  ;;  %v2916_v16 = vsub.f32 %v15465_v15, %v18940_v1 }
 0x338   :  { %11675 = vmatpush3.msra.mxu0 %v15384_v21  ;;  %11713 = vmatprep.subr.mxu1 %v13799_v0 }
 0x339   :  { %11676 = vmatprep.subr.mxu0 %v13799_v0  ;;  %11714 = vmatpush3.msra.mxu1 %v2889_v31  ;;  %v2917_v23 = vand.u32 4294901760, %v2916_v16 }
 0x33a   :  { %11677 = vmatpush3.msra.mxu0 %v15396_v61  ;;  %11715 = vmatprep.subr.mxu1 %v13799_v0 }
 0x33b   :  { %11678 = vmatprep.subr.mxu0 %v13799_v0  ;;  %11716 = vmatpush3.msra.mxu1 %v2896_v37 }
 0x33c   :  { %11679 = vmatpush3.msra.mxu0 %v15410_v52  ;;  %11717 = vmatprep.subr.mxu1 %v13799_v0 }
 0x33d   :  { %11680 = vmatprep.subr.mxu0 %v13799_v0  ;;  %11718 = vmatpush3.msra.mxu1 %v2903_v54  ;;  %v9369_v54 = vld [vmem:[%s18925_s2 + $0x2] ss:$0 sm:$0xff] }
 0x33e   :  { %11681 = vmatpush3.msra.mxu0 %v15417_v24  ;;  %11719 = vmatprep.subr.mxu1 %v13799_v0 }
 0x33f   :  { %11682 = vmatprep.subr.mxu0 %v13799_v0  ;;  %11720 = vmatpush3.msra.mxu1 %v2910_v26 }
 0x340   :  { %11683 = vmatpush3.msra.mxu0 %v15430_v48  ;;  %11721 = vmatprep.subr.mxu1 %v13799_v0 }
 0x341   :  { %11684 = vmatprep.subr.mxu0 %v13799_v0  ;;  %11722 = vmatpush3.msra.mxu1 %v2917_v23 }
 0x342   :  { %11685 = vmatpush3.msra.mxu0 %v15440_v20  ;;  %11761 = vmatprep.subr.mxu1 %v13799_v0 }
 0x343   :  { %11686 = vmatprep.subr.mxu0 %v13799_v0 }
 0x344   :  { %11687 = vmatpush3.msra.mxu0 %v15455_v4 }
 0x345   :  { %11726 = vmatprep.subr.mxu0 %v13799_v0 }
 0x39b   :  { %v2286_v28 = vpop.f32.mrf.mxu1 }
 0x39d   :  { %v11515_v62 = vpop.f32.mrf.mxu1 }
 0x3a3   :  { %v2135_v41 = vpop.f32.mrf.mxu0 }
 0x3a4   :  { %v2136_v1 = vadd.f32 %v9369_v54, %v2135_v41 }
 0x3a5   :  { %v11480_v31 = vpop.f32.mrf.mxu0 }
 0x3a6   :  { %v2287_v26 = vadd.f32 %v2286_v28, %v2136_v1 }
 0x3bb   :  { %v2479_v37 = vpop.f32.mrf.mxu1 }
 0x3bd   :  { %v11585_v32 = vpop.f32.mrf.mxu1 }
 0x3be   :  { %v3383_v32 = vld [vmem:[#allocation2 + $0x338] sm:$0xff] }
 0x3c4   :  { %v2390_v56 = vpop.f32.mrf.mxu0 }
 0x3c5   :  { %v2391_v43 = vadd.f32 %v2390_v56, %v2287_v26  ;;  %v15732_v26 = vand.u32 4294901760, %v3383_v32 }
 0x3c6   :  { %v11550_v10 = vpop.f32.mrf.mxu0 }
 0x3c7   :  { %v2480_v23 = vadd.f32 %v2479_v37, %v2391_v43 }
 0x3dd   :  { %v2685_v16 = vpop.f32.mrf.mxu1 }
 0x3df   :  { %v11655_v8 = vpop.f32.mrf.mxu1 }
 0x3e5   :  { %v2598_v58 = vpop.f32.mrf.mxu0 }
 0x3e6   :  { %v2599_v57 = vadd.f32 %v2598_v58, %v2480_v23 }
 0x3e7   :  { %v11620_v60 = vpop.f32.mrf.mxu0 }
 0x3e8   :  { %v2686_v62 = vadd.f32 %v2685_v16, %v2599_v57 }
 0x3ea   :  { %v2689_v46 = vmul.f32 0.01, %v2686_v62 }
 0x3ec   :  { %v2690_v31 = vmax.f32 %v2686_v62, %v2689_v46  ;;  %v3382_v62 = vld [vmem:[#allocation2 + $0x330] sm:$0xff] }
 0x3ee   :  { %v15485_v29 = vand.u32 4294901760, %v2690_v31 }
 0x3f0   :  { %v15488_v10 = vsub.f32 %v2690_v31, %v15485_v29  ;;  %11724 = vmatmul.mubr.f32.vlgmr.msra.gmra.mxu1 %v15485_v29 }
 0x3f1   :  { %11762 = vmatpush3.msra.mxu1 %v15290_v2  ;;  %11793 = vmatprep.mubr.msk.f32.mxu1 %vm13800_vm0, %v13799_v0 }
 0x3f2   :  { %11763 = vmatprep.subr.mxu1 %v13799_v0  ;;  %v2799_v58 = vand.u32 4294901760, %v15488_v10 }
 0x3f3   :  { %11764 = vmatpush3.msra.mxu1 %v15292_v59 }
 0x3f4   :  { %11765 = vmatprep.subr.mxu1 %v13799_v0  ;;  %v2800_v46 = vsub.f32 %v15488_v10, %v2799_v58 }
 0x3f5   :  { %11766 = vmatpush3.msra.mxu1 %v15294_v42 }
 0x3f6   :  { %11767 = vmatprep.subr.mxu1 %v13799_v0  ;;  %v2801_v60 = vand.u32 4294901760, %v2800_v46  ;;  %v15742_v46 = vand.u32 4294901760, %v3382_v62 }
 0x3f7   :  { %11768 = vmatpush3.msra.mxu1 %v15296_v11 }
 0x3f8   :  { %11769 = vmatprep.subr.mxu1 %v13799_v0  ;;  %11689 = vmatmul.mubr.f32.vlgmr.msra.gmra.mxu0 %v2801_v60 }
 0x3f9   :  { %11727 = vmatpush3.msra.mxu0 %v15299_v13  ;;  %11770 = vmatpush3.msra.mxu1 %v15302_v27  ;;  %v19010_v13 = vand.u32 4294901760, %v15421_v38 }
 0x3fa   :  { %11728 = vmatprep.subr.mxu0 %v13799_v0  ;;  %11771 = vmatprep.subr.mxu1 %v13799_v0 }
 0x3fb   :  { %11729 = vmatpush3.msra.mxu0 %v15309_v47  ;;  %11772 = vmatpush3.msra.mxu1 %v15304_v30  ;;  %v19014_v47 = vand.u32 4294901760, %v15465_v15 }
 0x3fc   :  { %11730 = vmatprep.subr.mxu0 %v13799_v0  ;;  %11773 = vmatprep.subr.mxu1 %v13799_v0 }
 0x3fd   :  { %11731 = vmatpush3.msra.mxu0 %v15312_v12  ;;  %11774 = vmatpush3.msra.mxu1 %v15306_v44  ;;  %v3391_v12 = vld [vmem:[#allocation2 + $0x378] sm:$0xff] }
 0x3fe   :  { %11732 = vmatprep.subr.mxu0 %v13799_v0  ;;  %11775 = vmatprep.subr.mxu1 %v13799_v0 }
 0x3ff   :  { %11733 = vmatpush3.msra.mxu0 %v15315_v51  ;;  %11776 = vmatpush3.msra.mxu1 %v15367_v5  ;;  %v3390_v51 = vld [vmem:[#allocation2 + $0x370] sm:$0xff] }
 0x400   :  { %11734 = vmatprep.subr.mxu0 %v13799_v0  ;;  %11777 = vmatprep.subr.mxu1 %v13799_v0 }
 0x401   :  { %11735 = vmatpush3.msra.mxu0 %v15320_v9  ;;  %11778 = vmatpush3.msra.mxu1 %v15375_v36  ;;  %v15654_v9 = vand.u32 4294901760, %v3390_v51 }
 0x402   :  { %11736 = vmatprep.subr.mxu0 %v13799_v0  ;;  %11779 = vmatprep.subr.mxu1 %v13799_v0 }
 0x403   :  { %11737 = vmatpush3.msra.mxu0 %v15324_v18  ;;  %11780 = vmatpush3.msra.mxu1 %v15384_v21 }
 0x404   :  { %11738 = vmatprep.subr.mxu0 %v13799_v0  ;;  %11781 = vmatprep.subr.mxu1 %v13799_v0 }
 0x405   :  { %11739 = vmatpush3.msra.mxu0 %v15336_v40  ;;  %11782 = vmatpush3.msra.mxu1 %v15396_v61 }
 0x406   :  { %11740 = vmatprep.subr.mxu0 %v13799_v0  ;;  %11783 = vmatprep.subr.mxu1 %v13799_v0 }
 0x407   :  { %11741 = vmatpush3.msra.mxu0 %v15373_v53  ;;  %11784 = vmatpush3.msra.mxu1 %v15410_v52 }
 0x408   :  { %11742 = vmatprep.subr.mxu0 %v13799_v0  ;;  %11785 = vmatprep.subr.mxu1 %v13799_v0 }
 0x409   :  { %11743 = vmatpush3.msra.mxu0 %v15382_v33  ;;  %11786 = vmatpush3.msra.mxu1 %v15417_v24 }
 0x40a   :  { %11744 = vmatprep.subr.mxu0 %v13799_v0  ;;  %11787 = vmatprep.subr.mxu1 %v13799_v0 }
 0x40b   :  { %11745 = vmatpush3.msra.mxu0 %v15394_v55  ;;  %11788 = vmatpush3.msra.mxu1 %v15430_v48 }
 0x40c   :  { %11746 = vmatprep.subr.mxu0 %v13799_v0  ;;  %11789 = vmatprep.subr.mxu1 %v13799_v0 }
 0x40d   :  { %11747 = vmatpush3.msra.mxu0 %v15406_v7  ;;  %11790 = vmatpush3.msra.mxu1 %v15440_v20 }
 0x40e   :  { %11748 = vmatprep.subr.mxu0 %v13799_v0  ;;  %11791 = vmatprep.subr.mxu1 %v13799_v0 }
 0x40f   :  { %11749 = vmatpush3.msra.mxu0 %v15421_v38  ;;  %11792 = vmatpush3.msra.mxu1 %v15455_v4 }
 0x410   :  { %11750 = vmatprep.subr.mxu0 %v13799_v0  ;;  %11794 = vmatmul.mubr.f32.vlgmr.msra.gmra.mxu1 %v2799_v58  ;;  %v15740_v58 = vsub.f32 %v3383_v32, %v15732_v26 }
 0x411   :  { %11831 = vmatprep.subr.mxu1 %v13799_v0  ;;  %11751 = vmatpush3.msra.mxu0 %v15428_v45 }
 0x412   :  { %11832 = vmatpush3.msra.mxu1 %v15290_v2  ;;  %11752 = vmatprep.subr.mxu0 %v13799_v0  ;;  %v19006_v2 = vand.u32 4294901760, %v15373_v53 }
 0x413   :  { %11833 = vmatprep.subr.mxu1 %v13799_v0  ;;  %11753 = vmatpush3.msra.mxu0 %v15438_v34 }
 0x414   :  { %11834 = vmatpush3.msra.mxu1 %v15292_v59  ;;  %11754 = vmatprep.subr.mxu0 %v13799_v0  ;;  %v19007_v59 = vand.u32 4294901760, %v15382_v33 }
 0x415   :  { %11835 = vmatprep.subr.mxu1 %v13799_v0  ;;  %11755 = vmatpush3.msra.mxu0 %v15453_v22 }
 0x416   :  { %11836 = vmatpush3.msra.mxu1 %v15294_v42  ;;  %11756 = vmatprep.subr.mxu0 %v13799_v0  ;;  %v19008_v42 = vand.u32 4294901760, %v15394_v55 }
 0x417   :  { %11837 = vmatprep.subr.mxu1 %v13799_v0  ;;  %11757 = vmatpush3.msra.mxu0 %v15465_v15 }
 0x418   :  { %11758 = vmatprep.mubr.msk.f32.mxu0 %vm13800_vm0, %v13799_v0  ;;  %11838 = vmatpush3.msra.mxu1 %v15296_v11  ;;  %v19009_v11 = vand.u32 4294901760, %v15406_v7 }
 0x419   :  { %11759 = vmatmul.mubr.f32.vlgmr.msra.gmra.mxu0 %v15488_v10  ;;  %11796 = vmatprep.subr.mxu0 %v13799_v0 }
 0x41a   :  { %11839 = vmatprep.subr.mxu1 %v13799_v0  ;;  %11797 = vmatpush3.msra.mxu0 %v2810_v19  ;;  %v15652_v19 = vand.u32 4294901760, %v3391_v12 }
 0x41b   :  { %11840 = vmatpush3.msra.mxu1 %v15302_v27  ;;  %11798 = vmatprep.subr.mxu0 %v13799_v0  ;;  %v19011_v27 = vand.u32 4294901760, %v15428_v45 }
 0x41c   :  { %11841 = vmatprep.subr.mxu1 %v13799_v0  ;;  %11799 = vmatpush3.msra.mxu0 %v2817_v49  ;;  %v15657_v18 = vsub.f32 %v3391_v12, %v15652_v19  ;;  %v15660_v49 = vsub.f32 %v3390_v51, %v15654_v9 }
 0x41d   :  { %11842 = vmatpush3.msra.mxu1 %v15304_v30  ;;  %11800 = vmatprep.subr.mxu0 %v13799_v0  ;;  %v19012_v30 = vand.u32 4294901760, %v15438_v34 }
 0x41e   :  { %11843 = vmatprep.subr.mxu1 %v13799_v0  ;;  %11801 = vmatpush3.msra.mxu0 %v2824_v35  ;;  %v3486_v35 = vand.u32 4294901760, %v15657_v18 }
 0x41f   :  { %11844 = vmatpush3.msra.mxu1 %v15306_v44  ;;  %11802 = vmatprep.subr.mxu0 %v13799_v0  ;;  %v19013_v44 = vand.u32 4294901760, %v15453_v22 }
 0x420   :  { %11845 = vmatprep.subr.mxu1 %v13799_v0  ;;  %11803 = vmatpush3.msra.mxu0 %v2831_v39  ;;  %v3493_v39 = vand.u32 4294901760, %v15660_v49 }
 0x421   :  { %11846 = vmatpush3.msra.mxu1 %v15367_v5  ;;  %11804 = vmatprep.subr.mxu0 %v13799_v0  ;;  %v3389_v5 = vld [vmem:[#allocation2 + $0x368] sm:$0xff] }
 0x422   :  { %11847 = vmatprep.subr.mxu1 %v13799_v0  ;;  %11805 = vmatpush3.msra.mxu0 %v2838_v25  ;;  %v3487_v25 = vsub.f32 %v15657_v18, %v3486_v35  ;;  %v3494_v40 = vsub.f32 %v15660_v49, %v3493_v39  ;;  %v15676_v53 = vand.u32 4294901760, %v3389_v5 }
 0x423   :  { %11848 = vmatpush3.msra.mxu1 %v15375_v36  ;;  %11806 = vmatprep.subr.mxu0 %v13799_v0  ;;  %v3388_v36 = vld [vmem:[#allocation2 + $0x360] sm:$0xff] }
 0x424   :  { %11849 = vmatprep.subr.mxu1 %v13799_v0  ;;  %11807 = vmatpush3.msra.mxu0 %v2845_v14  ;;  %v3488_v14 = vand.u32 4294901760, %v3487_v25  ;;  %v15681_v33 = vand.u32 4294901760, %v3388_v36 }
 0x425   :  { %11850 = vmatpush3.msra.mxu1 %v15384_v21  ;;  %11808 = vmatprep.subr.mxu0 %v13799_v0  ;;  %v3387_v21 = vld [vmem:[#allocation2 + $0x358] sm:$0xff] }
 0x426   :  { %11851 = vmatprep.subr.mxu1 %v13799_v0  ;;  %11809 = vmatpush3.msra.mxu0 %v2852_v6  ;;  %v3495_v6 = vand.u32 4294901760, %v3494_v40  ;;  %v15689_v7 = vand.u32 4294901760, %v3387_v21  ;;  %v3379_v40 = vld [vmem:[#allocation2 + $0x318] sm:$0xff] }
 0x427   :  { %11852 = vmatpush3.msra.mxu1 %v15396_v61  ;;  %11810 = vmatprep.subr.mxu0 %v13799_v0  ;;  %v15687_v61 = vsub.f32 %v3388_v36, %v15681_v33  ;;  %v15778_v36 = vand.u32 4294901760, %v3379_v40 }
 0x428   :  { %11853 = vmatprep.subr.mxu1 %v13799_v0  ;;  %11811 = vmatpush3.msra.mxu0 %v19006_v2  ;;  %v15698_v38 = vsub.f32 %v3387_v21, %v15689_v7  ;;  %v3381_v2 = vld [vmem:[#allocation2 + $0x328] sm:$0xff] }
 0x429   :  { %11854 = vmatpush3.msra.mxu1 %v15410_v52  ;;  %11812 = vmatprep.subr.mxu0 %v13799_v0  ;;  %v3386_v52 = vld [vmem:[#allocation2 + $0x350] sm:$0xff] }
 0x42a   :  { %11855 = vmatprep.subr.mxu1 %v13799_v0  ;;  %11813 = vmatpush3.msra.mxu0 %v19007_v59  ;;  %v15700_v45 = vand.u32 4294901760, %v3386_v52 }
 0x42b   :  { %11856 = vmatpush3.msra.mxu1 %v15417_v24  ;;  %11814 = vmatprep.subr.mxu0 %v13799_v0  ;;  %v3507_v24 = vand.u32 4294901760, %v15687_v61 }
 0x42c   :  { %11857 = vmatprep.subr.mxu1 %v13799_v0  ;;  %11815 = vmatpush3.msra.mxu0 %v19008_v42  ;;  %v15709_v8 = vsub.f32 %v3386_v52, %v15700_v45  ;;  %v18955_v42 = vand.u32 4294901760, %v15740_v58  ;;  %v3378_v52 = vld [vmem:[#allocation2 + $0x310] sm:$0xff] }
 0x42d   :  { %11858 = vmatpush3.msra.mxu1 %v15430_v48  ;;  %11816 = vmatprep.subr.mxu0 %v13799_v0  ;;  %v3385_v48 = vld [vmem:[#allocation2 + $0x348] sm:$0xff]  ;;  %v3508_v34 = vsub.f32 %v15687_v61, %v3507_v24 }
 0x42e   :  { %11859 = vmatprep.subr.mxu1 %v13799_v0  ;;  %11817 = vmatpush3.msra.mxu0 %v19009_v11  ;;  %v15712_v22 = vand.u32 4294901760, %v3385_v48  ;;  %v3521_v28 = vand.u32 4294901760, %v15709_v8  ;;  %v15755_v11 = vsub.f32 %v3382_v62, %v15742_v46 }
 0x42f   :  { %11860 = vmatpush3.msra.mxu1 %v15440_v20  ;;  %11818 = vmatprep.subr.mxu0 %v13799_v0  ;;  %v3514_v20 = vand.u32 4294901760, %v15698_v38  ;;  %v3509_v15 = vand.u32 4294901760, %v3508_v34  ;;  %v15792_v34 = vand.u32 4294901760, %v3378_v52 }
 0x430   :  { %11861 = vmatprep.subr.mxu1 %v13799_v0  ;;  %11819 = vmatpush3.msra.mxu0 %v19010_v13  ;;  %v15723_v37 = vsub.f32 %v3385_v48, %v15712_v22  ;;  %v3522_v54 = vsub.f32 %v15709_v8, %v3521_v28  ;;  %v15757_v13 = vand.u32 4294901760, %v3381_v2  ;;  %v18954_v12 = vand.u32 4294901760, %v15755_v11 }
 0x431   :  { %11862 = vmatpush3.msra.mxu1 %v15455_v4  ;;  %11863 = vmatprep.mubr.msk.f32.mxu1 %vm13800_vm0, %v13799_v0  ;;  %v3384_v4 = vld [vmem:[#allocation2 + $0x340] sm:$0xff]  ;;  %v3515_v1 = vsub.f32 %v15698_v38, %v3514_v20 }
 0x432   :  { %11820 = vmatprep.subr.mxu0 %v13799_v0  ;;  %11864 = vmatmul.mubr.f32.vlgmr.msra.gmra.mxu1 %v15485_v29  ;;  %v15719_v41 = vand.u32 4294901760, %v3384_v4  ;;  %v3528_v23 = vand.u32 4294901760, %v15723_v37  ;;  %v3523_v31 = vand.u32 4294901760, %v3522_v54  ;;  %v15767_v51 = vsub.f32 %v3381_v2, %v15757_v13 }
 0x433   :  { %11821 = vmatpush3.msra.mxu0 %v19011_v27  ;;  %11828 = vmatprep.mubr.msk.f32.mxu0 %vm13800_vm0, %v13799_v0  ;;  %v3516_v56 = vand.u32 4294901760, %v3515_v1 }
 0x434   :  { %11822 = vmatprep.subr.mxu0 %v13799_v0  ;;  %11901 = vmatprep.subr.mxu1 %v13799_v0  ;;  %v15730_v16 = vsub.f32 %v3384_v4, %v15719_v41  ;;  %v3529_v60 = vsub.f32 %v15723_v37, %v3528_v23  ;;  %v3377_v4 = vld [vmem:[#allocation2 + $0x308] sm:$0xff] }
 0x435   :  { %11823 = vmatpush3.msra.mxu0 %v19012_v30  ;;  %11933 = vmatprep.mubr.msk.f32.mxu1 %vm13800_vm0, %v13799_v0  ;;  %v3380_v30 = vld [vmem:[#allocation2 + $0x320] sm:$0xff]  ;;  %v15796_v32 = vand.u32 4294901760, %v3377_v4 }
 0x436   :  { %11824 = vmatprep.subr.mxu0 %v13799_v0  ;;  %11902 = vmatpush3.msra.mxu1 %v3488_v14  ;;  %v3535_v10 = vand.u32 4294901760, %v15730_v16  ;;  %v3530_v27 = vand.u32 4294901760, %v3529_v60  ;;  %v15770_v25 = vand.u32 4294901760, %v3380_v30 }
 0x437   :  { %11825 = vmatpush3.msra.mxu0 %v19013_v44  ;;  %11903 = vmatprep.subr.mxu1 %v13799_v0  ;;  %v15811_v2 = vsub.f32 %v3377_v4, %v15796_v32 }
 0x438   :  { %11826 = vmatprep.subr.mxu0 %v13799_v0  ;;  %11904 = vmatpush3.msra.mxu1 %v3495_v6  ;;  %v3536_v59 = vsub.f32 %v15730_v16, %v3535_v10  ;;  %v3550_v6 = vsub.f32 %v15755_v11, %v18954_v12  ;;  %v15782_v21 = vsub.f32 %v3380_v30, %v15770_v25 }
 0x439   :  { %11827 = vmatpush3.msra.mxu0 %v19014_v47  ;;  %11905 = vmatprep.subr.mxu1 %v13799_v0  ;;  %v3543_v47 = vsub.f32 %v15740_v58, %v18955_v42 }
 0x43a   :  { %11829 = vmatmul.mubr.f32.vlgmr.msra.gmra.mxu0 %v15485_v29  ;;  %11866 = vmatprep.subr.mxu0 %v13799_v0  ;;  %v15679_v29 = vsub.f32 %v3389_v5, %v15676_v53  ;;  %v3537_v44 = vand.u32 4294901760, %v3536_v59  ;;  %v18953_v5 = vand.u32 4294901760, %v15767_v51  ;;  %v18952_v1 = vand.u32 4294901760, %v15782_v21 }
 0x43b   :  { %11898 = vmatprep.mubr.msk.f32.mxu0 %vm13800_vm0, %v13799_v0  ;;  %11867 = vmatpush3.msra.mxu0 %v15652_v19  ;;  %v3544_v14 = vand.u32 4294901760, %v3543_v47  ;;  %v18949_v47 = vand.u32 4294901760, %v15811_v2 }
 0x43c   :  { %11868 = vmatprep.subr.mxu0 %v13799_v0  ;;  %v3500_v55 = vand.u32 4294901760, %v15679_v29  ;;  %v3557_v48 = vsub.f32 %v15767_v51, %v18953_v5  ;;  %v3564_v60 = vsub.f32 %v15782_v21, %v18952_v1 }
 0x43d   :  { %11869 = vmatpush3.msra.mxu0 %v15654_v9 }
 0x43e   :  { %11870 = vmatprep.subr.mxu0 %v13799_v0  ;;  %v3501_v57 = vsub.f32 %v15679_v29, %v3500_v55  ;;  %v3558_v54 = vand.u32 4294901760, %v3557_v48 }
 0x43f   :  { %11871 = vmatpush3.msra.mxu0 %v15676_v53 }
 0x440   :  { %11872 = vmatprep.subr.mxu0 %v13799_v0  ;;  %v3502_v43 = vand.u32 4294901760, %v3501_v57  ;;  %v3551_v57 = vand.u32 4294901760, %v3550_v6 }
 0x441   :  { %11873 = vmatpush3.msra.mxu0 %v15681_v33 }
 0x442   :  { %11874 = vmatprep.subr.mxu0 %v13799_v0  ;;  %11906 = vmatpush3.msra.mxu1 %v3502_v43  ;;  %v15790_v43 = vsub.f32 %v3379_v40, %v15778_v36 }
 0x443   :  { %11875 = vmatpush3.msra.mxu0 %v15689_v7  ;;  %11907 = vmatprep.subr.mxu1 %v13799_v0 }
 0x444   :  { %11876 = vmatprep.subr.mxu0 %v13799_v0  ;;  %11908 = vmatpush3.msra.mxu1 %v3509_v15  ;;  %v3376_v15 = vld [vmem:[#allocation2 + $0x300] sm:$0xff]  ;;  %v18951_v62 = vand.u32 4294901760, %v15790_v43 }
 0x445   :  { %11877 = vmatpush3.msra.mxu0 %v15700_v45  ;;  %11909 = vmatprep.subr.mxu1 %v13799_v0 }
 0x446   :  { %11878 = vmatprep.subr.mxu0 %v13799_v0  ;;  %11910 = vmatpush3.msra.mxu1 %v3516_v56  ;;  %v15798_v56 = vand.u32 4294901760, %v3376_v15 }
 0x447   :  { %11879 = vmatpush3.msra.mxu0 %v15712_v22  ;;  %11911 = vmatprep.subr.mxu1 %v13799_v0 }
 0x448   :  { %11880 = vmatprep.subr.mxu0 %v13799_v0  ;;  %11912 = vmatpush3.msra.mxu1 %v3523_v31  ;;  %v15804_v31 = vsub.f32 %v3378_v52, %v15792_v34  ;;  %v15814_v59 = vsub.f32 %v3376_v15, %v15798_v56  ;;  %v3585_v52 = vsub.f32 %v15811_v2, %v18949_v47 }
 0x449   :  { %11881 = vmatpush3.msra.mxu0 %v15719_v41  ;;  %11913 = vmatprep.subr.mxu1 %v13799_v0 }
 0x44a   :  { %11882 = vmatprep.subr.mxu0 %v13799_v0  ;;  %11914 = vmatpush3.msra.mxu1 %v3530_v27  ;;  %v3571_v27 = vsub.f32 %v15790_v43, %v18951_v62  ;;  %v18950_v30 = vand.u32 4294901760, %v15804_v31  ;;  %v18948_v40 = vand.u32 4294901760, %v15814_v59  ;;  %v3586_v4 = vand.u32 4294901760, %v3585_v52 }
 0x44b   :  { %11883 = vmatpush3.msra.mxu0 %v15732_v26  ;;  %11915 = vmatprep.subr.mxu1 %v13799_v0 }
 0x44c   :  { %11884 = vmatprep.subr.mxu0 %v13799_v0  ;;  %11916 = vmatpush3.msra.mxu1 %v3537_v44  ;;  %v3565_v44 = vand.u32 4294901760, %v3564_v60  ;;  %v3578_v6 = vsub.f32 %v15804_v31, %v18950_v30 }
 0x44d   :  { %11885 = vmatpush3.msra.mxu0 %v15742_v46  ;;  %11917 = vmatprep.subr.mxu1 %v13799_v0 }
 0x44e   :  { %11886 = vmatprep.subr.mxu0 %v13799_v0  ;;  %11918 = vmatpush3.msra.mxu1 %v3544_v14  ;;  %v3572_v14 = vand.u32 4294901760, %v3571_v27  ;;  %v3579_v48 = vand.u32 4294901760, %v3578_v6 }
 0x44f   :  { %11887 = vmatpush3.msra.mxu0 %v15757_v13  ;;  %11919 = vmatprep.subr.mxu1 %v13799_v0 }
 0x450   :  { %11888 = vmatprep.subr.mxu0 %v13799_v0  ;;  %11920 = vmatpush3.msra.mxu1 %v3551_v57  ;;  %v3592_v57 = vsub.f32 %v15814_v59, %v18948_v40 }
 0x451   :  { %11889 = vmatpush3.msra.mxu0 %v15770_v25  ;;  %11921 = vmatprep.subr.mxu1 %v13799_v0 }
 0x452   :  { %11890 = vmatprep.subr.mxu0 %v13799_v0  ;;  %11922 = vmatpush3.msra.mxu1 %v3558_v54  ;;  %v3593_v15 = vand.u32 4294901760, %v3592_v57  ;;  %v9371_v57 = vld [vmem:[%s18925_s2 + $0x3] ss:$0 sm:$0xff] }
 0x453   :  { %11891 = vmatpush3.msra.mxu0 %v15778_v36  ;;  %11923 = vmatprep.subr.mxu1 %v13799_v0 }
 0x454   :  { %11892 = vmatprep.subr.mxu0 %v13799_v0  ;;  %11924 = vmatpush3.msra.mxu1 %v3565_v44 }
 0x455   :  { %11893 = vmatpush3.msra.mxu0 %v15792_v34  ;;  %11925 = vmatprep.subr.mxu1 %v13799_v0 }
 0x456   :  { %11894 = vmatprep.subr.mxu0 %v13799_v0  ;;  %11926 = vmatpush3.msra.mxu1 %v3572_v14 }
 0x457   :  { %11895 = vmatpush3.msra.mxu0 %v15796_v32  ;;  %11927 = vmatprep.subr.mxu1 %v13799_v0 }
 0x458   :  { %11896 = vmatprep.subr.mxu0 %v13799_v0  ;;  %11928 = vmatpush3.msra.mxu1 %v3579_v48 }
 0x459   :  { %11897 = vmatpush3.msra.mxu0 %v15798_v56  ;;  %11929 = vmatprep.subr.mxu1 %v13799_v0 }
 0x45a   :  { %11936 = vmatprep.subr.mxu0 %v13799_v0  ;;  %11930 = vmatpush3.msra.mxu1 %v3586_v4 }
 0x45b   :  { %11931 = vmatprep.subr.mxu1 %v13799_v0 }
 0x45c   :  { %11932 = vmatpush3.msra.mxu1 %v3593_v15 }
 0x45d   :  { %11971 = vmatprep.subr.mxu1 %v13799_v0 }
 0x4b0   :  { %v2954_v54 = vpop.f32.mrf.mxu1 }
 0x4b2   :  { %v11725_v60 = vpop.f32.mrf.mxu1 }
 0x4b8   :  { %v2803_v27 = vpop.f32.mrf.mxu0 }
 0x4b9   :  { %v2804_v48 = vadd.f32 %v9371_v57, %v2803_v27 }
 0x4ba   :  { %v11690_v44 = vpop.f32.mrf.mxu0 }
 0x4bb   :  { %v2955_v4 = vadd.f32 %v2954_v54, %v2804_v48  ;;  %v3365_v54 = vld [vmem:[#allocation2 + $0x2b0] sm:$0xff] }
 0x4bc   :  { %v16057_v48 = vand.u32 4294901760, %v3365_v54 }
 0x4d0   :  { %v3147_v6 = vpop.f32.mrf.mxu1 }
 0x4d2   :  { %v11795_v40 = vpop.f32.mrf.mxu1 }
 0x4d9   :  { %v3058_v14 = vpop.f32.mrf.mxu0 }
 0x4da   :  { %v3059_v62 = vadd.f32 %v3058_v14, %v2955_v4 }
 0x4db   :  { %v11760_v52 = vpop.f32.mrf.mxu0 }
 0x4dc   :  { %v3148_v15 = vadd.f32 %v3147_v6, %v3059_v62  ;;  %v19019_v52 = vand.u32 4294901760, %v15790_v43 }
 0x4f2   :  { %v3353_v47 = vpop.f32.mrf.mxu1 }
 0x4f4   :  { %v11865_v30 = vpop.f32.mrf.mxu1 }
 0x4fa   :  { %v3266_v1 = vpop.f32.mrf.mxu0 }
 0x4fb   :  { %v3267_v5 = vadd.f32 %v3266_v1, %v3148_v15 }
 0x4fc   :  { %v11830_v12 = vpop.f32.mrf.mxu0 }
 0x4fd   :  { %v3354_v60 = vadd.f32 %v3353_v47, %v3267_v5 }
 0x4ff   :  { %13765 = vtanh.f32 %v3354_v60  ;;  %v3363_v60 = vld [vmem:[#allocation2 + $0x2a0] sm:$0xff] }
 0x50c   :  { %v13766_v44 = vpop.eup %13765 }
 0x50d   :  { %v15847_v42 = vand.u32 4294901760, %v13766_v44 }
 0x50f   :  { %11934 = vmatmul.mubr.f32.vlgmr.msra.gmra.mxu1 %v15847_v42  ;;  %v15851_v40 = vsub.f32 %v13766_v44, %v15847_v42  ;;  %v19020_v44 = vand.u32 4294901760, %v15804_v31 }
 0x510   :  { %11972 = vmatpush3.msra.mxu1 %v15652_v19  ;;  %12003 = vmatprep.mubr.msk.f32.mxu1 %vm13800_vm0, %v13799_v0 }
 0x511   :  { %11973 = vmatprep.subr.mxu1 %v13799_v0  ;;  %v3475_v1 = vand.u32 4294901760, %v15851_v40 }
 0x512   :  { %11974 = vmatpush3.msra.mxu1 %v15654_v9 }
 0x513   :  { %11975 = vmatprep.subr.mxu1 %v13799_v0  ;;  %v3476_v12 = vsub.f32 %v15851_v40, %v3475_v1 }
 0x514   :  { %11976 = vmatpush3.msra.mxu1 %v15676_v53 }
 0x515   :  { %11977 = vmatprep.subr.mxu1 %v13799_v0  ;;  %v3477_v5 = vand.u32 4294901760, %v3476_v12 }
 0x516   :  { %11978 = vmatpush3.msra.mxu1 %v15681_v33 }
 0x517   :  { %11979 = vmatprep.subr.mxu1 %v13799_v0  ;;  %11899 = vmatmul.mubr.f32.vlgmr.msra.gmra.mxu0 %v3477_v5 }
 0x518   :  { %11937 = vmatpush3.msra.mxu0 %v15657_v18  ;;  %11980 = vmatpush3.msra.mxu1 %v15689_v7 }
 0x519   :  { %11938 = vmatprep.subr.mxu0 %v13799_v0  ;;  %11981 = vmatprep.subr.mxu1 %v13799_v0 }
 0x51a   :  { %11939 = vmatpush3.msra.mxu0 %v15660_v49  ;;  %11982 = vmatpush3.msra.mxu1 %v15700_v45  ;;  %v3372_v49 = vld [vmem:[#allocation2 + $0x2e8] sm:$0xff] }
 0x51b   :  { %11940 = vmatprep.subr.mxu0 %v13799_v0  ;;  %11983 = vmatprep.subr.mxu1 %v13799_v0 }
 0x51c   :  { %11941 = vmatpush3.msra.mxu0 %v15679_v29  ;;  %11984 = vmatpush3.msra.mxu1 %v15712_v22  ;;  %v15966_v29 = vand.u32 4294901760, %v3372_v49 }
 0x51d   :  { %11942 = vmatprep.subr.mxu0 %v13799_v0  ;;  %11985 = vmatprep.subr.mxu1 %v13799_v0 }
 0x51e   :  { %11943 = vmatpush3.msra.mxu0 %v15687_v61  ;;  %11986 = vmatpush3.msra.mxu1 %v15719_v41  ;;  %v3370_v61 = vld [vmem:[#allocation2 + $0x2d8] sm:$0xff] }
 0x51f   :  { %11944 = vmatprep.subr.mxu0 %v13799_v0  ;;  %11987 = vmatprep.subr.mxu1 %v13799_v0 }
 0x520   :  { %11945 = vmatpush3.msra.mxu0 %v15698_v38  ;;  %11988 = vmatpush3.msra.mxu1 %v15732_v26  ;;  %v3369_v38 = vld [vmem:[#allocation2 + $0x2d0] sm:$0xff] }
 0x521   :  { %11946 = vmatprep.subr.mxu0 %v13799_v0  ;;  %11989 = vmatprep.subr.mxu1 %v13799_v0 }
 0x522   :  { %11947 = vmatpush3.msra.mxu0 %v15709_v8  ;;  %11990 = vmatpush3.msra.mxu1 %v15742_v46  ;;  %v19015_v8 = vand.u32 4294901760, %v15740_v58 }
 0x523   :  { %11948 = vmatprep.subr.mxu0 %v13799_v0  ;;  %11991 = vmatprep.subr.mxu1 %v13799_v0 }
 0x524   :  { %11949 = vmatpush3.msra.mxu0 %v15723_v37  ;;  %11992 = vmatpush3.msra.mxu1 %v15757_v13  ;;  %v3367_v37 = vld [vmem:[#allocation2 + $0x2c0] sm:$0xff] }
 0x525   :  { %11950 = vmatprep.subr.mxu0 %v13799_v0  ;;  %11993 = vmatprep.subr.mxu1 %v13799_v0 }
 0x526   :  { %11951 = vmatpush3.msra.mxu0 %v15730_v16  ;;  %11994 = vmatpush3.msra.mxu1 %v15770_v25  ;;  %v19016_v16 = vand.u32 4294901760, %v15755_v11 }
 0x527   :  { %11952 = vmatprep.subr.mxu0 %v13799_v0  ;;  %11995 = vmatprep.subr.mxu1 %v13799_v0 }
 0x528   :  { %11953 = vmatpush3.msra.mxu0 %v15740_v58  ;;  %11996 = vmatpush3.msra.mxu1 %v15778_v36 }
 0x529   :  { %11954 = vmatprep.subr.mxu0 %v13799_v0  ;;  %11997 = vmatprep.subr.mxu1 %v13799_v0 }
 0x52a   :  { %11955 = vmatpush3.msra.mxu0 %v15755_v11  ;;  %11998 = vmatpush3.msra.mxu1 %v15792_v34 }
 0x52b   :  { %11956 = vmatprep.subr.mxu0 %v13799_v0  ;;  %11999 = vmatprep.subr.mxu1 %v13799_v0 }
 0x52c   :  { %11957 = vmatpush3.msra.mxu0 %v15767_v51  ;;  %12000 = vmatpush3.msra.mxu1 %v15796_v32 }
 0x52d   :  { %11958 = vmatprep.subr.mxu0 %v13799_v0  ;;  %12001 = vmatprep.subr.mxu1 %v13799_v0 }
 0x52e   :  { %11959 = vmatpush3.msra.mxu0 %v15782_v21  ;;  %12002 = vmatpush3.msra.mxu1 %v15798_v56 }
 0x52f   :  { %11960 = vmatprep.subr.mxu0 %v13799_v0  ;;  %12004 = vmatmul.mubr.f32.vlgmr.msra.gmra.mxu1 %v3475_v1 }
 0x530   :  { %12041 = vmatprep.subr.mxu1 %v13799_v0  ;;  %11961 = vmatpush3.msra.mxu0 %v15790_v43 }
 0x531   :  { %12042 = vmatpush3.msra.mxu1 %v15652_v19  ;;  %11962 = vmatprep.subr.mxu0 %v13799_v0  ;;  %v3374_v19 = vld [vmem:[#allocation2 + $0x2f8] sm:$0xff] }
 0x532   :  { %12043 = vmatprep.subr.mxu1 %v13799_v0  ;;  %11963 = vmatpush3.msra.mxu0 %v15804_v31  ;;  %v15949_v18 = vand.u32 4294901760, %v3374_v19  ;;  %v19021_v31 = vand.u32 4294901760, %v15811_v2 }
 0x533   :  { %12044 = vmatpush3.msra.mxu1 %v15654_v9  ;;  %11964 = vmatprep.subr.mxu0 %v13799_v0  ;;  %v3373_v9 = vld [vmem:[#allocation2 + $0x2f0] sm:$0xff] }
 0x534   :  { %12045 = vmatprep.subr.mxu1 %v13799_v0  ;;  %11965 = vmatpush3.msra.mxu0 %v15811_v2  ;;  %v19022_v2 = vand.u32 4294901760, %v15814_v59 }
 0x535   :  { %12046 = vmatpush3.msra.mxu1 %v15676_v53  ;;  %11966 = vmatprep.subr.mxu0 %v13799_v0  ;;  %v15964_v53 = vsub.f32 %v3374_v19, %v15949_v18  ;;  %v3362_v19 = vld [vmem:[#allocation2 + $0x298] sm:$0xff] }
 0x536   :  { %12047 = vmatprep.subr.mxu1 %v13799_v0  ;;  %11967 = vmatpush3.msra.mxu0 %v15814_v59 }
 0x537   :  { %11968 = vmatprep.mubr.msk.f32.mxu0 %vm13800_vm0, %v13799_v0  ;;  %12048 = vmatpush3.msra.mxu1 %v15681_v33 }
 0x538   :  { %11969 = vmatmul.mubr.f32.vlgmr.msra.gmra.mxu0 %v15851_v40  ;;  %12006 = vmatprep.subr.mxu0 %v13799_v0 }
 0x539   :  { %12049 = vmatprep.subr.mxu1 %v13799_v0  ;;  %12007 = vmatpush3.msra.mxu0 %v3486_v35  ;;  %v15956_v35 = vand.u32 4294901760, %v3373_v9 }
 0x53a   :  { %12050 = vmatpush3.msra.mxu1 %v15689_v7  ;;  %12008 = vmatprep.subr.mxu0 %v13799_v0  ;;  %v4127_v7 = vand.u32 4294901760, %v15964_v53 }
 0x53b   :  { %12051 = vmatprep.subr.mxu1 %v13799_v0  ;;  %12009 = vmatpush3.msra.mxu0 %v3493_v39  ;;  %v3371_v39 = vld [vmem:[#allocation2 + $0x2e0] sm:$0xff]  ;;  %v15974_v33 = vsub.f32 %v3373_v9, %v15956_v35 }
 0x53c   :  { %12052 = vmatpush3.msra.mxu1 %v15700_v45  ;;  %12010 = vmatprep.subr.mxu0 %v13799_v0  ;;  %v15989_v45 = vand.u32 4294901760, %v3370_v61 }
 0x53d   :  { %12053 = vmatprep.subr.mxu1 %v13799_v0  ;;  %12011 = vmatpush3.msra.mxu0 %v3500_v55  ;;  %v15976_v55 = vand.u32 4294901760, %v3371_v39 }
 0x53e   :  { %12054 = vmatpush3.msra.mxu1 %v15712_v22  ;;  %12012 = vmatprep.subr.mxu0 %v13799_v0  ;;  %v4134_v22 = vand.u32 4294901760, %v15974_v33  ;;  %v16014_v58 = vsub.f32 %v3370_v61, %v15989_v45 }
 0x53f   :  { %12055 = vmatprep.subr.mxu1 %v13799_v0  ;;  %12013 = vmatpush3.msra.mxu0 %v3507_v24  ;;  %v15985_v24 = vsub.f32 %v3372_v49, %v15966_v29  ;;  %v16081_v49 = vsub.f32 %v3365_v54, %v16057_v48 }
 0x540   :  { %12056 = vmatpush3.msra.mxu1 %v15719_v41  ;;  %12014 = vmatprep.subr.mxu0 %v13799_v0  ;;  %v16000_v41 = vand.u32 4294901760, %v3369_v38  ;;  %v4135_v11 = vsub.f32 %v15974_v33, %v4134_v22 }
 0x541   :  { %12057 = vmatprep.subr.mxu1 %v13799_v0  ;;  %12015 = vmatpush3.msra.mxu0 %v3514_v20  ;;  %v3368_v20 = vld [vmem:[#allocation2 + $0x2c8] sm:$0xff] }
 0x542   :  { %12058 = vmatpush3.msra.mxu1 %v15732_v26  ;;  %12016 = vmatprep.subr.mxu0 %v13799_v0  ;;  %v4128_v26 = vsub.f32 %v15964_v53, %v4127_v7 }
 0x543   :  { %12059 = vmatprep.subr.mxu1 %v13799_v0  ;;  %12017 = vmatpush3.msra.mxu0 %v3521_v28  ;;  %v15996_v28 = vsub.f32 %v3371_v39, %v15976_v55  ;;  %v16083_v39 = vand.u32 4294901760, %v3363_v60 }
 0x544   :  { %12060 = vmatpush3.msra.mxu1 %v15742_v46  ;;  %12018 = vmatprep.subr.mxu0 %v13799_v0  ;;  %v19017_v46 = vand.u32 4294901760, %v15767_v51  ;;  %v19018_v51 = vand.u32 4294901760, %v15782_v21  ;;  %v4129_v62 = vand.u32 4294901760, %v4128_v26  ;;  %v4136_v21 = vand.u32 4294901760, %v4135_v11 }
 0x545   :  { %12061 = vmatprep.subr.mxu1 %v13799_v0  ;;  %12019 = vmatpush3.msra.mxu0 %v3528_v23  ;;  %v4141_v23 = vand.u32 4294901760, %v15985_v24  ;;  %v4190_v11 = vand.u32 4294901760, %v16081_v49 }
 0x546   :  { %12062 = vmatpush3.msra.mxu1 %v15757_v13  ;;  %12020 = vmatprep.subr.mxu0 %v13799_v0  ;;  %v4148_v13 = vand.u32 4294901760, %v15996_v28 }
 0x547   :  { %12063 = vmatprep.subr.mxu1 %v13799_v0  ;;  %12021 = vmatpush3.msra.mxu0 %v3535_v10  ;;  %v16009_v10 = vand.u32 4294901760, %v3368_v20  ;;  %v4142_v30 = vsub.f32 %v15985_v24, %v4141_v23 }
 0x548   :  { %12064 = vmatpush3.msra.mxu1 %v15770_v25  ;;  %12022 = vmatprep.subr.mxu0 %v13799_v0  ;;  %v16023_v25 = vand.u32 4294901760, %v3367_v37  ;;  %v4149_v6 = vsub.f32 %v15996_v28, %v4148_v13 }
 0x549   :  { %12065 = vmatprep.subr.mxu1 %v13799_v0  ;;  %12023 = vmatpush3.msra.mxu0 %v19015_v8  ;;  %v16037_v47 = vsub.f32 %v3368_v20, %v16009_v10  ;;  %v4143_v4 = vand.u32 4294901760, %v4142_v30  ;;  %v3359_v30 = vld [vmem:[#allocation2 + $0x280] sm:$0xff] }
 0x54a   :  { %12066 = vmatpush3.msra.mxu1 %v15778_v36  ;;  %12024 = vmatprep.subr.mxu0 %v13799_v0  ;;  %v3366_v36 = vld [vmem:[#allocation2 + $0x2b8] sm:$0xff]  ;;  %v16051_v14 = vsub.f32 %v3367_v37, %v16023_v25  ;;  %v4150_v12 = vand.u32 4294901760, %v4149_v6 }
 0x54b   :  { %12067 = vmatprep.subr.mxu1 %v13799_v0  ;;  %12025 = vmatpush3.msra.mxu0 %v19016_v16  ;;  %v16043_v27 = vand.u32 4294901760, %v3366_v36  ;;  %v4169_v15 = vand.u32 4294901760, %v16037_v47  ;;  %v16096_v16 = vand.u32 4294901760, %v3362_v19 }
 0x54c   :  { %12068 = vmatpush3.msra.mxu1 %v15792_v34  ;;  %12026 = vmatprep.subr.mxu0 %v13799_v0  ;;  %v16028_v34 = vsub.f32 %v3369_v38, %v16000_v41  ;;  %v4176_v5 = vand.u32 4294901760, %v16051_v14  ;;  %v3361_v38 = vld [vmem:[#allocation2 + $0x290] sm:$0xff] }
 0x54d   :  { %12069 = vmatprep.subr.mxu1 %v13799_v0  ;;  %12027 = vmatpush3.msra.mxu0 %v19017_v46  ;;  %v16068_v40 = vsub.f32 %v3366_v36, %v16043_v27  ;;  %v4170_v61 = vsub.f32 %v16037_v47, %v4169_v15  ;;  %v3360_v46 = vld [vmem:[#allocation2 + $0x288] sm:$0xff]  ;;  %v16107_v36 = vsub.f32 %v3363_v60, %v16083_v39 }
 0x54e   :  { %12070 = vmatpush3.msra.mxu1 %v15796_v32  ;;  %12028 = vmatprep.subr.mxu0 %v13799_v0  ;;  %v4155_v32 = vand.u32 4294901760, %v16014_v58  ;;  %v4162_v57 = vand.u32 4294901760, %v16028_v34  ;;  %v4177_v26 = vsub.f32 %v16051_v14, %v4176_v5  ;;  %v16121_v6 = vand.u32 4294901760, %v3360_v46 }
 0x54f   :  { %12071 = vmatprep.subr.mxu1 %v13799_v0  ;;  %12029 = vmatpush3.msra.mxu0 %v19018_v51  ;;  %v4183_v8 = vand.u32 4294901760, %v16068_v40  ;;  %v16109_v51 = vand.u32 4294901760, %v3361_v38 }
 0x550   :  { %12072 = vmatpush3.msra.mxu1 %v15798_v56  ;;  %12073 = vmatprep.mubr.msk.f32.mxu1 %vm13800_vm0, %v13799_v0  ;;  %v3364_v56 = vld [vmem:[#allocation2 + $0x2a8] sm:$0xff]  ;;  %v4156_v43 = vsub.f32 %v16014_v58, %v4155_v32  ;;  %v4163_v9 = vsub.f32 %v16028_v34, %v4162_v57 }
 0x551   :  { %12030 = vmatprep.subr.mxu0 %v13799_v0  ;;  %12074 = vmatmul.mubr.f32.vlgmr.msra.gmra.mxu1 %v15847_v42  ;;  %v16070_v1 = vand.u32 4294901760, %v3364_v56  ;;  %v16131_v60 = vsub.f32 %v3361_v38, %v16109_v51 }
 0x552   :  { %12111 = vmatprep.subr.mxu1 %v13799_v0  ;;  %12031 = vmatpush3.msra.mxu0 %v19019_v52  ;;  %v4157_v20 = vand.u32 4294901760, %v4156_v43  ;;  %v4164_v59 = vand.u32 4294901760, %v4163_v9  ;;  %v4191_v52 = vsub.f32 %v16081_v49, %v4190_v11 }
 0x553   :  { %12112 = vmatpush3.msra.mxu1 %v4129_v62  ;;  %12032 = vmatprep.subr.mxu0 %v13799_v0  ;;  %v16094_v37 = vsub.f32 %v3364_v56, %v16070_v1  ;;  %v4171_v62 = vand.u32 4294901760, %v4170_v61  ;;  %v4178_v56 = vand.u32 4294901760, %v4177_v26  ;;  %v4218_v38 = vand.u32 4294901760, %v16131_v60 }
 0x554   :  { %12113 = vmatprep.subr.mxu1 %v13799_v0  ;;  %12033 = vmatpush3.msra.mxu0 %v19020_v44  ;;  %v16133_v44 = vand.u32 4294901760, %v3359_v30  ;;  %v4192_v9 = vand.u32 4294901760, %v4191_v52 }
 0x555   :  { %12114 = vmatpush3.msra.mxu1 %v4136_v21  ;;  %12034 = vmatprep.subr.mxu0 %v13799_v0  ;;  %v4197_v54 = vand.u32 4294901760, %v16094_v37  ;;  %v16119_v21 = vsub.f32 %v3362_v19, %v16096_v16 }
 0x556   :  { %12115 = vmatprep.subr.mxu1 %v13799_v0  ;;  %12035 = vmatpush3.msra.mxu0 %v19021_v31  ;;  %v16143_v31 = vsub.f32 %v3360_v46, %v16121_v6 }
 0x557   :  { %12116 = vmatpush3.msra.mxu1 %v4143_v4  ;;  %12036 = vmatprep.subr.mxu0 %v13799_v0  ;;  %v4204_v4 = vand.u32 4294901760, %v16107_v36  ;;  %v4211_v19 = vand.u32 4294901760, %v16119_v21 }
 0x558   :  { %12117 = vmatprep.subr.mxu1 %v13799_v0  ;;  %12037 = vmatpush3.msra.mxu0 %v19022_v2  ;;  %v16153_v2 = vsub.f32 %v3359_v30, %v16133_v44  ;;  %v4225_v46 = vand.u32 4294901760, %v16143_v31 }
 0x559   :  { %12038 = vmatprep.mubr.msk.f32.mxu0 %vm13800_vm0, %v13799_v0  ;;  %12118 = vmatpush3.msra.mxu1 %v4150_v12  ;;  %v4198_v12 = vsub.f32 %v16094_v37, %v4197_v54  ;;  %v4205_v61 = vsub.f32 %v16107_v36, %v4204_v4  ;;  %v4212_v26 = vsub.f32 %v16119_v21, %v4211_v19 }
 0x55a   :  { %12039 = vmatmul.mubr.f32.vlgmr.msra.gmra.mxu0 %v15847_v42  ;;  %12076 = vmatprep.subr.mxu0 %v13799_v0  ;;  %v4184_v42 = vsub.f32 %v16068_v40, %v4183_v8  ;;  %v4232_v30 = vand.u32 4294901760, %v16153_v2 }
 0x55b   :  { %12119 = vmatprep.subr.mxu1 %v13799_v0  ;;  %12077 = vmatpush3.msra.mxu0 %v15949_v18 }
 0x55c   :  { %12120 = vmatpush3.msra.mxu1 %v4157_v20  ;;  %12078 = vmatprep.subr.mxu0 %v13799_v0  ;;  %v4185_v43 = vand.u32 4294901760, %v4184_v42  ;;  %v4199_v20 = vand.u32 4294901760, %v4198_v12  ;;  %v4213_v42 = vand.u32 4294901760, %v4212_v26 }
 0x55d   :  { %12121 = vmatprep.subr.mxu1 %v13799_v0  ;;  %12079 = vmatpush3.msra.mxu0 %v15956_v35 }
 0x55e   :  { %12122 = vmatpush3.msra.mxu1 %v4164_v59  ;;  %12080 = vmatprep.subr.mxu0 %v13799_v0  ;;  %v4206_v59 = vand.u32 4294901760, %v4205_v61  ;;  %v4701_v61 = vld [vmem:[#allocation2 + $0x3b8] sm:$0xff] }
 0x55f   :  { %12123 = vmatprep.subr.mxu1 %v13799_v0  ;;  %12081 = vmatpush3.msra.mxu0 %v15966_v29 }
 0x560   :  { %12124 = vmatpush3.msra.mxu1 %v4171_v62  ;;  %12082 = vmatprep.subr.mxu0 %v13799_v0  ;;  %v4219_v62 = vsub.f32 %v16131_v60, %v4218_v38 }
 0x561   :  { %12125 = vmatprep.subr.mxu1 %v13799_v0  ;;  %12083 = vmatpush3.msra.mxu0 %v15976_v55 }
 0x562   :  { %12126 = vmatpush3.msra.mxu1 %v4178_v56  ;;  %12084 = vmatprep.subr.mxu0 %v13799_v0  ;;  %v4226_v56 = vsub.f32 %v16143_v31, %v4225_v46  ;;  %v4220_v52 = vand.u32 4294901760, %v4219_v62 }
 0x563   :  { %12127 = vmatprep.subr.mxu1 %v13799_v0  ;;  %12085 = vmatpush3.msra.mxu0 %v15989_v45 }
 0x564   :  { %12128 = vmatpush3.msra.mxu1 %v4185_v43  ;;  %12086 = vmatprep.subr.mxu0 %v13799_v0  ;;  %v4233_v43 = vsub.f32 %v16153_v2, %v4232_v30  ;;  %v4227_v12 = vand.u32 4294901760, %v4226_v56  ;;  %v4699_v56 = vld [vmem:[#allocation2 + $0x3a8] sm:$0xff] }
 0x565   :  { %12129 = vmatprep.subr.mxu1 %v13799_v0  ;;  %12087 = vmatpush3.msra.mxu0 %v16000_v41 }
 0x566   :  { %12130 = vmatpush3.msra.mxu1 %v4192_v9  ;;  %12088 = vmatprep.subr.mxu0 %v13799_v0  ;;  %v4234_v9 = vand.u32 4294901760, %v4233_v43 }
 0x567   :  { %12131 = vmatprep.subr.mxu1 %v13799_v0  ;;  %12089 = vmatpush3.msra.mxu0 %v16009_v10 }
 0x568   :  { %12132 = vmatpush3.msra.mxu1 %v4199_v20  ;;  %12090 = vmatprep.subr.mxu0 %v13799_v0  ;;  %v16455_v20 = vand.u32 4294901760, %v4701_v61 }
 0x569   :  { %12133 = vmatprep.subr.mxu1 %v13799_v0  ;;  %12091 = vmatpush3.msra.mxu0 %v16023_v25 }
 0x56a   :  { %12134 = vmatpush3.msra.mxu1 %v4206_v59  ;;  %12092 = vmatprep.subr.mxu0 %v13799_v0 }
 0x56b   :  { %12135 = vmatprep.subr.mxu1 %v13799_v0  ;;  %12093 = vmatpush3.msra.mxu0 %v16043_v27 }
 0x56c   :  { %12136 = vmatpush3.msra.mxu1 %v4213_v42  ;;  %12094 = vmatprep.subr.mxu0 %v13799_v0 }
 0x56d   :  { %12137 = vmatprep.subr.mxu1 %v13799_v0  ;;  %12095 = vmatpush3.msra.mxu0 %v16057_v48 }
 0x56e   :  { %12138 = vmatpush3.msra.mxu1 %v4220_v52  ;;  %12096 = vmatprep.subr.mxu0 %v13799_v0 }
 0x56f   :  { %12139 = vmatprep.subr.mxu1 %v13799_v0  ;;  %12097 = vmatpush3.msra.mxu0 %v16070_v1 }
 0x570   :  { %12140 = vmatpush3.msra.mxu1 %v4227_v12  ;;  %12098 = vmatprep.subr.mxu0 %v13799_v0 }
 0x571   :  { %12141 = vmatprep.subr.mxu1 %v13799_v0  ;;  %12099 = vmatpush3.msra.mxu0 %v16083_v39 }
 0x572   :  { %12142 = vmatpush3.msra.mxu1 %v4234_v9  ;;  %12143 = vmatprep.mubr.msk.f32.mxu1 %vm13800_vm0, %v13799_v0  ;;  %v16476_v9 = vand.u32 4294901760, %v4699_v56 }
 0x573   :  { %12100 = vmatprep.subr.mxu0 %v13799_v0  ;;  %12144 = vmatmul.mubr.f32.vlgmr.msra.gmra.mxu1 %v15116_v3 }
 0x574   :  { %12181 = vmatprep.subr.mxu1 %v13799_v0  ;;  %12101 = vmatpush3.msra.mxu0 %v16096_v16 }
 0x575   :  { %12182 = vmatpush3.msra.mxu1 %v15949_v18  ;;  %12102 = vmatprep.subr.mxu0 %v13799_v0 }
 0x576   :  { %12183 = vmatprep.subr.mxu1 %v13799_v0  ;;  %12103 = vmatpush3.msra.mxu0 %v16109_v51 }
 0x577   :  { %12184 = vmatpush3.msra.mxu1 %v15956_v35  ;;  %12104 = vmatprep.subr.mxu0 %v13799_v0 }
 0x578   :  { %12185 = vmatprep.subr.mxu1 %v13799_v0  ;;  %12105 = vmatpush3.msra.mxu0 %v16121_v6 }
 0x579   :  { %12186 = vmatpush3.msra.mxu1 %v15966_v29  ;;  %12106 = vmatprep.subr.mxu0 %v13799_v0 }
 0x57a   :  { %12187 = vmatprep.subr.mxu1 %v13799_v0  ;;  %12107 = vmatpush3.msra.mxu0 %v16133_v44 }
 0x57b   :  { %12108 = vmatprep.mubr.msk.f32.mxu0 %vm13800_vm0, %v13799_v0  ;;  %12188 = vmatpush3.msra.mxu1 %v15976_v55 }
 0x57c   :  { %12109 = vmatmul.mubr.f32.vlgmr.msra.gmra.mxu0 %v15135_v63  ;;  %12146 = vmatprep.subr.mxu0 %v13799_v0 }
 0x57d   :  { %12189 = vmatprep.subr.mxu1 %v13799_v0  ;;  %12147 = vmatpush3.msra.mxu0 %v15964_v53  ;;  %v4709_v53 = vld [vmem:[#allocation2 + $0x3f8] sm:$0xff] }
 0x57e   :  { %12190 = vmatpush3.msra.mxu1 %v15989_v45  ;;  %12148 = vmatprep.subr.mxu0 %v13799_v0 }
 0x57f   :  { %12191 = vmatprep.subr.mxu1 %v13799_v0  ;;  %12149 = vmatpush3.msra.mxu0 %v15974_v33  ;;  %v4708_v33 = vld [vmem:[#allocation2 + $0x3f0] sm:$0xff] }
 0x580   :  { %12192 = vmatpush3.msra.mxu1 %v16000_v41  ;;  %12150 = vmatprep.subr.mxu0 %v13799_v0 }
 0x581   :  { %12193 = vmatprep.subr.mxu1 %v13799_v0  ;;  %12151 = vmatpush3.msra.mxu0 %v15985_v24  ;;  %v16372_v24 = vand.u32 4294901760, %v4708_v33 }
 0x582   :  { %12194 = vmatpush3.msra.mxu1 %v16009_v10  ;;  %12152 = vmatprep.subr.mxu0 %v13799_v0 }
 0x583   :  { %12195 = vmatprep.subr.mxu1 %v13799_v0  ;;  %12153 = vmatpush3.msra.mxu0 %v15996_v28  ;;  %v4704_v28 = vld [vmem:[#allocation2 + $0x3d0] sm:$0xff] }
 0x584   :  { %12196 = vmatpush3.msra.mxu1 %v16023_v25  ;;  %12154 = vmatprep.subr.mxu0 %v13799_v0 }
 0x585   :  { %12197 = vmatprep.subr.mxu1 %v13799_v0  ;;  %12155 = vmatpush3.msra.mxu0 %v16014_v58  ;;  %v16384_v58 = vand.u32 4294901760, %v4704_v28 }
 0x586   :  { %12198 = vmatpush3.msra.mxu1 %v16043_v27  ;;  %12156 = vmatprep.subr.mxu0 %v13799_v0 }
 0x587   :  { %12199 = vmatprep.subr.mxu1 %v13799_v0  ;;  %12157 = vmatpush3.msra.mxu0 %v16028_v34 }
 0x588   :  { %12200 = vmatpush3.msra.mxu1 %v16057_v48  ;;  %12158 = vmatprep.subr.mxu0 %v13799_v0 }
 0x589   :  { %12201 = vmatprep.subr.mxu1 %v13799_v0  ;;  %12159 = vmatpush3.msra.mxu0 %v16037_v47 }
 0x58a   :  { %12202 = vmatpush3.msra.mxu1 %v16070_v1  ;;  %12160 = vmatprep.subr.mxu0 %v13799_v0 }
 0x58b   :  { %12203 = vmatprep.subr.mxu1 %v13799_v0  ;;  %12161 = vmatpush3.msra.mxu0 %v16051_v14  ;;  %v16404_v14 = vsub.f32 %v4704_v28, %v16384_v58 }
 0x58c   :  { %12204 = vmatpush3.msra.mxu1 %v16083_v39  ;;  %12162 = vmatprep.subr.mxu0 %v13799_v0 }
 0x58d   :  { %12205 = vmatprep.subr.mxu1 %v13799_v0  ;;  %12163 = vmatpush3.msra.mxu0 %v16068_v40 }
 0x58e   :  { %12206 = vmatpush3.msra.mxu1 %v16096_v16  ;;  %12164 = vmatprep.subr.mxu0 %v13799_v0 }
 0x58f   :  { %12207 = vmatprep.subr.mxu1 %v13799_v0  ;;  %12165 = vmatpush3.msra.mxu0 %v16081_v49 }
 0x590   :  { %12208 = vmatpush3.msra.mxu1 %v16109_v51  ;;  %12166 = vmatprep.subr.mxu0 %v13799_v0 }
 0x591   :  { %12209 = vmatprep.subr.mxu1 %v13799_v0  ;;  %12167 = vmatpush3.msra.mxu0 %v16094_v37 }
 0x592   :  { %12210 = vmatpush3.msra.mxu1 %v16121_v6  ;;  %12168 = vmatprep.subr.mxu0 %v13799_v0 }
 0x593   :  { %12211 = vmatprep.subr.mxu1 %v13799_v0  ;;  %12169 = vmatpush3.msra.mxu0 %v16107_v36 }
 0x594   :  { %12212 = vmatpush3.msra.mxu1 %v16133_v44  ;;  %12213 = vmatprep.mubr.msk.f32.mxu1 %vm13800_vm0, %v13799_v0 }
 0x595   :  { %12170 = vmatprep.subr.mxu0 %v13799_v0  ;;  %12214 = vmatmul.mubr.f32.vlgmr.msra.gmra.mxu1 %v15127_v50 }
 0x596   :  { %12251 = vmatprep.subr.mxu1 %v13799_v0  ;;  %12171 = vmatpush3.msra.mxu0 %v16119_v21 }
 0x597   :  { %12252 = vmatpush3.msra.mxu1 %v15949_v18  ;;  %12172 = vmatprep.subr.mxu0 %v13799_v0 }
 0x598   :  { %12253 = vmatprep.subr.mxu1 %v13799_v0  ;;  %12173 = vmatpush3.msra.mxu0 %v16131_v60 }
 0x599   :  { %12254 = vmatpush3.msra.mxu1 %v15956_v35  ;;  %12174 = vmatprep.subr.mxu0 %v13799_v0 }
 0x59a   :  { %12255 = vmatprep.subr.mxu1 %v13799_v0  ;;  %12175 = vmatpush3.msra.mxu0 %v16143_v31 }
 0x59b   :  { %12256 = vmatpush3.msra.mxu1 %v15966_v29  ;;  %12176 = vmatprep.subr.mxu0 %v13799_v0  ;;  %v16370_v29 = vand.u32 4294901760, %v4709_v53 }
 0x59c   :  { %12257 = vmatprep.subr.mxu1 %v13799_v0  ;;  %12177 = vmatpush3.msra.mxu0 %v16153_v2 }
 0x59d   :  { %12178 = vmatprep.mubr.msk.f32.mxu0 %vm13800_vm0, %v13799_v0  ;;  %12258 = vmatpush3.msra.mxu1 %v15976_v55  ;;  %v4707_v55 = vld [vmem:[#allocation2 + $0x3e8] sm:$0xff] }
 0x59e   :  { %12179 = vmatmul.mubr.f32.vlgmr.msra.gmra.mxu0 %v15120_v17  ;;  %12216 = vmatprep.subr.mxu0 %v13799_v0 }
 0x59f   :  { %12259 = vmatprep.subr.mxu1 %v13799_v0  ;;  %12217 = vmatpush3.msra.mxu0 %v4127_v7  ;;  %v4706_v7 = vld [vmem:[#allocation2 + $0x3e0] sm:$0xff] }
 0x5a0   :  { %12260 = vmatpush3.msra.mxu1 %v15989_v45  ;;  %12218 = vmatprep.subr.mxu0 %v13799_v0  ;;  %v16376_v45 = vand.u32 4294901760, %v4706_v7 }
 0x5a1   :  { %12261 = vmatprep.subr.mxu1 %v13799_v0  ;;  %12219 = vmatpush3.msra.mxu0 %v4134_v22  ;;  %v4705_v22 = vld [vmem:[#allocation2 + $0x3d8] sm:$0xff] }
 0x5a2   :  { %12262 = vmatpush3.msra.mxu1 %v16000_v41  ;;  %12220 = vmatprep.subr.mxu0 %v13799_v0  ;;  %v4703_v41 = vld [vmem:[#allocation2 + $0x3c8] sm:$0xff]  ;;  %v16395_v47 = vsub.f32 %v4706_v7, %v16376_v45 }
 0x5a3   :  { %12263 = vmatprep.subr.mxu1 %v13799_v0  ;;  %12221 = vmatpush3.msra.mxu0 %v4141_v23  ;;  %v16379_v23 = vsub.f32 %v4709_v53, %v16370_v29  ;;  %v16486_v53 = vsub.f32 %v4699_v56, %v16476_v9 }
 0x5a4   :  { %12264 = vmatpush3.msra.mxu1 %v16009_v10  ;;  %12222 = vmatprep.subr.mxu0 %v13799_v0  ;;  %v16382_v10 = vand.u32 4294901760, %v4705_v22 }
 0x5a5   :  { %12265 = vmatprep.subr.mxu1 %v13799_v0  ;;  %12223 = vmatpush3.msra.mxu0 %v4148_v13  ;;  %v16386_v13 = vand.u32 4294901760, %v4703_v41 }
 0x5a6   :  { %12266 = vmatpush3.msra.mxu1 %v16023_v25  ;;  %12224 = vmatprep.subr.mxu0 %v13799_v0  ;;  %v16389_v25 = vsub.f32 %v4708_v33, %v16372_v24 }
 0x5a7   :  { %12267 = vmatprep.subr.mxu1 %v13799_v0  ;;  %12225 = vmatpush3.msra.mxu0 %v4155_v32  ;;  %v4804_v32 = vand.u32 4294901760, %v16379_v23 }
 0x5a8   :  { %12268 = vmatpush3.msra.mxu1 %v16043_v27  ;;  %12226 = vmatprep.subr.mxu0 %v13799_v0  ;;  %v16400_v27 = vsub.f32 %v4705_v22, %v16382_v10 }
 0x5a9   :  { %12269 = vmatprep.subr.mxu1 %v13799_v0  ;;  %12227 = vmatpush3.msra.mxu0 %v4162_v57  ;;  %v4811_v57 = vand.u32 4294901760, %v16389_v25  ;;  %v4805_v40 = vsub.f32 %v16379_v23, %v4804_v32 }
 0x5aa   :  { %12270 = vmatpush3.msra.mxu1 %v16057_v48  ;;  %12228 = vmatprep.subr.mxu0 %v13799_v0 }
 0x5ab   :  { %12271 = vmatprep.subr.mxu1 %v13799_v0  ;;  %12229 = vmatpush3.msra.mxu0 %v4169_v15  ;;  %v4825_v15 = vand.u32 4294901760, %v16395_v47  ;;  %v4812_v49 = vsub.f32 %v16389_v25, %v4811_v57 }
 0x5ac   :  { %12272 = vmatpush3.msra.mxu1 %v16070_v1  ;;  %12230 = vmatprep.subr.mxu0 %v13799_v0  ;;  %v4832_v1 = vand.u32 4294901760, %v16400_v27 }
 0x5ad   :  { %12273 = vmatprep.subr.mxu1 %v13799_v0  ;;  %12231 = vmatpush3.msra.mxu0 %v4176_v5  ;;  %v16416_v5 = vsub.f32 %v4703_v41, %v16386_v13  ;;  %v4826_v37 = vsub.f32 %v16395_v47, %v4825_v15  ;;  %v4874_v41 = vand.u32 4294901760, %v16486_v53 }
 0x5ae   :  { %12274 = vmatpush3.msra.mxu1 %v16083_v39  ;;  %12232 = vmatprep.subr.mxu0 %v13799_v0 }
 0x5af   :  { %12275 = vmatprep.subr.mxu1 %v13799_v0  ;;  %12233 = vmatpush3.msra.mxu0 %v4183_v8  ;;  %v4806_v8 = vand.u32 4294901760, %v4805_v40  ;;  %v4827_v21 = vand.u32 4294901760, %v4826_v37 }
 0x5b0   :  { %12276 = vmatpush3.msra.mxu1 %v16096_v16  ;;  %12234 = vmatprep.subr.mxu0 %v13799_v0  ;;  %v4839_v16 = vand.u32 4294901760, %v16404_v14 }
 0x5b1   :  { %12277 = vmatprep.subr.mxu1 %v13799_v0  ;;  %12235 = vmatpush3.msra.mxu0 %v4190_v11  ;;  %v4813_v11 = vand.u32 4294901760, %v4812_v49 }
 0x5b2   :  { %12278 = vmatpush3.msra.mxu1 %v16109_v51  ;;  %12236 = vmatprep.subr.mxu0 %v13799_v0  ;;  %v4833_v51 = vsub.f32 %v16400_v27, %v4832_v1 }
 0x5b3   :  { %12279 = vmatprep.subr.mxu1 %v13799_v0  ;;  %12237 = vmatpush3.msra.mxu0 %v4197_v54  ;;  %v4846_v54 = vand.u32 4294901760, %v16416_v5 }
 0x5b4   :  { %12280 = vmatpush3.msra.mxu1 %v16121_v6  ;;  %12238 = vmatprep.subr.mxu0 %v13799_v0  ;;  %v4840_v6 = vsub.f32 %v16404_v14, %v4839_v16  ;;  %v4834_v60 = vand.u32 4294901760, %v4833_v51 }
 0x5b5   :  { %12281 = vmatprep.subr.mxu1 %v13799_v0  ;;  %12239 = vmatpush3.msra.mxu0 %v4204_v4  ;;  %v4702_v4 = vld [vmem:[#allocation2 + $0x3c0] sm:$0xff] }
 0x5b6   :  { %12282 = vmatpush3.msra.mxu1 %v16133_v44  ;;  %12283 = vmatprep.mubr.msk.f32.mxu1 %vm13800_vm0, %v13799_v0  ;;  %v4847_v44 = vsub.f32 %v16416_v5, %v4846_v54 }
 0x5b7   :  { %12240 = vmatprep.subr.mxu0 %v13799_v0  ;;  %12284 = vmatmul.mubr.f32.vlgmr.msra.gmra.mxu1 %v15116_v3 }
 0x5b8   :  { %12241 = vmatpush3.msra.mxu0 %v4211_v19  ;;  %12248 = vmatprep.mubr.msk.f32.mxu0 %vm13800_vm0, %v13799_v0  ;;  %v16447_v19 = vand.u32 4294901760, %v4702_v4  ;;  %v4848_v59 = vand.u32 4294901760, %v4847_v44 }
 0x5b9   :  { %12242 = vmatprep.subr.mxu0 %v13799_v0  ;;  %12321 = vmatprep.subr.mxu1 %v13799_v0 }
 0x5ba   :  { %12243 = vmatpush3.msra.mxu0 %v4218_v38  ;;  %12353 = vmatprep.mubr.msk.f32.mxu1 %vm13800_vm0, %v13799_v0  ;;  %v4841_v38 = vand.u32 4294901760, %v4840_v6  ;;  %v16453_v2 = vsub.f32 %v4702_v4, %v16447_v19  ;;  %v4695_v4 = vld [vmem:[#allocation2 + $0x388] sm:$0xff] }
 0x5bb   :  { %12244 = vmatprep.subr.mxu0 %v13799_v0  ;;  %12322 = vmatpush3.msra.mxu1 %v4806_v8  ;;  %v4696_v8 = vld [vmem:[#allocation2 + $0x390] sm:$0xff] }
 0x5bc   :  { %12245 = vmatpush3.msra.mxu0 %v4225_v46  ;;  %12323 = vmatprep.subr.mxu1 %v13799_v0  ;;  %v4700_v46 = vld [vmem:[#allocation2 + $0x3b0] sm:$0xff]  ;;  %v4853_v62 = vand.u32 4294901760, %v16453_v2 }
 0x5bd   :  { %12246 = vmatprep.subr.mxu0 %v13799_v0  ;;  %12324 = vmatpush3.msra.mxu1 %v4813_v11  ;;  %v16464_v42 = vand.u32 4294901760, %v4700_v46 }
 0x5be   :  { %12247 = vmatpush3.msra.mxu0 %v4232_v30  ;;  %12325 = vmatprep.subr.mxu1 %v13799_v0  ;;  %v16462_v30 = vsub.f32 %v4701_v61, %v16455_v20  ;;  %v4854_v52 = vsub.f32 %v16453_v2, %v4853_v62 }
 0x5bf   :  { %12249 = vmatmul.mubr.f32.vlgmr.msra.gmra.mxu0 %v15116_v3  ;;  %12286 = vmatprep.subr.mxu0 %v13799_v0  ;;  %v16374_v3 = vand.u32 4294901760, %v4707_v55  ;;  %v16474_v12 = vsub.f32 %v4700_v46, %v16464_v42 }
 0x5c0   :  { %12318 = vmatprep.mubr.msk.f32.mxu0 %vm13800_vm0, %v13799_v0  ;;  %12287 = vmatpush3.msra.mxu0 %v16370_v29  ;;  %v4860_v43 = vand.u32 4294901760, %v16462_v30 }
 0x5c1   :  { %v16392_v34 = vsub.f32 %v4707_v55, %v16374_v3  ;;  %12288 = vmatprep.subr.mxu0 %v13799_v0  ;;  %v4697_v55 = vld [vmem:[#allocation2 + $0x398] sm:$0xff] }
 0x5c2   :  { %12289 = vmatpush3.msra.mxu0 %v16372_v24  ;;  %v16497_v40 = vand.u32 4294901760, %v4697_v55 }
 0x5c3   :  { %v4818_v48 = vand.u32 4294901760, %v16392_v34  ;;  %12290 = vmatprep.subr.mxu0 %v13799_v0 }
 0x5c4   :  { %12291 = vmatpush3.msra.mxu0 %v16374_v3  ;;  %v16509_v51 = vsub.f32 %v4697_v55, %v16497_v40 }
 0x5c5   :  { %v4819_v39 = vsub.f32 %v16392_v34, %v4818_v48  ;;  %12292 = vmatprep.subr.mxu0 %v13799_v0 }
 0x5c6   :  { %12293 = vmatpush3.msra.mxu0 %v16376_v45  ;;  %v18959_v44 = vand.u32 4294901760, %v16509_v51 }
 0x5c7   :  { %12294 = vmatprep.subr.mxu0 %v13799_v0  ;;  %v4820_v36 = vand.u32 4294901760, %v4819_v39 }
 0x5c8   :  { %12295 = vmatpush3.msra.mxu0 %v16382_v10  ;;  %v4889_v46 = vsub.f32 %v16509_v51, %v18959_v44 }
 0x5c9   :  { %12296 = vmatprep.subr.mxu0 %v13799_v0  ;;  %12326 = vmatpush3.msra.mxu1 %v4820_v36  ;;  %v4875_v36 = vsub.f32 %v16486_v53, %v4874_v41 }
 0x5ca   :  { %12297 = vmatpush3.msra.mxu0 %v16384_v58  ;;  %12327 = vmatprep.subr.mxu1 %v13799_v0 }
 0x5cb   :  { %12298 = vmatprep.subr.mxu0 %v13799_v0  ;;  %12328 = vmatpush3.msra.mxu1 %v4827_v21  ;;  %v16511_v21 = vand.u32 4294901760, %v4696_v8 }
 0x5cc   :  { %12299 = vmatpush3.msra.mxu0 %v16386_v13  ;;  %12329 = vmatprep.subr.mxu1 %v13799_v0 }
 0x5cd   :  { %12300 = vmatprep.subr.mxu0 %v13799_v0  ;;  %12330 = vmatpush3.msra.mxu1 %v4834_v60  ;;  %v4876_v60 = vand.u32 4294901760, %v4875_v36  ;;  %v16519_v61 = vsub.f32 %v4696_v8, %v16511_v21 }
 0x5ce   :  { %12301 = vmatpush3.msra.mxu0 %v16447_v19  ;;  %12331 = vmatprep.subr.mxu1 %v13799_v0 }
 0x5cf   :  { %v3630_v17 = vpop.f32.mrf.mxu1  ;;  %12302 = vmatprep.subr.mxu0 %v13799_v0  ;;  %12332 = vmatpush3.msra.mxu1 %v4841_v38  ;;  %v16521_v38 = vand.u32 4294901760, %v4695_v4 }
 0x5d0   :  { %12303 = vmatpush3.msra.mxu0 %v16455_v20  ;;  %12333 = vmatprep.subr.mxu1 %v13799_v0 }
 0x5d1   :  { %v11935_v50 = vpop.f32.mrf.mxu1  ;;  %12304 = vmatprep.subr.mxu0 %v13799_v0  ;;  %12334 = vmatpush3.msra.mxu1 %v4848_v59  ;;  %v18958_v59 = vand.u32 4294901760, %v16519_v61  ;;  %v16534_v56 = vsub.f32 %v4695_v4, %v16521_v38 }
 0x5d2   :  { %12305 = vmatpush3.msra.mxu0 %v16464_v42  ;;  %v4855_v50 = vand.u32 4294901760, %v4854_v52  ;;  %12335 = vmatprep.subr.mxu1 %v13799_v0 }
 0x5d3   :  { %12306 = vmatprep.subr.mxu0 %v13799_v0  ;;  %v18957_v55 = vand.u32 4294901760, %v16534_v56 }
 0x5d4   :  { %12307 = vmatpush3.msra.mxu0 %v16476_v9  ;;  %12336 = vmatpush3.msra.mxu1 %v4855_v50  ;;  %v4890_v50 = vand.u32 4294901760, %v4889_v46 }
 0x5d5   :  { %12308 = vmatprep.subr.mxu0 %v13799_v0  ;;  %12337 = vmatprep.subr.mxu1 %v13799_v0 }
 0x5d7   :  { %v3479_v63 = vpop.f32.mrf.mxu0 }
 0x5d8   :  { %v16368_v18 = vadd.f32 %v3630_v17, %v3479_v63  ;;  %v4698_v17 = vld [vmem:[#allocation2 + $0x3a0] sm:$0xff]  ;;  %v4861_v63 = vsub.f32 %v16462_v30, %v4860_v43 }
 0x5d9   :  { %v11900_v35 = vpop.f32.mrf.mxu0  ;;  %v16490_v33 = vand.u32 4294901760, %v4698_v17 }
 0x5da   :  { %v4867_v35 = vand.u32 4294901760, %v16474_v12  ;;  %v4862_v22 = vand.u32 4294901760, %v4861_v63  ;;  %v4896_v63 = vsub.f32 %v16519_v61, %v18958_v59 }
 0x5db   :  { %v16502_v39 = vsub.f32 %v4698_v17, %v16490_v33  ;;  %12309 = vmatpush3.msra.mxu0 %v16490_v33 }
 0x5dc   :  { %v4868_v28 = vsub.f32 %v16474_v12, %v4867_v35  ;;  %12338 = vmatpush3.msra.mxu1 %v4862_v22  ;;  %12310 = vmatprep.subr.mxu0 %v13799_v0  ;;  %v4897_v22 = vand.u32 4294901760, %v4896_v63 }
 0x5dd   :  { %12339 = vmatprep.subr.mxu1 %v13799_v0  ;;  %v18960_v6 = vand.u32 4294901760, %v16502_v39  ;;  %12311 = vmatpush3.msra.mxu0 %v16497_v40 }
 0x5de   :  { %v4869_v11 = vand.u32 4294901760, %v4868_v28  ;;  %12312 = vmatprep.subr.mxu0 %v13799_v0  ;;  %v4903_v28 = vsub.f32 %v16534_v56, %v18957_v55 }
 0x5df   :  { %12313 = vmatpush3.msra.mxu0 %v16511_v21 }
 0x5e0   :  { %12340 = vmatpush3.msra.mxu1 %v4869_v11  ;;  %12314 = vmatprep.subr.mxu0 %v13799_v0  ;;  %v4904_v8 = vand.u32 4294901760, %v4903_v28 }
 0x5e1   :  { %12341 = vmatprep.subr.mxu1 %v13799_v0  ;;  %12315 = vmatpush3.msra.mxu0 %v16521_v38 }
 0x5e2   :  { %12342 = vmatpush3.msra.mxu1 %v4876_v60  ;;  %12316 = vmatprep.subr.mxu0 %v13799_v0 }
 0x5e3   :  { %12343 = vmatprep.subr.mxu1 %v13799_v0 }
 0x5ef   :  { %v3823_v31 = vpop.f32.mrf.mxu1 }
 0x5f1   :  { %v12005_v26 = vpop.f32.mrf.mxu1 }
 0x5f2   :  { %v4694_v26 = vld [vmem:[#allocation2 + $0x380] sm:$0xff] }
 0x5f3   :  { %v16536_v52 = vand.u32 4294901760, %v4694_v26 }
 0x5f5   :  { %12317 = vmatpush3.msra.mxu0 %v16536_v52 }
 0x5f6   :  { %12356 = vmatprep.subr.mxu0 %v13799_v0 }
 0x5f8   :  { %v3734_v7 = vpop.f32.mrf.mxu0 }
 0x5f9   :  { %v3735_v49 = vadd.f32 %v3734_v7, %v16368_v18  ;;  %v16546_v7 = vsub.f32 %v4694_v26, %v16536_v52 }
 0x5fa   :  { %v11970_v37 = vpop.f32.mrf.mxu0 }
 0x5fb   :  { %v3824_v18 = vadd.f32 %v3823_v31, %v3735_v49  ;;  %v4882_v31 = vsub.f32 %v16502_v39, %v18960_v6  ;;  %v18956_v49 = vand.u32 4294901760, %v16546_v7 }
 0x5fd   :  { %v4883_v17 = vand.u32 4294901760, %v4882_v31  ;;  %v4910_v37 = vsub.f32 %v16546_v7, %v18956_v49 }
 0x5ff   :  { %12344 = vmatpush3.msra.mxu1 %v4883_v17  ;;  %v4911_v11 = vand.u32 4294901760, %v4910_v37 }
 0x600   :  { %12345 = vmatprep.subr.mxu1 %v13799_v0 }
 0x601   :  { %12346 = vmatpush3.msra.mxu1 %v4890_v50 }
 0x602   :  { %12347 = vmatprep.subr.mxu1 %v13799_v0 }
 0x603   :  { %12348 = vmatpush3.msra.mxu1 %v4897_v22 }
 0x604   :  { %12349 = vmatprep.subr.mxu1 %v13799_v0 }
 0x605   :  { %12350 = vmatpush3.msra.mxu1 %v4904_v8 }
 0x606   :  { %12351 = vmatprep.subr.mxu1 %v13799_v0 }
 0x607   :  { %12352 = vmatpush3.msra.mxu1 %v4911_v11 }
 0x608   :  { %12391 = vmatprep.subr.mxu1 %v13799_v0 }
 0x611   :  { %v4029_v36 = vpop.f32.mrf.mxu1 }
 0x613   :  { %v12075_v4 = vpop.f32.mrf.mxu1 }
 0x614   :  { %v9373_v4 = vld [vmem:[%s18925_s2 + $0x5] ss:$0 sm:$0xff] }
 0x61a   :  { %v3942_v60 = vpop.f32.mrf.mxu0 }
 0x61b   :  { %v3943_v31 = vadd.f32 %v3942_v60, %v3824_v18 }
 0x61c   :  { %v12040_v26 = vpop.f32.mrf.mxu0 }
 0x61d   :  { %v4030_v46 = vadd.f32 %v4029_v36, %v3943_v31  ;;  %v13773_v31 = vld [vmem:[%s18923_s0] sm:$0xff] }
 0x61e   :  { %v4682_v26 = vmul.f32 %v13773_v31, %v9373_v4 }
 0x633   :  { %v4271_v17 = vpop.f32.mrf.mxu1 }
 0x635   :  { %v12145_v50 = vpop.f32.mrf.mxu1 }
 0x63c   :  { %v4120_v63 = vpop.f32.mrf.mxu0 }
 0x63d   :  { %v4121_v28 = vadd.f32 %v4120_v63, %v4030_v46 }
 0x63e   :  { %v12110_v22 = vpop.f32.mrf.mxu0 }
 0x63f   :  { %v4272_v49 = vadd.f32 %v4271_v17, %v4121_v28 }
 0x655   :  { %v4464_v55 = vpop.f32.mrf.mxu1 }
 0x657   :  { %v12215_v37 = vpop.f32.mrf.mxu1 }
 0x658   :  { %v19024_v37 = vand.u32 4294901760, %v16509_v51 }
 0x65e   :  { %v4375_v8 = vpop.f32.mrf.mxu0 }
 0x65f   :  { %v4376_v6 = vadd.f32 %v4375_v8, %v4272_v49 }
 0x660   :  { %v12180_v59 = vpop.f32.mrf.mxu0 }
 0x661   :  { %v4465_v18 = vadd.f32 %v4464_v55, %v4376_v6  ;;  %v9375_v59 = vld [vmem:[%s18925_s2 + $0x4] ss:$0 sm:$0xff] }
 0x677   :  { %v4670_v44 = vpop.f32.mrf.mxu1 }
 0x679   :  { %v12285_v11 = vpop.f32.mrf.mxu1 }
 0x67f   :  { %v4583_v60 = vpop.f32.mrf.mxu0 }
 0x680   :  { %v4584_v36 = vadd.f32 %v4583_v60, %v4465_v18  ;;  %v5356_v60 = vld [vmem:[#allocation2 + $0x420] sm:$0xff] }
 0x681   :  { %v12250_v46 = vpop.f32.mrf.mxu0 }
 0x682   :  { %v4671_v17 = vadd.f32 %v4670_v44, %v4584_v36  ;;  %v19025_v36 = vand.u32 4294901760, %v16519_v61 }
 0x684   :  { %v4683_v50 = vadd.f32 %v4682_v26, %v4671_v17 }
 0x686   :  { %v16572_v49 = vadd.f32 %v9375_v59, %v4683_v50  ;;  %v5355_v59 = vld [vmem:[#allocation2 + $0x418] sm:$0xff] }
 0x688   :  { %v16575_v63 = vand.u32 4294901760, %v16572_v49 }
 0x68a   :  { %v16579_v6 = vsub.f32 %v16572_v49, %v16575_v63  ;;  %12354 = vmatmul.mubr.f32.vlgmr.msra.gmra.mxu1 %v16575_v63 }
 0x68b   :  { %12392 = vmatpush3.msra.mxu1 %v16370_v29  ;;  %12423 = vmatprep.mubr.msk.f32.mxu1 %vm13800_vm0, %v13799_v0 }
 0x68c   :  { %12393 = vmatprep.subr.mxu1 %v13799_v0  ;;  %v16587_v44 = vand.u32 4294901760, %v16579_v6 }
 0x68d   :  { %12394 = vmatpush3.msra.mxu1 %v16372_v24 }
 0x68e   :  { %12395 = vmatprep.subr.mxu1 %v13799_v0  ;;  %v4794_v55 = vsub.f32 %v16579_v6, %v16587_v44 }
 0x68f   :  { %12396 = vmatpush3.msra.mxu1 %v16374_v3 }
 0x690   :  { %12397 = vmatprep.subr.mxu1 %v13799_v0  ;;  %v16595_v28 = vand.u32 4294901760, %v4794_v55 }
 0x691   :  { %12398 = vmatpush3.msra.mxu1 %v16376_v45 }
 0x692   :  { %12399 = vmatprep.subr.mxu1 %v13799_v0  ;;  %12319 = vmatmul.mubr.f32.vlgmr.msra.gmra.mxu0 %v16595_v28 }
 0x693   :  { %12357 = vmatpush3.msra.mxu0 %v16379_v23  ;;  %12400 = vmatpush3.msra.mxu1 %v16382_v10 }
 0x694   :  { %12358 = vmatprep.subr.mxu0 %v13799_v0  ;;  %12401 = vmatprep.subr.mxu1 %v13799_v0 }
 0x695   :  { %12359 = vmatpush3.msra.mxu0 %v16389_v25  ;;  %12402 = vmatpush3.msra.mxu1 %v16384_v58 }
 0x696   :  { %12360 = vmatprep.subr.mxu0 %v13799_v0  ;;  %12403 = vmatprep.subr.mxu1 %v13799_v0 }
 0x697   :  { %12361 = vmatpush3.msra.mxu0 %v16392_v34  ;;  %12404 = vmatpush3.msra.mxu1 %v16386_v13 }
 0x698   :  { %12362 = vmatprep.subr.mxu0 %v13799_v0  ;;  %12405 = vmatprep.subr.mxu1 %v13799_v0 }
 0x699   :  { %12363 = vmatpush3.msra.mxu0 %v16395_v47  ;;  %12406 = vmatpush3.msra.mxu1 %v16447_v19  ;;  %v5363_v47 = vld [vmem:[#allocation2 + $0x458] sm:$0xff] }
 0x69a   :  { %12364 = vmatprep.subr.mxu0 %v13799_v0  ;;  %12407 = vmatprep.subr.mxu1 %v13799_v0 }
 0x69b   :  { %12365 = vmatpush3.msra.mxu0 %v16400_v27  ;;  %12408 = vmatpush3.msra.mxu1 %v16455_v20 }
 0x69c   :  { %12366 = vmatprep.subr.mxu0 %v13799_v0  ;;  %12409 = vmatprep.subr.mxu1 %v13799_v0 }
 0x69d   :  { %12367 = vmatpush3.msra.mxu0 %v16404_v14  ;;  %12410 = vmatpush3.msra.mxu1 %v16464_v42  ;;  %v5362_v14 = vld [vmem:[#allocation2 + $0x450] sm:$0xff] }
 0x69e   :  { %12368 = vmatprep.subr.mxu0 %v13799_v0  ;;  %12411 = vmatprep.subr.mxu1 %v13799_v0 }
 0x69f   :  { %12369 = vmatpush3.msra.mxu0 %v16416_v5  ;;  %12412 = vmatpush3.msra.mxu1 %v16476_v9  ;;  %v16736_v5 = vand.u32 4294901760, %v5362_v14 }
 0x6a0   :  { %12370 = vmatprep.subr.mxu0 %v13799_v0  ;;  %12413 = vmatprep.subr.mxu1 %v13799_v0 }
 0x6a1   :  { %12371 = vmatpush3.msra.mxu0 %v16453_v2  ;;  %12414 = vmatpush3.msra.mxu1 %v16490_v33 }
 0x6a2   :  { %12372 = vmatprep.subr.mxu0 %v13799_v0  ;;  %12415 = vmatprep.subr.mxu1 %v13799_v0 }
 0x6a3   :  { %12373 = vmatpush3.msra.mxu0 %v16462_v30  ;;  %12416 = vmatpush3.msra.mxu1 %v16497_v40 }
 0x6a4   :  { %12374 = vmatprep.subr.mxu0 %v13799_v0  ;;  %12417 = vmatprep.subr.mxu1 %v13799_v0 }
 0x6a5   :  { %12375 = vmatpush3.msra.mxu0 %v16474_v12  ;;  %12418 = vmatpush3.msra.mxu1 %v16511_v21  ;;  %v16764_v12 = vsub.f32 %v5362_v14, %v16736_v5 }
 0x6a6   :  { %12376 = vmatprep.subr.mxu0 %v13799_v0  ;;  %12419 = vmatprep.subr.mxu1 %v13799_v0 }
 0x6a7   :  { %12377 = vmatpush3.msra.mxu0 %v16486_v53  ;;  %12420 = vmatpush3.msra.mxu1 %v16521_v38  ;;  %v5505_v8 = vand.u32 4294901760, %v16764_v12 }
 0x6a8   :  { %12378 = vmatprep.subr.mxu0 %v13799_v0  ;;  %12421 = vmatprep.subr.mxu1 %v13799_v0 }
 0x6a9   :  { %12379 = vmatpush3.msra.mxu0 %v16502_v39  ;;  %12422 = vmatpush3.msra.mxu1 %v16536_v52  ;;  %v5506_v50 = vsub.f32 %v16764_v12, %v5505_v8 }
 0x6aa   :  { %12380 = vmatprep.subr.mxu0 %v13799_v0  ;;  %12424 = vmatmul.mubr.f32.vlgmr.msra.gmra.mxu1 %v16587_v44 }
 0x6ab   :  { %12461 = vmatprep.subr.mxu1 %v13799_v0  ;;  %12381 = vmatpush3.msra.mxu0 %v16509_v51 }
 0x6ac   :  { %12462 = vmatpush3.msra.mxu1 %v16370_v29  ;;  %12382 = vmatprep.subr.mxu0 %v13799_v0  ;;  %v5367_v29 = vld [vmem:[#allocation2 + $0x478] sm:$0xff] }
 0x6ad   :  { %12463 = vmatprep.subr.mxu1 %v13799_v0  ;;  %12383 = vmatpush3.msra.mxu0 %v16519_v61  ;;  %v19026_v61 = vand.u32 4294901760, %v16534_v56 }
 0x6ae   :  { %12464 = vmatpush3.msra.mxu1 %v16372_v24  ;;  %12384 = vmatprep.subr.mxu0 %v13799_v0  ;;  %v5366_v24 = vld [vmem:[#allocation2 + $0x470] sm:$0xff] }
 0x6af   :  { %12465 = vmatprep.subr.mxu1 %v13799_v0  ;;  %12385 = vmatpush3.msra.mxu0 %v16534_v56  ;;  %v16692_v23 = vand.u32 4294901760, %v5366_v24  ;;  %v19027_v56 = vand.u32 4294901760, %v16546_v7 }
 0x6b0   :  { %12466 = vmatpush3.msra.mxu1 %v16374_v3  ;;  %12386 = vmatprep.subr.mxu0 %v13799_v0  ;;  %v16685_v3 = vand.u32 4294901760, %v5367_v29 }
 0x6b1   :  { %12467 = vmatprep.subr.mxu1 %v13799_v0  ;;  %12387 = vmatpush3.msra.mxu0 %v16546_v7  ;;  %v16710_v25 = vsub.f32 %v5366_v24, %v16692_v23  ;;  %v5507_v7 = vand.u32 4294901760, %v5506_v50 }
 0x6b2   :  { %12388 = vmatprep.mubr.msk.f32.mxu0 %vm13800_vm0, %v13799_v0  ;;  %12468 = vmatpush3.msra.mxu1 %v16376_v45  ;;  %v5365_v45 = vld [vmem:[#allocation2 + $0x468] sm:$0xff] }
 0x6b3   :  { %12389 = vmatmul.mubr.f32.vlgmr.msra.gmra.mxu0 %v16579_v6  ;;  %12426 = vmatprep.subr.mxu0 %v13799_v0 }
 0x6b4   :  { %12469 = vmatprep.subr.mxu1 %v13799_v0  ;;  %12427 = vmatpush3.msra.mxu0 %v4804_v32 }
 0x6b5   :  { %12470 = vmatpush3.msra.mxu1 %v16382_v10  ;;  %12428 = vmatprep.subr.mxu0 %v13799_v0  ;;  %v5364_v10 = vld [vmem:[#allocation2 + $0x460] sm:$0xff] }
 0x6b6   :  { %12471 = vmatprep.subr.mxu1 %v13799_v0  ;;  %12429 = vmatpush3.msra.mxu0 %v4811_v57  ;;  %v16712_v34 = vand.u32 4294901760, %v5364_v10  ;;  %v16725_v57 = vand.u32 4294901760, %v5363_v47 }
 0x6b7   :  { %12472 = vmatpush3.msra.mxu1 %v16384_v58  ;;  %12430 = vmatprep.subr.mxu0 %v13799_v0  ;;  %v16700_v58 = vsub.f32 %v5367_v29, %v16685_v3  ;;  %v16819_v29 = vand.u32 4294901760, %v5356_v60 }
 0x6b8   :  { %12473 = vmatprep.subr.mxu1 %v13799_v0  ;;  %12431 = vmatpush3.msra.mxu0 %v4818_v48  ;;  %v5361_v48 = vld [vmem:[#allocation2 + $0x448] sm:$0xff] }
 0x6b9   :  { %12474 = vmatpush3.msra.mxu1 %v16386_v13  ;;  %12432 = vmatprep.subr.mxu0 %v13799_v0  ;;  %v16702_v13 = vand.u32 4294901760, %v5365_v45  ;;  %v5470_v32 = vand.u32 4294901760, %v16700_v58  ;;  %v16745_v2 = vand.u32 4294901760, %v5361_v48 }
 0x6ba   :  { %12475 = vmatprep.subr.mxu1 %v13799_v0  ;;  %12433 = vmatpush3.msra.mxu0 %v4825_v15  ;;  %v5477_v15 = vand.u32 4294901760, %v16710_v25 }
 0x6bb   :  { %12476 = vmatpush3.msra.mxu1 %v16447_v19  ;;  %12434 = vmatprep.subr.mxu0 %v13799_v0  ;;  %v16721_v27 = vsub.f32 %v5365_v45, %v16702_v13  ;;  %v5354_v45 = vld [vmem:[#allocation2 + $0x410] sm:$0xff] }
 0x6bc   :  { %12477 = vmatprep.subr.mxu1 %v13799_v0  ;;  %12435 = vmatpush3.msra.mxu0 %v4832_v1  ;;  %v16732_v1 = vsub.f32 %v5364_v10, %v16712_v34 }
 0x6bd   :  { %12478 = vmatpush3.msra.mxu1 %v16455_v20  ;;  %12436 = vmatprep.subr.mxu0 %v13799_v0  ;;  %v5484_v19 = vand.u32 4294901760, %v16721_v27  ;;  %v16750_v20 = vsub.f32 %v5363_v47, %v16725_v57 }
 0x6be   :  { %12479 = vmatprep.subr.mxu1 %v13799_v0  ;;  %12437 = vmatpush3.msra.mxu0 %v4839_v16  ;;  %v5360_v16 = vld [vmem:[#allocation2 + $0x440] sm:$0xff]  ;;  %v5491_v30 = vand.u32 4294901760, %v16732_v1 }
 0x6bf   :  { %12480 = vmatpush3.msra.mxu1 %v16464_v42  ;;  %12438 = vmatprep.subr.mxu0 %v13799_v0  ;;  %v16759_v42 = vand.u32 4294901760, %v5360_v16  ;;  %v5485_v53 = vsub.f32 %v16721_v27, %v5484_v19 }
 0x6c0   :  { %12481 = vmatprep.subr.mxu1 %v13799_v0  ;;  %12439 = vmatpush3.msra.mxu0 %v4846_v54  ;;  %v5471_v54 = vsub.f32 %v16700_v58, %v5470_v32 }
 0x6c1   :  { %12482 = vmatpush3.msra.mxu1 %v16476_v9  ;;  %12440 = vmatprep.subr.mxu0 %v13799_v0  ;;  %v19023_v9 = vand.u32 4294901760, %v16502_v39  ;;  %v16787_v22 = vsub.f32 %v5360_v16, %v16759_v42  ;;  %v5486_v4 = vand.u32 4294901760, %v5485_v53  ;;  %v5352_v53 = vld [vmem:[#allocation2 + $0x400] sm:$0xff] }
 0x6c2   :  { %12483 = vmatprep.subr.mxu1 %v13799_v0  ;;  %12441 = vmatpush3.msra.mxu0 %v4853_v62  ;;  %v5478_v62 = vsub.f32 %v16710_v25, %v5477_v15 }
 0x6c3   :  { %12484 = vmatpush3.msra.mxu1 %v16490_v33  ;;  %12442 = vmatprep.subr.mxu0 %v13799_v0  ;;  %v16773_v33 = vsub.f32 %v5361_v48, %v16745_v2  ;;  %v5519_v17 = vand.u32 4294901760, %v16787_v22  ;;  %v16832_v48 = vand.u32 4294901760, %v5355_v59 }
 0x6c4   :  { %12485 = vmatprep.subr.mxu1 %v13799_v0  ;;  %12443 = vmatpush3.msra.mxu0 %v4860_v43  ;;  %v5359_v43 = vld [vmem:[#allocation2 + $0x438] sm:$0xff]  ;;  %v5479_v39 = vand.u32 4294901760, %v5478_v62 }
 0x6c5   :  { %12486 = vmatpush3.msra.mxu1 %v16497_v40  ;;  %12444 = vmatprep.subr.mxu0 %v13799_v0  ;;  %v5498_v40 = vand.u32 4294901760, %v16750_v20  ;;  %v5512_v18 = vand.u32 4294901760, %v16773_v33  ;;  %v5520_v16 = vsub.f32 %v16787_v22, %v5519_v17 }
 0x6c6   :  { %12487 = vmatprep.subr.mxu1 %v13799_v0  ;;  %12445 = vmatpush3.msra.mxu0 %v4867_v35  ;;  %v5472_v35 = vand.u32 4294901760, %v5471_v54  ;;  %v5353_v54 = vld [vmem:[#allocation2 + $0x408] sm:$0xff] }
 0x6c7   :  { %12488 = vmatpush3.msra.mxu1 %v16511_v21  ;;  %12446 = vmatprep.subr.mxu0 %v13799_v0  ;;  %v16779_v21 = vand.u32 4294901760, %v5359_v43  ;;  %v5499_v51 = vsub.f32 %v16750_v20, %v5498_v40  ;;  %v5513_v24 = vsub.f32 %v16773_v33, %v5512_v18 }
 0x6c8   :  { %12489 = vmatprep.subr.mxu1 %v13799_v0  ;;  %12447 = vmatpush3.msra.mxu0 %v4874_v41  ;;  %v5358_v41 = vld [vmem:[#allocation2 + $0x430] sm:$0xff] }
 0x6c9   :  { %12490 = vmatpush3.msra.mxu1 %v16521_v38  ;;  %12448 = vmatprep.subr.mxu0 %v13799_v0  ;;  %v5492_v38 = vsub.f32 %v16732_v1, %v5491_v30  ;;  %v16793_v11 = vand.u32 4294901760, %v5358_v41  ;;  %v16804_v31 = vsub.f32 %v5359_v43, %v16779_v21  ;;  %v5500_v10 = vand.u32 4294901760, %v5499_v51 }
 0x6ca   :  { %12491 = vmatprep.subr.mxu1 %v13799_v0  ;;  %12449 = vmatpush3.msra.mxu0 %v19023_v9  ;;  %v16843_v43 = vsub.f32 %v5356_v60, %v16819_v29  ;;  %v16845_v9 = vand.u32 4294901760, %v5354_v45  ;;  %v16869_v51 = vand.u32 4294901760, %v5352_v53 }
 0x6cb   :  { %12492 = vmatpush3.msra.mxu1 %v16536_v52  ;;  %12493 = vmatprep.mubr.msk.f32.mxu1 %vm13800_vm0, %v13799_v0  ;;  %v5357_v52 = vld [vmem:[#allocation2 + $0x428] sm:$0xff]  ;;  %v5493_v46 = vand.u32 4294901760, %v5492_v38  ;;  %v16817_v55 = vsub.f32 %v5358_v41, %v16793_v11  ;;  %v5526_v47 = vand.u32 4294901760, %v16804_v31  ;;  %v16855_v38 = vsub.f32 %v5355_v59, %v16832_v48 }
 0x6cc   :  { %12450 = vmatprep.subr.mxu0 %v13799_v0  ;;  %12494 = vmatmul.mubr.f32.vlgmr.msra.gmra.mxu1 %v16575_v63  ;;  %v16806_v26 = vand.u32 4294901760, %v5357_v52  ;;  %v5547_v60 = vand.u32 4294901760, %v16843_v43 }
 0x6cd   :  { %12531 = vmatprep.subr.mxu1 %v13799_v0  ;;  %12451 = vmatpush3.msra.mxu0 %v19024_v37  ;;  %v5533_v62 = vand.u32 4294901760, %v16817_v55  ;;  %v5527_v41 = vsub.f32 %v16804_v31, %v5526_v47  ;;  %v5521_v37 = vand.u32 4294901760, %v5520_v16 }
 0x6ce   :  { %12532 = vmatpush3.msra.mxu1 %v5472_v35  ;;  %12452 = vmatprep.subr.mxu0 %v13799_v0  ;;  %v16830_v14 = vsub.f32 %v5357_v52, %v16806_v26  ;;  %v5514_v35 = vand.u32 4294901760, %v5513_v24  ;;  %v16857_v52 = vand.u32 4294901760, %v5353_v54 }
 0x6cf   :  { %12533 = vmatprep.subr.mxu1 %v13799_v0  ;;  %12453 = vmatpush3.msra.mxu0 %v19025_v36  ;;  %v16867_v36 = vsub.f32 %v5354_v45, %v16845_v9  ;;  %v5548_v45 = vsub.f32 %v16843_v43, %v5547_v60 }
 0x6d0   :  { %12534 = vmatpush3.msra.mxu1 %v5479_v39  ;;  %12454 = vmatprep.subr.mxu0 %v13799_v0  ;;  %v5540_v39 = vand.u32 4294901760, %v16830_v14  ;;  %v16879_v50 = vsub.f32 %v5353_v54, %v16857_v52 }
 0x6d1   :  { %12535 = vmatprep.subr.mxu1 %v13799_v0  ;;  %12455 = vmatpush3.msra.mxu0 %v19026_v61  ;;  %v5554_v61 = vand.u32 4294901760, %v16855_v38 }
 0x6d2   :  { %12536 = vmatpush3.msra.mxu1 %v5486_v4  ;;  %12456 = vmatprep.subr.mxu0 %v13799_v0  ;;  %v5534_v4 = vsub.f32 %v16817_v55, %v5533_v62  ;;  %v5541_v59 = vsub.f32 %v16830_v14, %v5540_v39 }
 0x6d3   :  { %12537 = vmatprep.subr.mxu1 %v13799_v0  ;;  %12457 = vmatpush3.msra.mxu0 %v19027_v56  ;;  %v5561_v56 = vand.u32 4294901760, %v16867_v36  ;;  %v5555_v54 = vsub.f32 %v16855_v38, %v5554_v61 }
 0x6d4   :  { %12458 = vmatprep.mubr.msk.f32.mxu0 %vm13800_vm0, %v13799_v0  ;;  %12538 = vmatpush3.msra.mxu1 %v5493_v46  ;;  %v5528_v46 = vand.u32 4294901760, %v5527_v41  ;;  %v5535_v24 = vand.u32 4294901760, %v5534_v4  ;;  %v5542_v16 = vand.u32 4294901760, %v5541_v59 }
 0x6d5   :  { %12459 = vmatmul.mubr.f32.vlgmr.msra.gmra.mxu0 %v16575_v63  ;;  %12496 = vmatprep.subr.mxu0 %v13799_v0 }
 0x6d6   :  { %12539 = vmatprep.subr.mxu1 %v13799_v0  ;;  %12497 = vmatpush3.msra.mxu0 %v16685_v3 }
 0x6d7   :  { %12540 = vmatpush3.msra.mxu1 %v5500_v10  ;;  %12498 = vmatprep.subr.mxu0 %v13799_v0  ;;  %v16889_v10 = vsub.f32 %v5352_v53, %v16869_v51  ;;  %v5562_v53 = vsub.f32 %v16867_v36, %v5561_v56 }
 0x6d8   :  { %12541 = vmatprep.subr.mxu1 %v13799_v0  ;;  %12499 = vmatpush3.msra.mxu0 %v16692_v23 }
 0x6d9   :  { %12542 = vmatpush3.msra.mxu1 %v5507_v7  ;;  %12500 = vmatprep.subr.mxu0 %v13799_v0  ;;  %v5568_v7 = vand.u32 4294901760, %v16879_v50  ;;  %v5575_v41 = vand.u32 4294901760, %v16889_v10 }
 0x6da   :  { %12543 = vmatprep.subr.mxu1 %v13799_v0  ;;  %12501 = vmatpush3.msra.mxu0 %v16702_v13 }
 0x6db   :  { %12544 = vmatpush3.msra.mxu1 %v5514_v35  ;;  %12502 = vmatprep.subr.mxu0 %v13799_v0  ;;  %v5549_v35 = vand.u32 4294901760, %v5548_v45  ;;  %v5569_v4 = vsub.f32 %v16879_v50, %v5568_v7  ;;  %v5576_v59 = vsub.f32 %v16889_v10, %v5575_v41 }
 0x6dc   :  { %12545 = vmatprep.subr.mxu1 %v13799_v0  ;;  %12503 = vmatpush3.msra.mxu0 %v16712_v34 }
 0x6dd   :  { %12546 = vmatpush3.msra.mxu1 %v5521_v37  ;;  %12504 = vmatprep.subr.mxu0 %v13799_v0  ;;  %v5556_v37 = vand.u32 4294901760, %v5555_v54  ;;  %v5577_v45 = vand.u32 4294901760, %v5576_v59 }
 0x6de   :  { %12547 = vmatprep.subr.mxu1 %v13799_v0  ;;  %12505 = vmatpush3.msra.mxu0 %v16725_v57 }
 0x6df   :  { %12548 = vmatpush3.msra.mxu1 %v5528_v46  ;;  %12506 = vmatprep.subr.mxu0 %v13799_v0  ;;  %v5563_v46 = vand.u32 4294901760, %v5562_v53 }
 0x6e0   :  { %12549 = vmatprep.subr.mxu1 %v13799_v0  ;;  %12507 = vmatpush3.msra.mxu0 %v16736_v5 }
 0x6e1   :  { %12550 = vmatpush3.msra.mxu1 %v5535_v24  ;;  %12508 = vmatprep.subr.mxu0 %v13799_v0  ;;  %v5570_v24 = vand.u32 4294901760, %v5569_v4 }
 0x6e2   :  { %12551 = vmatprep.subr.mxu1 %v13799_v0  ;;  %12509 = vmatpush3.msra.mxu0 %v16745_v2 }
 0x6e3   :  { %12552 = vmatpush3.msra.mxu1 %v5542_v16  ;;  %12510 = vmatprep.subr.mxu0 %v13799_v0 }
 0x6e4   :  { %12553 = vmatprep.subr.mxu1 %v13799_v0  ;;  %12511 = vmatpush3.msra.mxu0 %v16759_v42 }
 0x6e5   :  { %12554 = vmatpush3.msra.mxu1 %v5549_v35  ;;  %12512 = vmatprep.subr.mxu0 %v13799_v0  ;;  %v6026_v35 = vld [vmem:[#allocation2 + $0x4b0] sm:$0xff] }
 0x6e6   :  { %12555 = vmatprep.subr.mxu1 %v13799_v0  ;;  %12513 = vmatpush3.msra.mxu0 %v16779_v21  ;;  %v17200_v4 = vand.u32 4294901760, %v6026_v35 }
 0x6e7   :  { %12556 = vmatpush3.msra.mxu1 %v5556_v37  ;;  %12514 = vmatprep.subr.mxu0 %v13799_v0 }
 0x6e8   :  { %12557 = vmatprep.subr.mxu1 %v13799_v0  ;;  %12515 = vmatpush3.msra.mxu0 %v16793_v11 }
 0x6e9   :  { %12558 = vmatpush3.msra.mxu1 %v5563_v46  ;;  %12516 = vmatprep.subr.mxu0 %v13799_v0  ;;  %v6025_v46 = vld [vmem:[#allocation2 + $0x4a8] sm:$0xff] }
 0x6ea   :  { %12559 = vmatprep.subr.mxu1 %v13799_v0  ;;  %12517 = vmatpush3.msra.mxu0 %v16806_v26 }
 0x6eb   :  { %12560 = vmatpush3.msra.mxu1 %v5570_v24  ;;  %12518 = vmatprep.subr.mxu0 %v13799_v0 }
 0x6ec   :  { %12561 = vmatprep.subr.mxu1 %v13799_v0  ;;  %12519 = vmatpush3.msra.mxu0 %v16819_v29 }
 0x6ed   :  { %12562 = vmatpush3.msra.mxu1 %v5577_v45  ;;  %12563 = vmatprep.mubr.msk.f32.mxu1 %vm13800_vm0, %v13799_v0  ;;  %v17210_v45 = vsub.f32 %v6026_v35, %v17200_v4  ;;  %v6020_v35 = vld [vmem:[#allocation2 + $0x480] sm:$0xff] }
 0x6ee   :  { %12520 = vmatprep.subr.mxu0 %v13799_v0  ;;  %12564 = vmatmul.mubr.f32.vlgmr.msra.gmra.mxu1 %v16575_v63 }
 0x6ef   :  { %12601 = vmatprep.subr.mxu1 %v13799_v0  ;;  %12521 = vmatpush3.msra.mxu0 %v16832_v48 }
 0x6f0   :  { %12602 = vmatpush3.msra.mxu1 %v16685_v3  ;;  %12522 = vmatprep.subr.mxu0 %v13799_v0 }
 0x6f1   :  { %12603 = vmatprep.subr.mxu1 %v13799_v0  ;;  %12523 = vmatpush3.msra.mxu0 %v16845_v9 }
 0x6f2   :  { %12604 = vmatpush3.msra.mxu1 %v16692_v23  ;;  %12524 = vmatprep.subr.mxu0 %v13799_v0 }
 0x6f3   :  { %12605 = vmatprep.subr.mxu1 %v13799_v0  ;;  %12525 = vmatpush3.msra.mxu0 %v16857_v52 }
 0x6f4   :  { %12606 = vmatpush3.msra.mxu1 %v16702_v13  ;;  %12526 = vmatprep.subr.mxu0 %v13799_v0 }
 0x6f5   :  { %12607 = vmatprep.subr.mxu1 %v13799_v0  ;;  %12527 = vmatpush3.msra.mxu0 %v16869_v51 }
 0x6f6   :  { %12528 = vmatprep.mubr.msk.f32.mxu0 %vm13800_vm0, %v13799_v0  ;;  %12608 = vmatpush3.msra.mxu1 %v16712_v34 }
 0x6f7   :  { %12529 = vmatmul.mubr.f32.vlgmr.msra.gmra.mxu0 %v16595_v28  ;;  %12566 = vmatprep.subr.mxu0 %v13799_v0 }
 0x6f8   :  { %12609 = vmatprep.subr.mxu1 %v13799_v0  ;;  %12567 = vmatpush3.msra.mxu0 %v16700_v58  ;;  %v6035_v58 = vld [vmem:[#allocation2 + $0x4f8] sm:$0xff] }
 0x6f9   :  { %12610 = vmatpush3.msra.mxu1 %v16725_v57  ;;  %12568 = vmatprep.subr.mxu0 %v13799_v0 }
 0x6fa   :  { %12611 = vmatprep.subr.mxu1 %v13799_v0  ;;  %12569 = vmatpush3.msra.mxu0 %v16710_v25  ;;  %v6034_v25 = vld [vmem:[#allocation2 + $0x4f0] sm:$0xff] }
 0x6fb   :  { %12612 = vmatpush3.msra.mxu1 %v16736_v5  ;;  %12570 = vmatprep.subr.mxu0 %v13799_v0 }
 0x6fc   :  { %12613 = vmatprep.subr.mxu1 %v13799_v0  ;;  %12571 = vmatpush3.msra.mxu0 %v16721_v27  ;;  %v17108_v27 = vand.u32 4294901760, %v6034_v25 }
 0x6fd   :  { %12614 = vmatpush3.msra.mxu1 %v16745_v2  ;;  %12572 = vmatprep.subr.mxu0 %v13799_v0 }
 0x6fe   :  { %12615 = vmatprep.subr.mxu1 %v13799_v0  ;;  %12573 = vmatpush3.msra.mxu0 %v16732_v1  ;;  %v6030_v1 = vld [vmem:[#allocation2 + $0x4d0] sm:$0xff] }
 0x6ff   :  { %12616 = vmatpush3.msra.mxu1 %v16759_v42  ;;  %12574 = vmatprep.subr.mxu0 %v13799_v0 }
 0x700   :  { %12617 = vmatprep.subr.mxu1 %v13799_v0  ;;  %12575 = vmatpush3.msra.mxu0 %v16750_v20  ;;  %v17120_v20 = vand.u32 4294901760, %v6030_v1 }
 0x701   :  { %12618 = vmatpush3.msra.mxu1 %v16779_v21  ;;  %12576 = vmatprep.subr.mxu0 %v13799_v0 }
 0x702   :  { %12619 = vmatprep.subr.mxu1 %v13799_v0  ;;  %12577 = vmatpush3.msra.mxu0 %v16764_v12 }
 0x703   :  { %12620 = vmatpush3.msra.mxu1 %v16793_v11  ;;  %12578 = vmatprep.subr.mxu0 %v13799_v0 }
 0x704   :  { %12621 = vmatprep.subr.mxu1 %v13799_v0  ;;  %12579 = vmatpush3.msra.mxu0 %v16773_v33 }
 0x705   :  { %12622 = vmatpush3.msra.mxu1 %v16806_v26  ;;  %12580 = vmatprep.subr.mxu0 %v13799_v0 }
 0x706   :  { %12623 = vmatprep.subr.mxu1 %v13799_v0  ;;  %12581 = vmatpush3.msra.mxu0 %v16787_v22  ;;  %v17140_v22 = vsub.f32 %v6030_v1, %v17120_v20 }
 0x707   :  { %12624 = vmatpush3.msra.mxu1 %v16819_v29  ;;  %12582 = vmatprep.subr.mxu0 %v13799_v0 }
 0x708   :  { %12625 = vmatprep.subr.mxu1 %v13799_v0  ;;  %12583 = vmatpush3.msra.mxu0 %v16804_v31 }
 0x709   :  { %12626 = vmatpush3.msra.mxu1 %v16832_v48  ;;  %12584 = vmatprep.subr.mxu0 %v13799_v0 }
 0x70a   :  { %12627 = vmatprep.subr.mxu1 %v13799_v0  ;;  %12585 = vmatpush3.msra.mxu0 %v16817_v55 }
 0x70b   :  { %12628 = vmatpush3.msra.mxu1 %v16845_v9  ;;  %12586 = vmatprep.subr.mxu0 %v13799_v0 }
 0x70c   :  { %12629 = vmatprep.subr.mxu1 %v13799_v0  ;;  %12587 = vmatpush3.msra.mxu0 %v16830_v14 }
 0x70d   :  { %12630 = vmatpush3.msra.mxu1 %v16857_v52  ;;  %12588 = vmatprep.subr.mxu0 %v13799_v0 }
 0x70e   :  { %12631 = vmatprep.subr.mxu1 %v13799_v0  ;;  %12589 = vmatpush3.msra.mxu0 %v16843_v43 }
 0x70f   :  { %12632 = vmatpush3.msra.mxu1 %v16869_v51  ;;  %12633 = vmatprep.mubr.msk.f32.mxu1 %vm13800_vm0, %v13799_v0 }
 0x710   :  { %12590 = vmatprep.subr.mxu0 %v13799_v0  ;;  %12634 = vmatmul.mubr.f32.vlgmr.msra.gmra.mxu1 %v16587_v44 }
 0x711   :  { %12671 = vmatprep.subr.mxu1 %v13799_v0  ;;  %12591 = vmatpush3.msra.mxu0 %v16855_v38 }
 0x712   :  { %12672 = vmatpush3.msra.mxu1 %v16685_v3  ;;  %12592 = vmatprep.subr.mxu0 %v13799_v0 }
 0x713   :  { %12673 = vmatprep.subr.mxu1 %v13799_v0  ;;  %12593 = vmatpush3.msra.mxu0 %v16867_v36 }
 0x714   :  { %12674 = vmatpush3.msra.mxu1 %v16692_v23  ;;  %12594 = vmatprep.subr.mxu0 %v13799_v0 }
 0x715   :  { %12675 = vmatprep.subr.mxu1 %v13799_v0  ;;  %12595 = vmatpush3.msra.mxu0 %v16879_v50 }
 0x716   :  { %12676 = vmatpush3.msra.mxu1 %v16702_v13  ;;  %12596 = vmatprep.subr.mxu0 %v13799_v0  ;;  %v17106_v13 = vand.u32 4294901760, %v6035_v58 }
 0x717   :  { %12677 = vmatprep.subr.mxu1 %v13799_v0  ;;  %12597 = vmatpush3.msra.mxu0 %v16889_v10 }
 0x718   :  { %12598 = vmatprep.mubr.msk.f32.mxu0 %vm13800_vm0, %v13799_v0  ;;  %12678 = vmatpush3.msra.mxu1 %v16712_v34  ;;  %v6033_v34 = vld [vmem:[#allocation2 + $0x4e8] sm:$0xff] }
 0x719   :  { %12599 = vmatmul.mubr.f32.vlgmr.msra.gmra.mxu0 %v16579_v6  ;;  %12636 = vmatprep.subr.mxu0 %v13799_v0 }
 0x71a   :  { %12679 = vmatprep.subr.mxu1 %v13799_v0  ;;  %12637 = vmatpush3.msra.mxu0 %v5470_v32  ;;  %v6032_v32 = vld [vmem:[#allocation2 + $0x4e0] sm:$0xff] }
 0x71b   :  { %12680 = vmatpush3.msra.mxu1 %v16725_v57  ;;  %12638 = vmatprep.subr.mxu0 %v13799_v0  ;;  %v17112_v57 = vand.u32 4294901760, %v6032_v32 }
 0x71c   :  { %12681 = vmatprep.subr.mxu1 %v13799_v0  ;;  %12639 = vmatpush3.msra.mxu0 %v5477_v15  ;;  %v6031_v15 = vld [vmem:[#allocation2 + $0x4d8] sm:$0xff] }
 0x71d   :  { %12682 = vmatpush3.msra.mxu1 %v16736_v5  ;;  %12640 = vmatprep.subr.mxu0 %v13799_v0  ;;  %v6029_v5 = vld [vmem:[#allocation2 + $0x4c8] sm:$0xff]  ;;  %v17131_v33 = vsub.f32 %v6032_v32, %v17112_v57  ;;  %v6023_v32 = vld [vmem:[#allocation2 + $0x498] sm:$0xff] }
 0x71e   :  { %12683 = vmatprep.subr.mxu1 %v13799_v0  ;;  %12641 = vmatpush3.msra.mxu0 %v5484_v19  ;;  %v17115_v19 = vsub.f32 %v6035_v58, %v17106_v13  ;;  %v18967_v58 = vand.u32 4294901760, %v17210_v45 }
 0x71f   :  { %12684 = vmatpush3.msra.mxu1 %v16745_v2  ;;  %12642 = vmatprep.subr.mxu0 %v13799_v0  ;;  %v17118_v2 = vand.u32 4294901760, %v6031_v15 }
 0x720   :  { %12685 = vmatprep.subr.mxu1 %v13799_v0  ;;  %12643 = vmatpush3.msra.mxu0 %v5491_v30  ;;  %v17122_v30 = vand.u32 4294901760, %v6029_v5 }
 0x721   :  { %12686 = vmatpush3.msra.mxu1 %v16759_v42  ;;  %12644 = vmatprep.subr.mxu0 %v13799_v0  ;;  %v17125_v42 = vsub.f32 %v6034_v25, %v17108_v27 }
 0x722   :  { %12687 = vmatprep.subr.mxu1 %v13799_v0  ;;  %12645 = vmatpush3.msra.mxu0 %v5498_v40  ;;  %v6138_v40 = vand.u32 4294901760, %v17115_v19 }
 0x723   :  { %12688 = vmatpush3.msra.mxu1 %v16779_v21  ;;  %12646 = vmatprep.subr.mxu0 %v13799_v0  ;;  %v17136_v21 = vsub.f32 %v6031_v15, %v17118_v2 }
 0x724   :  { %12689 = vmatprep.subr.mxu1 %v13799_v0  ;;  %12647 = vmatpush3.msra.mxu0 %v5505_v8  ;;  %v6145_v8 = vand.u32 4294901760, %v17125_v42  ;;  %v6139_v31 = vsub.f32 %v17115_v19, %v6138_v40 }
 0x725   :  { %12690 = vmatpush3.msra.mxu1 %v16793_v11  ;;  %12648 = vmatprep.subr.mxu0 %v13799_v0 }
 0x726   :  { %12691 = vmatprep.subr.mxu1 %v13799_v0  ;;  %12649 = vmatpush3.msra.mxu0 %v5512_v18  ;;  %v6159_v18 = vand.u32 4294901760, %v17131_v33  ;;  %v6146_v55 = vsub.f32 %v17125_v42, %v6145_v8 }
 0x727   :  { %12692 = vmatpush3.msra.mxu1 %v16806_v26  ;;  %12650 = vmatprep.subr.mxu0 %v13799_v0  ;;  %v6166_v26 = vand.u32 4294901760, %v17136_v21 }
 0x728   :  { %12693 = vmatprep.subr.mxu1 %v13799_v0  ;;  %12651 = vmatpush3.msra.mxu0 %v5519_v17  ;;  %v17152_v17 = vsub.f32 %v6029_v5, %v17122_v30  ;;  %v6160_v14 = vsub.f32 %v17131_v33, %v6159_v18  ;;  %v6202_v5 = vsub.f32 %v17210_v45, %v18967_v58 }
 0x729   :  { %12694 = vmatpush3.msra.mxu1 %v16819_v29  ;;  %12652 = vmatprep.subr.mxu0 %v13799_v0 }
 0x72a   :  { %12695 = vmatprep.subr.mxu1 %v13799_v0  ;;  %12653 = vmatpush3.msra.mxu0 %v5526_v47  ;;  %v6140_v47 = vand.u32 4294901760, %v6139_v31  ;;  %v6161_v38 = vand.u32 4294901760, %v6160_v14  ;;  %v6022_v14 = vld [vmem:[#allocation2 + $0x490] sm:$0xff] }
 0x72b   :  { %12696 = vmatpush3.msra.mxu1 %v16832_v48  ;;  %12654 = vmatprep.subr.mxu0 %v13799_v0  ;;  %v6173_v48 = vand.u32 4294901760, %v17140_v22 }
 0x72c   :  { %12697 = vmatprep.subr.mxu1 %v13799_v0  ;;  %12655 = vmatpush3.msra.mxu0 %v5533_v62  ;;  %v6147_v62 = vand.u32 4294901760, %v6146_v55  ;;  %v17233_v55 = vand.u32 4294901760, %v6023_v32 }
 0x72d   :  { %12698 = vmatpush3.msra.mxu1 %v16845_v9  ;;  %12656 = vmatprep.subr.mxu0 %v13799_v0  ;;  %v6167_v9 = vsub.f32 %v17136_v21, %v6166_v26 }
 0x72e   :  { %12699 = vmatprep.subr.mxu1 %v13799_v0  ;;  %12657 = vmatpush3.msra.mxu0 %v5540_v39  ;;  %v6180_v39 = vand.u32 4294901760, %v17152_v17 }
 0x72f   :  { %12700 = vmatpush3.msra.mxu1 %v16857_v52  ;;  %12658 = vmatprep.subr.mxu0 %v13799_v0  ;;  %v6174_v52 = vsub.f32 %v17140_v22, %v6173_v48  ;;  %v6168_v36 = vand.u32 4294901760, %v6167_v9 }
 0x730   :  { %12701 = vmatprep.subr.mxu1 %v13799_v0  ;;  %12659 = vmatpush3.msra.mxu0 %v5547_v60  ;;  %v6028_v60 = vld [vmem:[#allocation2 + $0x4c0] sm:$0xff] }
 0x731   :  { %12702 = vmatpush3.msra.mxu1 %v16869_v51  ;;  %12703 = vmatprep.mubr.msk.f32.mxu1 %vm13800_vm0, %v13799_v0  ;;  %v6181_v51 = vsub.f32 %v17152_v17, %v6180_v39  ;;  %v6175_v10 = vand.u32 4294901760, %v6174_v52  ;;  %v17247_v52 = vand.u32 4294901760, %v6022_v14 }
 0x732   :  { %12660 = vmatprep.subr.mxu0 %v13799_v0  ;;  %12704 = vmatmul.mubr.f32.vlgmr.msra.gmra.mxu1 %v16575_v63 }
 0x733   :  { %12661 = vmatpush3.msra.mxu0 %v5554_v61  ;;  %12668 = vmatprep.mubr.msk.f32.mxu0 %vm13800_vm0, %v13799_v0  ;;  %v17183_v61 = vand.u32 4294901760, %v6028_v60  ;;  %v6182_v53 = vand.u32 4294901760, %v6181_v51 }
 0x734   :  { %12662 = vmatprep.subr.mxu0 %v13799_v0  ;;  %12741 = vmatprep.subr.mxu1 %v13799_v0 }
 0x735   :  { %12663 = vmatpush3.msra.mxu0 %v5561_v56  ;;  %12773 = vmatprep.mubr.msk.f32.mxu1 %vm13800_vm0, %v13799_v0  ;;  %v6027_v56 = vld [vmem:[#allocation2 + $0x4b8] sm:$0xff]  ;;  %v17189_v16 = vsub.f32 %v6028_v60, %v17183_v61 }
 0x736   :  { %12664 = vmatprep.subr.mxu0 %v13799_v0  ;;  %12742 = vmatpush3.msra.mxu1 %v6140_v47  ;;  %v17191_v54 = vand.u32 4294901760, %v6027_v56 }
 0x737   :  { %12665 = vmatpush3.msra.mxu0 %v5568_v7  ;;  %12743 = vmatprep.subr.mxu1 %v13799_v0 }
 0x738   :  { %12666 = vmatprep.subr.mxu0 %v13799_v0  ;;  %12744 = vmatpush3.msra.mxu1 %v6147_v62  ;;  %v17198_v37 = vsub.f32 %v6027_v56, %v17191_v54 }
 0x739   :  { %12667 = vmatpush3.msra.mxu0 %v5575_v41  ;;  %12745 = vmatprep.subr.mxu1 %v13799_v0  ;;  %v6187_v41 = vand.u32 4294901760, %v17189_v16 }
 0x73a   :  { %12669 = vmatmul.mubr.f32.vlgmr.msra.gmra.mxu0 %v16575_v63  ;;  %12706 = vmatprep.subr.mxu0 %v13799_v0  ;;  %v17110_v63 = vand.u32 4294901760, %v6033_v34  ;;  %v6194_v24 = vand.u32 4294901760, %v17198_v37 }
 0x73b   :  { %12738 = vmatprep.mubr.msk.f32.mxu0 %vm13800_vm0, %v13799_v0  ;;  %12707 = vmatpush3.msra.mxu0 %v17106_v13  ;;  %v6188_v59 = vsub.f32 %v17189_v16, %v6187_v41 }
 0x73c   :  { %v17128_v12 = vsub.f32 %v6033_v34, %v17110_v63  ;;  %12708 = vmatprep.subr.mxu0 %v13799_v0 }
 0x73d   :  { %12709 = vmatpush3.msra.mxu0 %v17108_v27 }
 0x73e   :  { %v6152_v11 = vand.u32 4294901760, %v17128_v12  ;;  %12710 = vmatprep.subr.mxu0 %v13799_v0 }
 0x73f   :  { %12711 = vmatpush3.msra.mxu0 %v17110_v63 }
 0x740   :  { %v6153_v29 = vsub.f32 %v17128_v12, %v6152_v11  ;;  %12712 = vmatprep.subr.mxu0 %v13799_v0 }
 0x741   :  { %12713 = vmatpush3.msra.mxu0 %v17112_v57 }
 0x742   :  { %12714 = vmatprep.subr.mxu0 %v13799_v0  ;;  %v6154_v43 = vand.u32 4294901760, %v6153_v29 }
 0x743   :  { %12715 = vmatpush3.msra.mxu0 %v17118_v2 }
 0x744   :  { %12716 = vmatprep.subr.mxu0 %v13799_v0  ;;  %12746 = vmatpush3.msra.mxu1 %v6154_v43  ;;  %v6203_v43 = vand.u32 4294901760, %v6202_v5 }
 0x745   :  { %12717 = vmatpush3.msra.mxu0 %v17120_v20  ;;  %12747 = vmatprep.subr.mxu1 %v13799_v0 }
 0x746   :  { %12718 = vmatprep.subr.mxu0 %v13799_v0  ;;  %12748 = vmatpush3.msra.mxu1 %v6161_v38  ;;  %v17245_v38 = vsub.f32 %v6023_v32, %v17233_v55 }
 0x747   :  { %12719 = vmatpush3.msra.mxu0 %v17122_v30  ;;  %12749 = vmatprep.subr.mxu1 %v13799_v0 }
 0x748   :  { %12720 = vmatprep.subr.mxu0 %v13799_v0  ;;  %12750 = vmatpush3.msra.mxu1 %v6168_v36  ;;  %v6021_v36 = vld [vmem:[#allocation2 + $0x488] sm:$0xff]  ;;  %v18964_v56 = vand.u32 4294901760, %v17245_v38 }
 0x749   :  { %12721 = vmatpush3.msra.mxu0 %v17183_v61  ;;  %12751 = vmatprep.subr.mxu1 %v13799_v0 }
 0x74a   :  { %v4948_v6 = vpop.f32.mrf.mxu1  ;;  %12722 = vmatprep.subr.mxu0 %v13799_v0  ;;  %12752 = vmatpush3.msra.mxu1 %v6175_v10  ;;  %v17255_v10 = vsub.f32 %v6022_v14, %v17247_v52 }
 0x74b   :  { %12723 = vmatpush3.msra.mxu0 %v17191_v54  ;;  %12753 = vmatprep.subr.mxu1 %v13799_v0 }
 0x74c   :  { %v12355_v44 = vpop.f32.mrf.mxu1  ;;  %12724 = vmatprep.subr.mxu0 %v13799_v0  ;;  %12754 = vmatpush3.msra.mxu1 %v6182_v53  ;;  %v6223_v53 = vsub.f32 %v17245_v38, %v18964_v56 }
 0x74d   :  { %12725 = vmatpush3.msra.mxu0 %v17200_v4  ;;  %v6024_v44 = vld [vmem:[#allocation2 + $0x4a0] sm:$0xff]  ;;  %12755 = vmatprep.subr.mxu1 %v13799_v0 }
 0x74e   :  { %12726 = vmatprep.subr.mxu0 %v13799_v0  ;;  %v17226_v34 = vand.u32 4294901760, %v6024_v44 }
 0x750   :  { %v17238_v47 = vsub.f32 %v6024_v44, %v17226_v34  ;;  %v17272_v44 = vand.u32 4294901760, %v6020_v35 }
 0x752   :  { %v4797_v28 = vpop.f32.mrf.mxu0  ;;  %v18965_v60 = vand.u32 4294901760, %v17238_v47 }
 0x753   :  { %v17104_v3 = vadd.f32 %v4948_v6, %v4797_v28  ;;  %v17212_v6 = vand.u32 4294901760, %v6025_v46  ;;  %v6189_v28 = vand.u32 4294901760, %v6188_v59 }
 0x754   :  { %v12320_v23 = vpop.f32.mrf.mxu0 }
 0x755   :  { %v6195_v23 = vsub.f32 %v17198_v37, %v6194_v24  ;;  %v17222_v25 = vsub.f32 %v6025_v46, %v17212_v6  ;;  %12727 = vmatpush3.msra.mxu0 %v17212_v6  ;;  %12756 = vmatpush3.msra.mxu1 %v6189_v28  ;;  %v18963_v46 = vand.u32 4294901760, %v17255_v10 }
 0x756   :  { %12728 = vmatprep.subr.mxu0 %v13799_v0  ;;  %12757 = vmatprep.subr.mxu1 %v13799_v0 }
 0x757   :  { %v6196_v1 = vand.u32 4294901760, %v6195_v23  ;;  %v18966_v31 = vand.u32 4294901760, %v17222_v25  ;;  %12729 = vmatpush3.msra.mxu0 %v17226_v34  ;;  %v6224_v23 = vand.u32 4294901760, %v6223_v53  ;;  %v6230_v32 = vsub.f32 %v17255_v10, %v18963_v46 }
 0x758   :  { %12730 = vmatprep.subr.mxu0 %v13799_v0 }
 0x759   :  { %12758 = vmatpush3.msra.mxu1 %v6196_v1  ;;  %v6209_v9 = vsub.f32 %v17222_v25, %v18966_v31  ;;  %12731 = vmatpush3.msra.mxu0 %v17233_v55  ;;  %v17282_v1 = vsub.f32 %v6020_v35, %v17272_v44  ;;  %v6231_v5 = vand.u32 4294901760, %v6230_v32 }
 0x75a   :  { %12759 = vmatprep.subr.mxu1 %v13799_v0  ;;  %12732 = vmatprep.subr.mxu0 %v13799_v0 }
 0x75b   :  { %12760 = vmatpush3.msra.mxu1 %v6203_v43  ;;  %v6210_v51 = vand.u32 4294901760, %v6209_v9  ;;  %12733 = vmatpush3.msra.mxu0 %v17247_v52  ;;  %v18961_v14 = vand.u32 4294901760, %v17282_v1 }
 0x75c   :  { %12761 = vmatprep.subr.mxu1 %v13799_v0  ;;  %12734 = vmatprep.subr.mxu0 %v13799_v0 }
 0x75d   :  { %12762 = vmatpush3.msra.mxu1 %v6210_v51  ;;  %v6244_v43 = vsub.f32 %v17282_v1, %v18961_v14 }
 0x75e   :  { %12763 = vmatprep.subr.mxu1 %v13799_v0 }
 0x75f   :  { %v6245_v9 = vand.u32 4294901760, %v6244_v43 }
 0x76a   :  { %v5141_v50 = vpop.f32.mrf.mxu1 }
 0x76c   :  { %v12425_v7 = vpop.f32.mrf.mxu1 }
 0x76d   :  { %v17257_v7 = vand.u32 4294901760, %v6021_v36 }
 0x76f   :  { %v17270_v59 = vsub.f32 %v6021_v36, %v17257_v7  ;;  %12735 = vmatpush3.msra.mxu0 %v17257_v7 }
 0x770   :  { %12736 = vmatprep.subr.mxu0 %v13799_v0 }
 0x771   :  { %12737 = vmatpush3.msra.mxu0 %v17272_v44 }
 0x772   :  { %12776 = vmatprep.subr.mxu0 %v13799_v0 }
 0x773   :  { %v5052_v15 = vpop.f32.mrf.mxu0 }
 0x774   :  { %v5053_v29 = vadd.f32 %v5052_v15, %v17104_v3  ;;  %v18962_v15 = vand.u32 4294901760, %v17270_v59 }
 0x775   :  { %v12390_v62 = vpop.f32.mrf.mxu0 }
 0x776   :  { %v5142_v3 = vadd.f32 %v5141_v50, %v5053_v29  ;;  %v6216_v50 = vsub.f32 %v17238_v47, %v18965_v60  ;;  %v6237_v29 = vsub.f32 %v17270_v59, %v18962_v15 }
 0x778   :  { %v6217_v28 = vand.u32 4294901760, %v6216_v50  ;;  %v6238_v62 = vand.u32 4294901760, %v6237_v29 }
 0x77a   :  { %12764 = vmatpush3.msra.mxu1 %v6217_v28 }
 0x77b   :  { %12765 = vmatprep.subr.mxu1 %v13799_v0 }
 0x77c   :  { %12766 = vmatpush3.msra.mxu1 %v6224_v23 }
 0x77d   :  { %12767 = vmatprep.subr.mxu1 %v13799_v0 }
 0x77e   :  { %12768 = vmatpush3.msra.mxu1 %v6231_v5 }
 0x77f   :  { %12769 = vmatprep.subr.mxu1 %v13799_v0 }
 0x780   :  { %12770 = vmatpush3.msra.mxu1 %v6238_v62 }
 0x781   :  { %12771 = vmatprep.subr.mxu1 %v13799_v0 }
 0x782   :  { %12772 = vmatpush3.msra.mxu1 %v6245_v9  ;;  %v9377_v9 = vld [vmem:[%s18925_s2 + $0x6] ss:$0 sm:$0xff] }
 0x783   :  { %12811 = vmatprep.subr.mxu1 %v13799_v0 }
 0x78c   :  { %v5347_v36 = vpop.f32.mrf.mxu1 }
 0x78e   :  { %v12495_v51 = vpop.f32.mrf.mxu1 }
 0x795   :  { %v5260_v50 = vpop.f32.mrf.mxu0 }
 0x796   :  { %v5261_v35 = vadd.f32 %v5260_v50, %v5142_v3 }
 0x797   :  { %v12460_v53 = vpop.f32.mrf.mxu0 }
 0x798   :  { %v17299_v28 = vadd.f32 %v5347_v36, %v5261_v35 }
 0x7ae   :  { %v5614_v23 = vpop.f32.mrf.mxu1 }
 0x7b0   :  { %v12565_v32 = vpop.f32.mrf.mxu1 }
 0x7b7   :  { %v5463_v29 = vpop.f32.mrf.mxu0 }
 0x7b8   :  { %v5464_v46 = vadd.f32 %v9377_v9, %v5463_v29  ;;  %v6697_v29 = vld [vmem:[#allocation2 + $0x538] sm:$0xff] }
 0x7b9   :  { %v12530_v5 = vpop.f32.mrf.mxu0 }
 0x7ba   :  { %v5615_v51 = vadd.f32 %v5614_v23, %v5464_v46  ;;  %v6698_v46 = vld [vmem:[#allocation2 + $0x540] sm:$0xff] }
 0x7d0   :  { %v5807_v14 = vpop.f32.mrf.mxu1 }
 0x7d2   :  { %v12635_v15 = vpop.f32.mrf.mxu1 }
 0x7d9   :  { %v5718_v43 = vpop.f32.mrf.mxu0 }
 0x7da   :  { %v5719_v3 = vadd.f32 %v5718_v43, %v5615_v51  ;;  %v17552_v51 = vand.u32 4294901760, %v6697_v29 }
 0x7db   :  { %v12600_v62 = vpop.f32.mrf.mxu0 }
 0x7dc   :  { %v5808_v50 = vadd.f32 %v5807_v14, %v5719_v3  ;;  %v17537_v14 = vand.u32 4294901760, %v6698_v46 }
 0x7de   :  { %v17550_v9 = vsub.f32 %v6698_v46, %v17537_v14 }
 0x7f2   :  { %v6013_v56 = vpop.f32.mrf.mxu1 }
 0x7f4   :  { %v12705_v60 = vpop.f32.mrf.mxu1 }
 0x7fa   :  { %v5926_v36 = vpop.f32.mrf.mxu0 }
 0x7fb   :  { %v5927_v35 = vadd.f32 %v5926_v36, %v5808_v50  ;;  %v6696_v50 = vld [vmem:[#allocation2 + $0x530] sm:$0xff] }
 0x7fc   :  { %v12670_v53 = vpop.f32.mrf.mxu0 }
 0x7fd   :  { %v6014_v32 = vadd.f32 %v6013_v56, %v5927_v35  ;;  %v6857_v53 = vand.u32 4294901760, %v17550_v9 }
 0x7ff   :  { %v6017_v31 = vmul.f32 0.01, %v6014_v32 }
 0x801   :  { %v6018_v5 = vmax.f32 %v6014_v32, %v6017_v31  ;;  %v17562_v32 = vsub.f32 %v6697_v29, %v17552_v51 }
 0x803   :  { %v17304_v58 = vand.u32 4294901760, %v6018_v5 }
 0x805   :  { %v17307_v15 = vsub.f32 %v6018_v5, %v17304_v58  ;;  %12774 = vmatmul.mubr.f32.vlgmr.msra.gmra.mxu1 %v17304_v58  ;;  %v17565_v5 = vand.u32 4294901760, %v6696_v50 }
 0x806   :  { %12812 = vmatpush3.msra.mxu1 %v17106_v13  ;;  %12843 = vmatprep.mubr.msk.f32.mxu1 %vm13800_vm0, %v13799_v0 }
 0x807   :  { %12813 = vmatprep.subr.mxu1 %v13799_v0  ;;  %v6127_v60 = vand.u32 4294901760, %v17307_v15 }
 0x808   :  { %12814 = vmatpush3.msra.mxu1 %v17108_v27 }
 0x809   :  { %12815 = vmatprep.subr.mxu1 %v13799_v0  ;;  %v6128_v31 = vsub.f32 %v17307_v15, %v6127_v60 }
 0x80a   :  { %12816 = vmatpush3.msra.mxu1 %v17110_v63 }
 0x80b   :  { %12817 = vmatprep.subr.mxu1 %v13799_v0  ;;  %v6129_v56 = vand.u32 4294901760, %v6128_v31  ;;  %v6858_v31 = vsub.f32 %v17550_v9, %v6857_v53 }
 0x80c   :  { %12818 = vmatpush3.msra.mxu1 %v17112_v57 }
 0x80d   :  { %12819 = vmatprep.subr.mxu1 %v13799_v0  ;;  %12739 = vmatmul.mubr.f32.vlgmr.msra.gmra.mxu0 %v6129_v56  ;;  %v6864_v56 = vand.u32 4294901760, %v17562_v32 }
 0x80e   :  { %12777 = vmatpush3.msra.mxu0 %v17115_v19  ;;  %12820 = vmatpush3.msra.mxu1 %v17118_v2  ;;  %v19032_v19 = vand.u32 4294901760, %v17255_v10 }
 0x80f   :  { %12778 = vmatprep.subr.mxu0 %v13799_v0  ;;  %12821 = vmatprep.subr.mxu1 %v13799_v0 }
 0x810   :  { %12779 = vmatpush3.msra.mxu0 %v17125_v42  ;;  %12822 = vmatpush3.msra.mxu1 %v17120_v20 }
 0x811   :  { %12780 = vmatprep.subr.mxu0 %v13799_v0  ;;  %12823 = vmatprep.subr.mxu1 %v13799_v0 }
 0x812   :  { %12781 = vmatpush3.msra.mxu0 %v17128_v12  ;;  %12824 = vmatpush3.msra.mxu1 %v17122_v30  ;;  %v6704_v12 = vld [vmem:[#allocation2 + $0x570] sm:$0xff] }
 0x813   :  { %12782 = vmatprep.subr.mxu0 %v13799_v0  ;;  %12825 = vmatprep.subr.mxu1 %v13799_v0 }
 0x814   :  { %12783 = vmatpush3.msra.mxu0 %v17131_v33  ;;  %12826 = vmatpush3.msra.mxu1 %v17183_v61 }
 0x815   :  { %12784 = vmatprep.subr.mxu0 %v13799_v0  ;;  %12827 = vmatprep.subr.mxu1 %v13799_v0 }
 0x816   :  { %12785 = vmatpush3.msra.mxu0 %v17136_v21  ;;  %12828 = vmatpush3.msra.mxu1 %v17191_v54  ;;  %v6703_v21 = vld [vmem:[#allocation2 + $0x568] sm:$0xff] }
 0x817   :  { %12786 = vmatprep.subr.mxu0 %v13799_v0  ;;  %12829 = vmatprep.subr.mxu1 %v13799_v0 }
 0x818   :  { %12787 = vmatpush3.msra.mxu0 %v17140_v22  ;;  %12830 = vmatpush3.msra.mxu1 %v17200_v4 }
 0x819   :  { %12788 = vmatprep.subr.mxu0 %v13799_v0  ;;  %12831 = vmatprep.subr.mxu1 %v13799_v0 }
 0x81a   :  { %12789 = vmatpush3.msra.mxu0 %v17152_v17  ;;  %12832 = vmatpush3.msra.mxu1 %v17212_v6 }
 0x81b   :  { %12790 = vmatprep.subr.mxu0 %v13799_v0  ;;  %12833 = vmatprep.subr.mxu1 %v13799_v0 }
 0x81c   :  { %12791 = vmatpush3.msra.mxu0 %v17189_v16  ;;  %12834 = vmatpush3.msra.mxu1 %v17226_v34 }
 0x81d   :  { %12792 = vmatprep.subr.mxu0 %v13799_v0  ;;  %12835 = vmatprep.subr.mxu1 %v13799_v0 }
 0x81e   :  { %12793 = vmatpush3.msra.mxu0 %v17198_v37  ;;  %12836 = vmatpush3.msra.mxu1 %v17233_v55 }
 0x81f   :  { %12794 = vmatprep.subr.mxu0 %v13799_v0  ;;  %12837 = vmatprep.subr.mxu1 %v13799_v0 }
 0x820   :  { %12795 = vmatpush3.msra.mxu0 %v17210_v45  ;;  %12838 = vmatpush3.msra.mxu1 %v17247_v52 }
 0x821   :  { %12796 = vmatprep.subr.mxu0 %v13799_v0  ;;  %12839 = vmatprep.subr.mxu1 %v13799_v0 }
 0x822   :  { %12797 = vmatpush3.msra.mxu0 %v17222_v25  ;;  %12840 = vmatpush3.msra.mxu1 %v17257_v7 }
 0x823   :  { %12798 = vmatprep.subr.mxu0 %v13799_v0  ;;  %12841 = vmatprep.subr.mxu1 %v13799_v0 }
 0x824   :  { %12799 = vmatpush3.msra.mxu0 %v17238_v47  ;;  %12842 = vmatpush3.msra.mxu1 %v17272_v44 }
 0x825   :  { %12800 = vmatprep.subr.mxu0 %v13799_v0  ;;  %12844 = vmatmul.mubr.f32.vlgmr.msra.gmra.mxu1 %v6127_v60 }
 0x826   :  { %12881 = vmatprep.subr.mxu1 %v13799_v0  ;;  %12801 = vmatpush3.msra.mxu0 %v17245_v38 }
 0x827   :  { %12882 = vmatpush3.msra.mxu1 %v17106_v13  ;;  %12802 = vmatprep.subr.mxu0 %v13799_v0  ;;  %v19028_v13 = vand.u32 4294901760, %v17210_v45 }
 0x828   :  { %12883 = vmatprep.subr.mxu1 %v13799_v0  ;;  %12803 = vmatpush3.msra.mxu0 %v17255_v10 }
 0x829   :  { %12884 = vmatpush3.msra.mxu1 %v17108_v27  ;;  %12804 = vmatprep.subr.mxu0 %v13799_v0  ;;  %v19029_v27 = vand.u32 4294901760, %v17222_v25 }
 0x82a   :  { %12885 = vmatprep.subr.mxu1 %v13799_v0  ;;  %12805 = vmatpush3.msra.mxu0 %v17270_v59 }
 0x82b   :  { %12886 = vmatpush3.msra.mxu1 %v17110_v63  ;;  %12806 = vmatprep.subr.mxu0 %v13799_v0  ;;  %v19030_v63 = vand.u32 4294901760, %v17238_v47 }
 0x82c   :  { %12887 = vmatprep.subr.mxu1 %v13799_v0  ;;  %12807 = vmatpush3.msra.mxu0 %v17282_v1 }
 0x82d   :  { %12808 = vmatprep.mubr.msk.f32.mxu0 %vm13800_vm0, %v13799_v0  ;;  %12888 = vmatpush3.msra.mxu1 %v17112_v57  ;;  %v19031_v57 = vand.u32 4294901760, %v17245_v38 }
 0x82e   :  { %12809 = vmatmul.mubr.f32.vlgmr.msra.gmra.mxu0 %v17307_v15  ;;  %12846 = vmatprep.subr.mxu0 %v13799_v0  ;;  %v6695_v15 = vld [vmem:[#allocation2 + $0x528] sm:$0xff] }
 0x82f   :  { %12889 = vmatprep.subr.mxu1 %v13799_v0  ;;  %12847 = vmatpush3.msra.mxu0 %v6138_v40  ;;  %v17476_v40 = vand.u32 4294901760, %v6704_v12 }
 0x830   :  { %12890 = vmatpush3.msra.mxu1 %v17118_v2  ;;  %12848 = vmatprep.subr.mxu0 %v13799_v0  ;;  %v19033_v2 = vand.u32 4294901760, %v17270_v59 }
 0x831   :  { %12891 = vmatprep.subr.mxu1 %v13799_v0  ;;  %12849 = vmatpush3.msra.mxu0 %v6145_v8  ;;  %v17482_v8 = vsub.f32 %v6704_v12, %v17476_v40  ;;  %v6693_v12 = vld [vmem:[#allocation2 + $0x518] sm:$0xff] }
 0x832   :  { %12892 = vmatpush3.msra.mxu1 %v17120_v20  ;;  %12850 = vmatprep.subr.mxu0 %v13799_v0  ;;  %v19034_v20 = vand.u32 4294901760, %v17282_v1 }
 0x833   :  { %12893 = vmatprep.subr.mxu1 %v13799_v0  ;;  %12851 = vmatpush3.msra.mxu0 %v6152_v11  ;;  %v17484_v11 = vand.u32 4294901760, %v6703_v21  ;;  %v6815_v17 = vand.u32 4294901760, %v17482_v8 }
 0x834   :  { %12894 = vmatpush3.msra.mxu1 %v17122_v30  ;;  %12852 = vmatprep.subr.mxu0 %v13799_v0  ;;  %v6705_v30 = vld [vmem:[#allocation2 + $0x578] sm:$0xff] }
 0x835   :  { %12895 = vmatprep.subr.mxu1 %v13799_v0  ;;  %12853 = vmatpush3.msra.mxu0 %v6159_v18  ;;  %v17471_v42 = vand.u32 4294901760, %v6705_v30  ;;  %v6702_v18 = vld [vmem:[#allocation2 + $0x560] sm:$0xff] }
 0x836   :  { %12896 = vmatpush3.msra.mxu1 %v17183_v61  ;;  %12854 = vmatprep.subr.mxu0 %v13799_v0  ;;  %v6701_v61 = vld [vmem:[#allocation2 + $0x558] sm:$0xff] }
 0x837   :  { %12897 = vmatprep.subr.mxu1 %v13799_v0  ;;  %12855 = vmatpush3.msra.mxu0 %v6166_v26  ;;  %v17474_v33 = vsub.f32 %v6705_v30, %v17471_v42 }
 0x838   :  { %12898 = vmatpush3.msra.mxu1 %v17191_v54  ;;  %12856 = vmatprep.subr.mxu0 %v13799_v0  ;;  %v6816_v54 = vsub.f32 %v17482_v8, %v6815_v17 }
 0x839   :  { %12899 = vmatprep.subr.mxu1 %v13799_v0  ;;  %12857 = vmatpush3.msra.mxu0 %v6173_v48  ;;  %v6808_v22 = vand.u32 4294901760, %v17474_v33  ;;  %v17493_v48 = vsub.f32 %v6703_v21, %v17484_v11 }
 0x83a   :  { %12900 = vmatpush3.msra.mxu1 %v17200_v4  ;;  %12858 = vmatprep.subr.mxu0 %v13799_v0  ;;  %v17507_v4 = vand.u32 4294901760, %v6701_v61  ;;  %v6817_v45 = vand.u32 4294901760, %v6816_v54  ;;  %v6692_v54 = vld [vmem:[#allocation2 + $0x510] sm:$0xff] }
 0x83b   :  { %12901 = vmatprep.subr.mxu1 %v13799_v0  ;;  %12859 = vmatpush3.msra.mxu0 %v6180_v39  ;;  %v6809_v26 = vsub.f32 %v17474_v33, %v6808_v22  ;;  %v17495_v39 = vand.u32 4294901760, %v6702_v18 }
 0x83c   :  { %12902 = vmatpush3.msra.mxu1 %v17212_v6  ;;  %12860 = vmatprep.subr.mxu0 %v13799_v0 }
 0x83d   :  { %12903 = vmatprep.subr.mxu1 %v13799_v0  ;;  %12861 = vmatpush3.msra.mxu0 %v6187_v41  ;;  %v6810_v16 = vand.u32 4294901760, %v6809_v26  ;;  %v6822_v41 = vand.u32 4294901760, %v17493_v48  ;;  %v17504_v37 = vsub.f32 %v6702_v18, %v17495_v39 }
 0x83e   :  { %12904 = vmatpush3.msra.mxu1 %v17226_v34  ;;  %12862 = vmatprep.subr.mxu0 %v13799_v0  ;;  %v17518_v34 = vsub.f32 %v6701_v61, %v17507_v4  ;;  %v17597_v61 = vand.u32 4294901760, %v6693_v12 }
 0x83f   :  { %12905 = vmatprep.subr.mxu1 %v13799_v0  ;;  %12863 = vmatpush3.msra.mxu0 %v6194_v24  ;;  %v6700_v24 = vld [vmem:[#allocation2 + $0x550] sm:$0xff]  ;;  %v6823_v6 = vsub.f32 %v17493_v48, %v6822_v41 }
 0x840   :  { %12906 = vmatpush3.msra.mxu1 %v17233_v55  ;;  %12864 = vmatprep.subr.mxu0 %v13799_v0  ;;  %v17514_v25 = vand.u32 4294901760, %v6700_v24  ;;  %v6699_v55 = vld [vmem:[#allocation2 + $0x548] sm:$0xff] }
 0x841   :  { %12907 = vmatprep.subr.mxu1 %v13799_v0  ;;  %12865 = vmatpush3.msra.mxu0 %v19028_v13  ;;  %v6824_v47 = vand.u32 4294901760, %v6823_v6  ;;  %v17527_v10 = vand.u32 4294901760, %v6699_v55  ;;  %v17573_v13 = vand.u32 4294901760, %v6695_v15  ;;  %v17610_v6 = vsub.f32 %v6693_v12, %v17597_v61 }
 0x842   :  { %12908 = vmatpush3.msra.mxu1 %v17247_v52  ;;  %12866 = vmatprep.subr.mxu0 %v13799_v0  ;;  %v17525_v52 = vsub.f32 %v6700_v24, %v17514_v25 }
 0x843   :  { %12909 = vmatprep.subr.mxu1 %v13799_v0  ;;  %12867 = vmatpush3.msra.mxu0 %v19029_v27  ;;  %v17535_v1 = vsub.f32 %v6699_v55, %v17527_v10  ;;  %v17577_v27 = vsub.f32 %v6696_v50, %v17565_v5  ;;  %v17612_v55 = vand.u32 4294901760, %v6692_v54 }
 0x844   :  { %12910 = vmatpush3.msra.mxu1 %v17257_v7  ;;  %12868 = vmatprep.subr.mxu0 %v13799_v0  ;;  %v6836_v7 = vand.u32 4294901760, %v17518_v34 }
 0x845   :  { %12911 = vmatprep.subr.mxu1 %v13799_v0  ;;  %12869 = vmatpush3.msra.mxu0 %v19030_v63  ;;  %v6850_v62 = vand.u32 4294901760, %v17535_v1  ;;  %v6694_v63 = vld [vmem:[#allocation2 + $0x520] sm:$0xff]  ;;  %v18974_v30 = vand.u32 4294901760, %v17577_v27  ;;  %v17622_v29 = vsub.f32 %v6692_v54, %v17612_v55 }
 0x846   :  { %12912 = vmatpush3.msra.mxu1 %v17272_v44  ;;  %12913 = vmatprep.mubr.msk.f32.mxu1 %vm13800_vm0, %v13799_v0  ;;  %v6843_v44 = vand.u32 4294901760, %v17525_v52  ;;  %v6837_v23 = vsub.f32 %v17518_v34, %v6836_v7 }
 0x847   :  { %12870 = vmatprep.subr.mxu0 %v13799_v0  ;;  %12914 = vmatmul.mubr.f32.vlgmr.msra.gmra.mxu1 %v17304_v58  ;;  %v6851_v35 = vsub.f32 %v17535_v1, %v6850_v62 }
 0x848   :  { %12871 = vmatpush3.msra.mxu0 %v19031_v57  ;;  %12878 = vmatprep.mubr.msk.f32.mxu0 %vm13800_vm0, %v13799_v0  ;;  %v6844_v43 = vsub.f32 %v17525_v52, %v6843_v44  ;;  %v6838_v3 = vand.u32 4294901760, %v6837_v23  ;;  %v6859_v57 = vand.u32 4294901760, %v6858_v31  ;;  %v18971_v23 = vand.u32 4294901760, %v17610_v6 }
 0x849   :  { %12872 = vmatprep.subr.mxu0 %v13799_v0  ;;  %12951 = vmatprep.subr.mxu1 %v13799_v0  ;;  %v6852_v60 = vand.u32 4294901760, %v6851_v35  ;;  %v18970_v35 = vand.u32 4294901760, %v17622_v29 }
 0x84a   :  { %12873 = vmatpush3.msra.mxu0 %v19032_v19  ;;  %12983 = vmatprep.mubr.msk.f32.mxu1 %vm13800_vm0, %v13799_v0  ;;  %v6845_v36 = vand.u32 4294901760, %v6844_v43  ;;  %v6865_v19 = vsub.f32 %v17562_v32, %v6864_v56 }
 0x84b   :  { %12874 = vmatprep.subr.mxu0 %v13799_v0  ;;  %12952 = vmatpush3.msra.mxu1 %v6810_v16  ;;  %v6872_v16 = vsub.f32 %v17577_v27, %v18974_v30 }
 0x84c   :  { %12875 = vmatpush3.msra.mxu0 %v19033_v2  ;;  %12953 = vmatprep.subr.mxu1 %v13799_v0  ;;  %v17585_v2 = vsub.f32 %v6695_v15, %v17573_v13  ;;  %v6866_v21 = vand.u32 4294901760, %v6865_v19 }
 0x84d   :  { %12876 = vmatprep.subr.mxu0 %v13799_v0  ;;  %12954 = vmatpush3.msra.mxu1 %v6817_v45 }
 0x84e   :  { %12877 = vmatpush3.msra.mxu0 %v19034_v20  ;;  %12955 = vmatprep.subr.mxu1 %v13799_v0  ;;  %v17587_v20 = vand.u32 4294901760, %v6694_v63  ;;  %v18973_v18 = vand.u32 4294901760, %v17585_v2 }
 0x84f   :  { %12879 = vmatmul.mubr.f32.vlgmr.msra.gmra.mxu0 %v17304_v58  ;;  %12916 = vmatprep.subr.mxu0 %v13799_v0  ;;  %v6829_v58 = vand.u32 4294901760, %v17504_v37 }
 0x850   :  { %12948 = vmatprep.mubr.msk.f32.mxu0 %vm13800_vm0, %v13799_v0  ;;  %12917 = vmatpush3.msra.mxu0 %v17471_v42  ;;  %v17595_v26 = vsub.f32 %v6694_v63, %v17587_v20  ;;  %v6879_v24 = vsub.f32 %v17585_v2, %v18973_v18  ;;  %v6900_v63 = vsub.f32 %v17622_v29, %v18970_v35 }
 0x851   :  { %12918 = vmatprep.subr.mxu0 %v13799_v0  ;;  %v6830_v38 = vsub.f32 %v17504_v37, %v6829_v58  ;;  %12956 = vmatpush3.msra.mxu1 %v6824_v47  ;;  %v6873_v47 = vand.u32 4294901760, %v6872_v16 }
 0x852   :  { %12919 = vmatpush3.msra.mxu0 %v17476_v40  ;;  %12957 = vmatprep.subr.mxu1 %v13799_v0  ;;  %v18972_v45 = vand.u32 4294901760, %v17595_v26  ;;  %v6880_v46 = vand.u32 4294901760, %v6879_v24  ;;  %v6901_v12 = vand.u32 4294901760, %v6900_v63 }
 0x853   :  { %12920 = vmatprep.subr.mxu0 %v13799_v0  ;;  %v6831_v59 = vand.u32 4294901760, %v6830_v38  ;;  %v6691_v38 = vld [vmem:[#allocation2 + $0x508] sm:$0xff] }
 0x854   :  { %12921 = vmatpush3.msra.mxu0 %v17484_v11  ;;  %v17625_v43 = vand.u32 4294901760, %v6691_v38 }
 0x855   :  { %12922 = vmatprep.subr.mxu0 %v13799_v0  ;;  %12958 = vmatpush3.msra.mxu1 %v6831_v59  ;;  %v6886_v59 = vsub.f32 %v17595_v26, %v18972_v45 }
 0x856   :  { %12923 = vmatpush3.msra.mxu0 %v17495_v39  ;;  %12959 = vmatprep.subr.mxu1 %v13799_v0 }
 0x857   :  { %12924 = vmatprep.subr.mxu0 %v13799_v0  ;;  %12960 = vmatpush3.msra.mxu1 %v6838_v3  ;;  %v6690_v3 = vld [vmem:[#allocation2 + $0x500] sm:$0xff]  ;;  %v6887_v50 = vand.u32 4294901760, %v6886_v59 }
 0x858   :  { %12925 = vmatpush3.msra.mxu0 %v17507_v4  ;;  %12961 = vmatprep.subr.mxu1 %v13799_v0  ;;  %v17633_v15 = vand.u32 4294901760, %v6690_v3 }
 0x859   :  { %12926 = vmatprep.subr.mxu0 %v13799_v0  ;;  %12962 = vmatpush3.msra.mxu1 %v6845_v36  ;;  %v6893_v36 = vsub.f32 %v17610_v6, %v18971_v23 }
 0x85a   :  { %12927 = vmatpush3.msra.mxu0 %v17514_v25  ;;  %12963 = vmatprep.subr.mxu1 %v13799_v0 }
 0x85b   :  { %12928 = vmatprep.subr.mxu0 %v13799_v0  ;;  %12964 = vmatpush3.msra.mxu1 %v6852_v60  ;;  %v17637_v60 = vsub.f32 %v6691_v38, %v17625_v43  ;;  %v6894_v31 = vand.u32 4294901760, %v6893_v36 }
 0x85c   :  { %12929 = vmatpush3.msra.mxu0 %v17527_v10  ;;  %12965 = vmatprep.subr.mxu1 %v13799_v0 }
 0x85d   :  { %12930 = vmatprep.subr.mxu0 %v13799_v0  ;;  %12966 = vmatpush3.msra.mxu1 %v6859_v57  ;;  %v17645_v57 = vsub.f32 %v6690_v3, %v17633_v15  ;;  %v18969_v19 = vand.u32 4294901760, %v17637_v60 }
 0x85e   :  { %12931 = vmatpush3.msra.mxu0 %v17537_v14  ;;  %12967 = vmatprep.subr.mxu1 %v13799_v0 }
 0x85f   :  { %12932 = vmatprep.subr.mxu0 %v13799_v0  ;;  %12968 = vmatpush3.msra.mxu1 %v6866_v21  ;;  %v18968_v21 = vand.u32 4294901760, %v17645_v57  ;;  %v6907_v16 = vsub.f32 %v17637_v60, %v18969_v19 }
 0x860   :  { %12933 = vmatpush3.msra.mxu0 %v17552_v51  ;;  %12969 = vmatprep.subr.mxu1 %v13799_v0 }
 0x861   :  { %12934 = vmatprep.subr.mxu0 %v13799_v0  ;;  %12970 = vmatpush3.msra.mxu1 %v6873_v47  ;;  %v6914_v54 = vsub.f32 %v17645_v57, %v18968_v21  ;;  %v6908_v24 = vand.u32 4294901760, %v6907_v16 }
 0x862   :  { %12935 = vmatpush3.msra.mxu0 %v17565_v5  ;;  %12971 = vmatprep.subr.mxu1 %v13799_v0 }
 0x863   :  { %12936 = vmatprep.subr.mxu0 %v13799_v0  ;;  %12972 = vmatpush3.msra.mxu1 %v6880_v46  ;;  %v6915_v47 = vand.u32 4294901760, %v6914_v54 }
 0x864   :  { %12937 = vmatpush3.msra.mxu0 %v17573_v13  ;;  %12973 = vmatprep.subr.mxu1 %v13799_v0 }
 0x865   :  { %12938 = vmatprep.subr.mxu0 %v13799_v0  ;;  %12974 = vmatpush3.msra.mxu1 %v6887_v50 }
 0x866   :  { %12939 = vmatpush3.msra.mxu0 %v17587_v20  ;;  %12975 = vmatprep.subr.mxu1 %v13799_v0 }
 0x867   :  { %12940 = vmatprep.subr.mxu0 %v13799_v0  ;;  %12976 = vmatpush3.msra.mxu1 %v6894_v31 }
 0x868   :  { %12941 = vmatpush3.msra.mxu0 %v17597_v61  ;;  %12977 = vmatprep.subr.mxu1 %v13799_v0 }
 0x869   :  { %12942 = vmatprep.subr.mxu0 %v13799_v0  ;;  %12978 = vmatpush3.msra.mxu1 %v6901_v12  ;;  %v9379_v12 = vld [vmem:[%s18925_s2 + $0x7] ss:$0 sm:$0xff] }
 0x86a   :  { %12943 = vmatpush3.msra.mxu0 %v17612_v55  ;;  %12979 = vmatprep.subr.mxu1 %v13799_v0 }
 0x86b   :  { %12944 = vmatprep.subr.mxu0 %v13799_v0  ;;  %12980 = vmatpush3.msra.mxu1 %v6908_v24 }
 0x86c   :  { %12945 = vmatpush3.msra.mxu0 %v17625_v43  ;;  %12981 = vmatprep.subr.mxu1 %v13799_v0 }
 0x86d   :  { %12946 = vmatprep.subr.mxu0 %v13799_v0  ;;  %12982 = vmatpush3.msra.mxu1 %v6915_v47 }
 0x86e   :  { %12947 = vmatpush3.msra.mxu0 %v17633_v15  ;;  %13021 = vmatprep.subr.mxu1 %v13799_v0 }
 0x86f   :  { %12986 = vmatprep.subr.mxu0 %v13799_v0 }
 0x8c5   :  { %v6282_v38 = vpop.f32.mrf.mxu1 }
 0x8c7   :  { %v12775_v46 = vpop.f32.mrf.mxu1 }
 0x8cd   :  { %v6131_v59 = vpop.f32.mrf.mxu0 }
 0x8ce   :  { %v6132_v16 = vadd.f32 %v9379_v12, %v6131_v59  ;;  %v7366_v59 = vld [vmem:[#allocation2 + $0x5c0] sm:$0xff] }
 0x8cf   :  { %v12740_v3 = vpop.f32.mrf.mxu0  ;;  %v17918_v12 = vand.u32 4294901760, %v7366_v59 }
 0x8d0   :  { %v6283_v24 = vadd.f32 %v6282_v38, %v6132_v16  ;;  %v7365_v16 = vld [vmem:[#allocation2 + $0x5b8] sm:$0xff] }
 0x8e5   :  { %v6475_v50 = vpop.f32.mrf.mxu1 }
 0x8e7   :  { %v12845_v36 = vpop.f32.mrf.mxu1 }
 0x8ee   :  { %v6386_v31 = vpop.f32.mrf.mxu0 }
 0x8ef   :  { %v6387_v19 = vadd.f32 %v6386_v31, %v6283_v24  ;;  %v17924_v24 = vsub.f32 %v7366_v59, %v17918_v12 }
 0x8f0   :  { %v12810_v63 = vpop.f32.mrf.mxu0 }
 0x8f1   :  { %v6476_v47 = vadd.f32 %v6475_v50, %v6387_v19 }
 0x907   :  { %v6681_v54 = vpop.f32.mrf.mxu1 }
 0x909   :  { %v12915_v21 = vpop.f32.mrf.mxu1 }
 0x90f   :  { %v6594_v35 = vpop.f32.mrf.mxu0 }
 0x910   :  { %v6595_v23 = vadd.f32 %v6594_v35, %v6476_v47  ;;  %v17926_v47 = vand.u32 4294901760, %v7365_v16 }
 0x911   :  { %v12880_v45 = vpop.f32.mrf.mxu0 }
 0x912   :  { %v6682_v46 = vadd.f32 %v6681_v54, %v6595_v23 }
 0x914   :  { %13767 = vtanh.f32 %v6682_v46  ;;  %v7364_v46 = vld [vmem:[#allocation2 + $0x5b0] sm:$0xff] }
 0x921   :  { %v13768_v3 = vpop.eup %13767 }
 0x922   :  { %v6686_v18 = vmul.f32 1.442695, %v13768_v3 }
 0x924   :  { %13769 = vpow2.f32 %v6686_v18 }
 0x931   :  { %v13770_v36 = vpop.eup %13769 }
 0x932   :  { %v6688_v63 = vmul.f32 %v13770_v36, %v17299_v28  ;;  %v18983_v36 = vand.u32 4294901760, %v17924_v24 }
 0x934   :  { %v17667_v30 = vand.u32 4294901760, %v6688_v63 }
 0x936   :  { %12984 = vmatmul.mubr.f32.vlgmr.msra.gmra.mxu1 %v17667_v30  ;;  %v17671_v38 = vsub.f32 %v6688_v63, %v17667_v30  ;;  %v17933_v63 = vsub.f32 %v7365_v16, %v17926_v47 }
 0x937   :  { %13022 = vmatpush3.msra.mxu1 %v17471_v42  ;;  %13053 = vmatprep.mubr.msk.f32.mxu1 %vm13800_vm0, %v13799_v0 }
 0x938   :  { %13023 = vmatprep.subr.mxu1 %v13799_v0  ;;  %v17678_v45 = vand.u32 4294901760, %v17671_v38 }
 0x939   :  { %13024 = vmatpush3.msra.mxu1 %v17476_v40 }
 0x93a   :  { %13025 = vmatprep.subr.mxu1 %v13799_v0  ;;  %v6798_v28 = vsub.f32 %v17671_v38, %v17678_v45 }
 0x93b   :  { %13026 = vmatpush3.msra.mxu1 %v17484_v11 }
 0x93c   :  { %13027 = vmatprep.subr.mxu1 %v13799_v0  ;;  %v17686_v18 = vand.u32 4294901760, %v6798_v28  ;;  %v17935_v28 = vand.u32 4294901760, %v7364_v46 }
 0x93d   :  { %13028 = vmatpush3.msra.mxu1 %v17495_v39 }
 0x93e   :  { %13029 = vmatprep.subr.mxu1 %v13799_v0  ;;  %12949 = vmatmul.mubr.f32.vlgmr.msra.gmra.mxu0 %v17686_v18 }
 0x93f   :  { %12987 = vmatpush3.msra.mxu0 %v17474_v33  ;;  %13030 = vmatpush3.msra.mxu1 %v17507_v4  ;;  %v19036_v33 = vand.u32 4294901760, %v17585_v2 }
 0x940   :  { %12988 = vmatprep.subr.mxu0 %v13799_v0  ;;  %13031 = vmatprep.subr.mxu1 %v13799_v0 }
 0x941   :  { %12989 = vmatpush3.msra.mxu0 %v17482_v8  ;;  %13032 = vmatpush3.msra.mxu1 %v17514_v25  ;;  %v19039_v8 = vand.u32 4294901760, %v17622_v29 }
 0x942   :  { %12990 = vmatprep.subr.mxu0 %v13799_v0  ;;  %13033 = vmatprep.subr.mxu1 %v13799_v0 }
 0x943   :  { %12991 = vmatpush3.msra.mxu0 %v17493_v48  ;;  %13034 = vmatpush3.msra.mxu1 %v17527_v10  ;;  %v7373_v48 = vld [vmem:[#allocation2 + $0x5f8] sm:$0xff] }
 0x944   :  { %12992 = vmatprep.subr.mxu0 %v13799_v0  ;;  %13035 = vmatprep.subr.mxu1 %v13799_v0 }
 0x945   :  { %12993 = vmatpush3.msra.mxu0 %v17504_v37  ;;  %13036 = vmatpush3.msra.mxu1 %v17537_v14  ;;  %v7371_v37 = vld [vmem:[#allocation2 + $0x5e8] sm:$0xff] }
 0x946   :  { %12994 = vmatprep.subr.mxu0 %v13799_v0  ;;  %13037 = vmatprep.subr.mxu1 %v13799_v0 }
 0x947   :  { %12995 = vmatpush3.msra.mxu0 %v17518_v34  ;;  %13038 = vmatpush3.msra.mxu1 %v17552_v51 }
 0x948   :  { %12996 = vmatprep.subr.mxu0 %v13799_v0  ;;  %13039 = vmatprep.subr.mxu1 %v13799_v0 }
 0x949   :  { %12997 = vmatpush3.msra.mxu0 %v17525_v52  ;;  %13040 = vmatpush3.msra.mxu1 %v17565_v5  ;;  %v7369_v52 = vld [vmem:[#allocation2 + $0x5d8] sm:$0xff] }
 0x94a   :  { %12998 = vmatprep.subr.mxu0 %v13799_v0  ;;  %13041 = vmatprep.subr.mxu1 %v13799_v0 }
 0x94b   :  { %12999 = vmatpush3.msra.mxu0 %v17535_v1  ;;  %13042 = vmatpush3.msra.mxu1 %v17573_v13  ;;  %v17853_v1 = vand.u32 4294901760, %v7369_v52 }
 0x94c   :  { %13000 = vmatprep.subr.mxu0 %v13799_v0  ;;  %13043 = vmatprep.subr.mxu1 %v13799_v0 }
 0x94d   :  { %13001 = vmatpush3.msra.mxu0 %v17550_v9  ;;  %13044 = vmatpush3.msra.mxu1 %v17587_v20 }
 0x94e   :  { %13002 = vmatprep.subr.mxu0 %v13799_v0  ;;  %13045 = vmatprep.subr.mxu1 %v13799_v0 }
 0x94f   :  { %13003 = vmatpush3.msra.mxu0 %v17562_v32  ;;  %13046 = vmatpush3.msra.mxu1 %v17597_v61 }
 0x950   :  { %13004 = vmatprep.subr.mxu0 %v13799_v0  ;;  %13047 = vmatprep.subr.mxu1 %v13799_v0 }
 0x951   :  { %13005 = vmatpush3.msra.mxu0 %v17577_v27  ;;  %13048 = vmatpush3.msra.mxu1 %v17612_v55 }
 0x952   :  { %13006 = vmatprep.subr.mxu0 %v13799_v0  ;;  %13049 = vmatprep.subr.mxu1 %v13799_v0 }
 0x953   :  { %13007 = vmatpush3.msra.mxu0 %v17585_v2  ;;  %13050 = vmatpush3.msra.mxu1 %v17625_v43 }
 0x954   :  { %13008 = vmatprep.subr.mxu0 %v13799_v0  ;;  %13051 = vmatprep.subr.mxu1 %v13799_v0 }
 0x955   :  { %13009 = vmatpush3.msra.mxu0 %v17595_v26  ;;  %13052 = vmatpush3.msra.mxu1 %v17633_v15 }
 0x956   :  { %13010 = vmatprep.subr.mxu0 %v13799_v0  ;;  %13054 = vmatmul.mubr.f32.vlgmr.msra.gmra.mxu1 %v17678_v45 }
 0x957   :  { %13091 = vmatprep.subr.mxu1 %v13799_v0  ;;  %13011 = vmatpush3.msra.mxu0 %v17610_v6 }
 0x958   :  { %13092 = vmatpush3.msra.mxu1 %v17471_v42  ;;  %13012 = vmatprep.subr.mxu0 %v13799_v0  ;;  %v19035_v42 = vand.u32 4294901760, %v17577_v27 }
 0x959   :  { %13093 = vmatprep.subr.mxu1 %v13799_v0  ;;  %13013 = vmatpush3.msra.mxu0 %v17622_v29 }
 0x95a   :  { %13094 = vmatpush3.msra.mxu1 %v17476_v40  ;;  %13014 = vmatprep.subr.mxu0 %v13799_v0  ;;  %v19037_v40 = vand.u32 4294901760, %v17595_v26 }
 0x95b   :  { %13095 = vmatprep.subr.mxu1 %v13799_v0  ;;  %13015 = vmatpush3.msra.mxu0 %v17637_v60 }
 0x95c   :  { %13096 = vmatpush3.msra.mxu1 %v17484_v11  ;;  %13016 = vmatprep.subr.mxu0 %v13799_v0  ;;  %v19040_v11 = vand.u32 4294901760, %v17637_v60 }
 0x95d   :  { %13097 = vmatprep.subr.mxu1 %v13799_v0  ;;  %13017 = vmatpush3.msra.mxu0 %v17645_v57 }
 0x95e   :  { %13018 = vmatprep.mubr.msk.f32.mxu0 %vm13800_vm0, %v13799_v0  ;;  %13098 = vmatpush3.msra.mxu1 %v17495_v39  ;;  %v17841_v39 = vand.u32 4294901760, %v7373_v48 }
 0x95f   :  { %13019 = vmatmul.mubr.f32.vlgmr.msra.gmra.mxu0 %v17671_v38  ;;  %13056 = vmatprep.subr.mxu0 %v13799_v0 }
 0x960   :  { %13099 = vmatprep.subr.mxu1 %v13799_v0  ;;  %13057 = vmatpush3.msra.mxu0 %v6808_v22  ;;  %v19038_v22 = vand.u32 4294901760, %v17610_v6 }
 0x961   :  { %13100 = vmatpush3.msra.mxu1 %v17507_v4  ;;  %13058 = vmatprep.subr.mxu0 %v13799_v0  ;;  %v7370_v4 = vld [vmem:[#allocation2 + $0x5e0] sm:$0xff] }
 0x962   :  { %13101 = vmatprep.subr.mxu1 %v13799_v0  ;;  %13059 = vmatpush3.msra.mxu0 %v6815_v17  ;;  %v19041_v17 = vand.u32 4294901760, %v17645_v57  ;;  %v17847_v34 = vand.u32 4294901760, %v7370_v4 }
 0x963   :  { %13102 = vmatpush3.msra.mxu1 %v17514_v25  ;;  %13060 = vmatprep.subr.mxu0 %v13799_v0  ;;  %v17845_v25 = vand.u32 4294901760, %v7371_v37 }
 0x964   :  { %13103 = vmatprep.subr.mxu1 %v13799_v0  ;;  %13061 = vmatpush3.msra.mxu0 %v6822_v41  ;;  %v7372_v41 = vld [vmem:[#allocation2 + $0x5f0] sm:$0xff] }
 0x965   :  { %13104 = vmatpush3.msra.mxu1 %v17527_v10  ;;  %13062 = vmatprep.subr.mxu0 %v13799_v0  ;;  %v7368_v10 = vld [vmem:[#allocation2 + $0x5d0] sm:$0xff] }
 0x966   :  { %13105 = vmatprep.subr.mxu1 %v13799_v0  ;;  %13063 = vmatpush3.msra.mxu0 %v6829_v58  ;;  %v17843_v58 = vand.u32 4294901760, %v7372_v41 }
 0x967   :  { %13106 = vmatpush3.msra.mxu1 %v17537_v14  ;;  %13064 = vmatprep.subr.mxu0 %v13799_v0  ;;  %v17855_v14 = vand.u32 4294901760, %v7368_v10 }
 0x968   :  { %13107 = vmatprep.subr.mxu1 %v13799_v0  ;;  %13065 = vmatpush3.msra.mxu0 %v6836_v7  ;;  %v7367_v7 = vld [vmem:[#allocation2 + $0x5c8] sm:$0xff]  ;;  %v17860_v9 = vsub.f32 %v7372_v41, %v17843_v58 }
 0x969   :  { %13108 = vmatpush3.msra.mxu1 %v17552_v51  ;;  %13066 = vmatprep.subr.mxu0 %v13799_v0  ;;  %v17863_v51 = vsub.f32 %v7371_v37, %v17845_v25 }
 0x96a   :  { %13109 = vmatprep.subr.mxu1 %v13799_v0  ;;  %13067 = vmatpush3.msra.mxu0 %v6843_v44  ;;  %v17850_v44 = vsub.f32 %v7373_v48, %v17841_v39 }
 0x96b   :  { %13110 = vmatpush3.msra.mxu1 %v17565_v5  ;;  %13068 = vmatprep.subr.mxu0 %v13799_v0  ;;  %v17871_v5 = vsub.f32 %v7369_v52, %v17853_v1  ;;  %v7490_v27 = vand.u32 4294901760, %v17863_v51  ;;  %v7361_v52 = vld [vmem:[#allocation2 + $0x598] sm:$0xff] }
 0x96c   :  { %13111 = vmatprep.subr.mxu1 %v13799_v0  ;;  %13069 = vmatpush3.msra.mxu0 %v6850_v62  ;;  %v17857_v62 = vand.u32 4294901760, %v7367_v7  ;;  %v7476_v32 = vand.u32 4294901760, %v17850_v44 }
 0x96d   :  { %13112 = vmatpush3.msra.mxu1 %v17573_v13  ;;  %13070 = vmatprep.subr.mxu0 %v13799_v0  ;;  %v7483_v13 = vand.u32 4294901760, %v17860_v9  ;;  %v7504_v26 = vand.u32 4294901760, %v17871_v5 }
 0x96e   :  { %13113 = vmatprep.subr.mxu1 %v13799_v0  ;;  %13071 = vmatpush3.msra.mxu0 %v6857_v53  ;;  %v17866_v53 = vsub.f32 %v7370_v4, %v17847_v34 }
 0x96f   :  { %13114 = vmatpush3.msra.mxu1 %v17587_v20  ;;  %13072 = vmatprep.subr.mxu0 %v13799_v0  ;;  %v7477_v20 = vsub.f32 %v17850_v44, %v7476_v32  ;;  %v7484_v6 = vsub.f32 %v17860_v9, %v7483_v13  ;;  %v7505_v60 = vsub.f32 %v17871_v5, %v7504_v26 }
 0x970   :  { %13115 = vmatprep.subr.mxu1 %v13799_v0  ;;  %13073 = vmatpush3.msra.mxu0 %v6864_v56  ;;  %v17875_v56 = vsub.f32 %v7368_v10, %v17855_v14  ;;  %v7497_v2 = vand.u32 4294901760, %v17866_v53 }
 0x971   :  { %13116 = vmatpush3.msra.mxu1 %v17597_v61  ;;  %13074 = vmatprep.subr.mxu0 %v13799_v0  ;;  %v17887_v61 = vsub.f32 %v7367_v7, %v17857_v62  ;;  %v7478_v23 = vand.u32 4294901760, %v7477_v20  ;;  %v7485_v35 = vand.u32 4294901760, %v7484_v6  ;;  %v7506_v50 = vand.u32 4294901760, %v7505_v60 }
 0x972   :  { %13117 = vmatprep.subr.mxu1 %v13799_v0  ;;  %13075 = vmatpush3.msra.mxu0 %v19035_v42  ;;  %v7498_v29 = vsub.f32 %v17866_v53, %v7497_v2  ;;  %v7363_v42 = vld [vmem:[#allocation2 + $0x5a8] sm:$0xff]  ;;  %v17968_v6 = vand.u32 4294901760, %v7361_v52 }
 0x973   :  { %13118 = vmatpush3.msra.mxu1 %v17612_v55  ;;  %13076 = vmatprep.subr.mxu0 %v13799_v0  ;;  %v7491_v55 = vsub.f32 %v17863_v51, %v7490_v27  ;;  %v18984_v57 = vand.u32 4294901760, %v17887_v61 }
 0x974   :  { %13119 = vmatprep.subr.mxu1 %v13799_v0  ;;  %13077 = vmatpush3.msra.mxu0 %v19036_v33  ;;  %v7499_v19 = vand.u32 4294901760, %v7498_v29  ;;  %v7526_v33 = vsub.f32 %v17924_v24, %v18983_v36 }
 0x975   :  { %13120 = vmatpush3.msra.mxu1 %v17625_v43  ;;  %13078 = vmatprep.subr.mxu0 %v13799_v0  ;;  %v7511_v43 = vand.u32 4294901760, %v17875_v56  ;;  %v7519_v31 = vsub.f32 %v17887_v61, %v18984_v57 }
 0x976   :  { %13121 = vmatprep.subr.mxu1 %v13799_v0  ;;  %13079 = vmatpush3.msra.mxu0 %v19037_v40  ;;  %v18982_v40 = vand.u32 4294901760, %v17933_v63 }
 0x977   :  { %13122 = vmatpush3.msra.mxu1 %v17633_v15  ;;  %13123 = vmatprep.mubr.msk.f32.mxu1 %vm13800_vm0, %v13799_v0  ;;  %v7492_v15 = vand.u32 4294901760, %v7491_v55  ;;  %v7512_v21 = vsub.f32 %v17875_v56, %v7511_v43  ;;  %v7520_v3 = vand.u32 4294901760, %v7519_v31 }
 0x978   :  { %13080 = vmatprep.subr.mxu0 %v13799_v0  ;;  %13124 = vmatmul.mubr.f32.vlgmr.msra.gmra.mxu1 %v17667_v30  ;;  %v7533_v48 = vsub.f32 %v17933_v63, %v18982_v40 }
 0x979   :  { %13081 = vmatpush3.msra.mxu0 %v19038_v22  ;;  %13088 = vmatprep.mubr.msk.f32.mxu0 %vm13800_vm0, %v13799_v0  ;;  %v7513_v54 = vand.u32 4294901760, %v7512_v21  ;;  %v17945_v22 = vsub.f32 %v7364_v46, %v17935_v28  ;;  %v7359_v21 = vld [vmem:[#allocation2 + $0x588] sm:$0xff]  ;;  %v7358_v46 = vld [vmem:[#allocation2 + $0x580] sm:$0xff] }
 0x97a   :  { %13082 = vmatprep.subr.mxu0 %v13799_v0  ;;  %13161 = vmatprep.subr.mxu1 %v13799_v0  ;;  %v7534_v10 = vand.u32 4294901760, %v7533_v48  ;;  %v17991_v16 = vand.u32 4294901760, %v7359_v21 }
 0x97b   :  { %13083 = vmatpush3.msra.mxu0 %v19039_v8  ;;  %13193 = vmatprep.mubr.msk.f32.mxu1 %vm13800_vm0, %v13799_v0  ;;  %v17947_v8 = vand.u32 4294901760, %v7363_v42  ;;  %v18981_v41 = vand.u32 4294901760, %v17945_v22 }
 0x97c   :  { %13084 = vmatprep.subr.mxu0 %v13799_v0  ;;  %13162 = vmatpush3.msra.mxu1 %v7478_v23  ;;  %v7360_v23 = vld [vmem:[#allocation2 + $0x590] sm:$0xff] }
 0x97d   :  { %13085 = vmatpush3.msra.mxu0 %v19040_v11  ;;  %13163 = vmatprep.subr.mxu1 %v13799_v0  ;;  %v7362_v11 = vld [vmem:[#allocation2 + $0x5a0] sm:$0xff]  ;;  %v17957_v37 = vsub.f32 %v7363_v42, %v17947_v8  ;;  %v7540_v7 = vsub.f32 %v17945_v22, %v18981_v41  ;;  %v17981_v60 = vand.u32 4294901760, %v7360_v23 }
 0x97e   :  { %13086 = vmatprep.subr.mxu0 %v13799_v0  ;;  %13164 = vmatpush3.msra.mxu1 %v7485_v35  ;;  %v17961_v4 = vand.u32 4294901760, %v7362_v11 }
 0x97f   :  { %13087 = vmatpush3.msra.mxu0 %v19041_v17  ;;  %13165 = vmatprep.subr.mxu1 %v13799_v0  ;;  %v7527_v17 = vand.u32 4294901760, %v7526_v33  ;;  %v18980_v20 = vand.u32 4294901760, %v17957_v37  ;;  %v7541_v29 = vand.u32 4294901760, %v7540_v7  ;;  %v17989_v31 = vsub.f32 %v7360_v23, %v17981_v60 }
 0x980   :  { %13089 = vmatmul.mubr.f32.vlgmr.msra.gmra.mxu0 %v17667_v30  ;;  %13126 = vmatprep.subr.mxu0 %v13799_v0  ;;  %v17972_v55 = vsub.f32 %v7362_v11, %v17961_v4  ;;  %v18004_v33 = vsub.f32 %v7359_v21, %v17991_v16  ;;  %v18006_v11 = vand.u32 4294901760, %v7358_v46 }
 0x981   :  { %13158 = vmatprep.mubr.msk.f32.mxu0 %vm13800_vm0, %v13799_v0  ;;  %13127 = vmatpush3.msra.mxu0 %v17841_v39  ;;  %v7547_v35 = vsub.f32 %v17957_v37, %v18980_v20  ;;  %v18976_v42 = vand.u32 4294901760, %v17989_v31 }
 0x982   :  { %13128 = vmatprep.subr.mxu0 %v13799_v0  ;;  %13166 = vmatpush3.msra.mxu1 %v7492_v15  ;;  %v17979_v15 = vsub.f32 %v7361_v52, %v17968_v6  ;;  %v18016_v7 = vsub.f32 %v7358_v46, %v18006_v11 }
 0x983   :  { %13129 = vmatpush3.msra.mxu0 %v17843_v58  ;;  %13167 = vmatprep.subr.mxu1 %v13799_v0  ;;  %v7548_v59 = vand.u32 4294901760, %v7547_v35  ;;  %v7568_v52 = vsub.f32 %v17989_v31, %v18976_v42 }
 0x984   :  { %13130 = vmatprep.subr.mxu0 %v13799_v0  ;;  %13168 = vmatpush3.msra.mxu1 %v7499_v19  ;;  %v18979_v19 = vand.u32 4294901760, %v17972_v55  ;;  %v18977_v35 = vand.u32 4294901760, %v18016_v7 }
 0x985   :  { %13131 = vmatpush3.msra.mxu0 %v17845_v25  ;;  %13169 = vmatprep.subr.mxu1 %v13799_v0  ;;  %v7569_v23 = vand.u32 4294901760, %v7568_v52 }
 0x986   :  { %13132 = vmatprep.subr.mxu0 %v13799_v0  ;;  %13170 = vmatpush3.msra.mxu1 %v7506_v50  ;;  %v18978_v50 = vand.u32 4294901760, %v17979_v15 }
 0x987   :  { %13133 = vmatpush3.msra.mxu0 %v17847_v34  ;;  %13171 = vmatprep.subr.mxu1 %v13799_v0 }
 0x988   :  { %13134 = vmatprep.subr.mxu0 %v13799_v0  ;;  %13172 = vmatpush3.msra.mxu1 %v7513_v54  ;;  %v7554_v54 = vsub.f32 %v17972_v55, %v18979_v19 }
 0x989   :  { %13135 = vmatpush3.msra.mxu0 %v17853_v1  ;;  %13173 = vmatprep.subr.mxu1 %v13799_v0 }
 0x98a   :  { %13136 = vmatprep.subr.mxu0 %v13799_v0  ;;  %13174 = vmatpush3.msra.mxu1 %v7520_v3  ;;  %v7561_v3 = vsub.f32 %v17979_v15, %v18978_v50 }
 0x98b   :  { %13137 = vmatpush3.msra.mxu0 %v17855_v14  ;;  %13175 = vmatprep.subr.mxu1 %v13799_v0 }
 0x98c   :  { %13138 = vmatprep.subr.mxu0 %v13799_v0  ;;  %13176 = vmatpush3.msra.mxu1 %v7527_v17  ;;  %v7555_v17 = vand.u32 4294901760, %v7554_v54  ;;  %v7562_v48 = vand.u32 4294901760, %v7561_v3 }
 0x98d   :  { %13139 = vmatpush3.msra.mxu0 %v17857_v62  ;;  %13177 = vmatprep.subr.mxu1 %v13799_v0 }
 0x98e   :  { %13140 = vmatprep.subr.mxu0 %v13799_v0  ;;  %13178 = vmatpush3.msra.mxu1 %v7534_v10  ;;  %v18975_v10 = vand.u32 4294901760, %v18004_v33 }
 0x98f   :  { %13141 = vmatpush3.msra.mxu0 %v17918_v12  ;;  %13179 = vmatprep.subr.mxu1 %v13799_v0 }
 0x990   :  { %13142 = vmatprep.subr.mxu0 %v13799_v0  ;;  %13180 = vmatpush3.msra.mxu1 %v7541_v29  ;;  %v7575_v29 = vsub.f32 %v18004_v33, %v18975_v10 }
 0x991   :  { %13143 = vmatpush3.msra.mxu0 %v17926_v47  ;;  %13181 = vmatprep.subr.mxu1 %v13799_v0 }
 0x992   :  { %13144 = vmatprep.subr.mxu0 %v13799_v0  ;;  %13182 = vmatpush3.msra.mxu1 %v7548_v59  ;;  %v7576_v21 = vand.u32 4294901760, %v7575_v29  ;;  %v7582_v59 = vsub.f32 %v18016_v7, %v18977_v35 }
 0x993   :  { %13145 = vmatpush3.msra.mxu0 %v17935_v28  ;;  %13183 = vmatprep.subr.mxu1 %v13799_v0 }
 0x994   :  { %13146 = vmatprep.subr.mxu0 %v13799_v0  ;;  %13184 = vmatpush3.msra.mxu1 %v7555_v17  ;;  %v7583_v54 = vand.u32 4294901760, %v7582_v59 }
 0x995   :  { %13147 = vmatpush3.msra.mxu0 %v17947_v8  ;;  %13185 = vmatprep.subr.mxu1 %v13799_v0 }
 0x996   :  { %13148 = vmatprep.subr.mxu0 %v13799_v0  ;;  %13186 = vmatpush3.msra.mxu1 %v7562_v48 }
 0x997   :  { %13149 = vmatpush3.msra.mxu0 %v17961_v4  ;;  %13187 = vmatprep.subr.mxu1 %v13799_v0 }
 0x998   :  { %13150 = vmatprep.subr.mxu0 %v13799_v0  ;;  %13188 = vmatpush3.msra.mxu1 %v7569_v23  ;;  %v9381_v23 = vld [vmem:[%s18925_s2 + $0x8] ss:$0 sm:$0xff] }
 0x999   :  { %13151 = vmatpush3.msra.mxu0 %v17968_v6  ;;  %13189 = vmatprep.subr.mxu1 %v13799_v0 }
 0x99a   :  { %13152 = vmatprep.subr.mxu0 %v13799_v0  ;;  %13190 = vmatpush3.msra.mxu1 %v7576_v21 }
 0x99b   :  { %13153 = vmatpush3.msra.mxu0 %v17981_v60  ;;  %13191 = vmatprep.subr.mxu1 %v13799_v0 }
 0x99c   :  { %13154 = vmatprep.subr.mxu0 %v13799_v0  ;;  %13192 = vmatpush3.msra.mxu1 %v7583_v54 }
 0x99d   :  { %13155 = vmatpush3.msra.mxu0 %v17991_v16  ;;  %13231 = vmatprep.subr.mxu1 %v13799_v0 }
 0x99e   :  { %13156 = vmatprep.subr.mxu0 %v13799_v0 }
 0x99f   :  { %13157 = vmatpush3.msra.mxu0 %v18006_v11 }
 0x9a0   :  { %13196 = vmatprep.subr.mxu0 %v13799_v0 }
 0x9f6   :  { %v6952_v46 = vpop.f32.mrf.mxu1 }
 0x9f8   :  { %v12985_v3 = vpop.f32.mrf.mxu1 }
 0x9fe   :  { %v6801_v17 = vpop.f32.mrf.mxu0 }
 0x9ff   :  { %v6802_v35 = vadd.f32 %v9381_v23, %v6801_v17  ;;  %v8049_v23 = vld [vmem:[#allocation2 + $0x6b8] sm:$0xff] }
 0xa00   :  { %v12950_v48 = vpop.f32.mrf.mxu0 }
 0xa01   :  { %v6953_v21 = vadd.f32 %v6952_v46, %v6802_v35 }
 0xa16   :  { %v7145_v52 = vpop.f32.mrf.mxu1 }
 0xa18   :  { %v13055_v29 = vpop.f32.mrf.mxu1 }
 0xa1f   :  { %v7056_v10 = vpop.f32.mrf.mxu0 }
 0xa20   :  { %v7057_v19 = vadd.f32 %v7056_v10, %v6953_v21 }
 0xa21   :  { %v13020_v42 = vpop.f32.mrf.mxu0 }
 0xa22   :  { %v7146_v54 = vadd.f32 %v7145_v52, %v7057_v19 }
 0xa38   :  { %v7351_v59 = vpop.f32.mrf.mxu1 }
 0xa3a   :  { %v13125_v50 = vpop.f32.mrf.mxu1 }
 0xa3b   :  { %v8051_v50 = vld [vmem:[#allocation2 + $0x6c8] sm:$0xff] }
 0xa3c   :  { %v18263_v10 = vand.u32 4294901760, %v8051_v50 }
 0xa3e   :  { %v18274_v29 = vsub.f32 %v8051_v50, %v18263_v10 }
 0xa40   :  { %v7264_v20 = vpop.f32.mrf.mxu0 }
 0xa41   :  { %v7265_v41 = vadd.f32 %v7264_v20, %v7146_v54 }
 0xa42   :  { %v13090_v40 = vpop.f32.mrf.mxu0 }
 0xa43   :  { %v7352_v3 = vadd.f32 %v7351_v59, %v7265_v41 }
 0xa45   :  { %v7355_v36 = vmul.f32 0.01, %v7352_v3 }
 0xa47   :  { %v7356_v48 = vmax.f32 %v7352_v3, %v7355_v36  ;;  %v18283_v3 = vand.u32 4294901760, %v8049_v23 }
 0xa49   :  { %v18036_v57 = vand.u32 4294901760, %v7356_v48 }
 0xa4b   :  { %v18039_v42 = vsub.f32 %v7356_v48, %v18036_v57  ;;  %13194 = vmatmul.mubr.f32.vlgmr.msra.gmra.mxu1 %v18036_v57  ;;  %v8194_v48 = vand.u32 4294901760, %v18274_v29 }
 0xa4c   :  { %13232 = vmatpush3.msra.mxu1 %v17841_v39  ;;  %13263 = vmatprep.mubr.msk.f32.mxu1 %vm13800_vm0, %v13799_v0 }
 0xa4d   :  { %13233 = vmatprep.subr.mxu1 %v13799_v0  ;;  %v7465_v20 = vand.u32 4294901760, %v18039_v42 }
 0xa4e   :  { %13234 = vmatpush3.msra.mxu1 %v17843_v58 }
 0xa4f   :  { %13235 = vmatprep.subr.mxu1 %v13799_v0  ;;  %v7466_v36 = vsub.f32 %v18039_v42, %v7465_v20 }
 0xa50   :  { %13236 = vmatpush3.msra.mxu1 %v17845_v25 }
 0xa51   :  { %13237 = vmatprep.subr.mxu1 %v13799_v0  ;;  %v7467_v40 = vand.u32 4294901760, %v7466_v36 }
 0xa52   :  { %13238 = vmatpush3.msra.mxu1 %v17847_v34 }
 0xa53   :  { %13239 = vmatprep.subr.mxu1 %v13799_v0  ;;  %13159 = vmatmul.mubr.f32.vlgmr.msra.gmra.mxu0 %v7467_v40  ;;  %v18291_v40 = vsub.f32 %v8049_v23, %v18283_v3 }
 0xa54   :  { %13197 = vmatpush3.msra.mxu0 %v17850_v44  ;;  %13240 = vmatpush3.msra.mxu1 %v17853_v1  ;;  %v19046_v44 = vand.u32 4294901760, %v17957_v37 }
 0xa55   :  { %13198 = vmatprep.subr.mxu0 %v13799_v0  ;;  %13241 = vmatprep.subr.mxu1 %v13799_v0 }
 0xa56   :  { %13199 = vmatpush3.msra.mxu0 %v17860_v9  ;;  %13242 = vmatpush3.msra.mxu1 %v17855_v14  ;;  %v19050_v9 = vand.u32 4294901760, %v18004_v33 }
 0xa57   :  { %13200 = vmatprep.subr.mxu0 %v13799_v0  ;;  %13243 = vmatprep.subr.mxu1 %v13799_v0 }
 0xa58   :  { %13201 = vmatpush3.msra.mxu0 %v17863_v51  ;;  %13244 = vmatpush3.msra.mxu1 %v17857_v62  ;;  %v19051_v51 = vand.u32 4294901760, %v18016_v7 }
 0xa59   :  { %13202 = vmatprep.subr.mxu0 %v13799_v0  ;;  %13245 = vmatprep.subr.mxu1 %v13799_v0 }
 0xa5a   :  { %13203 = vmatpush3.msra.mxu0 %v17866_v53  ;;  %13246 = vmatpush3.msra.mxu1 %v17918_v12  ;;  %v8057_v53 = vld [vmem:[#allocation2 + $0x6f8] sm:$0xff] }
 0xa5b   :  { %13204 = vmatprep.subr.mxu0 %v13799_v0  ;;  %13247 = vmatprep.subr.mxu1 %v13799_v0 }
 0xa5c   :  { %13205 = vmatpush3.msra.mxu0 %v17871_v5  ;;  %13248 = vmatpush3.msra.mxu1 %v17926_v47  ;;  %v18203_v5 = vand.u32 4294901760, %v8057_v53 }
 0xa5d   :  { %13206 = vmatprep.subr.mxu0 %v13799_v0  ;;  %13249 = vmatprep.subr.mxu1 %v13799_v0 }
 0xa5e   :  { %13207 = vmatpush3.msra.mxu0 %v17875_v56  ;;  %13250 = vmatpush3.msra.mxu1 %v17935_v28 }
 0xa5f   :  { %13208 = vmatprep.subr.mxu0 %v13799_v0  ;;  %13251 = vmatprep.subr.mxu1 %v13799_v0 }
 0xa60   :  { %13209 = vmatpush3.msra.mxu0 %v17887_v61  ;;  %13252 = vmatpush3.msra.mxu1 %v17947_v8 }
 0xa61   :  { %13210 = vmatprep.subr.mxu0 %v13799_v0  ;;  %13253 = vmatprep.subr.mxu1 %v13799_v0 }
 0xa62   :  { %13211 = vmatpush3.msra.mxu0 %v17924_v24  ;;  %13254 = vmatpush3.msra.mxu1 %v17961_v4 }
 0xa63   :  { %13212 = vmatprep.subr.mxu0 %v13799_v0  ;;  %13255 = vmatprep.subr.mxu1 %v13799_v0 }
 0xa64   :  { %13213 = vmatpush3.msra.mxu0 %v17933_v63  ;;  %13256 = vmatpush3.msra.mxu1 %v17968_v6 }
 0xa65   :  { %13214 = vmatprep.subr.mxu0 %v13799_v0  ;;  %13257 = vmatprep.subr.mxu1 %v13799_v0 }
 0xa66   :  { %13215 = vmatpush3.msra.mxu0 %v17945_v22  ;;  %13258 = vmatpush3.msra.mxu1 %v17981_v60 }
 0xa67   :  { %13216 = vmatprep.subr.mxu0 %v13799_v0  ;;  %13259 = vmatprep.subr.mxu1 %v13799_v0 }
 0xa68   :  { %13217 = vmatpush3.msra.mxu0 %v17957_v37  ;;  %13260 = vmatpush3.msra.mxu1 %v17991_v16 }
 0xa69   :  { %13218 = vmatprep.subr.mxu0 %v13799_v0  ;;  %13261 = vmatprep.subr.mxu1 %v13799_v0 }
 0xa6a   :  { %13219 = vmatpush3.msra.mxu0 %v17972_v55  ;;  %13262 = vmatpush3.msra.mxu1 %v18006_v11 }
 0xa6b   :  { %13220 = vmatprep.subr.mxu0 %v13799_v0  ;;  %13264 = vmatmul.mubr.f32.vlgmr.msra.gmra.mxu1 %v7465_v20 }
 0xa6c   :  { %13301 = vmatprep.subr.mxu1 %v13799_v0  ;;  %13221 = vmatpush3.msra.mxu0 %v17979_v15 }
 0xa6d   :  { %13302 = vmatpush3.msra.mxu1 %v17841_v39  ;;  %13222 = vmatprep.subr.mxu0 %v13799_v0  ;;  %v19042_v39 = vand.u32 4294901760, %v17887_v61 }
 0xa6e   :  { %13303 = vmatprep.subr.mxu1 %v13799_v0  ;;  %13223 = vmatpush3.msra.mxu0 %v17989_v31 }
 0xa6f   :  { %13304 = vmatpush3.msra.mxu1 %v17843_v58  ;;  %13224 = vmatprep.subr.mxu0 %v13799_v0  ;;  %v19043_v58 = vand.u32 4294901760, %v17924_v24  ;;  %v8055_v24 = vld [vmem:[#allocation2 + $0x6e8] sm:$0xff] }
 0xa70   :  { %13305 = vmatprep.subr.mxu1 %v13799_v0  ;;  %13225 = vmatpush3.msra.mxu0 %v18004_v33 }
 0xa71   :  { %13306 = vmatpush3.msra.mxu1 %v17845_v25  ;;  %13226 = vmatprep.subr.mxu0 %v13799_v0  ;;  %v19044_v25 = vand.u32 4294901760, %v17933_v63  ;;  %v8054_v63 = vld [vmem:[#allocation2 + $0x6e0] sm:$0xff] }
 0xa72   :  { %13307 = vmatprep.subr.mxu1 %v13799_v0  ;;  %13227 = vmatpush3.msra.mxu0 %v18016_v7  ;;  %v8050_v7 = vld [vmem:[#allocation2 + $0x6c0] sm:$0xff] }
 0xa73   :  { %13228 = vmatprep.mubr.msk.f32.mxu0 %vm13800_vm0, %v13799_v0  ;;  %13308 = vmatpush3.msra.mxu1 %v17847_v34  ;;  %v19045_v34 = vand.u32 4294901760, %v17945_v22  ;;  %v18232_v22 = vand.u32 4294901760, %v8054_v63  ;;  %v18270_v52 = vand.u32 4294901760, %v8050_v7 }
 0xa74   :  { %13229 = vmatmul.mubr.f32.vlgmr.msra.gmra.mxu0 %v18039_v42  ;;  %13266 = vmatprep.subr.mxu0 %v13799_v0  ;;  %v8048_v42 = vld [vmem:[#allocation2 + $0x6b0] sm:$0xff] }
 0xa75   :  { %13309 = vmatprep.subr.mxu1 %v13799_v0  ;;  %13267 = vmatpush3.msra.mxu0 %v7476_v32  ;;  %v8056_v32 = vld [vmem:[#allocation2 + $0x6f0] sm:$0xff]  ;;  %v18238_v37 = vsub.f32 %v8054_v63, %v18232_v22  ;;  %v18281_v54 = vsub.f32 %v8050_v7, %v18270_v52 }
 0xa76   :  { %13310 = vmatpush3.msra.mxu1 %v17853_v1  ;;  %13268 = vmatprep.subr.mxu0 %v13799_v0  ;;  %v19047_v1 = vand.u32 4294901760, %v17972_v55  ;;  %v18205_v56 = vand.u32 4294901760, %v8056_v32 }
 0xa77   :  { %13311 = vmatprep.subr.mxu1 %v13799_v0  ;;  %13269 = vmatpush3.msra.mxu0 %v7483_v13  ;;  %v18208_v13 = vsub.f32 %v8057_v53, %v18203_v5  ;;  %v18993_v36 = vand.u32 4294901760, %v18281_v54 }
 0xa78   :  { %13312 = vmatpush3.msra.mxu1 %v17855_v14  ;;  %13270 = vmatprep.subr.mxu0 %v13799_v0  ;;  %v19048_v14 = vand.u32 4294901760, %v17979_v15  ;;  %v8173_v15 = vand.u32 4294901760, %v18238_v37 }
 0xa79   :  { %13313 = vmatprep.subr.mxu1 %v13799_v0  ;;  %13271 = vmatpush3.msra.mxu0 %v7490_v27  ;;  %v18211_v27 = vsub.f32 %v8056_v32, %v18205_v56 }
 0xa7a   :  { %13314 = vmatpush3.msra.mxu1 %v17857_v62  ;;  %13272 = vmatprep.subr.mxu0 %v13799_v0  ;;  %v19049_v62 = vand.u32 4294901760, %v17989_v31 }
 0xa7b   :  { %13315 = vmatprep.subr.mxu1 %v13799_v0  ;;  %13273 = vmatpush3.msra.mxu0 %v7497_v2  ;;  %v8152_v2 = vand.u32 4294901760, %v18208_v13 }
 0xa7c   :  { %13316 = vmatpush3.msra.mxu1 %v17918_v12  ;;  %13274 = vmatprep.subr.mxu0 %v13799_v0 }
 0xa7d   :  { %13317 = vmatprep.subr.mxu1 %v13799_v0  ;;  %13275 = vmatpush3.msra.mxu0 %v7504_v26  ;;  %v8159_v26 = vand.u32 4294901760, %v18211_v27  ;;  %v8153_v61 = vsub.f32 %v18208_v13, %v8152_v2 }
 0xa7e   :  { %13318 = vmatpush3.msra.mxu1 %v17926_v47  ;;  %13276 = vmatprep.subr.mxu0 %v13799_v0  ;;  %v18227_v47 = vand.u32 4294901760, %v8055_v24 }
 0xa7f   :  { %13319 = vmatprep.subr.mxu1 %v13799_v0  ;;  %13277 = vmatpush3.msra.mxu0 %v7511_v43  ;;  %v8160_v43 = vsub.f32 %v18211_v27, %v8159_v26 }
 0xa80   :  { %13320 = vmatpush3.msra.mxu1 %v17935_v28  ;;  %13278 = vmatprep.subr.mxu0 %v13799_v0  ;;  %v18230_v28 = vsub.f32 %v8055_v24, %v18227_v47 }
 0xa81   :  { %13321 = vmatprep.subr.mxu1 %v13799_v0  ;;  %13279 = vmatpush3.msra.mxu0 %v19042_v39  ;;  %v8161_v12 = vand.u32 4294901760, %v8160_v43  ;;  %v18293_v39 = vand.u32 4294901760, %v8048_v42 }
 0xa82   :  { %13322 = vmatpush3.msra.mxu1 %v17947_v8  ;;  %13280 = vmatprep.subr.mxu0 %v13799_v0  ;;  %v8053_v8 = vld [vmem:[#allocation2 + $0x6d8] sm:$0xff]  ;;  %v8166_v41 = vand.u32 4294901760, %v18230_v28 }
 0xa83   :  { %13323 = vmatprep.subr.mxu1 %v13799_v0  ;;  %13281 = vmatpush3.msra.mxu0 %v19043_v58  ;;  %v8195_v58 = vsub.f32 %v18274_v29, %v8194_v48 }
 0xa84   :  { %13324 = vmatpush3.msra.mxu1 %v17961_v4  ;;  %13282 = vmatprep.subr.mxu0 %v13799_v0  ;;  %v18240_v4 = vand.u32 4294901760, %v8053_v8  ;;  %v8167_v55 = vsub.f32 %v18230_v28, %v8166_v41 }
 0xa85   :  { %13325 = vmatprep.subr.mxu1 %v13799_v0  ;;  %13283 = vmatpush3.msra.mxu0 %v19044_v25  ;;  %v8047_v25 = vld [vmem:[#allocation2 + $0x6a8] sm:$0xff] }
 0xa86   :  { %13326 = vmatpush3.msra.mxu1 %v17968_v6  ;;  %13284 = vmatprep.subr.mxu0 %v13799_v0  ;;  %v8052_v6 = vld [vmem:[#allocation2 + $0x6d0] sm:$0xff]  ;;  %v8168_v31 = vand.u32 4294901760, %v8167_v55 }
 0xa87   :  { %13327 = vmatprep.subr.mxu1 %v13799_v0  ;;  %13285 = vmatpush3.msra.mxu0 %v19045_v34  ;;  %v18251_v19 = vand.u32 4294901760, %v8052_v6  ;;  %v8202_v34 = vsub.f32 %v18281_v54, %v18993_v36  ;;  %v8044_v55 = vld [vmem:[#allocation2 + $0x690] sm:$0xff] }
 0xa88   :  { %13328 = vmatpush3.msra.mxu1 %v17981_v60  ;;  %13286 = vmatprep.subr.mxu0 %v13799_v0  ;;  %v18249_v60 = vsub.f32 %v8053_v8, %v18240_v4  ;;  %v18343_v7 = vand.u32 4294901760, %v8044_v55 }
 0xa89   :  { %13329 = vmatprep.subr.mxu1 %v13799_v0  ;;  %13287 = vmatpush3.msra.mxu0 %v19046_v44  ;;  %v18992_v44 = vand.u32 4294901760, %v18291_v40 }
 0xa8a   :  { %13330 = vmatpush3.msra.mxu1 %v17991_v16  ;;  %13288 = vmatprep.subr.mxu0 %v13799_v0  ;;  %v8174_v16 = vsub.f32 %v18238_v37, %v8173_v15  ;;  %v8180_v33 = vand.u32 4294901760, %v18249_v60 }
 0xa8b   :  { %13331 = vmatprep.subr.mxu1 %v13799_v0  ;;  %13289 = vmatpush3.msra.mxu0 %v19047_v1  ;;  %v18306_v1 = vsub.f32 %v8048_v42, %v18293_v39  ;;  %v8209_v53 = vsub.f32 %v18291_v40, %v18992_v44 }
 0xa8c   :  { %13332 = vmatpush3.msra.mxu1 %v18006_v11  ;;  %13333 = vmatprep.mubr.msk.f32.mxu1 %vm13800_vm0, %v13799_v0  ;;  %v18260_v11 = vsub.f32 %v8052_v6, %v18251_v19  ;;  %v8175_v35 = vand.u32 4294901760, %v8174_v16  ;;  %v8181_v46 = vsub.f32 %v18249_v60, %v8180_v33 }
 0xa8d   :  { %13290 = vmatprep.subr.mxu0 %v13799_v0  ;;  %13334 = vmatmul.mubr.f32.vlgmr.msra.gmra.mxu1 %v18036_v57  ;;  %v18991_v32 = vand.u32 4294901760, %v18306_v1 }
 0xa8e   :  { %13291 = vmatpush3.msra.mxu0 %v19048_v14  ;;  %13298 = vmatprep.mubr.msk.f32.mxu0 %vm13800_vm0, %v13799_v0  ;;  %v8187_v17 = vand.u32 4294901760, %v18260_v11  ;;  %v8182_v59 = vand.u32 4294901760, %v8181_v46  ;;  %v18308_v14 = vand.u32 4294901760, %v8047_v25  ;;  %v8042_v46 = vld [vmem:[#allocation2 + $0x680] sm:$0xff] }
 0xa8f   :  { %13292 = vmatprep.subr.mxu0 %v13799_v0  ;;  %13371 = vmatprep.subr.mxu1 %v13799_v0  ;;  %v8216_v24 = vsub.f32 %v18306_v1, %v18991_v32 }
 0xa90   :  { %13293 = vmatpush3.msra.mxu0 %v19049_v62  ;;  %13403 = vmatprep.mubr.msk.f32.mxu1 %vm13800_vm0, %v13799_v0  ;;  %v8188_v21 = vsub.f32 %v18260_v11, %v8187_v17  ;;  %v8196_v62 = vand.u32 4294901760, %v8195_v58  ;;  %v18355_v58 = vsub.f32 %v8044_v55, %v18343_v7 }
 0xa91   :  { %13294 = vmatprep.subr.mxu0 %v13799_v0  ;;  %v8217_v50 = vand.u32 4294901760, %v8216_v24 }
 0xa92   :  { %13295 = vmatpush3.msra.mxu0 %v19050_v9  ;;  %v8189_v20 = vand.u32 4294901760, %v8188_v21  ;;  %v8046_v9 = vld [vmem:[#allocation2 + $0x6a0] sm:$0xff]  ;;  %v18349_v21 = vand.u32 4294901760, %v8042_v46 }
 0xa93   :  { %13296 = vmatprep.subr.mxu0 %v13799_v0  ;;  %v18321_v43 = vand.u32 4294901760, %v8046_v9 }
 0xa94   :  { %13297 = vmatpush3.msra.mxu0 %v19051_v51  ;;  %v8203_v51 = vand.u32 4294901760, %v8202_v34 }
 0xa95   :  { %13299 = vmatmul.mubr.f32.vlgmr.msra.gmra.mxu0 %v18036_v57  ;;  %13336 = vmatprep.subr.mxu0 %v13799_v0  ;;  %v8154_v57 = vand.u32 4294901760, %v8153_v61  ;;  %v18318_v61 = vsub.f32 %v8047_v25, %v18308_v14  ;;  %v18333_v6 = vsub.f32 %v8046_v9, %v18321_v43 }
 0xa96   :  { %13368 = vmatprep.mubr.msk.f32.mxu0 %vm13800_vm0, %v13799_v0  ;;  %13337 = vmatpush3.msra.mxu0 %v18203_v5 }
 0xa97   :  { %13338 = vmatprep.subr.mxu0 %v13799_v0  ;;  %13372 = vmatpush3.msra.mxu1 %v8154_v57  ;;  %v8045_v57 = vld [vmem:[#allocation2 + $0x698] sm:$0xff]  ;;  %v18990_v63 = vand.u32 4294901760, %v18318_v61  ;;  %v18989_v23 = vand.u32 4294901760, %v18333_v6 }
 0xa98   :  { %13339 = vmatpush3.msra.mxu0 %v18205_v56  ;;  %13373 = vmatprep.subr.mxu1 %v13799_v0  ;;  %v18329_v8 = vand.u32 4294901760, %v8045_v57 }
 0xa99   :  { %13340 = vmatprep.subr.mxu0 %v13799_v0  ;;  %13374 = vmatpush3.msra.mxu1 %v8161_v12  ;;  %v8210_v12 = vand.u32 4294901760, %v8209_v53  ;;  %v8230_v25 = vsub.f32 %v18333_v6, %v18989_v23 }
 0xa9a   :  { %13375 = vmatprep.subr.mxu1 %v13799_v0  ;;  %13341 = vmatpush3.msra.mxu0 %v18227_v47  ;;  %v18341_v16 = vsub.f32 %v8045_v57, %v18329_v8 }
 0xa9b   :  { %13342 = vmatprep.subr.mxu0 %v13799_v0  ;;  %13376 = vmatpush3.msra.mxu1 %v8168_v31  ;;  %v8223_v31 = vsub.f32 %v18318_v61, %v18990_v63  ;;  %v8231_v53 = vand.u32 4294901760, %v8230_v25 }
 0xa9c   :  { %13343 = vmatpush3.msra.mxu0 %v18232_v22  ;;  %13377 = vmatprep.subr.mxu1 %v13799_v0 }
 0xa9d   :  { %13344 = vmatprep.subr.mxu0 %v13799_v0  ;;  %13378 = vmatpush3.msra.mxu1 %v8175_v35  ;;  %v8043_v35 = vld [vmem:[#allocation2 + $0x688] sm:$0xff]  ;;  %v8224_v42 = vand.u32 4294901760, %v8223_v31 }
 0xa9e   :  { %13345 = vmatpush3.msra.mxu0 %v18240_v4  ;;  %13379 = vmatprep.subr.mxu1 %v13799_v0 }
 0xa9f   :  { %13346 = vmatprep.subr.mxu0 %v13799_v0  ;;  %13380 = vmatpush3.msra.mxu1 %v8182_v59  ;;  %v18347_v59 = vand.u32 4294901760, %v8043_v35 }
 0xaa0   :  { %13347 = vmatpush3.msra.mxu0 %v18251_v19  ;;  %13381 = vmatprep.subr.mxu1 %v13799_v0 }
 0xaa1   :  { %13348 = vmatprep.subr.mxu0 %v13799_v0  ;;  %13382 = vmatpush3.msra.mxu1 %v8189_v20  ;;  %v18988_v20 = vand.u32 4294901760, %v18341_v16  ;;  %v18362_v34 = vsub.f32 %v8043_v35, %v18347_v59 }
 0xaa2   :  { %13349 = vmatpush3.msra.mxu0 %v18263_v10  ;;  %13383 = vmatprep.subr.mxu1 %v13799_v0 }
 0xaa3   :  { %13350 = vmatprep.subr.mxu0 %v13799_v0  ;;  %13384 = vmatpush3.msra.mxu1 %v8196_v62  ;;  %v18365_v62 = vsub.f32 %v8042_v46, %v18349_v21  ;;  %v8237_v9 = vsub.f32 %v18341_v16, %v18988_v20  ;;  %v18986_v57 = vand.u32 4294901760, %v18362_v34 }
 0xaa4   :  { %13351 = vmatpush3.msra.mxu0 %v18270_v52  ;;  %13385 = vmatprep.subr.mxu1 %v13799_v0 }
 0xaa5   :  { %13352 = vmatprep.subr.mxu0 %v13799_v0  ;;  %13386 = vmatpush3.msra.mxu1 %v8203_v51  ;;  %v18987_v51 = vand.u32 4294901760, %v18355_v58  ;;  %v8238_v24 = vand.u32 4294901760, %v8237_v9 }
 0xaa6   :  { %13353 = vmatpush3.msra.mxu0 %v18283_v3  ;;  %13387 = vmatprep.subr.mxu1 %v13799_v0 }
 0xaa7   :  { %13354 = vmatprep.subr.mxu0 %v13799_v0  ;;  %13388 = vmatpush3.msra.mxu1 %v8210_v12  ;;  %v18985_v12 = vand.u32 4294901760, %v18365_v62  ;;  %v8244_v55 = vsub.f32 %v18355_v58, %v18987_v51 }
 0xaa8   :  { %13355 = vmatpush3.msra.mxu0 %v18293_v39  ;;  %13389 = vmatprep.subr.mxu1 %v13799_v0 }
 0xaa9   :  { %13356 = vmatprep.subr.mxu0 %v13799_v0  ;;  %13390 = vmatpush3.msra.mxu1 %v8217_v50  ;;  %v8251_v50 = vsub.f32 %v18362_v34, %v18986_v57  ;;  %v8258_v31 = vsub.f32 %v18365_v62, %v18985_v12  ;;  %v8245_v35 = vand.u32 4294901760, %v8244_v55 }
 0xaaa   :  { %13357 = vmatpush3.msra.mxu0 %v18308_v14  ;;  %13391 = vmatprep.subr.mxu1 %v13799_v0 }
 0xaab   :  { %13358 = vmatprep.subr.mxu0 %v13799_v0  ;;  %13392 = vmatpush3.msra.mxu1 %v8224_v42  ;;  %v8252_v46 = vand.u32 4294901760, %v8251_v50  ;;  %v8259_v42 = vand.u32 4294901760, %v8258_v31  ;;  %v9383_v31 = vld [vmem:[%s18925_s2 + $0x9] ss:$0 sm:$0xff] }
 0xaac   :  { %13359 = vmatpush3.msra.mxu0 %v18321_v43  ;;  %13393 = vmatprep.subr.mxu1 %v13799_v0 }
 0xaad   :  { %13360 = vmatprep.subr.mxu0 %v13799_v0  ;;  %13394 = vmatpush3.msra.mxu1 %v8231_v53 }
 0xaae   :  { %13361 = vmatpush3.msra.mxu0 %v18329_v8  ;;  %13395 = vmatprep.subr.mxu1 %v13799_v0 }
 0xaaf   :  { %13362 = vmatprep.subr.mxu0 %v13799_v0  ;;  %13396 = vmatpush3.msra.mxu1 %v8238_v24 }
 0xab0   :  { %13363 = vmatpush3.msra.mxu0 %v18343_v7  ;;  %13397 = vmatprep.subr.mxu1 %v13799_v0 }
 0xab1   :  { %13364 = vmatprep.subr.mxu0 %v13799_v0  ;;  %13398 = vmatpush3.msra.mxu1 %v8245_v35 }
 0xab2   :  { %13365 = vmatpush3.msra.mxu0 %v18347_v59  ;;  %13399 = vmatprep.subr.mxu1 %v13799_v0 }
 0xab3   :  { %13366 = vmatprep.subr.mxu0 %v13799_v0  ;;  %13400 = vmatpush3.msra.mxu1 %v8252_v46 }
 0xab4   :  { %13367 = vmatpush3.msra.mxu0 %v18349_v21  ;;  %13401 = vmatprep.subr.mxu1 %v13799_v0 }
 0xab5   :  { %13406 = vmatprep.subr.mxu0 %v13799_v0  ;;  %13402 = vmatpush3.msra.mxu1 %v8259_v42 }
 0xab6   :  { %13441 = vmatprep.subr.mxu1 %v13799_v0 }
 0xb0b   :  { %v7620_v25 = vpop.f32.mrf.mxu1 }
 0xb0d   :  { %v13195_v9 = vpop.f32.mrf.mxu1 }
 0xb13   :  { %v7469_v53 = vpop.f32.mrf.mxu0 }
 0xb14   :  { %v7470_v35 = vadd.f32 %v9383_v31, %v7469_v53  ;;  %v8031_v53 = vld [vmem:[#allocation2 + $0x630] sm:$0xff] }
 0xb15   :  { %v13160_v55 = vpop.f32.mrf.mxu0 }
 0xb16   :  { %v7621_v46 = vadd.f32 %v7620_v25, %v7470_v35  ;;  %v19057_v35 = vand.u32 4294901760, %v18341_v16 }
 0xb2b   :  { %v7813_v12 = vpop.f32.mrf.mxu1 }
 0xb2d   :  { %v13265_v57 = vpop.f32.mrf.mxu1 }
 0xb34   :  { %v7724_v24 = vpop.f32.mrf.mxu0 }
 0xb35   :  { %v7725_v23 = vadd.f32 %v7724_v24, %v7621_v46 }
 0xb36   :  { %v13230_v50 = vpop.f32.mrf.mxu0 }
 0xb37   :  { %v7814_v42 = vadd.f32 %v7813_v12, %v7725_v23 }
 0xb4d   :  { %v8019_v51 = vpop.f32.mrf.mxu1 }
 0xb4f   :  { %v13335_v20 = vpop.f32.mrf.mxu1 }
 0xb50   :  { %v8032_v20 = vld [vmem:[#allocation2 + $0x638] sm:$0xff] }
 0xb51   :  { %v18594_v24 = vand.u32 4294901760, %v8032_v20 }
 0xb55   :  { %v7932_v63 = vpop.f32.mrf.mxu0 }
 0xb56   :  { %v7933_v32 = vadd.f32 %v7932_v63, %v7814_v42  ;;  %v18608_v42 = vand.u32 4294901760, %v8031_v53 }
 0xb57   :  { %v13300_v44 = vpop.f32.mrf.mxu0 }
 0xb58   :  { %v8020_v9 = vadd.f32 %v8019_v51, %v7933_v32 }
 0xb5a   :  { %13771 = vtanh.f32 %v8020_v9 }
 0xb67   :  { %v13772_v55 = vpop.eup %13771 }
 0xb68   :  { %v18398_v36 = vand.u32 4294901760, %v13772_v55 }
 0xb6a   :  { %13404 = vmatmul.mubr.f32.vlgmr.msra.gmra.mxu1 %v18398_v36  ;;  %v18402_v57 = vsub.f32 %v13772_v55, %v18398_v36 }
 0xb6b   :  { %13442 = vmatpush3.msra.mxu1 %v18203_v5  ;;  %13473 = vmatprep.mubr.msk.f32.mxu1 %vm13800_vm0, %v13799_v0 }
 0xb6c   :  { %13443 = vmatprep.subr.mxu1 %v13799_v0  ;;  %v8141_v63 = vand.u32 4294901760, %v18402_v57 }
 0xb6d   :  { %13444 = vmatpush3.msra.mxu1 %v18205_v56 }
 0xb6e   :  { %13445 = vmatprep.subr.mxu1 %v13799_v0  ;;  %v8142_v44 = vsub.f32 %v18402_v57, %v8141_v63 }
 0xb6f   :  { %13446 = vmatpush3.msra.mxu1 %v18227_v47 }
 0xb70   :  { %13447 = vmatprep.subr.mxu1 %v13799_v0  ;;  %v8143_v32 = vand.u32 4294901760, %v8142_v44  ;;  %v18619_v44 = vsub.f32 %v8032_v20, %v18594_v24 }
 0xb71   :  { %13448 = vmatpush3.msra.mxu1 %v18232_v22 }
 0xb72   :  { %13449 = vmatprep.subr.mxu1 %v13799_v0  ;;  %13369 = vmatmul.mubr.f32.vlgmr.msra.gmra.mxu0 %v8143_v32 }
 0xb73   :  { %13407 = vmatpush3.msra.mxu0 %v18208_v13  ;;  %13450 = vmatpush3.msra.mxu1 %v18240_v4 }
 0xb74   :  { %13408 = vmatprep.subr.mxu0 %v13799_v0  ;;  %13451 = vmatprep.subr.mxu1 %v13799_v0 }
 0xb75   :  { %13409 = vmatpush3.msra.mxu0 %v18211_v27  ;;  %13452 = vmatpush3.msra.mxu1 %v18251_v19  ;;  %v8038_v27 = vld [vmem:[#allocation2 + $0x668] sm:$0xff] }
 0xb76   :  { %13410 = vmatprep.subr.mxu0 %v13799_v0  ;;  %13453 = vmatprep.subr.mxu1 %v13799_v0 }
 0xb77   :  { %13411 = vmatpush3.msra.mxu0 %v18230_v28  ;;  %13454 = vmatpush3.msra.mxu1 %v18263_v10  ;;  %v18517_v28 = vand.u32 4294901760, %v8038_v27 }
 0xb78   :  { %13412 = vmatprep.subr.mxu0 %v13799_v0  ;;  %13455 = vmatprep.subr.mxu1 %v13799_v0 }
 0xb79   :  { %13413 = vmatpush3.msra.mxu0 %v18238_v37  ;;  %13456 = vmatpush3.msra.mxu1 %v18270_v52  ;;  %v8036_v37 = vld [vmem:[#allocation2 + $0x658] sm:$0xff] }
 0xb7a   :  { %13414 = vmatprep.subr.mxu0 %v13799_v0  ;;  %13457 = vmatprep.subr.mxu1 %v13799_v0 }
 0xb7b   :  { %13415 = vmatpush3.msra.mxu0 %v18249_v60  ;;  %13458 = vmatpush3.msra.mxu1 %v18283_v3  ;;  %v18536_v60 = vsub.f32 %v8038_v27, %v18517_v28  ;;  %v8028_v27 = vld [vmem:[#allocation2 + $0x618] sm:$0xff] }
 0xb7c   :  { %13416 = vmatprep.subr.mxu0 %v13799_v0  ;;  %13459 = vmatprep.subr.mxu1 %v13799_v0 }
 0xb7d   :  { %13417 = vmatpush3.msra.mxu0 %v18260_v11  ;;  %13460 = vmatpush3.msra.mxu1 %v18293_v39  ;;  %v8034_v11 = vld [vmem:[#allocation2 + $0x648] sm:$0xff] }
 0xb7e   :  { %13418 = vmatprep.subr.mxu0 %v13799_v0  ;;  %13461 = vmatprep.subr.mxu1 %v13799_v0 }
 0xb7f   :  { %13419 = vmatpush3.msra.mxu0 %v18274_v29  ;;  %13462 = vmatpush3.msra.mxu1 %v18308_v14 }
 0xb80   :  { %13420 = vmatprep.subr.mxu0 %v13799_v0  ;;  %13463 = vmatprep.subr.mxu1 %v13799_v0 }
 0xb81   :  { %13421 = vmatpush3.msra.mxu0 %v18281_v54  ;;  %13464 = vmatpush3.msra.mxu1 %v18321_v43 }
 0xb82   :  { %13422 = vmatprep.subr.mxu0 %v13799_v0  ;;  %13465 = vmatprep.subr.mxu1 %v13799_v0 }
 0xb83   :  { %13423 = vmatpush3.msra.mxu0 %v18291_v40  ;;  %13466 = vmatpush3.msra.mxu1 %v18329_v8 }
 0xb84   :  { %13424 = vmatprep.subr.mxu0 %v13799_v0  ;;  %13467 = vmatprep.subr.mxu1 %v13799_v0 }
 0xb85   :  { %13425 = vmatpush3.msra.mxu0 %v18306_v1  ;;  %13468 = vmatpush3.msra.mxu1 %v18343_v7 }
 0xb86   :  { %13426 = vmatprep.subr.mxu0 %v13799_v0  ;;  %13469 = vmatprep.subr.mxu1 %v13799_v0 }
 0xb87   :  { %13427 = vmatpush3.msra.mxu0 %v18318_v61  ;;  %13470 = vmatpush3.msra.mxu1 %v18347_v59 }
 0xb88   :  { %13428 = vmatprep.subr.mxu0 %v13799_v0  ;;  %13471 = vmatprep.subr.mxu1 %v13799_v0 }
 0xb89   :  { %13429 = vmatpush3.msra.mxu0 %v18333_v6  ;;  %13472 = vmatpush3.msra.mxu1 %v18349_v21 }
 0xb8a   :  { %13430 = vmatprep.subr.mxu0 %v13799_v0  ;;  %13474 = vmatmul.mubr.f32.vlgmr.msra.gmra.mxu1 %v8141_v63  ;;  %v19058_v63 = vand.u32 4294901760, %v18355_v58 }
 0xb8b   :  { %13511 = vmatprep.subr.mxu1 %v13799_v0  ;;  %13431 = vmatpush3.msra.mxu0 %v18341_v16 }
 0xb8c   :  { %13512 = vmatpush3.msra.mxu1 %v18203_v5  ;;  %13432 = vmatprep.subr.mxu0 %v13799_v0  ;;  %v8040_v5 = vld [vmem:[#allocation2 + $0x678] sm:$0xff] }
 0xb8d   :  { %13513 = vmatprep.subr.mxu1 %v13799_v0  ;;  %13433 = vmatpush3.msra.mxu0 %v18355_v58  ;;  %v18500_v13 = vand.u32 4294901760, %v8040_v5  ;;  %v19059_v58 = vand.u32 4294901760, %v18362_v34 }
 0xb8e   :  { %13514 = vmatpush3.msra.mxu1 %v18205_v56  ;;  %13434 = vmatprep.subr.mxu0 %v13799_v0  ;;  %v8039_v56 = vld [vmem:[#allocation2 + $0x670] sm:$0xff] }
 0xb8f   :  { %13515 = vmatprep.subr.mxu1 %v13799_v0  ;;  %13435 = vmatpush3.msra.mxu0 %v18362_v34  ;;  %v19060_v34 = vand.u32 4294901760, %v18365_v62 }
 0xb90   :  { %13516 = vmatpush3.msra.mxu1 %v18227_v47  ;;  %13436 = vmatprep.subr.mxu0 %v13799_v0  ;;  %v18515_v47 = vsub.f32 %v8040_v5, %v18500_v13 }
 0xb91   :  { %13517 = vmatprep.subr.mxu1 %v13799_v0  ;;  %13437 = vmatpush3.msra.mxu0 %v18365_v62 }
 0xb92   :  { %13438 = vmatprep.mubr.msk.f32.mxu0 %vm13800_vm0, %v13799_v0  ;;  %13518 = vmatpush3.msra.mxu1 %v18232_v22 }
 0xb93   :  { %13439 = vmatmul.mubr.f32.vlgmr.msra.gmra.mxu0 %v18402_v57  ;;  %13476 = vmatprep.subr.mxu0 %v13799_v0  ;;  %v8029_v57 = vld [vmem:[#allocation2 + $0x620] sm:$0xff] }
 0xb94   :  { %13519 = vmatprep.subr.mxu1 %v13799_v0  ;;  %13477 = vmatpush3.msra.mxu0 %v8152_v2  ;;  %v18507_v2 = vand.u32 4294901760, %v8039_v56 }
 0xb95   :  { %13520 = vmatpush3.msra.mxu1 %v18240_v4  ;;  %13478 = vmatprep.subr.mxu0 %v13799_v0  ;;  %v19052_v4 = vand.u32 4294901760, %v18281_v54  ;;  %v8033_v54 = vld [vmem:[#allocation2 + $0x640] sm:$0xff] }
 0xb96   :  { %13521 = vmatprep.subr.mxu1 %v13799_v0  ;;  %13479 = vmatpush3.msra.mxu0 %v8159_v26  ;;  %v8037_v26 = vld [vmem:[#allocation2 + $0x660] sm:$0xff]  ;;  %v18525_v22 = vsub.f32 %v8039_v56, %v18507_v2  ;;  %v18574_v23 = vand.u32 4294901760, %v8033_v54 }
 0xb97   :  { %13522 = vmatpush3.msra.mxu1 %v18251_v19  ;;  %13480 = vmatprep.subr.mxu0 %v13799_v0  ;;  %v8035_v19 = vld [vmem:[#allocation2 + $0x650] sm:$0xff] }
 0xb98   :  { %13523 = vmatprep.subr.mxu1 %v13799_v0  ;;  %13481 = vmatpush3.msra.mxu0 %v8166_v41  ;;  %v18527_v41 = vand.u32 4294901760, %v8037_v26  ;;  %v18551_v29 = vand.u32 4294901760, %v8035_v19  ;;  %v18602_v31 = vsub.f32 %v8033_v54, %v18574_v23  ;;  %v8849_v54 = vand.u32 4294901760, %v18619_v44 }
 0xb99   :  { %13524 = vmatpush3.msra.mxu1 %v18263_v10  ;;  %13482 = vmatprep.subr.mxu0 %v13799_v0  ;;  %v19053_v10 = vand.u32 4294901760, %v18291_v40  ;;  %v8807_v40 = vand.u32 4294901760, %v18536_v60 }
 0xb9a   :  { %13525 = vmatprep.subr.mxu1 %v13799_v0  ;;  %13483 = vmatpush3.msra.mxu0 %v8173_v15  ;;  %v8793_v15 = vand.u32 4294901760, %v18515_v47  ;;  %v8842_v56 = vand.u32 4294901760, %v18602_v31 }
 0xb9b   :  { %13526 = vmatpush3.msra.mxu1 %v18270_v52  ;;  %13484 = vmatprep.subr.mxu0 %v13799_v0  ;;  %v18547_v52 = vsub.f32 %v8037_v26, %v18527_v41  ;;  %v8808_v12 = vsub.f32 %v18536_v60, %v8807_v40 }
 0xb9c   :  { %13527 = vmatprep.subr.mxu1 %v13799_v0  ;;  %13485 = vmatpush3.msra.mxu0 %v8180_v33  ;;  %v18540_v33 = vand.u32 4294901760, %v8036_v37 }
 0xb9d   :  { %13528 = vmatpush3.msra.mxu1 %v18283_v3  ;;  %13486 = vmatprep.subr.mxu0 %v13799_v0  ;;  %v19054_v3 = vand.u32 4294901760, %v18306_v1  ;;  %v19055_v1 = vand.u32 4294901760, %v18318_v61  ;;  %v19056_v61 = vand.u32 4294901760, %v18333_v6  ;;  %v8809_v9 = vand.u32 4294901760, %v8808_v12 }
 0xb9e   :  { %13529 = vmatprep.subr.mxu1 %v13799_v0  ;;  %13487 = vmatpush3.msra.mxu0 %v8187_v17  ;;  %v8800_v17 = vand.u32 4294901760, %v18525_v22 }
 0xb9f   :  { %13530 = vmatpush3.msra.mxu1 %v18293_v39  ;;  %13488 = vmatprep.subr.mxu0 %v13799_v0  ;;  %v18560_v39 = vand.u32 4294901760, %v8034_v11 }
 0xba0   :  { %13531 = vmatprep.subr.mxu1 %v13799_v0  ;;  %13489 = vmatpush3.msra.mxu0 %v8194_v48  ;;  %v8794_v48 = vsub.f32 %v18515_v47, %v8793_v15 }
 0xba1   :  { %13532 = vmatpush3.msra.mxu1 %v18308_v14  ;;  %13490 = vmatprep.subr.mxu0 %v13799_v0  ;;  %v18565_v14 = vsub.f32 %v8036_v37, %v18540_v33  ;;  %v18588_v25 = vsub.f32 %v8034_v11, %v18560_v39  ;;  %v18632_v37 = vsub.f32 %v8031_v53, %v18608_v42  ;;  %v8027_v11 = vld [vmem:[#allocation2 + $0x610] sm:$0xff]  ;;  %v8025_v53 = vld [vmem:[#allocation2 + $0x600] sm:$0xff] }
 0xba2   :  { %13533 = vmatprep.subr.mxu1 %v13799_v0  ;;  %13491 = vmatpush3.msra.mxu0 %v19052_v4  ;;  %v8795_v51 = vand.u32 4294901760, %v8794_v48  ;;  %v18634_v4 = vand.u32 4294901760, %v8029_v57  ;;  %v18647_v48 = vand.u32 4294901760, %v8028_v27 }
 0xba3   :  { %13534 = vmatpush3.msra.mxu1 %v18321_v43  ;;  %13492 = vmatprep.subr.mxu0 %v13799_v0  ;;  %v8801_v43 = vsub.f32 %v18525_v22, %v8800_v17  ;;  %v8835_v55 = vand.u32 4294901760, %v18588_v25  ;;  %v8856_v20 = vand.u32 4294901760, %v18632_v37 }
 0xba4   :  { %13535 = vmatprep.subr.mxu1 %v13799_v0  ;;  %13493 = vmatpush3.msra.mxu0 %v19053_v10 }
 0xba5   :  { %13536 = vmatpush3.msra.mxu1 %v18329_v8  ;;  %13494 = vmatprep.subr.mxu0 %v13799_v0  ;;  %v8814_v8 = vand.u32 4294901760, %v18547_v52  ;;  %v8802_v6 = vand.u32 4294901760, %v8801_v43  ;;  %v8026_v43 = vld [vmem:[#allocation2 + $0x608] sm:$0xff] }
 0xba6   :  { %13537 = vmatprep.subr.mxu1 %v13799_v0  ;;  %13495 = vmatpush3.msra.mxu0 %v19054_v3 }
 0xba7   :  { %13538 = vmatpush3.msra.mxu1 %v18343_v7  ;;  %13496 = vmatprep.subr.mxu0 %v13799_v0  ;;  %v18579_v7 = vsub.f32 %v8035_v19, %v18551_v29  ;;  %v8815_v50 = vsub.f32 %v18547_v52, %v8814_v8  ;;  %v8836_v19 = vsub.f32 %v18588_v25, %v8835_v55 }
 0xba8   :  { %13539 = vmatprep.subr.mxu1 %v13799_v0  ;;  %13497 = vmatpush3.msra.mxu0 %v19055_v1  ;;  %v8843_v1 = vsub.f32 %v18602_v31, %v8842_v56 }
 0xba9   :  { %13540 = vmatpush3.msra.mxu1 %v18347_v59  ;;  %13498 = vmatprep.subr.mxu0 %v13799_v0  ;;  %v8821_v59 = vand.u32 4294901760, %v18565_v14  ;;  %v8828_v46 = vand.u32 4294901760, %v18579_v7  ;;  %v8816_v5 = vand.u32 4294901760, %v8815_v50  ;;  %v8837_v12 = vand.u32 4294901760, %v8836_v19 }
 0xbaa   :  { %13541 = vmatprep.subr.mxu1 %v13799_v0  ;;  %13499 = vmatpush3.msra.mxu0 %v19056_v61  ;;  %v18658_v61 = vsub.f32 %v8029_v57, %v18634_v4  ;;  %v18670_v50 = vsub.f32 %v8028_v27, %v18647_v48 }
 0xbab   :  { %13542 = vmatpush3.msra.mxu1 %v18349_v21  ;;  %13543 = vmatprep.mubr.msk.f32.mxu1 %vm13800_vm0, %v13799_v0  ;;  %v8030_v21 = vld [vmem:[#allocation2 + $0x628] sm:$0xff]  ;;  %v8822_v16 = vsub.f32 %v18565_v14, %v8821_v59  ;;  %v8829_v26 = vsub.f32 %v18579_v7, %v8828_v46 }
 0xbac   :  { %13500 = vmatprep.subr.mxu0 %v13799_v0  ;;  %13544 = vmatmul.mubr.f32.vlgmr.msra.gmra.mxu1 %v18398_v36  ;;  %v18621_v32 = vand.u32 4294901760, %v8030_v21  ;;  %v8870_v57 = vand.u32 4294901760, %v18658_v61 }
 0xbad   :  { %13581 = vmatprep.subr.mxu1 %v13799_v0  ;;  %13501 = vmatpush3.msra.mxu0 %v19057_v35  ;;  %v8823_v10 = vand.u32 4294901760, %v8822_v16  ;;  %v8830_v62 = vand.u32 4294901760, %v8829_v26  ;;  %v8844_v35 = vand.u32 4294901760, %v8843_v1  ;;  %v18684_v16 = vand.u32 4294901760, %v8025_v53 }
 0xbae   :  { %13582 = vmatpush3.msra.mxu1 %v8795_v51  ;;  %13502 = vmatprep.subr.mxu0 %v13799_v0  ;;  %v18645_v3 = vsub.f32 %v8030_v21, %v18621_v32  ;;  %v18660_v51 = vand.u32 4294901760, %v8027_v11  ;;  %v18672_v21 = vand.u32 4294901760, %v8026_v43 }
 0xbaf   :  { %13583 = vmatprep.subr.mxu1 %v13799_v0  ;;  %13503 = vmatpush3.msra.mxu0 %v19058_v63 }
 0xbb0   :  { %13584 = vmatpush3.msra.mxu1 %v8802_v6  ;;  %13504 = vmatprep.subr.mxu0 %v13799_v0  ;;  %v8863_v6 = vand.u32 4294901760, %v18645_v3  ;;  %v18682_v63 = vsub.f32 %v8027_v11, %v18660_v51  ;;  %v18694_v26 = vsub.f32 %v8026_v43, %v18672_v21  ;;  %v8871_v11 = vsub.f32 %v18658_v61, %v8870_v57 }
 0xbb1   :  { %13585 = vmatprep.subr.mxu1 %v13799_v0  ;;  %13505 = vmatpush3.msra.mxu0 %v19059_v58  ;;  %v8877_v58 = vand.u32 4294901760, %v18670_v50 }
 0xbb2   :  { %13586 = vmatpush3.msra.mxu1 %v8809_v9  ;;  %13506 = vmatprep.subr.mxu0 %v13799_v0  ;;  %v8857_v9 = vsub.f32 %v18632_v37, %v8856_v20  ;;  %v8864_v27 = vsub.f32 %v18645_v3, %v8863_v6 }
 0xbb3   :  { %13587 = vmatprep.subr.mxu1 %v13799_v0  ;;  %13507 = vmatpush3.msra.mxu0 %v19060_v34  ;;  %v8884_v34 = vand.u32 4294901760, %v18682_v63  ;;  %v8878_v43 = vsub.f32 %v18670_v50, %v8877_v58 }
 0xbb4   :  { %13508 = vmatprep.mubr.msk.f32.mxu0 %vm13800_vm0, %v13799_v0  ;;  %13588 = vmatpush3.msra.mxu1 %v8816_v5  ;;  %v8858_v19 = vand.u32 4294901760, %v8857_v9  ;;  %v8865_v1 = vand.u32 4294901760, %v8864_v27 }
 0xbb5   :  { %13509 = vmatmul.mubr.f32.vlgmr.msra.gmra.mxu0 %v18398_v36  ;;  %13546 = vmatprep.subr.mxu0 %v13799_v0  ;;  %v8850_v36 = vsub.f32 %v18619_v44, %v8849_v54 }
 0xbb6   :  { %13589 = vmatprep.subr.mxu1 %v13799_v0  ;;  %13547 = vmatpush3.msra.mxu0 %v18500_v13 }
 0xbb7   :  { %13590 = vmatpush3.msra.mxu1 %v8823_v10  ;;  %13548 = vmatprep.subr.mxu0 %v13799_v0  ;;  %v8851_v5 = vand.u32 4294901760, %v8850_v36  ;;  %v18704_v10 = vsub.f32 %v8025_v53, %v18684_v16  ;;  %v8885_v53 = vsub.f32 %v18682_v63, %v8884_v34 }
 0xbb8   :  { %13591 = vmatprep.subr.mxu1 %v13799_v0  ;;  %13549 = vmatpush3.msra.mxu0 %v18507_v2 }
 0xbb9   :  { %13592 = vmatpush3.msra.mxu1 %v8830_v62  ;;  %13550 = vmatprep.subr.mxu0 %v13799_v0  ;;  %v8891_v62 = vand.u32 4294901760, %v18694_v26  ;;  %v8898_v36 = vand.u32 4294901760, %v18704_v10 }
 0xbba   :  { %13593 = vmatprep.subr.mxu1 %v13799_v0  ;;  %13551 = vmatpush3.msra.mxu0 %v18517_v28 }
 0xbbb   :  { %13594 = vmatpush3.msra.mxu1 %v8837_v12  ;;  %13552 = vmatprep.subr.mxu0 %v13799_v0  ;;  %v8872_v12 = vand.u32 4294901760, %v8871_v11  ;;  %v8892_v9 = vsub.f32 %v18694_v26, %v8891_v62  ;;  %v8899_v27 = vsub.f32 %v18704_v10, %v8898_v36 }
 0xbbc   :  { %13595 = vmatprep.subr.mxu1 %v13799_v0  ;;  %13553 = vmatpush3.msra.mxu0 %v18527_v41 }
 0xbbd   :  { %13596 = vmatpush3.msra.mxu1 %v8844_v35  ;;  %13554 = vmatprep.subr.mxu0 %v13799_v0  ;;  %v8879_v35 = vand.u32 4294901760, %v8878_v43  ;;  %v8900_v11 = vand.u32 4294901760, %v8899_v27 }
 0xbbe   :  { %13597 = vmatprep.subr.mxu1 %v13799_v0  ;;  %13555 = vmatpush3.msra.mxu0 %v18540_v33 }
 0xbbf   :  { %13598 = vmatpush3.msra.mxu1 %v8851_v5  ;;  %13556 = vmatprep.subr.mxu0 %v13799_v0  ;;  %v8886_v5 = vand.u32 4294901760, %v8885_v53 }
 0xbc0   :  { %13599 = vmatprep.subr.mxu1 %v13799_v0  ;;  %13557 = vmatpush3.msra.mxu0 %v18551_v29 }
 0xbc1   :  { %13600 = vmatpush3.msra.mxu1 %v8858_v19  ;;  %13558 = vmatprep.subr.mxu0 %v13799_v0  ;;  %v8893_v19 = vand.u32 4294901760, %v8892_v9 }
 0xbc2   :  { %13601 = vmatprep.subr.mxu1 %v13799_v0  ;;  %13559 = vmatpush3.msra.mxu0 %v18560_v39 }
 0xbc3   :  { %13602 = vmatpush3.msra.mxu1 %v8865_v1  ;;  %13560 = vmatprep.subr.mxu0 %v13799_v0 }
 0xbc4   :  { %13603 = vmatprep.subr.mxu1 %v13799_v0  ;;  %13561 = vmatpush3.msra.mxu0 %v18574_v23 }
 0xbc5   :  { %13604 = vmatpush3.msra.mxu1 %v8872_v12  ;;  %13562 = vmatprep.subr.mxu0 %v13799_v0 }
 0xbc6   :  { %13605 = vmatprep.subr.mxu1 %v13799_v0  ;;  %13563 = vmatpush3.msra.mxu0 %v18594_v24 }
 0xbc7   :  { %13606 = vmatpush3.msra.mxu1 %v8879_v35  ;;  %13564 = vmatprep.subr.mxu0 %v13799_v0 }
 0xbc8   :  { %13607 = vmatprep.subr.mxu1 %v13799_v0  ;;  %13565 = vmatpush3.msra.mxu0 %v18608_v42 }
 0xbc9   :  { %13608 = vmatpush3.msra.mxu1 %v8886_v5  ;;  %13566 = vmatprep.subr.mxu0 %v13799_v0 }
 0xbca   :  { %13609 = vmatprep.subr.mxu1 %v13799_v0  ;;  %13567 = vmatpush3.msra.mxu0 %v18621_v32 }
 0xbcb   :  { %13610 = vmatpush3.msra.mxu1 %v8893_v19  ;;  %13568 = vmatprep.subr.mxu0 %v13799_v0 }
 0xbcc   :  { %13611 = vmatprep.subr.mxu1 %v13799_v0  ;;  %13569 = vmatpush3.msra.mxu0 %v18634_v4 }
 0xbcd   :  { %13612 = vmatpush3.msra.mxu1 %v8900_v11  ;;  %13613 = vmatprep.mubr.msk.f32.mxu1 %vm13800_vm0, %v13799_v0 }
 0xbce   :  { %13570 = vmatprep.subr.mxu0 %v13799_v0  ;;  %13614 = vmatmul.mubr.f32.vlgmr.msra.gmra.mxu1 %v17667_v30 }
 0xbcf   :  { %13651 = vmatprep.subr.mxu1 %v13799_v0  ;;  %13571 = vmatpush3.msra.mxu0 %v18647_v48 }
 0xbd0   :  { %13652 = vmatpush3.msra.mxu1 %v18500_v13  ;;  %13572 = vmatprep.subr.mxu0 %v13799_v0 }
 0xbd1   :  { %13653 = vmatprep.subr.mxu1 %v13799_v0  ;;  %13573 = vmatpush3.msra.mxu0 %v18660_v51 }
 0xbd2   :  { %13654 = vmatpush3.msra.mxu1 %v18507_v2  ;;  %13574 = vmatprep.subr.mxu0 %v13799_v0 }
 0xbd3   :  { %13655 = vmatprep.subr.mxu1 %v13799_v0  ;;  %13575 = vmatpush3.msra.mxu0 %v18672_v21 }
 0xbd4   :  { %13656 = vmatpush3.msra.mxu1 %v18517_v28  ;;  %13576 = vmatprep.subr.mxu0 %v13799_v0 }
 0xbd5   :  { %13657 = vmatprep.subr.mxu1 %v13799_v0  ;;  %13577 = vmatpush3.msra.mxu0 %v18684_v16 }
 0xbd6   :  { %13578 = vmatprep.mubr.msk.f32.mxu0 %vm13800_vm0, %v13799_v0  ;;  %13658 = vmatpush3.msra.mxu1 %v18527_v41 }
 0xbd7   :  { %13579 = vmatmul.mubr.f32.vlgmr.msra.gmra.mxu0 %v17686_v18  ;;  %13616 = vmatprep.subr.mxu0 %v13799_v0 }
 0xbd8   :  { %13659 = vmatprep.subr.mxu1 %v13799_v0  ;;  %13617 = vmatpush3.msra.mxu0 %v18515_v47 }
 0xbd9   :  { %13660 = vmatpush3.msra.mxu1 %v18540_v33  ;;  %13618 = vmatprep.subr.mxu0 %v13799_v0 }
 0xbda   :  { %13661 = vmatprep.subr.mxu1 %v13799_v0  ;;  %13619 = vmatpush3.msra.mxu0 %v18525_v22 }
 0xbdb   :  { %13662 = vmatpush3.msra.mxu1 %v18551_v29  ;;  %13620 = vmatprep.subr.mxu0 %v13799_v0 }
 0xbdc   :  { %13663 = vmatprep.subr.mxu1 %v13799_v0  ;;  %13621 = vmatpush3.msra.mxu0 %v18536_v60 }
 0xbdd   :  { %13664 = vmatpush3.msra.mxu1 %v18560_v39  ;;  %13622 = vmatprep.subr.mxu0 %v13799_v0 }
 0xbde   :  { %13665 = vmatprep.subr.mxu1 %v13799_v0  ;;  %13623 = vmatpush3.msra.mxu0 %v18547_v52 }
 0xbdf   :  { %13666 = vmatpush3.msra.mxu1 %v18574_v23  ;;  %13624 = vmatprep.subr.mxu0 %v13799_v0 }
 0xbe0   :  { %13667 = vmatprep.subr.mxu1 %v13799_v0  ;;  %13625 = vmatpush3.msra.mxu0 %v18565_v14 }
 0xbe1   :  { %13668 = vmatpush3.msra.mxu1 %v18594_v24  ;;  %13626 = vmatprep.subr.mxu0 %v13799_v0 }
 0xbe2   :  { %13669 = vmatprep.subr.mxu1 %v13799_v0  ;;  %13627 = vmatpush3.msra.mxu0 %v18579_v7 }
 0xbe3   :  { %13670 = vmatpush3.msra.mxu1 %v18608_v42  ;;  %13628 = vmatprep.subr.mxu0 %v13799_v0 }
 0xbe4   :  { %13671 = vmatprep.subr.mxu1 %v13799_v0  ;;  %13629 = vmatpush3.msra.mxu0 %v18588_v25 }
 0xbe5   :  { %13672 = vmatpush3.msra.mxu1 %v18621_v32  ;;  %13630 = vmatprep.subr.mxu0 %v13799_v0 }
 0xbe6   :  { %13673 = vmatprep.subr.mxu1 %v13799_v0  ;;  %13631 = vmatpush3.msra.mxu0 %v18602_v31 }
 0xbe7   :  { %13674 = vmatpush3.msra.mxu1 %v18634_v4  ;;  %13632 = vmatprep.subr.mxu0 %v13799_v0 }
 0xbe8   :  { %13675 = vmatprep.subr.mxu1 %v13799_v0  ;;  %13633 = vmatpush3.msra.mxu0 %v18619_v44 }
 0xbe9   :  { %13676 = vmatpush3.msra.mxu1 %v18647_v48  ;;  %13634 = vmatprep.subr.mxu0 %v13799_v0 }
 0xbea   :  { %13677 = vmatprep.subr.mxu1 %v13799_v0  ;;  %13635 = vmatpush3.msra.mxu0 %v18632_v37 }
 0xbeb   :  { %13678 = vmatpush3.msra.mxu1 %v18660_v51  ;;  %13636 = vmatprep.subr.mxu0 %v13799_v0 }
 0xbec   :  { %13679 = vmatprep.subr.mxu1 %v13799_v0  ;;  %13637 = vmatpush3.msra.mxu0 %v18645_v3 }
 0xbed   :  { %13680 = vmatpush3.msra.mxu1 %v18672_v21  ;;  %13638 = vmatprep.subr.mxu0 %v13799_v0 }
 0xbee   :  { %13681 = vmatprep.subr.mxu1 %v13799_v0  ;;  %13639 = vmatpush3.msra.mxu0 %v18658_v61 }
 0xbef   :  { %13682 = vmatpush3.msra.mxu1 %v18684_v16  ;;  %13683 = vmatprep.mubr.msk.f32.mxu1 %vm13800_vm0, %v13799_v0 }
 0xbf0   :  { %13640 = vmatprep.subr.mxu0 %v13799_v0  ;;  %13684 = vmatmul.mubr.f32.vlgmr.msra.gmra.mxu1 %v17678_v45 }
 0xbf1   :  { %13721 = vmatprep.subr.mxu1 %v13799_v0  ;;  %13641 = vmatpush3.msra.mxu0 %v18670_v50 }
 0xbf2   :  { %13722 = vmatpush3.msra.mxu1 %v18500_v13  ;;  %13642 = vmatprep.subr.mxu0 %v13799_v0 }
 0xbf3   :  { %13723 = vmatprep.subr.mxu1 %v13799_v0  ;;  %13643 = vmatpush3.msra.mxu0 %v18682_v63 }
 0xbf4   :  { %13724 = vmatpush3.msra.mxu1 %v18507_v2  ;;  %13644 = vmatprep.subr.mxu0 %v13799_v0 }
 0xbf5   :  { %13725 = vmatprep.subr.mxu1 %v13799_v0  ;;  %13645 = vmatpush3.msra.mxu0 %v18694_v26 }
 0xbf6   :  { %13726 = vmatpush3.msra.mxu1 %v18517_v28  ;;  %13646 = vmatprep.subr.mxu0 %v13799_v0 }
 0xbf7   :  { %13727 = vmatprep.subr.mxu1 %v13799_v0  ;;  %13647 = vmatpush3.msra.mxu0 %v18704_v10 }
 0xbf8   :  { %13648 = vmatprep.mubr.msk.f32.mxu0 %vm13800_vm0, %v13799_v0  ;;  %13728 = vmatpush3.msra.mxu1 %v18527_v41 }
 0xbf9   :  { %13649 = vmatmul.mubr.f32.vlgmr.msra.gmra.mxu0 %v17671_v38  ;;  %13686 = vmatprep.subr.mxu0 %v13799_v0 }
 0xbfa   :  { %13729 = vmatprep.subr.mxu1 %v13799_v0  ;;  %13687 = vmatpush3.msra.mxu0 %v8793_v15 }
 0xbfb   :  { %13730 = vmatpush3.msra.mxu1 %v18540_v33  ;;  %13688 = vmatprep.subr.mxu0 %v13799_v0 }
 0xbfc   :  { %13731 = vmatprep.subr.mxu1 %v13799_v0  ;;  %13689 = vmatpush3.msra.mxu0 %v8800_v17 }
 0xbfd   :  { %13732 = vmatpush3.msra.mxu1 %v18551_v29  ;;  %13690 = vmatprep.subr.mxu0 %v13799_v0 }
 0xbfe   :  { %13733 = vmatprep.subr.mxu1 %v13799_v0  ;;  %13691 = vmatpush3.msra.mxu0 %v8807_v40 }
 0xbff   :  { %13734 = vmatpush3.msra.mxu1 %v18560_v39  ;;  %13692 = vmatprep.subr.mxu0 %v13799_v0 }
 0xc00   :  { %13735 = vmatprep.subr.mxu1 %v13799_v0  ;;  %13693 = vmatpush3.msra.mxu0 %v8814_v8 }
 0xc01   :  { %13736 = vmatpush3.msra.mxu1 %v18574_v23  ;;  %13694 = vmatprep.subr.mxu0 %v13799_v0 }
 0xc02   :  { %13737 = vmatprep.subr.mxu1 %v13799_v0  ;;  %13695 = vmatpush3.msra.mxu0 %v8821_v59 }
 0xc03   :  { %13738 = vmatpush3.msra.mxu1 %v18594_v24  ;;  %13696 = vmatprep.subr.mxu0 %v13799_v0 }
 0xc04   :  { %13739 = vmatprep.subr.mxu1 %v13799_v0  ;;  %13697 = vmatpush3.msra.mxu0 %v8828_v46 }
 0xc05   :  { %13740 = vmatpush3.msra.mxu1 %v18608_v42  ;;  %13698 = vmatprep.subr.mxu0 %v13799_v0 }
 0xc06   :  { %13741 = vmatprep.subr.mxu1 %v13799_v0  ;;  %13699 = vmatpush3.msra.mxu0 %v8835_v55 }
 0xc07   :  { %13742 = vmatpush3.msra.mxu1 %v18621_v32  ;;  %13700 = vmatprep.subr.mxu0 %v13799_v0 }
 0xc08   :  { %13743 = vmatprep.subr.mxu1 %v13799_v0  ;;  %13701 = vmatpush3.msra.mxu0 %v8842_v56  ;;  %v9385_v56 = vld [vmem:[%s18925_s2 + $0xb] ss:$0 sm:$0xff] }
 0xc09   :  { %13744 = vmatpush3.msra.mxu1 %v18634_v4  ;;  %13702 = vmatprep.subr.mxu0 %v13799_v0  ;;  %v9348_v3 = vmul.f32 %v9385_v56, %v16572_v49 }
 0xc0a   :  { %13745 = vmatprep.subr.mxu1 %v13799_v0  ;;  %13703 = vmatpush3.msra.mxu0 %v8849_v54 }
 0xc0b   :  { %13746 = vmatpush3.msra.mxu1 %v18647_v48  ;;  %13704 = vmatprep.subr.mxu0 %v13799_v0  ;;  %v9387_v48 = vld [vmem:[%s18925_s2 + $0xa] ss:$0 sm:$0xff] }
 0xc0c   :  { %13747 = vmatprep.subr.mxu1 %v13799_v0  ;;  %13705 = vmatpush3.msra.mxu0 %v8856_v20 }
 0xc0d   :  { %13748 = vmatpush3.msra.mxu1 %v18660_v51  ;;  %13706 = vmatprep.subr.mxu0 %v13799_v0 }
 0xc0e   :  { %13749 = vmatprep.subr.mxu1 %v13799_v0  ;;  %13707 = vmatpush3.msra.mxu0 %v8863_v6 }
 0xc0f   :  { %13750 = vmatpush3.msra.mxu1 %v18672_v21  ;;  %13708 = vmatprep.subr.mxu0 %v13799_v0 }
 0xc10   :  { %13751 = vmatprep.subr.mxu1 %v13799_v0  ;;  %13709 = vmatpush3.msra.mxu0 %v8870_v57 }
 0xc11   :  { %13752 = vmatpush3.msra.mxu1 %v18684_v16  ;;  %13753 = vmatprep.mubr.msk.f32.mxu1 %vm13800_vm0, %v13799_v0 }
 0xc12   :  { %13710 = vmatprep.subr.mxu0 %v13799_v0  ;;  %13754 = vmatmul.mubr.f32.vlgmr.msra.gmra.mxu1 %v17667_v30 }
 0xc13   :  { %13711 = vmatpush3.msra.mxu0 %v8877_v58  ;;  %13718 = vmatprep.mubr.msk.f32.mxu0 %vm13800_vm0, %v13799_v0 }
 0xc14   :  { %13712 = vmatprep.subr.mxu0 %v13799_v0 }
 0xc15   :  { %13713 = vmatpush3.msra.mxu0 %v8884_v34 }
 0xc16   :  { %13714 = vmatprep.subr.mxu0 %v13799_v0 }
 0xc17   :  { %13715 = vmatpush3.msra.mxu0 %v8891_v62 }
 0xc18   :  { %13716 = vmatprep.subr.mxu0 %v13799_v0 }
 0xc19   :  { %13717 = vmatpush3.msra.mxu0 %v8898_v36 }
 0xc1a   :  { %13719 = vmatmul.mubr.f32.vlgmr.msra.gmra.mxu0 %v17667_v30 }
 0xc2a   :  { %v8296_v38 = vpop.f32.mrf.mxu1 }
 0xc2c   :  { %v13405_v45 = vpop.f32.mrf.mxu1 }
 0xc32   :  { %v8145_v18 = vpop.f32.mrf.mxu0 }
 0xc33   :  { %v8297_v13 = vadd.f32 %v8296_v38, %v8145_v18 }
 0xc34   :  { %v13370_v2 = vpop.f32.mrf.mxu0 }
 0xc4a   :  { %v8489_v47 = vpop.f32.mrf.mxu1 }
 0xc4c   :  { %v13475_v28 = vpop.f32.mrf.mxu1 }
 0xc53   :  { %v8400_v22 = vpop.f32.mrf.mxu0 }
 0xc54   :  { %v8401_v41 = vadd.f32 %v8400_v22, %v8297_v13 }
 0xc55   :  { %v13440_v15 = vpop.f32.mrf.mxu0 }
 0xc56   :  { %v8490_v60 = vadd.f32 %v8489_v47, %v8401_v41 }
 0xc6c   :  { %v8695_v33 = vpop.f32.mrf.mxu1 }
 0xc6e   :  { %v13545_v17 = vpop.f32.mrf.mxu1 }
 0xc75   :  { %v8608_v52 = vpop.f32.mrf.mxu0 }
 0xc76   :  { %v8609_v0 = vadd.f32 %v8608_v52, %v8490_v60 }
 0xc77   :  { %v13510_v29 = vpop.f32.mrf.mxu0 }
 0xc78   :  { %v8696_v40 = vadd.f32 %v8695_v33, %v8609_v0 }
 0xc8e   :  { %v8937_v39 = vpop.f32.mrf.mxu1 }
 0xc90   :  { %v13615_v14 = vpop.f32.mrf.mxu1 }
 0xc97   :  { %v8786_v30 = vpop.f32.mrf.mxu0 }
 0xc98   :  { %v8787_v8 = vadd.f32 %v8786_v30, %v8696_v40 }
 0xc99   :  { %v13580_v23 = vpop.f32.mrf.mxu0 }
 0xc9a   :  { %v8938_v7 = vadd.f32 %v8937_v39, %v8787_v8 }
 0xcb0   :  { %v9130_v25 = vpop.f32.mrf.mxu1 }
 0xcb2   :  { %v13685_v59 = vpop.f32.mrf.mxu1 }
 0xcb9   :  { %v9041_v24 = vpop.f32.mrf.mxu0 }
 0xcba   :  { %v9042_v55 = vadd.f32 %v9041_v24, %v8938_v7 }
 0xcbb   :  { %v13650_v31 = vpop.f32.mrf.mxu0 }
 0xcbc   :  { %v9131_v44 = vadd.f32 %v9130_v25, %v9042_v55 }
 0xcd2   :  { %v9336_v46 = vpop.f32.mrf.mxu1 }
 0xcd4   :  { %v13755_v42 = vpop.f32.mrf.mxu1 }
 0xcda   :  { %v9249_v32 = vpop.f32.mrf.mxu0 }
 0xcdb   :  { %v9250_v37 = vadd.f32 %v9249_v32, %v9131_v44 }
 0xcdc   :  { %v13720_v4 = vpop.f32.mrf.mxu0 }
 0xcdd   :  { %v9337_v54 = vadd.f32 %v9336_v46, %v9250_v37 }
 0xcdf   :  { %v9349_v20 = vadd.f32 %v9348_v3, %v9337_v54 }
 0xce1   :  { %v9358_v61 = vadd.f32 %v9387_v48, %v9349_v20 }
 0xce3   :  { %9359 = vst [vmem:[%s18926_s3] sm:$0xff] %v9358_v61 }
 0xce4   :  { %9364 = vsyncpa [#allocation3], 1 }

</bundles_post_ra>
